<compile_context>
chip_gen: v5e
topology: v5e:2x2
jax: 0.10.0
libtpu: 0.0.40
codegen_flags: <defaults>
</compile_context>

<pallas_src>
import functools

import numpy as np

import jax
import jax.numpy as jnp
from jax.experimental import pallas as pl
from jax.experimental.pallas import tpu as pltpu

# ----------------------------- model config (small, synthetic) ---------------
VOCAB = 50          # phoneme vocab
D_MODEL = 32        # encoder_dim == decoder_dim
N_HEADS = 2
D_K = D_MODEL // N_HEADS
FFT_FILTER = 64     # conv1d filter size inside the FFT block
FFT_K1, FFT_K2 = 9, 1
N_ENC_LAYERS = 2
N_DEC_LAYERS = 2
VP_FILTER = 32      # variance predictor filter
VP_K = 3
N_BINS = 16         # pitch / energy quantization bins
N_MEL = 20          # n_mel_channels
N_MEL_PAD = 128     # lane-dense mel head width (sliced back to N_MEL outside)
VP_OUT_PAD = 128    # lane-dense variance-predictor output (3 used lanes)
MAX_SEQ_LEN = 64    # positional table size
MAX_MEL = 32        # static max mel length used by the length regulator


# ----------------------------- in-kernel helpers ------------------------------
def _layernorm(x, g, b):
    mu = jnp.mean(x, axis=-1, keepdims=True)
    var = jnp.mean(jnp.square(x - mu), axis=-1, keepdims=True)
    return (x - mu) * jax.lax.rsqrt(var + 1e-5) * g + b


def _masked_rolls(x, ksize, seg_len):
    """K shifted copies of x along the row axis (same-padding conv taps).

    Row r of tap k equals x[r + k - pad] if the shift stays inside the row's
    segment of length `seg_len` (the full block for the FFT conv, per-batch T
    for the batch-folded variance-predictor conv), else 0.  Implemented with
    pltpu.roll (XLU sublane rotation) + an iota edge mask - no shift matrices.
    """
    rows = x.shape[0]
    pad = (ksize - 1) // 2
    pos = jax.lax.broadcasted_iota(jnp.int32, (rows, 1), 0) % seg_len
    taps = []
    for k in range(ksize):
        d = k - pad
        rolled = x if d == 0 else pltpu.roll(x, shift=(-d) % rows, axis=0)
        valid = jnp.logical_and(pos + d >= 0, pos + d < seg_len)
        taps.append(jnp.where(valid, rolled, 0.0))
    return taps


def _fft_layers(x, npad, bias, n_layers,
                wq, bq, wk, bk, wv, bv, wo, bo,
                ln1g, ln1b, cw1, cb1, cw2, cb2, ln2g, ln2b):
    """n_layers FFT blocks (MHSA + conv FFN); activation stays in VMEM."""
    f32, bf16 = jnp.float32, jnp.bfloat16
    seq, dim = x.shape
    for l in range(n_layers):
        # ---- multi-head self-attention (per-head static weight-Ref slices) ----
        xb = x.astype(bf16)
        ctx = jnp.zeros((seq, dim), f32) + bo[l]
        for h in range(N_HEADS):
            q = jnp.dot(xb, wq[l, h], preferred_element_type=f32) + bq[l, h]
            k = jnp.dot(xb, wk[l, h], preferred_element_type=f32) + bk[l, h]
            v = jnp.dot(xb, wv[l, h], preferred_element_type=f32) + bv[l, h]
            # 1/sqrt(d_k) already folded into wq at init
            s = jax.lax.dot_general(q.astype(bf16), k.astype(bf16),
                                    (((1,), (1,)), ((), ())),
                                    preferred_element_type=f32) + bias
            s = s - jnp.max(s, axis=-1, keepdims=True)
            p = jnp.exp(s)
            p = p * pl.reciprocal(jnp.sum(p, axis=-1, keepdims=True), approx=True)
            o_h = jnp.dot(p.astype(bf16), v.astype(bf16),
                          preferred_element_type=f32)
            # output projection folded per head: concat(o_h) @ Wo == sum_h o_h @ Wo_h
            ctx = ctx + jnp.dot(o_h.astype(bf16), wo[l, h],
                                preferred_element_type=f32)
        x1 = _layernorm(ctx + x, ln1g[l], ln1b[l]) * npad

        # ---- conv FFN: conv1 (K=9, same pad) as ONE im2col matmul, conv2 (K=1) ----
        win = jnp.concatenate(_masked_rolls(x1, FFT_K1, seq), axis=-1).astype(bf16)
        hcv = jnp.dot(win, cw1[l], preferred_element_type=f32) + cb1[l]
        hcv = jnp.maximum(hcv, 0.0)
        hcv = jnp.dot(hcv.astype(bf16), cw2[l], preferred_element_type=f32) + cb2[l]
        x = _layernorm(hcv + x1, ln2g[l], ln2b[l]) * npad
    return x


# ----------------------------- Pallas kernels ---------------------------------
def _fft_stack_kernel(x_ref, npad_ref, bias_ref,
                      wq, bq, wk, bk, wv, bv, wo, bo,
                      ln1g, ln1b, cw1, cb1, cw2, cb2, ln2g, ln2b,
                      o_ref, *, n_layers):
    o_ref[0] = _fft_layers(x_ref[0], npad_ref[0], bias_ref[0], n_layers,
                           wq, bq, wk, bk, wv, bv, wo, bo,
                           ln1g, ln1b, cw1, cb1, cw2, cb2, ln2g, ln2b)


def _fft_stack_mel_kernel(x_ref, npad_ref, bias_ref,
                          wq, bq, wk, bk, wv, bv, wo, bo,
                          ln1g, ln1b, cw1, cb1, cw2, cb2, ln2g, ln2b,
                          melw, melb, o_ref, *, n_layers):
    x = _fft_layers(x_ref[0], npad_ref[0], bias_ref[0], n_layers,
                    wq, bq, wk, bk, wv, bv, wo, bo,
                    ln1g, ln1b, cw1, cb1, cw2, cb2, ln2g, ln2b)
    # fused mel head: x is already zero at padded frames (== masked_fill(0))
    o_ref[0] = jnp.dot(x.astype(jnp.bfloat16), melw[...],
                       preferred_element_type=jnp.float32) + melb[...]


def _variance_predictor_kernel(x_ref, npad_ref,
                               cw1, cb1, ln1g, ln1b,
                               cw2, cb2, ln2g, ln2b,
                               lw, lb, o_ref, *, seg_len):
    """Duration / pitch / energy predictors, batch folded into the row dim."""
    f32, bf16 = jnp.float32, jnp.bfloat16
    x = x_ref[...]                     # (B*T, D) f32
    npad = npad_ref[...]               # (B*T, 1) 1.0 at valid rows
    rows = x.shape[0]
    win_x = jnp.concatenate(_masked_rolls(x, VP_K, seg_len), axis=-1).astype(bf16)
    outs = []
    for i in range(3):                 # 0 = duration, 1 = pitch, 2 = energy
        h = jnp.dot(win_x, cw1[i], preferred_element_type=f32) + cb1[i]
        h = _layernorm(jnp.maximum(h, 0.0), ln1g[i], ln1b[i])
        win_h = jnp.concatenate(_masked_rolls(h, VP_K, seg_len), axis=-1).astype(bf16)
        h2 = jnp.dot(win_h, cw2[i], preferred_element_type=f32) + cb2[i]
        h2 = _layernorm(jnp.maximum(h2, 0.0), ln2g[i], ln2b[i])
        # final width-1 linear as a lane reduction; masked_fill(0) at pad rows
        outs.append((jnp.sum(h2 * lw[i], axis=-1, keepdims=True) + lb[i]) * npad)
    o_ref[...] = jnp.concatenate(
        outs + [jnp.zeros((rows, VP_OUT_PAD - 3), f32)], axis=-1)


# ----------------------------- pallas_call wrappers ---------------------------
def _wspec(a):
    """Full-array spec for a broadcast (weight) operand, constant across grid."""
    return pl.BlockSpec(a.shape, lambda *_, _n=a.ndim: (0,) * _n)


_FFT_WEIGHT_KEYS = ('wq', 'bq', 'wk', 'bk', 'wv', 'bv', 'wo', 'bo',
                    'ln1_g', 'ln1_b', 'cw1', 'cb1', 'cw2', 'cb2',
                    'ln2_g', 'ln2_b')


def _fft_stack_call(stack_params, x, nonpad, attn_bias, n_layers,
                    mel_w=None, mel_b=None):
    B, T, D = x.shape
    weights = tuple(stack_params[k] for k in _FFT_WEIGHT_KEYS)
    act_specs = [pl.BlockSpec((1, T, D), lambda b: (b, 0, 0)),
                 pl.BlockSpec((1, T, 1), lambda b: (b, 0, 0)),
                 pl.BlockSpec((1, 1, T), lambda b: (b, 0, 0))]
    if mel_w is None:
        kernel = functools.partial(_fft_stack_kernel, n_layers=n_layers)
        extra, extra_specs, out_dim = (), [], D
    else:
        kernel = functools.partial(_fft_stack_mel_kernel, n_layers=n_layers)
        extra, extra_specs, out_dim = (mel_w, mel_b), [_wspec(mel_w), _wspec(mel_b)], N_MEL_PAD
    return pl.pallas_call(
        kernel,
        out_shape=jax.ShapeDtypeStruct((B, T, out_dim), jnp.float32),
        grid=(B,),
        in_specs=act_specs + [_wspec(a) for a in weights] + extra_specs,
        out_specs=pl.BlockSpec((1, T, out_dim), lambda b: (b, 0, 0)),
        compiler_params=pltpu.CompilerParams(
            dimension_semantics=("parallel",)),
    )(x, nonpad, attn_bias, *weights, *extra)


def variance_predictors(params, x, src_nonpad):
    """(log_duration, pitch, energy), each (B, T), in one fused call."""
    B, T, D = x.shape
    vp = params['variance_predictors']
    weights = (vp['cw1'], vp['cb1'], vp['ln1_g'], vp['ln1_b'],
               vp['cw2'], vp['cb2'], vp['ln2_g'], vp['ln2_b'],
               vp['lw'], vp['lb'])
    x2d = x.reshape(B * T, D)
    np2d = src_nonpad.reshape(B * T, 1)
    out = pl.pallas_call(
        functools.partial(_variance_predictor_kernel, seg_len=T),
        out_shape=jax.ShapeDtypeStruct((B * T, VP_OUT_PAD), jnp.float32),
        grid=(1,),
        in_specs=[pl.BlockSpec((B * T, D), lambda i: (0, 0)),
                  pl.BlockSpec((B * T, 1), lambda i: (0, 0))]
                 + [_wspec(a) for a in weights],
        out_specs=pl.BlockSpec((B * T, VP_OUT_PAD), lambda i: (0, 0)),
    )(x2d, np2d, *weights)
    out = out.reshape(B, T, VP_OUT_PAD)
    return out[..., 0], out[..., 1], out[..., 2]


# ----------------------------- model blocks -----------------------------------
def encoder(params, src_seq, src_pos):
    x = jnp.take(params['src_emb'], src_seq, axis=0) \
        + jnp.take(params['pos_table'], src_pos, axis=0)
    nonpad = (src_pos != 0).astype(jnp.float32)[..., None]                    # (B,T,1)
    bias = jnp.where(src_pos == 0, -1e9, 0.0).astype(jnp.float32)[:, None, :]  # (B,1,T)
    x = _fft_stack_call(params['encoder'], x, nonpad, bias, N_ENC_LAYERS)
    return x, nonpad


def decoder_with_mel_head(params, x, mel_pos):
    x = x + jnp.take(params['pos_table'], mel_pos, axis=0)
    nonpad = (mel_pos != 0).astype(jnp.float32)[..., None]
    bias = jnp.where(mel_pos == 0, -1e9, 0.0).astype(jnp.float32)[:, None, :]
    mel = _fft_stack_call(params['decoder'], x, nonpad, bias, N_DEC_LAYERS,
                          mel_w=params['mel_w'], mel_b=params['mel_b'])
    return mel[..., :N_MEL]


def length_regulator(x, duration, max_mel):
    """Expand phoneme hidden states to frames (data-dependent gather, plain JAX)."""
    B, T, D = x.shape
    cum = jnp.cumsum(duration, axis=-1)                 # (B, T)
    frame = jnp.arange(max_mel, dtype=jnp.int32)        # (M,)
    idx = jnp.sum(frame[None, :, None] >= cum[:, None, :], axis=-1)   # (B, M)
    total = cum[:, -1]
    valid = frame[None, :] < total[:, None]
    idx = jnp.clip(idx, 0, T - 1)
    idx3 = jnp.broadcast_to(idx[..., None], (B, max_mel, D))
    out = jnp.take_along_axis(x, idx3, axis=1) * valid[..., None].astype(x.dtype)
    mel_len = jnp.minimum(total, max_mel)
    mel_pos = jnp.where(frame[None, :] < mel_len[:, None], frame[None, :] + 1, 0)
    return out, mel_pos.astype(jnp.int32)


def variance_adaptor(params, x, src_pos, max_mel_length,
                     duration_target, pitch_target, energy_target,
                     duration_coeff, pitch_coeff, energy_coeff):
    src_mask = (src_pos != 0)
    src_nonpad = src_mask.astype(jnp.float32)[..., None]

    log_duration, pitch, energy = variance_predictors(params, x, src_nonpad)

    if duration_target is not None:
        duration = duration_target
    else:
        duration = jnp.maximum(
            jnp.round((jnp.exp(log_duration) - 1.0) * duration_coeff), 0.0
        ).astype(jnp.int32)
    duration = duration * src_mask.astype(jnp.int32)

    pitch_val = pitch_target if pitch_target is not None else pitch * pitch_coeff
    pitch_emb = jnp.take(params['pitch_emb'],
                         jnp.digitize(pitch_val, params['pitch_bins']), axis=0)
    energy_val = energy_target if energy_target is not None else energy * energy_coeff
    energy_emb = jnp.take(params['energy_emb'],
                          jnp.digitize(energy_val, params['energy_bins']), axis=0)

    x = x + pitch_emb + energy_emb
    mel_hidden, mel_pos = length_regulator(x, duration, max_mel_length)

    return {'mel-spectrogram': mel_hidden,
            'mel-length': mel_pos,            # per-frame position tensor (B, M)
            'log_duration': log_duration,
            'pitch': pitch,
            'energy': energy}


def fastspeech2_forward(params, src_seq, src_pos, mel_pos=None,
                        max_mel_length=MAX_MEL, duration_target=None,
                        pitch_target=None, energy_target=None,
                        duration_coeff=1.0, pitch_coeff=1.0, energy_coeff=1.0):
    enc_out, _non_pad_mask = encoder(params, src_seq, src_pos)
    adaptor = variance_adaptor(params, enc_out, src_pos, max_mel_length,
                               duration_target, pitch_target, energy_target,
                               duration_coeff, pitch_coeff, energy_coeff)
    if mel_pos is None:
        mel_pos = adaptor['mel-length']
    mel = decoder_with_mel_head(params, adaptor['mel-spectrogram'], mel_pos)
    return {'mel_predict': mel,
            'log_duration_predict': adaptor['log_duration'],
            'pitch_predict': adaptor['pitch'],
            'energy_predict': adaptor['energy'],
            'mel_length_predict': adaptor['mel-length']}


# ----------------------------- parameter init ---------------------------------
def _sinusoid_table(n_pos, d):
    pos = jnp.arange(n_pos, dtype=jnp.float32)[:, None]
    i = jnp.arange(d, dtype=jnp.float32)[None, :]
    angle = pos / jnp.power(10000.0, 2.0 * jnp.floor(i / 2.0) / d)
    table = jnp.where(jnp.arange(d)[None, :] % 2 == 0, jnp.sin(angle), jnp.cos(angle))
    return table.at[0].set(0.0).astype(jnp.float32)


def init_params(key):
    keys = iter(jax.random.split(key, 64))
    bf16 = jnp.bfloat16

    def w(shape, scale=0.02, dtype=jnp.float32):
        return (scale * jax.random.normal(next(keys), shape, jnp.float32)).astype(dtype)

    def fft_stack_params(n_layers):
        qscale = 1.0 / float(np.sqrt(D_K))     # attention scale folded into Wq
        return dict(
            wq=(w((n_layers, N_HEADS, D_MODEL, D_K)) * qscale).astype(bf16),
            bq=jnp.zeros((n_layers, N_HEADS, 1, D_K), jnp.float32),
            wk=w((n_layers, N_HEADS, D_MODEL, D_K), dtype=bf16),
            bk=jnp.zeros((n_layers, N_HEADS, 1, D_K), jnp.float32),
            wv=w((n_layers, N_HEADS, D_MODEL, D_K), dtype=bf16),
            bv=jnp.zeros((n_layers, N_HEADS, 1, D_K), jnp.float32),
            wo=w((n_layers, N_HEADS, D_K, D_MODEL), dtype=bf16),
            bo=jnp.zeros((n_layers, 1, D_MODEL), jnp.float32),
            ln1_g=jnp.ones((n_layers, 1, D_MODEL), jnp.float32),
            ln1_b=jnp.zeros((n_layers, 1, D_MODEL), jnp.float32),
            cw1=w((n_layers, FFT_K1 * D_MODEL, FFT_FILTER), dtype=bf16),
            cb1=jnp.zeros((n_layers, 1, FFT_FILTER), jnp.float32),
            cw2=w((n_layers, FFT_FILTER, D_MODEL), dtype=bf16),
            cb2=jnp.zeros((n_layers, 1, D_MODEL), jnp.float32),
            ln2_g=jnp.ones((n_layers, 1, D_MODEL), jnp.float32),
            ln2_b=jnp.zeros((n_layers, 1, D_MODEL), jnp.float32),
        )

    def variance_predictor_params():
        # stacked: index 0 = duration, 1 = pitch, 2 = energy
        return dict(
            cw1=w((3, VP_K * D_MODEL, VP_FILTER), dtype=bf16),
            cb1=jnp.zeros((3, 1, VP_FILTER), jnp.float32),
            ln1_g=jnp.ones((3, 1, VP_FILTER), jnp.float32),
            ln1_b=jnp.zeros((3, 1, VP_FILTER), jnp.float32),
            cw2=w((3, VP_K * VP_FILTER, VP_FILTER), dtype=bf16),
            cb2=jnp.zeros((3, 1, VP_FILTER), jnp.float32),
            ln2_g=jnp.ones((3, 1, VP_FILTER), jnp.float32),
            ln2_b=jnp.zeros((3, 1, VP_FILTER), jnp.float32),
            lw=w((3, 1, VP_FILTER)),
            lb=jnp.zeros((3, 1, 1), jnp.float32),
        )

    src_emb = w((VOCAB, D_MODEL), scale=0.1).at[0].set(0.0)      # padding_idx=0
    mel_w = jnp.zeros((D_MODEL, N_MEL_PAD), jnp.float32)
    mel_w = mel_w.at[:, :N_MEL].set(w((D_MODEL, N_MEL))).astype(bf16)

    return dict(
        src_emb=src_emb,
        pos_table=_sinusoid_table(MAX_SEQ_LEN + 1, D_MODEL),
        encoder=fft_stack_params(N_ENC_LAYERS),
        decoder=fft_stack_params(N_DEC_LAYERS),
        variance_predictors=variance_predictor_params(),
        pitch_emb=w((N_BINS, D_MODEL), scale=0.1),
        energy_emb=w((N_BINS, D_MODEL), scale=0.1),
        pitch_bins=jnp.linspace(-2.0, 2.0, N_BINS - 1),
        energy_bins=jnp.linspace(-2.0, 2.0, N_BINS - 1),
        mel_w=mel_w,
        mel_b=jnp.zeros((1, N_MEL_PAD), jnp.float32),
    )


# ----------------------------- demo --------------------------------------------
if __name__ == "__main__":
    key = jax.random.PRNGKey(0)
    params = init_params(key)

    B, T = 2, 8
    lengths = jnp.array([8, 6], dtype=jnp.int32)
    pos = jnp.arange(T, dtype=jnp.int32)[None, :]
    valid = pos < lengths[:, None]

    tok_key = jax.random.fold_in(key, 123)
    src_seq = jax.random.randint(tok_key, (B, T), 1, VOCAB)
    src_seq = jnp.where(valid, src_seq, 0).astype(jnp.int32)
    src_pos = jnp.where(valid, pos + 1, 0).astype(jnp.int32)

    duration_target = jnp.array([[4, 3, 5, 2, 4, 3, 4, 3],
                                 [2, 4, 3, 5, 1, 4, 3, 2]], dtype=jnp.int32)
    duration_target = jnp.where(valid, duration_target, 0)

    @jax.jit
    def forward(p, seq, spos, dur):
        return fastspeech2_forward(p, seq, spos,
                                   max_mel_length=MAX_MEL,
                                   duration_target=dur)

    out = forward(params, src_seq, src_pos, duration_target)
    out = jax.block_until_ready(out)

    assert out['mel_predict'].shape == (B, MAX_MEL, N_MEL)
    assert out['log_duration_predict'].shape == (B, T)
    assert out['pitch_predict'].shape == (B, T)
    assert out['energy_predict'].shape == (B, T)
    assert out['mel_length_predict'].shape == (B, MAX_MEL)
    assert bool(jnp.all(jnp.isfinite(out['mel_predict'])))
    assert bool(jnp.all(jnp.isfinite(out['log_duration_predict'])))
    # predictor outputs must be zero at padded source positions (masked_fill)
    assert bool(jnp.all(jnp.where(valid, True, out['pitch_predict'] == 0.0)))
    # TODO(synk): WaveGlow vocoder inference (external module) is out of scope.
    # TODO(synk): dropout is omitted (inference-mode forward only).
    print("KERNEL_OK")
</pallas_src>

<mosaic_0001>
module attributes {stable_mosaic.version = 11 : i64} {
  func.func @_fft_stack_kernel(%arg0: i32, %arg1: memref<1x8x32xf32, #tpu.memory_space<vmem>>, %arg2: memref<1x8x1xf32, #tpu.memory_space<vmem>>, %arg3: memref<1x1x8xf32, #tpu.memory_space<vmem>>, %arg4: memref<2x2x32x16xbf16, #tpu.memory_space<vmem>>, %arg5: memref<2x2x1x16xf32, #tpu.memory_space<vmem>>, %arg6: memref<2x2x32x16xbf16, #tpu.memory_space<vmem>>, %arg7: memref<2x2x1x16xf32, #tpu.memory_space<vmem>>, %arg8: memref<2x2x32x16xbf16, #tpu.memory_space<vmem>>, %arg9: memref<2x2x1x16xf32, #tpu.memory_space<vmem>>, %arg10: memref<2x2x16x32xbf16, #tpu.memory_space<vmem>>, %arg11: memref<2x1x32xf32, #tpu.memory_space<vmem>>, %arg12: memref<2x1x32xf32, #tpu.memory_space<vmem>>, %arg13: memref<2x1x32xf32, #tpu.memory_space<vmem>>, %arg14: memref<2x288x64xbf16, #tpu.memory_space<vmem>>, %arg15: memref<2x1x64xf32, #tpu.memory_space<vmem>>, %arg16: memref<2x64x32xbf16, #tpu.memory_space<vmem>>, %arg17: memref<2x1x32xf32, #tpu.memory_space<vmem>>, %arg18: memref<2x1x32xf32, #tpu.memory_space<vmem>>, %arg19: memref<2x1x32xf32, #tpu.memory_space<vmem>>, %arg20: memref<1x8x32xf32, #tpu.memory_space<vmem>>) attributes {dimension_semantics = [#tpu.dimension_semantics<parallel>], iteration_bounds = array<i64: 2>, scalar_prefetch = 0 : i64, scratch_operands = 0 : i64, tpu.core_type = #tpu.core_type<tc>, window_params = [{transform_indices = @transform_0, window_bounds = array<i64: 1, 8, 32>}, {transform_indices = @transform_1, window_bounds = array<i64: 1, 8, 1>}, {transform_indices = @transform_2, window_bounds = array<i64: 1, 1, 8>}, {pipeline_mode = #tpu.pipeline_mode<synchronous>, transform_indices = @transform_3, window_bounds = array<i64: 2, 2, 32, 16>}, {pipeline_mode = #tpu.pipeline_mode<synchronous>, transform_indices = @transform_4, window_bounds = array<i64: 2, 2, 1, 16>}, {pipeline_mode = #tpu.pipeline_mode<synchronous>, transform_indices = @transform_5, window_bounds = array<i64: 2, 2, 32, 16>}, {pipeline_mode = #tpu.pipeline_mode<synchronous>, transform_indices = @transform_6, window_bounds = array<i64: 2, 2, 1, 16>}, {pipeline_mode = #tpu.pipeline_mode<synchronous>, transform_indices = @transform_7, window_bounds = array<i64: 2, 2, 32, 16>}, {pipeline_mode = #tpu.pipeline_mode<synchronous>, transform_indices = @transform_8, window_bounds = array<i64: 2, 2, 1, 16>}, {pipeline_mode = #tpu.pipeline_mode<synchronous>, transform_indices = @transform_9, window_bounds = array<i64: 2, 2, 16, 32>}, {pipeline_mode = #tpu.pipeline_mode<synchronous>, transform_indices = @transform_10, window_bounds = array<i64: 2, 1, 32>}, {pipeline_mode = #tpu.pipeline_mode<synchronous>, transform_indices = @transform_11, window_bounds = array<i64: 2, 1, 32>}, {pipeline_mode = #tpu.pipeline_mode<synchronous>, transform_indices = @transform_12, window_bounds = array<i64: 2, 1, 32>}, {pipeline_mode = #tpu.pipeline_mode<synchronous>, transform_indices = @transform_13, window_bounds = array<i64: 2, 288, 64>}, {pipeline_mode = #tpu.pipeline_mode<synchronous>, transform_indices = @transform_14, window_bounds = array<i64: 2, 1, 64>}, {pipeline_mode = #tpu.pipeline_mode<synchronous>, transform_indices = @transform_15, window_bounds = array<i64: 2, 64, 32>}, {pipeline_mode = #tpu.pipeline_mode<synchronous>, transform_indices = @transform_16, window_bounds = array<i64: 2, 1, 32>}, {pipeline_mode = #tpu.pipeline_mode<synchronous>, transform_indices = @transform_17, window_bounds = array<i64: 2, 1, 32>}, {pipeline_mode = #tpu.pipeline_mode<synchronous>, transform_indices = @transform_18, window_bounds = array<i64: 2, 1, 32>}, {transform_indices = @transform_19, window_bounds = array<i64: 1, 8, 32>}]} {
    %c0 = arith.constant 0 : index
    %c0_0 = arith.constant 0 : index
    %c0_1 = arith.constant 0 : index
    %0 = vector.load %arg1[%c0, %c0_0, %c0_1] : memref<1x8x32xf32, #tpu.memory_space<vmem>>, vector<1x8x32xf32>
    %1 = vector.shape_cast %0 : vector<1x8x32xf32> to vector<8x32xf32>
    %c0_2 = arith.constant 0 : index
    %c0_3 = arith.constant 0 : index
    %c0_4 = arith.constant 0 : index
    %2 = vector.load %arg2[%c0_2, %c0_3, %c0_4] : memref<1x8x1xf32, #tpu.memory_space<vmem>>, vector<1x8x1xf32>
    %3 = vector.shape_cast %2 : vector<1x8x1xf32> to vector<8x1xf32>
    %c0_5 = arith.constant 0 : index
    %c0_6 = arith.constant 0 : index
    %c0_7 = arith.constant 0 : index
    %4 = vector.load %arg3[%c0_5, %c0_6, %c0_7] : memref<1x1x8xf32, #tpu.memory_space<vmem>>, vector<1x1x8xf32>
    %5 = vector.shape_cast %4 : vector<1x1x8xf32> to vector<1x8xf32>
    %6 = arith.truncf %1 : vector<8x32xf32> to vector<8x32xbf16>
    %cst = arith.constant 0.000000e+00 : f32
    %7 = vector.broadcast %cst : f32 to vector<8x32xf32>
    %c0_8 = arith.constant 0 : index
    %c0_9 = arith.constant 0 : index
    %c0_10 = arith.constant 0 : index
    %8 = vector.load %arg11[%c0_8, %c0_9, %c0_10] : memref<2x1x32xf32, #tpu.memory_space<vmem>>, vector<1x1x32xf32>
    %9 = vector.shape_cast %8 : vector<1x1x32xf32> to vector<1x32xf32>
    %10 = vector.broadcast %9 : vector<1x32xf32> to vector<8x32xf32>
    %11 = arith.addf %7, %10 : vector<8x32xf32>
    %c0_11 = arith.constant 0 : index
    %c0_12 = arith.constant 0 : index
    %c0_13 = arith.constant 0 : index
    %c0_14 = arith.constant 0 : index
    %12 = vector.load %arg4[%c0_11, %c0_12, %c0_13, %c0_14] : memref<2x2x32x16xbf16, #tpu.memory_space<vmem>>, vector<1x1x32x16xbf16>
    %13 = vector.shape_cast %12 : vector<1x1x32x16xbf16> to vector<32x16xbf16>
    %cst_15 = arith.constant dense<0.000000e+00> : vector<8x16xf32>
    %14 = tpu.matmul %6, %13, %cst_15 {dimension_numbers = #tpu.dot_dimension_numbers<[1], [0], [0], [1], [0, 0, 1, 1], [], []>} : vector<8x32xbf16>, vector<32x16xbf16>, vector<8x16xf32> -> vector<8x16xf32>
    %c0_16 = arith.constant 0 : index
    %c0_17 = arith.constant 0 : index
    %c0_18 = arith.constant 0 : index
    %c0_19 = arith.constant 0 : index
    %15 = vector.load %arg5[%c0_16, %c0_17, %c0_18, %c0_19] : memref<2x2x1x16xf32, #tpu.memory_space<vmem>>, vector<1x1x1x16xf32>
    %16 = vector.shape_cast %15 : vector<1x1x1x16xf32> to vector<1x16xf32>
    %17 = vector.broadcast %16 : vector<1x16xf32> to vector<8x16xf32>
    %18 = arith.addf %14, %17 : vector<8x16xf32>
    %c0_20 = arith.constant 0 : index
    %c0_21 = arith.constant 0 : index
    %c0_22 = arith.constant 0 : index
    %c0_23 = arith.constant 0 : index
    %19 = vector.load %arg6[%c0_20, %c0_21, %c0_22, %c0_23] : memref<2x2x32x16xbf16, #tpu.memory_space<vmem>>, vector<1x1x32x16xbf16>
    %20 = vector.shape_cast %19 : vector<1x1x32x16xbf16> to vector<32x16xbf16>
    %cst_24 = arith.constant dense<0.000000e+00> : vector<8x16xf32>
    %21 = tpu.matmul %6, %20, %cst_24 {dimension_numbers = #tpu.dot_dimension_numbers<[1], [0], [0], [1], [0, 0, 1, 1], [], []>} : vector<8x32xbf16>, vector<32x16xbf16>, vector<8x16xf32> -> vector<8x16xf32>
    %c0_25 = arith.constant 0 : index
    %c0_26 = arith.constant 0 : index
    %c0_27 = arith.constant 0 : index
    %c0_28 = arith.constant 0 : index
    %22 = vector.load %arg7[%c0_25, %c0_26, %c0_27, %c0_28] : memref<2x2x1x16xf32, #tpu.memory_space<vmem>>, vector<1x1x1x16xf32>
    %23 = vector.shape_cast %22 : vector<1x1x1x16xf32> to vector<1x16xf32>
    %24 = vector.broadcast %23 : vector<1x16xf32> to vector<8x16xf32>
    %25 = arith.addf %21, %24 : vector<8x16xf32>
    %c0_29 = arith.constant 0 : index
    %c0_30 = arith.constant 0 : index
    %c0_31 = arith.constant 0 : index
    %c0_32 = arith.constant 0 : index
    %26 = vector.load %arg8[%c0_29, %c0_30, %c0_31, %c0_32] : memref<2x2x32x16xbf16, #tpu.memory_space<vmem>>, vector<1x1x32x16xbf16>
    %27 = vector.shape_cast %26 : vector<1x1x32x16xbf16> to vector<32x16xbf16>
    %cst_33 = arith.constant dense<0.000000e+00> : vector<8x16xf32>
    %28 = tpu.matmul %6, %27, %cst_33 {dimension_numbers = #tpu.dot_dimension_numbers<[1], [0], [0], [1], [0, 0, 1, 1], [], []>} : vector<8x32xbf16>, vector<32x16xbf16>, vector<8x16xf32> -> vector<8x16xf32>
    %c0_34 = arith.constant 0 : index
    %c0_35 = arith.constant 0 : index
    %c0_36 = arith.constant 0 : index
    %c0_37 = arith.constant 0 : index
    %29 = vector.load %arg9[%c0_34, %c0_35, %c0_36, %c0_37] : memref<2x2x1x16xf32, #tpu.memory_space<vmem>>, vector<1x1x1x16xf32>
    %30 = vector.shape_cast %29 : vector<1x1x1x16xf32> to vector<1x16xf32>
    %31 = vector.broadcast %30 : vector<1x16xf32> to vector<8x16xf32>
    %32 = arith.addf %28, %31 : vector<8x16xf32>
    %33 = arith.truncf %18 : vector<8x16xf32> to vector<8x16xbf16>
    %34 = arith.truncf %25 : vector<8x16xf32> to vector<8x16xbf16>
    %cst_38 = arith.constant dense<0.000000e+00> : vector<8x8xf32>
    %35 = tpu.matmul %33, %34, %cst_38 {dimension_numbers = #tpu.dot_dimension_numbers<[1], [1], [0], [0], [0, 0, 1, 0], [], []>} : vector<8x16xbf16>, vector<8x16xbf16>, vector<8x8xf32> -> vector<8x8xf32>
    %36 = vector.broadcast %5 : vector<1x8xf32> to vector<8x8xf32>
    %37 = arith.addf %35, %36 : vector<8x8xf32>
    %cst_39 = arith.constant dense<0xFF800000> : vector<8xf32>
    %38 = vector.multi_reduction <maximumf>, %37, %cst_39 [1] : vector<8x8xf32> to vector<8xf32>
    %39 = vector.shape_cast %38 : vector<8xf32> to vector<8x1xf32>
    %40 = vector.broadcast %39 : vector<8x1xf32> to vector<8x8xf32>
    %41 = arith.subf %37, %40 : vector<8x8xf32>
    %42 = math.exp %41 : vector<8x8xf32>
    %cst_40 = arith.constant dense<0.000000e+00> : vector<8xf32>
    %43 = vector.multi_reduction <add>, %42, %cst_40 [1] : vector<8x8xf32> to vector<8xf32>
    %44 = vector.shape_cast %43 : vector<8xf32> to vector<8x1xf32>
    %45 = tpu.reciprocal %44 {approx = true} : vector<8x1xf32> -> vector<8x1xf32>
    %46 = vector.broadcast %45 : vector<8x1xf32> to vector<8x8xf32>
    %47 = arith.mulf %42, %46 : vector<8x8xf32>
    %48 = arith.truncf %47 : vector<8x8xf32> to vector<8x8xbf16>
    %49 = arith.truncf %32 : vector<8x16xf32> to vector<8x16xbf16>
    %cst_41 = arith.constant dense<0.000000e+00> : vector<8x16xf32>
    %50 = tpu.matmul %48, %49, %cst_41 {dimension_numbers = #tpu.dot_dimension_numbers<[1], [0], [0], [1], [0, 0, 1, 1], [], []>} : vector<8x8xbf16>, vector<8x16xbf16>, vector<8x16xf32> -> vector<8x16xf32>
    %51 = arith.truncf %50 : vector<8x16xf32> to vector<8x16xbf16>
    %c0_42 = arith.constant 0 : index
    %c0_43 = arith.constant 0 : index
    %c0_44 = arith.constant 0 : index
    %c0_45 = arith.constant 0 : index
    %52 = vector.load %arg10[%c0_42, %c0_43, %c0_44, %c0_45] : memref<2x2x16x32xbf16, #tpu.memory_space<vmem>>, vector<1x1x16x32xbf16>
    %53 = vector.shape_cast %52 : vector<1x1x16x32xbf16> to vector<16x32xbf16>
    %cst_46 = arith.constant dense<0.000000e+00> : vector<8x32xf32>
    %54 = tpu.matmul %51, %53, %cst_46 {dimension_numbers = #tpu.dot_dimension_numbers<[1], [0], [0], [1], [0, 0, 1, 1], [], []>} : vector<8x16xbf16>, vector<16x32xbf16>, vector<8x32xf32> -> vector<8x32xf32>
    %55 = arith.addf %11, %54 : vector<8x32xf32>
    %c0_47 = arith.constant 0 : index
    %c1 = arith.constant 1 : index
    %c0_48 = arith.constant 0 : index
    %c0_49 = arith.constant 0 : index
    %56 = vector.load %arg4[%c0_47, %c1, %c0_48, %c0_49] : memref<2x2x32x16xbf16, #tpu.memory_space<vmem>>, vector<1x1x32x16xbf16>
    %57 = vector.shape_cast %56 : vector<1x1x32x16xbf16> to vector<32x16xbf16>
    %cst_50 = arith.constant dense<0.000000e+00> : vector<8x16xf32>
    %58 = tpu.matmul %6, %57, %cst_50 {dimension_numbers = #tpu.dot_dimension_numbers<[1], [0], [0], [1], [0, 0, 1, 1], [], []>} : vector<8x32xbf16>, vector<32x16xbf16>, vector<8x16xf32> -> vector<8x16xf32>
    %c0_51 = arith.constant 0 : index
    %c1_52 = arith.constant 1 : index
    %c0_53 = arith.constant 0 : index
    %c0_54 = arith.constant 0 : index
    %59 = vector.load %arg5[%c0_51, %c1_52, %c0_53, %c0_54] : memref<2x2x1x16xf32, #tpu.memory_space<vmem>>, vector<1x1x1x16xf32>
    %60 = vector.shape_cast %59 : vector<1x1x1x16xf32> to vector<1x16xf32>
    %61 = vector.broadcast %60 : vector<1x16xf32> to vector<8x16xf32>
    %62 = arith.addf %58, %61 : vector<8x16xf32>
    %c0_55 = arith.constant 0 : index
    %c1_56 = arith.constant 1 : index
    %c0_57 = arith.constant 0 : index
    %c0_58 = arith.constant 0 : index
    %63 = vector.load %arg6[%c0_55, %c1_56, %c0_57, %c0_58] : memref<2x2x32x16xbf16, #tpu.memory_space<vmem>>, vector<1x1x32x16xbf16>
    %64 = vector.shape_cast %63 : vector<1x1x32x16xbf16> to vector<32x16xbf16>
    %cst_59 = arith.constant dense<0.000000e+00> : vector<8x16xf32>
    %65 = tpu.matmul %6, %64, %cst_59 {dimension_numbers = #tpu.dot_dimension_numbers<[1], [0], [0], [1], [0, 0, 1, 1], [], []>} : vector<8x32xbf16>, vector<32x16xbf16>, vector<8x16xf32> -> vector<8x16xf32>
    %c0_60 = arith.constant 0 : index
    %c1_61 = arith.constant 1 : index
    %c0_62 = arith.constant 0 : index
    %c0_63 = arith.constant 0 : index
    %66 = vector.load %arg7[%c0_60, %c1_61, %c0_62, %c0_63] : memref<2x2x1x16xf32, #tpu.memory_space<vmem>>, vector<1x1x1x16xf32>
    %67 = vector.shape_cast %66 : vector<1x1x1x16xf32> to vector<1x16xf32>
    %68 = vector.broadcast %67 : vector<1x16xf32> to vector<8x16xf32>
    %69 = arith.addf %65, %68 : vector<8x16xf32>
    %c0_64 = arith.constant 0 : index
    %c1_65 = arith.constant 1 : index
    %c0_66 = arith.constant 0 : index
    %c0_67 = arith.constant 0 : index
    %70 = vector.load %arg8[%c0_64, %c1_65, %c0_66, %c0_67] : memref<2x2x32x16xbf16, #tpu.memory_space<vmem>>, vector<1x1x32x16xbf16>
    %71 = vector.shape_cast %70 : vector<1x1x32x16xbf16> to vector<32x16xbf16>
    %cst_68 = arith.constant dense<0.000000e+00> : vector<8x16xf32>
    %72 = tpu.matmul %6, %71, %cst_68 {dimension_numbers = #tpu.dot_dimension_numbers<[1], [0], [0], [1], [0, 0, 1, 1], [], []>} : vector<8x32xbf16>, vector<32x16xbf16>, vector<8x16xf32> -> vector<8x16xf32>
    %c0_69 = arith.constant 0 : index
    %c1_70 = arith.constant 1 : index
    %c0_71 = arith.constant 0 : index
    %c0_72 = arith.constant 0 : index
    %73 = vector.load %arg9[%c0_69, %c1_70, %c0_71, %c0_72] : memref<2x2x1x16xf32, #tpu.memory_space<vmem>>, vector<1x1x1x16xf32>
    %74 = vector.shape_cast %73 : vector<1x1x1x16xf32> to vector<1x16xf32>
    %75 = vector.broadcast %74 : vector<1x16xf32> to vector<8x16xf32>
    %76 = arith.addf %72, %75 : vector<8x16xf32>
    %77 = arith.truncf %62 : vector<8x16xf32> to vector<8x16xbf16>
    %78 = arith.truncf %69 : vector<8x16xf32> to vector<8x16xbf16>
    %cst_73 = arith.constant dense<0.000000e+00> : vector<8x8xf32>
    %79 = tpu.matmul %77, %78, %cst_73 {dimension_numbers = #tpu.dot_dimension_numbers<[1], [1], [0], [0], [0, 0, 1, 0], [], []>} : vector<8x16xbf16>, vector<8x16xbf16>, vector<8x8xf32> -> vector<8x8xf32>
    %80 = vector.broadcast %5 : vector<1x8xf32> to vector<8x8xf32>
    %81 = arith.addf %79, %80 : vector<8x8xf32>
    %cst_74 = arith.constant dense<0xFF800000> : vector<8xf32>
    %82 = vector.multi_reduction <maximumf>, %81, %cst_74 [1] : vector<8x8xf32> to vector<8xf32>
    %83 = vector.shape_cast %82 : vector<8xf32> to vector<8x1xf32>
    %84 = vector.broadcast %83 : vector<8x1xf32> to vector<8x8xf32>
    %85 = arith.subf %81, %84 : vector<8x8xf32>
    %86 = math.exp %85 : vector<8x8xf32>
    %cst_75 = arith.constant dense<0.000000e+00> : vector<8xf32>
    %87 = vector.multi_reduction <add>, %86, %cst_75 [1] : vector<8x8xf32> to vector<8xf32>
    %88 = vector.shape_cast %87 : vector<8xf32> to vector<8x1xf32>
    %89 = tpu.reciprocal %88 {approx = true} : vector<8x1xf32> -> vector<8x1xf32>
    %90 = vector.broadcast %89 : vector<8x1xf32> to vector<8x8xf32>
    %91 = arith.mulf %86, %90 : vector<8x8xf32>
    %92 = arith.truncf %91 : vector<8x8xf32> to vector<8x8xbf16>
    %93 = arith.truncf %76 : vector<8x16xf32> to vector<8x16xbf16>
    %cst_76 = arith.constant dense<0.000000e+00> : vector<8x16xf32>
    %94 = tpu.matmul %92, %93, %cst_76 {dimension_numbers = #tpu.dot_dimension_numbers<[1], [0], [0], [1], [0, 0, 1, 1], [], []>} : vector<8x8xbf16>, vector<8x16xbf16>, vector<8x16xf32> -> vector<8x16xf32>
    %95 = arith.truncf %94 : vector<8x16xf32> to vector<8x16xbf16>
    %c0_77 = arith.constant 0 : index
    %c1_78 = arith.constant 1 : index
    %c0_79 = arith.constant 0 : index
    %c0_80 = arith.constant 0 : index
    %96 = vector.load %arg10[%c0_77, %c1_78, %c0_79, %c0_80] : memref<2x2x16x32xbf16, #tpu.memory_space<vmem>>, vector<1x1x16x32xbf16>
    %97 = vector.shape_cast %96 : vector<1x1x16x32xbf16> to vector<16x32xbf16>
    %cst_81 = arith.constant dense<0.000000e+00> : vector<8x32xf32>
    %98 = tpu.matmul %95, %97, %cst_81 {dimension_numbers = #tpu.dot_dimension_numbers<[1], [0], [0], [1], [0, 0, 1, 1], [], []>} : vector<8x16xbf16>, vector<16x32xbf16>, vector<8x32xf32> -> vector<8x32xf32>
    %99 = arith.addf %55, %98 : vector<8x32xf32>
    %100 = arith.addf %99, %1 : vector<8x32xf32>
    %c0_82 = arith.constant 0 : index
    %c0_83 = arith.constant 0 : index
    %c0_84 = arith.constant 0 : index
    %101 = vector.load %arg12[%c0_82, %c0_83, %c0_84] : memref<2x1x32xf32, #tpu.memory_space<vmem>>, vector<1x1x32xf32>
    %102 = vector.shape_cast %101 : vector<1x1x32xf32> to vector<1x32xf32>
    %c0_85 = arith.constant 0 : index
    %c0_86 = arith.constant 0 : index
    %c0_87 = arith.constant 0 : index
    %103 = vector.load %arg13[%c0_85, %c0_86, %c0_87] : memref<2x1x32xf32, #tpu.memory_space<vmem>>, vector<1x1x32xf32>
    %104 = vector.shape_cast %103 : vector<1x1x32xf32> to vector<1x32xf32>
    %cst_88 = arith.constant dense<0.000000e+00> : vector<8xf32>
    %105 = vector.multi_reduction <add>, %100, %cst_88 [1] : vector<8x32xf32> to vector<8xf32>
    %106 = vector.shape_cast %105 : vector<8xf32> to vector<8x1xf32>
    %cst_89 = arith.constant 3.200000e+01 : f32
    %107 = vector.broadcast %cst_89 : f32 to vector<8x1xf32>
    %108 = arith.divf %106, %107 : vector<8x1xf32>
    %109 = vector.broadcast %108 : vector<8x1xf32> to vector<8x32xf32>
    %110 = arith.subf %100, %109 : vector<8x32xf32>
    %111 = arith.mulf %110, %110 : vector<8x32xf32>
    %cst_90 = arith.constant dense<0.000000e+00> : vector<8xf32>
    %112 = vector.multi_reduction <add>, %111, %cst_90 [1] : vector<8x32xf32> to vector<8xf32>
    %113 = vector.shape_cast %112 : vector<8xf32> to vector<8x1xf32>
    %cst_91 = arith.constant 3.200000e+01 : f32
    %114 = vector.broadcast %cst_91 : f32 to vector<8x1xf32>
    %115 = arith.divf %113, %114 : vector<8x1xf32>
    %116 = vector.broadcast %108 : vector<8x1xf32> to vector<8x32xf32>
    %117 = arith.subf %100, %116 : vector<8x32xf32>
    %cst_92 = arith.constant 9.99999974E-6 : f32
    %118 = vector.broadcast %cst_92 : f32 to vector<8x1xf32>
    %119 = arith.addf %115, %118 : vector<8x1xf32>
    %120 = math.rsqrt %119 : vector<8x1xf32>
    %121 = vector.broadcast %120 : vector<8x1xf32> to vector<8x32xf32>
    %122 = arith.mulf %117, %121 : vector<8x32xf32>
    %123 = vector.broadcast %102 : vector<1x32xf32> to vector<8x32xf32>
    %124 = arith.mulf %122, %123 : vector<8x32xf32>
    %125 = vector.broadcast %104 : vector<1x32xf32> to vector<8x32xf32>
    %126 = arith.addf %124, %125 : vector<8x32xf32>
    %127 = vector.broadcast %3 : vector<8x1xf32> to vector<8x32xf32>
    %128 = arith.mulf %126, %127 : vector<8x32xf32>
    %129 = tpu.iota {dimensions = array<i32: 0>} : vector<8x1xi32>
    %c8_i32 = arith.constant 8 : i32
    %c0_i32 = arith.constant 0 : i32
    %130 = arith.cmpi eq, %c8_i32, %c0_i32 : i32
    %c1_i32 = arith.constant 1 : i32
    %131 = arith.select %130, %c1_i32, %c8_i32 : i32
    %132 = vector.broadcast %131 : i32 to vector<8x1xi32>
    %133 = arith.remsi %129, %132 : vector<8x1xi32>
    %c0_i32_93 = arith.constant 0 : i32
    %134 = vector.broadcast %c0_i32_93 : i32 to vector<8x1xi32>
    %135 = arith.cmpi ne, %133, %134 : vector<8x1xi32>
    %c0_i32_94 = arith.constant 0 : i32
    %136 = vector.broadcast %c0_i32_94 : i32 to vector<8x1xi32>
    %137 = arith.cmpi slt, %133, %136 : vector<8x1xi32>
    %c0_i32_95 = arith.constant 0 : i32
    %138 = arith.cmpi slt, %131, %c0_i32_95 : i32
    %139 = vector.broadcast %138 : i1 to vector<8x1xi1>
    %140 = vector.broadcast %139 : vector<8x1xi1> to vector<8x1xi1>
    %141 = arith.xori %137, %140 : vector<8x1xi1>
    %142 = arith.andi %141, %135 : vector<8x1xi1>
    %143 = vector.broadcast %131 : i32 to vector<8x1xi32>
    %144 = arith.addi %133, %143 : vector<8x1xi32>
    %145 = arith.select %142, %144, %133 : vector<8x1xi1>, vector<8x1xi32>
    %c4_i32 = arith.constant 4 : i32
    %146 = tpu.dynamic_rotate %128 by %c4_i32 dim 0 : vector<8x32xf32>, i32 -> vector<8x32xf32>
    %c-4_i32 = arith.constant -4 : i32
    %147 = vector.broadcast %c-4_i32 : i32 to vector<8x1xi32>
    %148 = arith.addi %145, %147 : vector<8x1xi32>
    %c0_i32_96 = arith.constant 0 : i32
    %149 = vector.broadcast %c0_i32_96 : i32 to vector<8x1xi32>
    %150 = arith.cmpi sge, %148, %149 : vector<8x1xi32>
    %c-4_i32_97 = arith.constant -4 : i32
    %151 = vector.broadcast %c-4_i32_97 : i32 to vector<8x1xi32>
    %152 = arith.addi %145, %151 : vector<8x1xi32>
    %c8_i32_98 = arith.constant 8 : i32
    %153 = vector.broadcast %c8_i32_98 : i32 to vector<8x1xi32>
    %154 = arith.cmpi slt, %152, %153 : vector<8x1xi32>
    %155 = arith.andi %150, %154 : vector<8x1xi1>
    %cst_99 = arith.constant 0.000000e+00 : f32
    %156 = vector.shape_cast %155 : vector<8x1xi1> to vector<8x1xi1>
    %157 = vector.broadcast %156 : vector<8x1xi1> to vector<8x32xi1>
    %158 = vector.broadcast %cst_99 : f32 to vector<8x32xf32>
    %159 = arith.select %157, %146, %158 : vector<8x32xi1>, vector<8x32xf32>
    %c3_i32 = arith.constant 3 : i32
    %160 = tpu.dynamic_rotate %128 by %c3_i32 dim 0 : vector<8x32xf32>, i32 -> vector<8x32xf32>
    %c-3_i32 = arith.constant -3 : i32
    %161 = vector.broadcast %c-3_i32 : i32 to vector<8x1xi32>
    %162 = arith.addi %145, %161 : vector<8x1xi32>
    %c0_i32_100 = arith.constant 0 : i32
    %163 = vector.broadcast %c0_i32_100 : i32 to vector<8x1xi32>
    %164 = arith.cmpi sge, %162, %163 : vector<8x1xi32>
    %c-3_i32_101 = arith.constant -3 : i32
    %165 = vector.broadcast %c-3_i32_101 : i32 to vector<8x1xi32>
    %166 = arith.addi %145, %165 : vector<8x1xi32>
    %c8_i32_102 = arith.constant 8 : i32
    %167 = vector.broadcast %c8_i32_102 : i32 to vector<8x1xi32>
    %168 = arith.cmpi slt, %166, %167 : vector<8x1xi32>
    %169 = arith.andi %164, %168 : vector<8x1xi1>
    %cst_103 = arith.constant 0.000000e+00 : f32
    %170 = vector.shape_cast %169 : vector<8x1xi1> to vector<8x1xi1>
    %171 = vector.broadcast %170 : vector<8x1xi1> to vector<8x32xi1>
    %172 = vector.broadcast %cst_103 : f32 to vector<8x32xf32>
    %173 = arith.select %171, %160, %172 : vector<8x32xi1>, vector<8x32xf32>
    %c2_i32 = arith.constant 2 : i32
    %174 = tpu.dynamic_rotate %128 by %c2_i32 dim 0 : vector<8x32xf32>, i32 -> vector<8x32xf32>
    %c-2_i32 = arith.constant -2 : i32
    %175 = vector.broadcast %c-2_i32 : i32 to vector<8x1xi32>
    %176 = arith.addi %145, %175 : vector<8x1xi32>
    %c0_i32_104 = arith.constant 0 : i32
    %177 = vector.broadcast %c0_i32_104 : i32 to vector<8x1xi32>
    %178 = arith.cmpi sge, %176, %177 : vector<8x1xi32>
    %c-2_i32_105 = arith.constant -2 : i32
    %179 = vector.broadcast %c-2_i32_105 : i32 to vector<8x1xi32>
    %180 = arith.addi %145, %179 : vector<8x1xi32>
    %c8_i32_106 = arith.constant 8 : i32
    %181 = vector.broadcast %c8_i32_106 : i32 to vector<8x1xi32>
    %182 = arith.cmpi slt, %180, %181 : vector<8x1xi32>
    %183 = arith.andi %178, %182 : vector<8x1xi1>
    %cst_107 = arith.constant 0.000000e+00 : f32
    %184 = vector.shape_cast %183 : vector<8x1xi1> to vector<8x1xi1>
    %185 = vector.broadcast %184 : vector<8x1xi1> to vector<8x32xi1>
    %186 = vector.broadcast %cst_107 : f32 to vector<8x32xf32>
    %187 = arith.select %185, %174, %186 : vector<8x32xi1>, vector<8x32xf32>
    %c1_i32_108 = arith.constant 1 : i32
    %188 = tpu.dynamic_rotate %128 by %c1_i32_108 dim 0 : vector<8x32xf32>, i32 -> vector<8x32xf32>
    %c-1_i32 = arith.constant -1 : i32
    %189 = vector.broadcast %c-1_i32 : i32 to vector<8x1xi32>
    %190 = arith.addi %145, %189 : vector<8x1xi32>
    %c0_i32_109 = arith.constant 0 : i32
    %191 = vector.broadcast %c0_i32_109 : i32 to vector<8x1xi32>
    %192 = arith.cmpi sge, %190, %191 : vector<8x1xi32>
    %c-1_i32_110 = arith.constant -1 : i32
    %193 = vector.broadcast %c-1_i32_110 : i32 to vector<8x1xi32>
    %194 = arith.addi %145, %193 : vector<8x1xi32>
    %c8_i32_111 = arith.constant 8 : i32
    %195 = vector.broadcast %c8_i32_111 : i32 to vector<8x1xi32>
    %196 = arith.cmpi slt, %194, %195 : vector<8x1xi32>
    %197 = arith.andi %192, %196 : vector<8x1xi1>
    %cst_112 = arith.constant 0.000000e+00 : f32
    %198 = vector.shape_cast %197 : vector<8x1xi1> to vector<8x1xi1>
    %199 = vector.broadcast %198 : vector<8x1xi1> to vector<8x32xi1>
    %200 = vector.broadcast %cst_112 : f32 to vector<8x32xf32>
    %201 = arith.select %199, %188, %200 : vector<8x32xi1>, vector<8x32xf32>
    %c0_i32_113 = arith.constant 0 : i32
    %202 = vector.broadcast %c0_i32_113 : i32 to vector<8x1xi32>
    %203 = arith.addi %145, %202 : vector<8x1xi32>
    %c0_i32_114 = arith.constant 0 : i32
    %204 = vector.broadcast %c0_i32_114 : i32 to vector<8x1xi32>
    %205 = arith.cmpi sge, %203, %204 : vector<8x1xi32>
    %c0_i32_115 = arith.constant 0 : i32
    %206 = vector.broadcast %c0_i32_115 : i32 to vector<8x1xi32>
    %207 = arith.addi %145, %206 : vector<8x1xi32>
    %c8_i32_116 = arith.constant 8 : i32
    %208 = vector.broadcast %c8_i32_116 : i32 to vector<8x1xi32>
    %209 = arith.cmpi slt, %207, %208 : vector<8x1xi32>
    %210 = arith.andi %205, %209 : vector<8x1xi1>
    %cst_117 = arith.constant 0.000000e+00 : f32
    %211 = vector.shape_cast %210 : vector<8x1xi1> to vector<8x1xi1>
    %212 = vector.broadcast %211 : vector<8x1xi1> to vector<8x32xi1>
    %213 = vector.broadcast %cst_117 : f32 to vector<8x32xf32>
    %214 = arith.select %212, %128, %213 : vector<8x32xi1>, vector<8x32xf32>
    %c7_i32 = arith.constant 7 : i32
    %215 = tpu.dynamic_rotate %128 by %c7_i32 dim 0 : vector<8x32xf32>, i32 -> vector<8x32xf32>
    %c1_i32_118 = arith.constant 1 : i32
    %216 = vector.broadcast %c1_i32_118 : i32 to vector<8x1xi32>
    %217 = arith.addi %145, %216 : vector<8x1xi32>
    %c0_i32_119 = arith.constant 0 : i32
    %218 = vector.broadcast %c0_i32_119 : i32 to vector<8x1xi32>
    %219 = arith.cmpi sge, %217, %218 : vector<8x1xi32>
    %c1_i32_120 = arith.constant 1 : i32
    %220 = vector.broadcast %c1_i32_120 : i32 to vector<8x1xi32>
    %221 = arith.addi %145, %220 : vector<8x1xi32>
    %c8_i32_121 = arith.constant 8 : i32
    %222 = vector.broadcast %c8_i32_121 : i32 to vector<8x1xi32>
    %223 = arith.cmpi slt, %221, %222 : vector<8x1xi32>
    %224 = arith.andi %219, %223 : vector<8x1xi1>
    %cst_122 = arith.constant 0.000000e+00 : f32
    %225 = vector.shape_cast %224 : vector<8x1xi1> to vector<8x1xi1>
    %226 = vector.broadcast %225 : vector<8x1xi1> to vector<8x32xi1>
    %227 = vector.broadcast %cst_122 : f32 to vector<8x32xf32>
    %228 = arith.select %226, %215, %227 : vector<8x32xi1>, vector<8x32xf32>
    %c6_i32 = arith.constant 6 : i32
    %229 = tpu.dynamic_rotate %128 by %c6_i32 dim 0 : vector<8x32xf32>, i32 -> vector<8x32xf32>
    %c2_i32_123 = arith.constant 2 : i32
    %230 = vector.broadcast %c2_i32_123 : i32 to vector<8x1xi32>
    %231 = arith.addi %145, %230 : vector<8x1xi32>
    %c0_i32_124 = arith.constant 0 : i32
    %232 = vector.broadcast %c0_i32_124 : i32 to vector<8x1xi32>
    %233 = arith.cmpi sge, %231, %232 : vector<8x1xi32>
    %c2_i32_125 = arith.constant 2 : i32
    %234 = vector.broadcast %c2_i32_125 : i32 to vector<8x1xi32>
    %235 = arith.addi %145, %234 : vector<8x1xi32>
    %c8_i32_126 = arith.constant 8 : i32
    %236 = vector.broadcast %c8_i32_126 : i32 to vector<8x1xi32>
    %237 = arith.cmpi slt, %235, %236 : vector<8x1xi32>
    %238 = arith.andi %233, %237 : vector<8x1xi1>
    %cst_127 = arith.constant 0.000000e+00 : f32
    %239 = vector.shape_cast %238 : vector<8x1xi1> to vector<8x1xi1>
    %240 = vector.broadcast %239 : vector<8x1xi1> to vector<8x32xi1>
    %241 = vector.broadcast %cst_127 : f32 to vector<8x32xf32>
    %242 = arith.select %240, %229, %241 : vector<8x32xi1>, vector<8x32xf32>
    %c5_i32 = arith.constant 5 : i32
    %243 = tpu.dynamic_rotate %128 by %c5_i32 dim 0 : vector<8x32xf32>, i32 -> vector<8x32xf32>
    %c3_i32_128 = arith.constant 3 : i32
    %244 = vector.broadcast %c3_i32_128 : i32 to vector<8x1xi32>
    %245 = arith.addi %145, %244 : vector<8x1xi32>
    %c0_i32_129 = arith.constant 0 : i32
    %246 = vector.broadcast %c0_i32_129 : i32 to vector<8x1xi32>
    %247 = arith.cmpi sge, %245, %246 : vector<8x1xi32>
    %c3_i32_130 = arith.constant 3 : i32
    %248 = vector.broadcast %c3_i32_130 : i32 to vector<8x1xi32>
    %249 = arith.addi %145, %248 : vector<8x1xi32>
    %c8_i32_131 = arith.constant 8 : i32
    %250 = vector.broadcast %c8_i32_131 : i32 to vector<8x1xi32>
    %251 = arith.cmpi slt, %249, %250 : vector<8x1xi32>
    %252 = arith.andi %247, %251 : vector<8x1xi1>
    %cst_132 = arith.constant 0.000000e+00 : f32
    %253 = vector.shape_cast %252 : vector<8x1xi1> to vector<8x1xi1>
    %254 = vector.broadcast %253 : vector<8x1xi1> to vector<8x32xi1>
    %255 = vector.broadcast %cst_132 : f32 to vector<8x32xf32>
    %256 = arith.select %254, %243, %255 : vector<8x32xi1>, vector<8x32xf32>
    %c4_i32_133 = arith.constant 4 : i32
    %257 = tpu.dynamic_rotate %128 by %c4_i32_133 dim 0 : vector<8x32xf32>, i32 -> vector<8x32xf32>
    %c4_i32_134 = arith.constant 4 : i32
    %258 = vector.broadcast %c4_i32_134 : i32 to vector<8x1xi32>
    %259 = arith.addi %145, %258 : vector<8x1xi32>
    %c0_i32_135 = arith.constant 0 : i32
    %260 = vector.broadcast %c0_i32_135 : i32 to vector<8x1xi32>
    %261 = arith.cmpi sge, %259, %260 : vector<8x1xi32>
    %c4_i32_136 = arith.constant 4 : i32
    %262 = vector.broadcast %c4_i32_136 : i32 to vector<8x1xi32>
    %263 = arith.addi %145, %262 : vector<8x1xi32>
    %c8_i32_137 = arith.constant 8 : i32
    %264 = vector.broadcast %c8_i32_137 : i32 to vector<8x1xi32>
    %265 = arith.cmpi slt, %263, %264 : vector<8x1xi32>
    %266 = arith.andi %261, %265 : vector<8x1xi1>
    %cst_138 = arith.constant 0.000000e+00 : f32
    %267 = vector.shape_cast %266 : vector<8x1xi1> to vector<8x1xi1>
    %268 = vector.broadcast %267 : vector<8x1xi1> to vector<8x32xi1>
    %269 = vector.broadcast %cst_138 : f32 to vector<8x32xf32>
    %270 = arith.select %268, %257, %269 : vector<8x32xi1>, vector<8x32xf32>
    %271 = tpu.concatenate %159, %173, %187, %201, %214, %228, %242, %256, %270 in 1 : vector<8x32xf32>, vector<8x32xf32>, vector<8x32xf32>, vector<8x32xf32>, vector<8x32xf32>, vector<8x32xf32>, vector<8x32xf32>, vector<8x32xf32>, vector<8x32xf32> -> vector<8x288xf32>
    %272 = arith.truncf %271 : vector<8x288xf32> to vector<8x288xbf16>
    %c0_139 = arith.constant 0 : index
    %c0_140 = arith.constant 0 : index
    %c0_141 = arith.constant 0 : index
    %273 = vector.load %arg14[%c0_139, %c0_140, %c0_141] : memref<2x288x64xbf16, #tpu.memory_space<vmem>>, vector<1x288x64xbf16>
    %274 = vector.shape_cast %273 : vector<1x288x64xbf16> to vector<288x64xbf16>
    %cst_142 = arith.constant dense<0.000000e+00> : vector<8x64xf32>
    %275 = tpu.matmul %272, %274, %cst_142 {dimension_numbers = #tpu.dot_dimension_numbers<[1], [0], [0], [1], [0, 0, 1, 1], [], []>} : vector<8x288xbf16>, vector<288x64xbf16>, vector<8x64xf32> -> vector<8x64xf32>
    %c0_143 = arith.constant 0 : index
    %c0_144 = arith.constant 0 : index
    %c0_145 = arith.constant 0 : index
    %276 = vector.load %arg15[%c0_143, %c0_144, %c0_145] : memref<2x1x64xf32, #tpu.memory_space<vmem>>, vector<1x1x64xf32>
    %277 = vector.shape_cast %276 : vector<1x1x64xf32> to vector<1x64xf32>
    %278 = vector.broadcast %277 : vector<1x64xf32> to vector<8x64xf32>
    %279 = arith.addf %275, %278 : vector<8x64xf32>
    %cst_146 = arith.constant 0.000000e+00 : f32
    %280 = vector.broadcast %cst_146 : f32 to vector<8x64xf32>
    %281 = arith.maximumf %279, %280 : vector<8x64xf32>
    %282 = arith.truncf %281 : vector<8x64xf32> to vector<8x64xbf16>
    %c0_147 = arith.constant 0 : index
    %c0_148 = arith.constant 0 : index
    %c0_149 = arith.constant 0 : index
    %283 = vector.load %arg16[%c0_147, %c0_148, %c0_149] : memref<2x64x32xbf16, #tpu.memory_space<vmem>>, vector<1x64x32xbf16>
    %284 = vector.shape_cast %283 : vector<1x64x32xbf16> to vector<64x32xbf16>
    %cst_150 = arith.constant dense<0.000000e+00> : vector<8x32xf32>
    %285 = tpu.matmul %282, %284, %cst_150 {dimension_numbers = #tpu.dot_dimension_numbers<[1], [0], [0], [1], [0, 0, 1, 1], [], []>} : vector<8x64xbf16>, vector<64x32xbf16>, vector<8x32xf32> -> vector<8x32xf32>
    %c0_151 = arith.constant 0 : index
    %c0_152 = arith.constant 0 : index
    %c0_153 = arith.constant 0 : index
    %286 = vector.load %arg17[%c0_151, %c0_152, %c0_153] : memref<2x1x32xf32, #tpu.memory_space<vmem>>, vector<1x1x32xf32>
    %287 = vector.shape_cast %286 : vector<1x1x32xf32> to vector<1x32xf32>
    %288 = vector.broadcast %287 : vector<1x32xf32> to vector<8x32xf32>
    %289 = arith.addf %285, %288 : vector<8x32xf32>
    %290 = arith.addf %289, %128 : vector<8x32xf32>
    %c0_154 = arith.constant 0 : index
    %c0_155 = arith.constant 0 : index
    %c0_156 = arith.constant 0 : index
    %291 = vector.load %arg18[%c0_154, %c0_155, %c0_156] : memref<2x1x32xf32, #tpu.memory_space<vmem>>, vector<1x1x32xf32>
    %292 = vector.shape_cast %291 : vector<1x1x32xf32> to vector<1x32xf32>
    %c0_157 = arith.constant 0 : index
    %c0_158 = arith.constant 0 : index
    %c0_159 = arith.constant 0 : index
    %293 = vector.load %arg19[%c0_157, %c0_158, %c0_159] : memref<2x1x32xf32, #tpu.memory_space<vmem>>, vector<1x1x32xf32>
    %294 = vector.shape_cast %293 : vector<1x1x32xf32> to vector<1x32xf32>
    %cst_160 = arith.constant dense<0.000000e+00> : vector<8xf32>
    %295 = vector.multi_reduction <add>, %290, %cst_160 [1] : vector<8x32xf32> to vector<8xf32>
    %296 = vector.shape_cast %295 : vector<8xf32> to vector<8x1xf32>
    %cst_161 = arith.constant 3.200000e+01 : f32
    %297 = vector.broadcast %cst_161 : f32 to vector<8x1xf32>
    %298 = arith.divf %296, %297 : vector<8x1xf32>
    %299 = vector.broadcast %298 : vector<8x1xf32> to vector<8x32xf32>
    %300 = arith.subf %290, %299 : vector<8x32xf32>
    %301 = arith.mulf %300, %300 : vector<8x32xf32>
    %cst_162 = arith.constant dense<0.000000e+00> : vector<8xf32>
    %302 = vector.multi_reduction <add>, %301, %cst_162 [1] : vector<8x32xf32> to vector<8xf32>
    %303 = vector.shape_cast %302 : vector<8xf32> to vector<8x1xf32>
    %cst_163 = arith.constant 3.200000e+01 : f32
    %304 = vector.broadcast %cst_163 : f32 to vector<8x1xf32>
    %305 = arith.divf %303, %304 : vector<8x1xf32>
    %306 = vector.broadcast %298 : vector<8x1xf32> to vector<8x32xf32>
    %307 = arith.subf %290, %306 : vector<8x32xf32>
    %cst_164 = arith.constant 9.99999974E-6 : f32
    %308 = vector.broadcast %cst_164 : f32 to vector<8x1xf32>
    %309 = arith.addf %305, %308 : vector<8x1xf32>
    %310 = math.rsqrt %309 : vector<8x1xf32>
    %311 = vector.broadcast %310 : vector<8x1xf32> to vector<8x32xf32>
    %312 = arith.mulf %307, %311 : vector<8x32xf32>
    %313 = vector.broadcast %292 : vector<1x32xf32> to vector<8x32xf32>
    %314 = arith.mulf %312, %313 : vector<8x32xf32>
    %315 = vector.broadcast %294 : vector<1x32xf32> to vector<8x32xf32>
    %316 = arith.addf %314, %315 : vector<8x32xf32>
    %317 = vector.broadcast %3 : vector<8x1xf32> to vector<8x32xf32>
    %318 = arith.mulf %316, %317 : vector<8x32xf32>
    %319 = arith.truncf %318 : vector<8x32xf32> to vector<8x32xbf16>
    %cst_165 = arith.constant 0.000000e+00 : f32
    %320 = vector.broadcast %cst_165 : f32 to vector<8x32xf32>
    %c1_166 = arith.constant 1 : index
    %c0_167 = arith.constant 0 : index
    %c0_168 = arith.constant 0 : index
    %321 = vector.load %arg11[%c1_166, %c0_167, %c0_168] : memref<2x1x32xf32, #tpu.memory_space<vmem>>, vector<1x1x32xf32>
    %322 = vector.shape_cast %321 : vector<1x1x32xf32> to vector<1x32xf32>
    %323 = vector.broadcast %322 : vector<1x32xf32> to vector<8x32xf32>
    %324 = arith.addf %320, %323 : vector<8x32xf32>
    %c1_169 = arith.constant 1 : index
    %c0_170 = arith.constant 0 : index
    %c0_171 = arith.constant 0 : index
    %c0_172 = arith.constant 0 : index
    %325 = vector.load %arg4[%c1_169, %c0_170, %c0_171, %c0_172] : memref<2x2x32x16xbf16, #tpu.memory_space<vmem>>, vector<1x1x32x16xbf16>
    %326 = vector.shape_cast %325 : vector<1x1x32x16xbf16> to vector<32x16xbf16>
    %cst_173 = arith.constant dense<0.000000e+00> : vector<8x16xf32>
    %327 = tpu.matmul %319, %326, %cst_173 {dimension_numbers = #tpu.dot_dimension_numbers<[1], [0], [0], [1], [0, 0, 1, 1], [], []>} : vector<8x32xbf16>, vector<32x16xbf16>, vector<8x16xf32> -> vector<8x16xf32>
    %c1_174 = arith.constant 1 : index
    %c0_175 = arith.constant 0 : index
    %c0_176 = arith.constant 0 : index
    %c0_177 = arith.constant 0 : index
    %328 = vector.load %arg5[%c1_174, %c0_175, %c0_176, %c0_177] : memref<2x2x1x16xf32, #tpu.memory_space<vmem>>, vector<1x1x1x16xf32>
    %329 = vector.shape_cast %328 : vector<1x1x1x16xf32> to vector<1x16xf32>
    %330 = vector.broadcast %329 : vector<1x16xf32> to vector<8x16xf32>
    %331 = arith.addf %327, %330 : vector<8x16xf32>
    %c1_178 = arith.constant 1 : index
    %c0_179 = arith.constant 0 : index
    %c0_180 = arith.constant 0 : index
    %c0_181 = arith.constant 0 : index
    %332 = vector.load %arg6[%c1_178, %c0_179, %c0_180, %c0_181] : memref<2x2x32x16xbf16, #tpu.memory_space<vmem>>, vector<1x1x32x16xbf16>
    %333 = vector.shape_cast %332 : vector<1x1x32x16xbf16> to vector<32x16xbf16>
    %cst_182 = arith.constant dense<0.000000e+00> : vector<8x16xf32>
    %334 = tpu.matmul %319, %333, %cst_182 {dimension_numbers = #tpu.dot_dimension_numbers<[1], [0], [0], [1], [0, 0, 1, 1], [], []>} : vector<8x32xbf16>, vector<32x16xbf16>, vector<8x16xf32> -> vector<8x16xf32>
    %c1_183 = arith.constant 1 : index
    %c0_184 = arith.constant 0 : index
    %c0_185 = arith.constant 0 : index
    %c0_186 = arith.constant 0 : index
    %335 = vector.load %arg7[%c1_183, %c0_184, %c0_185, %c0_186] : memref<2x2x1x16xf32, #tpu.memory_space<vmem>>, vector<1x1x1x16xf32>
    %336 = vector.shape_cast %335 : vector<1x1x1x16xf32> to vector<1x16xf32>
    %337 = vector.broadcast %336 : vector<1x16xf32> to vector<8x16xf32>
    %338 = arith.addf %334, %337 : vector<8x16xf32>
    %c1_187 = arith.constant 1 : index
    %c0_188 = arith.constant 0 : index
    %c0_189 = arith.constant 0 : index
    %c0_190 = arith.constant 0 : index
    %339 = vector.load %arg8[%c1_187, %c0_188, %c0_189, %c0_190] : memref<2x2x32x16xbf16, #tpu.memory_space<vmem>>, vector<1x1x32x16xbf16>
    %340 = vector.shape_cast %339 : vector<1x1x32x16xbf16> to vector<32x16xbf16>
    %cst_191 = arith.constant dense<0.000000e+00> : vector<8x16xf32>
    %341 = tpu.matmul %319, %340, %cst_191 {dimension_numbers = #tpu.dot_dimension_numbers<[1], [0], [0], [1], [0, 0, 1, 1], [], []>} : vector<8x32xbf16>, vector<32x16xbf16>, vector<8x16xf32> -> vector<8x16xf32>
    %c1_192 = arith.constant 1 : index
    %c0_193 = arith.constant 0 : index
    %c0_194 = arith.constant 0 : index
    %c0_195 = arith.constant 0 : index
    %342 = vector.load %arg9[%c1_192, %c0_193, %c0_194, %c0_195] : memref<2x2x1x16xf32, #tpu.memory_space<vmem>>, vector<1x1x1x16xf32>
    %343 = vector.shape_cast %342 : vector<1x1x1x16xf32> to vector<1x16xf32>
    %344 = vector.broadcast %343 : vector<1x16xf32> to vector<8x16xf32>
    %345 = arith.addf %341, %344 : vector<8x16xf32>
    %346 = arith.truncf %331 : vector<8x16xf32> to vector<8x16xbf16>
    %347 = arith.truncf %338 : vector<8x16xf32> to vector<8x16xbf16>
    %cst_196 = arith.constant dense<0.000000e+00> : vector<8x8xf32>
    %348 = tpu.matmul %346, %347, %cst_196 {dimension_numbers = #tpu.dot_dimension_numbers<[1], [1], [0], [0], [0, 0, 1, 0], [], []>} : vector<8x16xbf16>, vector<8x16xbf16>, vector<8x8xf32> -> vector<8x8xf32>
    %349 = vector.broadcast %5 : vector<1x8xf32> to vector<8x8xf32>
    %350 = arith.addf %348, %349 : vector<8x8xf32>
    %cst_197 = arith.constant dense<0xFF800000> : vector<8xf32>
    %351 = vector.multi_reduction <maximumf>, %350, %cst_197 [1] : vector<8x8xf32> to vector<8xf32>
    %352 = vector.shape_cast %351 : vector<8xf32> to vector<8x1xf32>
    %353 = vector.broadcast %352 : vector<8x1xf32> to vector<8x8xf32>
    %354 = arith.subf %350, %353 : vector<8x8xf32>
    %355 = math.exp %354 : vector<8x8xf32>
    %cst_198 = arith.constant dense<0.000000e+00> : vector<8xf32>
    %356 = vector.multi_reduction <add>, %355, %cst_198 [1] : vector<8x8xf32> to vector<8xf32>
    %357 = vector.shape_cast %356 : vector<8xf32> to vector<8x1xf32>
    %358 = tpu.reciprocal %357 {approx = true} : vector<8x1xf32> -> vector<8x1xf32>
    %359 = vector.broadcast %358 : vector<8x1xf32> to vector<8x8xf32>
    %360 = arith.mulf %355, %359 : vector<8x8xf32>
    %361 = arith.truncf %360 : vector<8x8xf32> to vector<8x8xbf16>
    %362 = arith.truncf %345 : vector<8x16xf32> to vector<8x16xbf16>
    %cst_199 = arith.constant dense<0.000000e+00> : vector<8x16xf32>
    %363 = tpu.matmul %361, %362, %cst_199 {dimension_numbers = #tpu.dot_dimension_numbers<[1], [0], [0], [1], [0, 0, 1, 1], [], []>} : vector<8x8xbf16>, vector<8x16xbf16>, vector<8x16xf32> -> vector<8x16xf32>
    %364 = arith.truncf %363 : vector<8x16xf32> to vector<8x16xbf16>
    %c1_200 = arith.constant 1 : index
    %c0_201 = arith.constant 0 : index
    %c0_202 = arith.constant 0 : index
    %c0_203 = arith.constant 0 : index
    %365 = vector.load %arg10[%c1_200, %c0_201, %c0_202, %c0_203] : memref<2x2x16x32xbf16, #tpu.memory_space<vmem>>, vector<1x1x16x32xbf16>
    %366 = vector.shape_cast %365 : vector<1x1x16x32xbf16> to vector<16x32xbf16>
    %cst_204 = arith.constant dense<0.000000e+00> : vector<8x32xf32>
    %367 = tpu.matmul %364, %366, %cst_204 {dimension_numbers = #tpu.dot_dimension_numbers<[1], [0], [0], [1], [0, 0, 1, 1], [], []>} : vector<8x16xbf16>, vector<16x32xbf16>, vector<8x32xf32> -> vector<8x32xf32>
    %368 = arith.addf %324, %367 : vector<8x32xf32>
    %c1_205 = arith.constant 1 : index
    %c1_206 = arith.constant 1 : index
    %c0_207 = arith.constant 0 : index
    %c0_208 = arith.constant 0 : index
    %369 = vector.load %arg4[%c1_205, %c1_206, %c0_207, %c0_208] : memref<2x2x32x16xbf16, #tpu.memory_space<vmem>>, vector<1x1x32x16xbf16>
    %370 = vector.shape_cast %369 : vector<1x1x32x16xbf16> to vector<32x16xbf16>
    %cst_209 = arith.constant dense<0.000000e+00> : vector<8x16xf32>
    %371 = tpu.matmul %319, %370, %cst_209 {dimension_numbers = #tpu.dot_dimension_numbers<[1], [0], [0], [1], [0, 0, 1, 1], [], []>} : vector<8x32xbf16>, vector<32x16xbf16>, vector<8x16xf32> -> vector<8x16xf32>
    %c1_210 = arith.constant 1 : index
    %c1_211 = arith.constant 1 : index
    %c0_212 = arith.constant 0 : index
    %c0_213 = arith.constant 0 : index
    %372 = vector.load %arg5[%c1_210, %c1_211, %c0_212, %c0_213] : memref<2x2x1x16xf32, #tpu.memory_space<vmem>>, vector<1x1x1x16xf32>
    %373 = vector.shape_cast %372 : vector<1x1x1x16xf32> to vector<1x16xf32>
    %374 = vector.broadcast %373 : vector<1x16xf32> to vector<8x16xf32>
    %375 = arith.addf %371, %374 : vector<8x16xf32>
    %c1_214 = arith.constant 1 : index
    %c1_215 = arith.constant 1 : index
    %c0_216 = arith.constant 0 : index
    %c0_217 = arith.constant 0 : index
    %376 = vector.load %arg6[%c1_214, %c1_215, %c0_216, %c0_217] : memref<2x2x32x16xbf16, #tpu.memory_space<vmem>>, vector<1x1x32x16xbf16>
    %377 = vector.shape_cast %376 : vector<1x1x32x16xbf16> to vector<32x16xbf16>
    %cst_218 = arith.constant dense<0.000000e+00> : vector<8x16xf32>
    %378 = tpu.matmul %319, %377, %cst_218 {dimension_numbers = #tpu.dot_dimension_numbers<[1], [0], [0], [1], [0, 0, 1, 1], [], []>} : vector<8x32xbf16>, vector<32x16xbf16>, vector<8x16xf32> -> vector<8x16xf32>
    %c1_219 = arith.constant 1 : index
    %c1_220 = arith.constant 1 : index
    %c0_221 = arith.constant 0 : index
    %c0_222 = arith.constant 0 : index
    %379 = vector.load %arg7[%c1_219, %c1_220, %c0_221, %c0_222] : memref<2x2x1x16xf32, #tpu.memory_space<vmem>>, vector<1x1x1x16xf32>
    %380 = vector.shape_cast %379 : vector<1x1x1x16xf32> to vector<1x16xf32>
    %381 = vector.broadcast %380 : vector<1x16xf32> to vector<8x16xf32>
    %382 = arith.addf %378, %381 : vector<8x16xf32>
    %c1_223 = arith.constant 1 : index
    %c1_224 = arith.constant 1 : index
    %c0_225 = arith.constant 0 : index
    %c0_226 = arith.constant 0 : index
    %383 = vector.load %arg8[%c1_223, %c1_224, %c0_225, %c0_226] : memref<2x2x32x16xbf16, #tpu.memory_space<vmem>>, vector<1x1x32x16xbf16>
    %384 = vector.shape_cast %383 : vector<1x1x32x16xbf16> to vector<32x16xbf16>
    %cst_227 = arith.constant dense<0.000000e+00> : vector<8x16xf32>
    %385 = tpu.matmul %319, %384, %cst_227 {dimension_numbers = #tpu.dot_dimension_numbers<[1], [0], [0], [1], [0, 0, 1, 1], [], []>} : vector<8x32xbf16>, vector<32x16xbf16>, vector<8x16xf32> -> vector<8x16xf32>
    %c1_228 = arith.constant 1 : index
    %c1_229 = arith.constant 1 : index
    %c0_230 = arith.constant 0 : index
    %c0_231 = arith.constant 0 : index
    %386 = vector.load %arg9[%c1_228, %c1_229, %c0_230, %c0_231] : memref<2x2x1x16xf32, #tpu.memory_space<vmem>>, vector<1x1x1x16xf32>
    %387 = vector.shape_cast %386 : vector<1x1x1x16xf32> to vector<1x16xf32>
    %388 = vector.broadcast %387 : vector<1x16xf32> to vector<8x16xf32>
    %389 = arith.addf %385, %388 : vector<8x16xf32>
    %390 = arith.truncf %375 : vector<8x16xf32> to vector<8x16xbf16>
    %391 = arith.truncf %382 : vector<8x16xf32> to vector<8x16xbf16>
    %cst_232 = arith.constant dense<0.000000e+00> : vector<8x8xf32>
    %392 = tpu.matmul %390, %391, %cst_232 {dimension_numbers = #tpu.dot_dimension_numbers<[1], [1], [0], [0], [0, 0, 1, 0], [], []>} : vector<8x16xbf16>, vector<8x16xbf16>, vector<8x8xf32> -> vector<8x8xf32>
    %393 = vector.broadcast %5 : vector<1x8xf32> to vector<8x8xf32>
    %394 = arith.addf %392, %393 : vector<8x8xf32>
    %cst_233 = arith.constant dense<0xFF800000> : vector<8xf32>
    %395 = vector.multi_reduction <maximumf>, %394, %cst_233 [1] : vector<8x8xf32> to vector<8xf32>
    %396 = vector.shape_cast %395 : vector<8xf32> to vector<8x1xf32>
    %397 = vector.broadcast %396 : vector<8x1xf32> to vector<8x8xf32>
    %398 = arith.subf %394, %397 : vector<8x8xf32>
    %399 = math.exp %398 : vector<8x8xf32>
    %cst_234 = arith.constant dense<0.000000e+00> : vector<8xf32>
    %400 = vector.multi_reduction <add>, %399, %cst_234 [1] : vector<8x8xf32> to vector<8xf32>
    %401 = vector.shape_cast %400 : vector<8xf32> to vector<8x1xf32>
    %402 = tpu.reciprocal %401 {approx = true} : vector<8x1xf32> -> vector<8x1xf32>
    %403 = vector.broadcast %402 : vector<8x1xf32> to vector<8x8xf32>
    %404 = arith.mulf %399, %403 : vector<8x8xf32>
    %405 = arith.truncf %404 : vector<8x8xf32> to vector<8x8xbf16>
    %406 = arith.truncf %389 : vector<8x16xf32> to vector<8x16xbf16>
    %cst_235 = arith.constant dense<0.000000e+00> : vector<8x16xf32>
    %407 = tpu.matmul %405, %406, %cst_235 {dimension_numbers = #tpu.dot_dimension_numbers<[1], [0], [0], [1], [0, 0, 1, 1], [], []>} : vector<8x8xbf16>, vector<8x16xbf16>, vector<8x16xf32> -> vector<8x16xf32>
    %408 = arith.truncf %407 : vector<8x16xf32> to vector<8x16xbf16>
    %c1_236 = arith.constant 1 : index
    %c1_237 = arith.constant 1 : index
    %c0_238 = arith.constant 0 : index
    %c0_239 = arith.constant 0 : index
    %409 = vector.load %arg10[%c1_236, %c1_237, %c0_238, %c0_239] : memref<2x2x16x32xbf16, #tpu.memory_space<vmem>>, vector<1x1x16x32xbf16>
    %410 = vector.shape_cast %409 : vector<1x1x16x32xbf16> to vector<16x32xbf16>
    %cst_240 = arith.constant dense<0.000000e+00> : vector<8x32xf32>
    %411 = tpu.matmul %408, %410, %cst_240 {dimension_numbers = #tpu.dot_dimension_numbers<[1], [0], [0], [1], [0, 0, 1, 1], [], []>} : vector<8x16xbf16>, vector<16x32xbf16>, vector<8x32xf32> -> vector<8x32xf32>
    %412 = arith.addf %368, %411 : vector<8x32xf32>
    %413 = arith.addf %412, %318 : vector<8x32xf32>
    %c1_241 = arith.constant 1 : index
    %c0_242 = arith.constant 0 : index
    %c0_243 = arith.constant 0 : index
    %414 = vector.load %arg12[%c1_241, %c0_242, %c0_243] : memref<2x1x32xf32, #tpu.memory_space<vmem>>, vector<1x1x32xf32>
    %415 = vector.shape_cast %414 : vector<1x1x32xf32> to vector<1x32xf32>
    %c1_244 = arith.constant 1 : index
    %c0_245 = arith.constant 0 : index
    %c0_246 = arith.constant 0 : index
    %416 = vector.load %arg13[%c1_244, %c0_245, %c0_246] : memref<2x1x32xf32, #tpu.memory_space<vmem>>, vector<1x1x32xf32>
    %417 = vector.shape_cast %416 : vector<1x1x32xf32> to vector<1x32xf32>
    %cst_247 = arith.constant dense<0.000000e+00> : vector<8xf32>
    %418 = vector.multi_reduction <add>, %413, %cst_247 [1] : vector<8x32xf32> to vector<8xf32>
    %419 = vector.shape_cast %418 : vector<8xf32> to vector<8x1xf32>
    %cst_248 = arith.constant 3.200000e+01 : f32
    %420 = vector.broadcast %cst_248 : f32 to vector<8x1xf32>
    %421 = arith.divf %419, %420 : vector<8x1xf32>
    %422 = vector.broadcast %421 : vector<8x1xf32> to vector<8x32xf32>
    %423 = arith.subf %413, %422 : vector<8x32xf32>
    %424 = arith.mulf %423, %423 : vector<8x32xf32>
    %cst_249 = arith.constant dense<0.000000e+00> : vector<8xf32>
    %425 = vector.multi_reduction <add>, %424, %cst_249 [1] : vector<8x32xf32> to vector<8xf32>
    %426 = vector.shape_cast %425 : vector<8xf32> to vector<8x1xf32>
    %cst_250 = arith.constant 3.200000e+01 : f32
    %427 = vector.broadcast %cst_250 : f32 to vector<8x1xf32>
    %428 = arith.divf %426, %427 : vector<8x1xf32>
    %429 = vector.broadcast %421 : vector<8x1xf32> to vector<8x32xf32>
    %430 = arith.subf %413, %429 : vector<8x32xf32>
    %cst_251 = arith.constant 9.99999974E-6 : f32
    %431 = vector.broadcast %cst_251 : f32 to vector<8x1xf32>
    %432 = arith.addf %428, %431 : vector<8x1xf32>
    %433 = math.rsqrt %432 : vector<8x1xf32>
    %434 = vector.broadcast %433 : vector<8x1xf32> to vector<8x32xf32>
    %435 = arith.mulf %430, %434 : vector<8x32xf32>
    %436 = vector.broadcast %415 : vector<1x32xf32> to vector<8x32xf32>
    %437 = arith.mulf %435, %436 : vector<8x32xf32>
    %438 = vector.broadcast %417 : vector<1x32xf32> to vector<8x32xf32>
    %439 = arith.addf %437, %438 : vector<8x32xf32>
    %440 = vector.broadcast %3 : vector<8x1xf32> to vector<8x32xf32>
    %441 = arith.mulf %439, %440 : vector<8x32xf32>
    %442 = tpu.iota {dimensions = array<i32: 0>} : vector<8x1xi32>
    %c8_i32_252 = arith.constant 8 : i32
    %c0_i32_253 = arith.constant 0 : i32
    %443 = arith.cmpi eq, %c8_i32_252, %c0_i32_253 : i32
    %c1_i32_254 = arith.constant 1 : i32
    %444 = arith.select %443, %c1_i32_254, %c8_i32_252 : i32
    %445 = vector.broadcast %444 : i32 to vector<8x1xi32>
    %446 = arith.remsi %442, %445 : vector<8x1xi32>
    %c0_i32_255 = arith.constant 0 : i32
    %447 = vector.broadcast %c0_i32_255 : i32 to vector<8x1xi32>
    %448 = arith.cmpi ne, %446, %447 : vector<8x1xi32>
    %c0_i32_256 = arith.constant 0 : i32
    %449 = vector.broadcast %c0_i32_256 : i32 to vector<8x1xi32>
    %450 = arith.cmpi slt, %446, %449 : vector<8x1xi32>
    %c0_i32_257 = arith.constant 0 : i32
    %451 = arith.cmpi slt, %444, %c0_i32_257 : i32
    %452 = vector.broadcast %451 : i1 to vector<8x1xi1>
    %453 = vector.broadcast %452 : vector<8x1xi1> to vector<8x1xi1>
    %454 = arith.xori %450, %453 : vector<8x1xi1>
    %455 = arith.andi %454, %448 : vector<8x1xi1>
    %456 = vector.broadcast %444 : i32 to vector<8x1xi32>
    %457 = arith.addi %446, %456 : vector<8x1xi32>
    %458 = arith.select %455, %457, %446 : vector<8x1xi1>, vector<8x1xi32>
    %c4_i32_258 = arith.constant 4 : i32
    %459 = tpu.dynamic_rotate %441 by %c4_i32_258 dim 0 : vector<8x32xf32>, i32 -> vector<8x32xf32>
    %c-4_i32_259 = arith.constant -4 : i32
    %460 = vector.broadcast %c-4_i32_259 : i32 to vector<8x1xi32>
    %461 = arith.addi %458, %460 : vector<8x1xi32>
    %c0_i32_260 = arith.constant 0 : i32
    %462 = vector.broadcast %c0_i32_260 : i32 to vector<8x1xi32>
    %463 = arith.cmpi sge, %461, %462 : vector<8x1xi32>
    %c-4_i32_261 = arith.constant -4 : i32
    %464 = vector.broadcast %c-4_i32_261 : i32 to vector<8x1xi32>
    %465 = arith.addi %458, %464 : vector<8x1xi32>
    %c8_i32_262 = arith.constant 8 : i32
    %466 = vector.broadcast %c8_i32_262 : i32 to vector<8x1xi32>
    %467 = arith.cmpi slt, %465, %466 : vector<8x1xi32>
    %468 = arith.andi %463, %467 : vector<8x1xi1>
    %cst_263 = arith.constant 0.000000e+00 : f32
    %469 = vector.shape_cast %468 : vector<8x1xi1> to vector<8x1xi1>
    %470 = vector.broadcast %469 : vector<8x1xi1> to vector<8x32xi1>
    %471 = vector.broadcast %cst_263 : f32 to vector<8x32xf32>
    %472 = arith.select %470, %459, %471 : vector<8x32xi1>, vector<8x32xf32>
    %c3_i32_264 = arith.constant 3 : i32
    %473 = tpu.dynamic_rotate %441 by %c3_i32_264 dim 0 : vector<8x32xf32>, i32 -> vector<8x32xf32>
    %c-3_i32_265 = arith.constant -3 : i32
    %474 = vector.broadcast %c-3_i32_265 : i32 to vector<8x1xi32>
    %475 = arith.addi %458, %474 : vector<8x1xi32>
    %c0_i32_266 = arith.constant 0 : i32
    %476 = vector.broadcast %c0_i32_266 : i32 to vector<8x1xi32>
    %477 = arith.cmpi sge, %475, %476 : vector<8x1xi32>
    %c-3_i32_267 = arith.constant -3 : i32
    %478 = vector.broadcast %c-3_i32_267 : i32 to vector<8x1xi32>
    %479 = arith.addi %458, %478 : vector<8x1xi32>
    %c8_i32_268 = arith.constant 8 : i32
    %480 = vector.broadcast %c8_i32_268 : i32 to vector<8x1xi32>
    %481 = arith.cmpi slt, %479, %480 : vector<8x1xi32>
    %482 = arith.andi %477, %481 : vector<8x1xi1>
    %cst_269 = arith.constant 0.000000e+00 : f32
    %483 = vector.shape_cast %482 : vector<8x1xi1> to vector<8x1xi1>
    %484 = vector.broadcast %483 : vector<8x1xi1> to vector<8x32xi1>
    %485 = vector.broadcast %cst_269 : f32 to vector<8x32xf32>
    %486 = arith.select %484, %473, %485 : vector<8x32xi1>, vector<8x32xf32>
    %c2_i32_270 = arith.constant 2 : i32
    %487 = tpu.dynamic_rotate %441 by %c2_i32_270 dim 0 : vector<8x32xf32>, i32 -> vector<8x32xf32>
    %c-2_i32_271 = arith.constant -2 : i32
    %488 = vector.broadcast %c-2_i32_271 : i32 to vector<8x1xi32>
    %489 = arith.addi %458, %488 : vector<8x1xi32>
    %c0_i32_272 = arith.constant 0 : i32
    %490 = vector.broadcast %c0_i32_272 : i32 to vector<8x1xi32>
    %491 = arith.cmpi sge, %489, %490 : vector<8x1xi32>
    %c-2_i32_273 = arith.constant -2 : i32
    %492 = vector.broadcast %c-2_i32_273 : i32 to vector<8x1xi32>
    %493 = arith.addi %458, %492 : vector<8x1xi32>
    %c8_i32_274 = arith.constant 8 : i32
    %494 = vector.broadcast %c8_i32_274 : i32 to vector<8x1xi32>
    %495 = arith.cmpi slt, %493, %494 : vector<8x1xi32>
    %496 = arith.andi %491, %495 : vector<8x1xi1>
    %cst_275 = arith.constant 0.000000e+00 : f32
    %497 = vector.shape_cast %496 : vector<8x1xi1> to vector<8x1xi1>
    %498 = vector.broadcast %497 : vector<8x1xi1> to vector<8x32xi1>
    %499 = vector.broadcast %cst_275 : f32 to vector<8x32xf32>
    %500 = arith.select %498, %487, %499 : vector<8x32xi1>, vector<8x32xf32>
    %c1_i32_276 = arith.constant 1 : i32
    %501 = tpu.dynamic_rotate %441 by %c1_i32_276 dim 0 : vector<8x32xf32>, i32 -> vector<8x32xf32>
    %c-1_i32_277 = arith.constant -1 : i32
    %502 = vector.broadcast %c-1_i32_277 : i32 to vector<8x1xi32>
    %503 = arith.addi %458, %502 : vector<8x1xi32>
    %c0_i32_278 = arith.constant 0 : i32
    %504 = vector.broadcast %c0_i32_278 : i32 to vector<8x1xi32>
    %505 = arith.cmpi sge, %503, %504 : vector<8x1xi32>
    %c-1_i32_279 = arith.constant -1 : i32
    %506 = vector.broadcast %c-1_i32_279 : i32 to vector<8x1xi32>
    %507 = arith.addi %458, %506 : vector<8x1xi32>
    %c8_i32_280 = arith.constant 8 : i32
    %508 = vector.broadcast %c8_i32_280 : i32 to vector<8x1xi32>
    %509 = arith.cmpi slt, %507, %508 : vector<8x1xi32>
    %510 = arith.andi %505, %509 : vector<8x1xi1>
    %cst_281 = arith.constant 0.000000e+00 : f32
    %511 = vector.shape_cast %510 : vector<8x1xi1> to vector<8x1xi1>
    %512 = vector.broadcast %511 : vector<8x1xi1> to vector<8x32xi1>
    %513 = vector.broadcast %cst_281 : f32 to vector<8x32xf32>
    %514 = arith.select %512, %501, %513 : vector<8x32xi1>, vector<8x32xf32>
    %c0_i32_282 = arith.constant 0 : i32
    %515 = vector.broadcast %c0_i32_282 : i32 to vector<8x1xi32>
    %516 = arith.addi %458, %515 : vector<8x1xi32>
    %c0_i32_283 = arith.constant 0 : i32
    %517 = vector.broadcast %c0_i32_283 : i32 to vector<8x1xi32>
    %518 = arith.cmpi sge, %516, %517 : vector<8x1xi32>
    %c0_i32_284 = arith.constant 0 : i32
    %519 = vector.broadcast %c0_i32_284 : i32 to vector<8x1xi32>
    %520 = arith.addi %458, %519 : vector<8x1xi32>
    %c8_i32_285 = arith.constant 8 : i32
    %521 = vector.broadcast %c8_i32_285 : i32 to vector<8x1xi32>
    %522 = arith.cmpi slt, %520, %521 : vector<8x1xi32>
    %523 = arith.andi %518, %522 : vector<8x1xi1>
    %cst_286 = arith.constant 0.000000e+00 : f32
    %524 = vector.shape_cast %523 : vector<8x1xi1> to vector<8x1xi1>
    %525 = vector.broadcast %524 : vector<8x1xi1> to vector<8x32xi1>
    %526 = vector.broadcast %cst_286 : f32 to vector<8x32xf32>
    %527 = arith.select %525, %441, %526 : vector<8x32xi1>, vector<8x32xf32>
    %c7_i32_287 = arith.constant 7 : i32
    %528 = tpu.dynamic_rotate %441 by %c7_i32_287 dim 0 : vector<8x32xf32>, i32 -> vector<8x32xf32>
    %c1_i32_288 = arith.constant 1 : i32
    %529 = vector.broadcast %c1_i32_288 : i32 to vector<8x1xi32>
    %530 = arith.addi %458, %529 : vector<8x1xi32>
    %c0_i32_289 = arith.constant 0 : i32
    %531 = vector.broadcast %c0_i32_289 : i32 to vector<8x1xi32>
    %532 = arith.cmpi sge, %530, %531 : vector<8x1xi32>
    %c1_i32_290 = arith.constant 1 : i32
    %533 = vector.broadcast %c1_i32_290 : i32 to vector<8x1xi32>
    %534 = arith.addi %458, %533 : vector<8x1xi32>
    %c8_i32_291 = arith.constant 8 : i32
    %535 = vector.broadcast %c8_i32_291 : i32 to vector<8x1xi32>
    %536 = arith.cmpi slt, %534, %535 : vector<8x1xi32>
    %537 = arith.andi %532, %536 : vector<8x1xi1>
    %cst_292 = arith.constant 0.000000e+00 : f32
    %538 = vector.shape_cast %537 : vector<8x1xi1> to vector<8x1xi1>
    %539 = vector.broadcast %538 : vector<8x1xi1> to vector<8x32xi1>
    %540 = vector.broadcast %cst_292 : f32 to vector<8x32xf32>
    %541 = arith.select %539, %528, %540 : vector<8x32xi1>, vector<8x32xf32>
    %c6_i32_293 = arith.constant 6 : i32
    %542 = tpu.dynamic_rotate %441 by %c6_i32_293 dim 0 : vector<8x32xf32>, i32 -> vector<8x32xf32>
    %c2_i32_294 = arith.constant 2 : i32
    %543 = vector.broadcast %c2_i32_294 : i32 to vector<8x1xi32>
    %544 = arith.addi %458, %543 : vector<8x1xi32>
    %c0_i32_295 = arith.constant 0 : i32
    %545 = vector.broadcast %c0_i32_295 : i32 to vector<8x1xi32>
    %546 = arith.cmpi sge, %544, %545 : vector<8x1xi32>
    %c2_i32_296 = arith.constant 2 : i32
    %547 = vector.broadcast %c2_i32_296 : i32 to vector<8x1xi32>
    %548 = arith.addi %458, %547 : vector<8x1xi32>
    %c8_i32_297 = arith.constant 8 : i32
    %549 = vector.broadcast %c8_i32_297 : i32 to vector<8x1xi32>
    %550 = arith.cmpi slt, %548, %549 : vector<8x1xi32>
    %551 = arith.andi %546, %550 : vector<8x1xi1>
    %cst_298 = arith.constant 0.000000e+00 : f32
    %552 = vector.shape_cast %551 : vector<8x1xi1> to vector<8x1xi1>
    %553 = vector.broadcast %552 : vector<8x1xi1> to vector<8x32xi1>
    %554 = vector.broadcast %cst_298 : f32 to vector<8x32xf32>
    %555 = arith.select %553, %542, %554 : vector<8x32xi1>, vector<8x32xf32>
    %c5_i32_299 = arith.constant 5 : i32
    %556 = tpu.dynamic_rotate %441 by %c5_i32_299 dim 0 : vector<8x32xf32>, i32 -> vector<8x32xf32>
    %c3_i32_300 = arith.constant 3 : i32
    %557 = vector.broadcast %c3_i32_300 : i32 to vector<8x1xi32>
    %558 = arith.addi %458, %557 : vector<8x1xi32>
    %c0_i32_301 = arith.constant 0 : i32
    %559 = vector.broadcast %c0_i32_301 : i32 to vector<8x1xi32>
    %560 = arith.cmpi sge, %558, %559 : vector<8x1xi32>
    %c3_i32_302 = arith.constant 3 : i32
    %561 = vector.broadcast %c3_i32_302 : i32 to vector<8x1xi32>
    %562 = arith.addi %458, %561 : vector<8x1xi32>
    %c8_i32_303 = arith.constant 8 : i32
    %563 = vector.broadcast %c8_i32_303 : i32 to vector<8x1xi32>
    %564 = arith.cmpi slt, %562, %563 : vector<8x1xi32>
    %565 = arith.andi %560, %564 : vector<8x1xi1>
    %cst_304 = arith.constant 0.000000e+00 : f32
    %566 = vector.shape_cast %565 : vector<8x1xi1> to vector<8x1xi1>
    %567 = vector.broadcast %566 : vector<8x1xi1> to vector<8x32xi1>
    %568 = vector.broadcast %cst_304 : f32 to vector<8x32xf32>
    %569 = arith.select %567, %556, %568 : vector<8x32xi1>, vector<8x32xf32>
    %c4_i32_305 = arith.constant 4 : i32
    %570 = tpu.dynamic_rotate %441 by %c4_i32_305 dim 0 : vector<8x32xf32>, i32 -> vector<8x32xf32>
    %c4_i32_306 = arith.constant 4 : i32
    %571 = vector.broadcast %c4_i32_306 : i32 to vector<8x1xi32>
    %572 = arith.addi %458, %571 : vector<8x1xi32>
    %c0_i32_307 = arith.constant 0 : i32
    %573 = vector.broadcast %c0_i32_307 : i32 to vector<8x1xi32>
    %574 = arith.cmpi sge, %572, %573 : vector<8x1xi32>
    %c4_i32_308 = arith.constant 4 : i32
    %575 = vector.broadcast %c4_i32_308 : i32 to vector<8x1xi32>
    %576 = arith.addi %458, %575 : vector<8x1xi32>
    %c8_i32_309 = arith.constant 8 : i32
    %577 = vector.broadcast %c8_i32_309 : i32 to vector<8x1xi32>
    %578 = arith.cmpi slt, %576, %577 : vector<8x1xi32>
    %579 = arith.andi %574, %578 : vector<8x1xi1>
    %cst_310 = arith.constant 0.000000e+00 : f32
    %580 = vector.shape_cast %579 : vector<8x1xi1> to vector<8x1xi1>
    %581 = vector.broadcast %580 : vector<8x1xi1> to vector<8x32xi1>
    %582 = vector.broadcast %cst_310 : f32 to vector<8x32xf32>
    %583 = arith.select %581, %570, %582 : vector<8x32xi1>, vector<8x32xf32>
    %584 = tpu.concatenate %472, %486, %500, %514, %527, %541, %555, %569, %583 in 1 : vector<8x32xf32>, vector<8x32xf32>, vector<8x32xf32>, vector<8x32xf32>, vector<8x32xf32>, vector<8x32xf32>, vector<8x32xf32>, vector<8x32xf32>, vector<8x32xf32> -> vector<8x288xf32>
    %585 = arith.truncf %584 : vector<8x288xf32> to vector<8x288xbf16>
    %c1_311 = arith.constant 1 : index
    %c0_312 = arith.constant 0 : index
    %c0_313 = arith.constant 0 : index
    %586 = vector.load %arg14[%c1_311, %c0_312, %c0_313] : memref<2x288x64xbf16, #tpu.memory_space<vmem>>, vector<1x288x64xbf16>
    %587 = vector.shape_cast %586 : vector<1x288x64xbf16> to vector<288x64xbf16>
    %cst_314 = arith.constant dense<0.000000e+00> : vector<8x64xf32>
    %588 = tpu.matmul %585, %587, %cst_314 {dimension_numbers = #tpu.dot_dimension_numbers<[1], [0], [0], [1], [0, 0, 1, 1], [], []>} : vector<8x288xbf16>, vector<288x64xbf16>, vector<8x64xf32> -> vector<8x64xf32>
    %c1_315 = arith.constant 1 : index
    %c0_316 = arith.constant 0 : index
    %c0_317 = arith.constant 0 : index
    %589 = vector.load %arg15[%c1_315, %c0_316, %c0_317] : memref<2x1x64xf32, #tpu.memory_space<vmem>>, vector<1x1x64xf32>
    %590 = vector.shape_cast %589 : vector<1x1x64xf32> to vector<1x64xf32>
    %591 = vector.broadcast %590 : vector<1x64xf32> to vector<8x64xf32>
    %592 = arith.addf %588, %591 : vector<8x64xf32>
    %cst_318 = arith.constant 0.000000e+00 : f32
    %593 = vector.broadcast %cst_318 : f32 to vector<8x64xf32>
    %594 = arith.maximumf %592, %593 : vector<8x64xf32>
    %595 = arith.truncf %594 : vector<8x64xf32> to vector<8x64xbf16>
    %c1_319 = arith.constant 1 : index
    %c0_320 = arith.constant 0 : index
    %c0_321 = arith.constant 0 : index
    %596 = vector.load %arg16[%c1_319, %c0_320, %c0_321] : memref<2x64x32xbf16, #tpu.memory_space<vmem>>, vector<1x64x32xbf16>
    %597 = vector.shape_cast %596 : vector<1x64x32xbf16> to vector<64x32xbf16>
    %cst_322 = arith.constant dense<0.000000e+00> : vector<8x32xf32>
    %598 = tpu.matmul %595, %597, %cst_322 {dimension_numbers = #tpu.dot_dimension_numbers<[1], [0], [0], [1], [0, 0, 1, 1], [], []>} : vector<8x64xbf16>, vector<64x32xbf16>, vector<8x32xf32> -> vector<8x32xf32>
    %c1_323 = arith.constant 1 : index
    %c0_324 = arith.constant 0 : index
    %c0_325 = arith.constant 0 : index
    %599 = vector.load %arg17[%c1_323, %c0_324, %c0_325] : memref<2x1x32xf32, #tpu.memory_space<vmem>>, vector<1x1x32xf32>
    %600 = vector.shape_cast %599 : vector<1x1x32xf32> to vector<1x32xf32>
    %601 = vector.broadcast %600 : vector<1x32xf32> to vector<8x32xf32>
    %602 = arith.addf %598, %601 : vector<8x32xf32>
    %603 = arith.addf %602, %441 : vector<8x32xf32>
    %c1_326 = arith.constant 1 : index
    %c0_327 = arith.constant 0 : index
    %c0_328 = arith.constant 0 : index
    %604 = vector.load %arg18[%c1_326, %c0_327, %c0_328] : memref<2x1x32xf32, #tpu.memory_space<vmem>>, vector<1x1x32xf32>
    %605 = vector.shape_cast %604 : vector<1x1x32xf32> to vector<1x32xf32>
    %c1_329 = arith.constant 1 : index
    %c0_330 = arith.constant 0 : index
    %c0_331 = arith.constant 0 : index
    %606 = vector.load %arg19[%c1_329, %c0_330, %c0_331] : memref<2x1x32xf32, #tpu.memory_space<vmem>>, vector<1x1x32xf32>
    %607 = vector.shape_cast %606 : vector<1x1x32xf32> to vector<1x32xf32>
    %cst_332 = arith.constant dense<0.000000e+00> : vector<8xf32>
    %608 = vector.multi_reduction <add>, %603, %cst_332 [1] : vector<8x32xf32> to vector<8xf32>
    %609 = vector.shape_cast %608 : vector<8xf32> to vector<8x1xf32>
    %cst_333 = arith.constant 3.200000e+01 : f32
    %610 = vector.broadcast %cst_333 : f32 to vector<8x1xf32>
    %611 = arith.divf %609, %610 : vector<8x1xf32>
    %612 = vector.broadcast %611 : vector<8x1xf32> to vector<8x32xf32>
    %613 = arith.subf %603, %612 : vector<8x32xf32>
    %614 = arith.mulf %613, %613 : vector<8x32xf32>
    %cst_334 = arith.constant dense<0.000000e+00> : vector<8xf32>
    %615 = vector.multi_reduction <add>, %614, %cst_334 [1] : vector<8x32xf32> to vector<8xf32>
    %616 = vector.shape_cast %615 : vector<8xf32> to vector<8x1xf32>
    %cst_335 = arith.constant 3.200000e+01 : f32
    %617 = vector.broadcast %cst_335 : f32 to vector<8x1xf32>
    %618 = arith.divf %616, %617 : vector<8x1xf32>
    %619 = vector.broadcast %611 : vector<8x1xf32> to vector<8x32xf32>
    %620 = arith.subf %603, %619 : vector<8x32xf32>
    %cst_336 = arith.constant 9.99999974E-6 : f32
    %621 = vector.broadcast %cst_336 : f32 to vector<8x1xf32>
    %622 = arith.addf %618, %621 : vector<8x1xf32>
    %623 = math.rsqrt %622 : vector<8x1xf32>
    %624 = vector.broadcast %623 : vector<8x1xf32> to vector<8x32xf32>
    %625 = arith.mulf %620, %624 : vector<8x32xf32>
    %626 = vector.broadcast %605 : vector<1x32xf32> to vector<8x32xf32>
    %627 = arith.mulf %625, %626 : vector<8x32xf32>
    %628 = vector.broadcast %607 : vector<1x32xf32> to vector<8x32xf32>
    %629 = arith.addf %627, %628 : vector<8x32xf32>
    %630 = vector.broadcast %3 : vector<8x1xf32> to vector<8x32xf32>
    %631 = arith.mulf %629, %630 : vector<8x32xf32>
    %c0_337 = arith.constant 0 : index
    %c0_338 = arith.constant 0 : index
    %c0_339 = arith.constant 0 : index
    %632 = vector.load %arg20[%c0_337, %c0_338, %c0_339] : memref<1x8x32xf32, #tpu.memory_space<vmem>>, vector<1x8x32xf32>
    %633 = vector.shape_cast %632 : vector<1x8x32xf32> to vector<8x32xf32>
    %634 = vector.shape_cast %631 : vector<8x32xf32> to vector<1x8x32xf32>
    tpu.vector_store %arg20[%c0_337, %c0_338, %c0_339], %634 {strides = array<i32>} : memref<1x8x32xf32, #tpu.memory_space<vmem>>, vector<1x8x32xf32>,
    return
  }
  func.func @transform_0(%arg0: i32) -> (i32, i32, i32) {
    %c0_i32 = arith.constant 0 : i32
    %c0_i32_0 = arith.constant 0 : i32
    %c0_i32_1 = arith.constant 0 : i32
    return %arg0, %c0_i32, %c0_i32_0 : i32, i32, i32
  }
  func.func @transform_1(%arg0: i32) -> (i32, i32, i32) {
    %c0_i32 = arith.constant 0 : i32
    %c0_i32_0 = arith.constant 0 : i32
    %c0_i32_1 = arith.constant 0 : i32
    return %arg0, %c0_i32, %c0_i32_0 : i32, i32, i32
  }
  func.func @transform_2(%arg0: i32) -> (i32, i32, i32) {
    %c0_i32 = arith.constant 0 : i32
    %c0_i32_0 = arith.constant 0 : i32
    %c0_i32_1 = arith.constant 0 : i32
    return %arg0, %c0_i32, %c0_i32_0 : i32, i32, i32
  }
  func.func @transform_3(%arg0: i32) -> (i32, i32, i32, i32) {
    %c0_i32 = arith.constant 0 : i32
    %c0_i32_0 = arith.constant 0 : i32
    %c0_i32_1 = arith.constant 0 : i32
    %c0_i32_2 = arith.constant 0 : i32
    %c0_i32_3 = arith.constant 0 : i32
    return %c0_i32, %c0_i32_0, %c0_i32_1, %c0_i32_2 : i32, i32, i32, i32
  }
  func.func @transform_4(%arg0: i32) -> (i32, i32, i32, i32) {
    %c0_i32 = arith.constant 0 : i32
    %c0_i32_0 = arith.constant 0 : i32
    %c0_i32_1 = arith.constant 0 : i32
    %c0_i32_2 = arith.constant 0 : i32
    %c0_i32_3 = arith.constant 0 : i32
    return %c0_i32, %c0_i32_0, %c0_i32_1, %c0_i32_2 : i32, i32, i32, i32
  }
  func.func @transform_5(%arg0: i32) -> (i32, i32, i32, i32) {
    %c0_i32 = arith.constant 0 : i32
    %c0_i32_0 = arith.constant 0 : i32
    %c0_i32_1 = arith.constant 0 : i32
    %c0_i32_2 = arith.constant 0 : i32
    %c0_i32_3 = arith.constant 0 : i32
    return %c0_i32, %c0_i32_0, %c0_i32_1, %c0_i32_2 : i32, i32, i32, i32
  }
  func.func @transform_6(%arg0: i32) -> (i32, i32, i32, i32) {
    %c0_i32 = arith.constant 0 : i32
    %c0_i32_0 = arith.constant 0 : i32
    %c0_i32_1 = arith.constant 0 : i32
    %c0_i32_2 = arith.constant 0 : i32
    %c0_i32_3 = arith.constant 0 : i32
    return %c0_i32, %c0_i32_0, %c0_i32_1, %c0_i32_2 : i32, i32, i32, i32
  }
  func.func @transform_7(%arg0: i32) -> (i32, i32, i32, i32) {
    %c0_i32 = arith.constant 0 : i32
    %c0_i32_0 = arith.constant 0 : i32
    %c0_i32_1 = arith.constant 0 : i32
    %c0_i32_2 = arith.constant 0 : i32
    %c0_i32_3 = arith.constant 0 : i32
    return %c0_i32, %c0_i32_0, %c0_i32_1, %c0_i32_2 : i32, i32, i32, i32
  }
  func.func @transform_8(%arg0: i32) -> (i32, i32, i32, i32) {
    %c0_i32 = arith.constant 0 : i32
    %c0_i32_0 = arith.constant 0 : i32
    %c0_i32_1 = arith.constant 0 : i32
    %c0_i32_2 = arith.constant 0 : i32
    %c0_i32_3 = arith.constant 0 : i32
    return %c0_i32, %c0_i32_0, %c0_i32_1, %c0_i32_2 : i32, i32, i32, i32
  }
  func.func @transform_9(%arg0: i32) -> (i32, i32, i32, i32) {
    %c0_i32 = arith.constant 0 : i32
    %c0_i32_0 = arith.constant 0 : i32
    %c0_i32_1 = arith.constant 0 : i32
    %c0_i32_2 = arith.constant 0 : i32
    %c0_i32_3 = arith.constant 0 : i32
    return %c0_i32, %c0_i32_0, %c0_i32_1, %c0_i32_2 : i32, i32, i32, i32
  }
  func.func @transform_10(%arg0: i32) -> (i32, i32, i32) {
    %c0_i32 = arith.constant 0 : i32
    %c0_i32_0 = arith.constant 0 : i32
    %c0_i32_1 = arith.constant 0 : i32
    %c0_i32_2 = arith.constant 0 : i32
    return %c0_i32, %c0_i32_0, %c0_i32_1 : i32, i32, i32
  }
  func.func @transform_11(%arg0: i32) -> (i32, i32, i32) {
    %c0_i32 = arith.constant 0 : i32
    %c0_i32_0 = arith.constant 0 : i32
    %c0_i32_1 = arith.constant 0 : i32
    %c0_i32_2 = arith.constant 0 : i32
    return %c0_i32, %c0_i32_0, %c0_i32_1 : i32, i32, i32
  }
  func.func @transform_12(%arg0: i32) -> (i32, i32, i32) {
    %c0_i32 = arith.constant 0 : i32
    %c0_i32_0 = arith.constant 0 : i32
    %c0_i32_1 = arith.constant 0 : i32
    %c0_i32_2 = arith.constant 0 : i32
    return %c0_i32, %c0_i32_0, %c0_i32_1 : i32, i32, i32
  }
  func.func @transform_13(%arg0: i32) -> (i32, i32, i32) {
    %c0_i32 = arith.constant 0 : i32
    %c0_i32_0 = arith.constant 0 : i32
    %c0_i32_1 = arith.constant 0 : i32
    %c0_i32_2 = arith.constant 0 : i32
    return %c0_i32, %c0_i32_0, %c0_i32_1 : i32, i32, i32
  }
  func.func @transform_14(%arg0: i32) -> (i32, i32, i32) {
    %c0_i32 = arith.constant 0 : i32
    %c0_i32_0 = arith.constant 0 : i32
    %c0_i32_1 = arith.constant 0 : i32
    %c0_i32_2 = arith.constant 0 : i32
    return %c0_i32, %c0_i32_0, %c0_i32_1 : i32, i32, i32
  }
  func.func @transform_15(%arg0: i32) -> (i32, i32, i32) {
    %c0_i32 = arith.constant 0 : i32
    %c0_i32_0 = arith.constant 0 : i32
    %c0_i32_1 = arith.constant 0 : i32
    %c0_i32_2 = arith.constant 0 : i32
    return %c0_i32, %c0_i32_0, %c0_i32_1 : i32, i32, i32
  }
  func.func @transform_16(%arg0: i32) -> (i32, i32, i32) {
    %c0_i32 = arith.constant 0 : i32
    %c0_i32_0 = arith.constant 0 : i32
    %c0_i32_1 = arith.constant 0 : i32
    %c0_i32_2 = arith.constant 0 : i32
    return %c0_i32, %c0_i32_0, %c0_i32_1 : i32, i32, i32
  }
  func.func @transform_17(%arg0: i32) -> (i32, i32, i32) {
    %c0_i32 = arith.constant 0 : i32
    %c0_i32_0 = arith.constant 0 : i32
    %c0_i32_1 = arith.constant 0 : i32
    %c0_i32_2 = arith.constant 0 : i32
    return %c0_i32, %c0_i32_0, %c0_i32_1 : i32, i32, i32
  }
  func.func @transform_18(%arg0: i32) -> (i32, i32, i32) {
    %c0_i32 = arith.constant 0 : i32
    %c0_i32_0 = arith.constant 0 : i32
    %c0_i32_1 = arith.constant 0 : i32
    %c0_i32_2 = arith.constant 0 : i32
    return %c0_i32, %c0_i32_0, %c0_i32_1 : i32, i32, i32
  }
  func.func @transform_19(%arg0: i32) -> (i32, i32, i32) {
    %c0_i32 = arith.constant 0 : i32
    %c0_i32_0 = arith.constant 0 : i32
    %c0_i32_1 = arith.constant 0 : i32
    return %arg0, %c0_i32, %c0_i32_0 : i32, i32, i32
  }
}

module attributes {stable_mosaic.version = 11 : i64} {
  func.func @_variance_predictor_kernel(%arg0: i32, %arg1: memref<16x32xf32, #tpu.memory_space<vmem>>, %arg2: memref<16x1xf32, #tpu.memory_space<vmem>>, %arg3: memref<3x96x32xbf16, #tpu.memory_space<vmem>>, %arg4: memref<3x1x32xf32, #tpu.memory_space<vmem>>, %arg5: memref<3x1x32xf32, #tpu.memory_space<vmem>>, %arg6: memref<3x1x32xf32, #tpu.memory_space<vmem>>, %arg7: memref<3x96x32xbf16, #tpu.memory_space<vmem>>, %arg8: memref<3x1x32xf32, #tpu.memory_space<vmem>>, %arg9: memref<3x1x32xf32, #tpu.memory_space<vmem>>, %arg10: memref<3x1x32xf32, #tpu.memory_space<vmem>>, %arg11: memref<3x1x32xf32, #tpu.memory_space<vmem>>, %arg12: memref<3x1x1xf32, #tpu.memory_space<vmem>>, %arg13: memref<16x128xf32, #tpu.memory_space<vmem>>) attributes {dimension_semantics = [#tpu.dimension_semantics<arbitrary>], iteration_bounds = array<i64: 1>, scalar_prefetch = 0 : i64, scratch_operands = 0 : i64, tpu.core_type = #tpu.core_type<tc>, window_params = [{pipeline_mode = #tpu.pipeline_mode<synchronous>, transform_indices = @transform_0, window_bounds = array<i64: 16, 32>}, {pipeline_mode = #tpu.pipeline_mode<synchronous>, transform_indices = @transform_1, window_bounds = array<i64: 16, 1>}, {pipeline_mode = #tpu.pipeline_mode<synchronous>, transform_indices = @transform_2, window_bounds = array<i64: 3, 96, 32>}, {pipeline_mode = #tpu.pipeline_mode<synchronous>, transform_indices = @transform_3, window_bounds = array<i64: 3, 1, 32>}, {pipeline_mode = #tpu.pipeline_mode<synchronous>, transform_indices = @transform_4, window_bounds = array<i64: 3, 1, 32>}, {pipeline_mode = #tpu.pipeline_mode<synchronous>, transform_indices = @transform_5, window_bounds = array<i64: 3, 1, 32>}, {pipeline_mode = #tpu.pipeline_mode<synchronous>, transform_indices = @transform_6, window_bounds = array<i64: 3, 96, 32>}, {pipeline_mode = #tpu.pipeline_mode<synchronous>, transform_indices = @transform_7, window_bounds = array<i64: 3, 1, 32>}, {pipeline_mode = #tpu.pipeline_mode<synchronous>, transform_indices = @transform_8, window_bounds = array<i64: 3, 1, 32>}, {pipeline_mode = #tpu.pipeline_mode<synchronous>, transform_indices = @transform_9, window_bounds = array<i64: 3, 1, 32>}, {pipeline_mode = #tpu.pipeline_mode<synchronous>, transform_indices = @transform_10, window_bounds = array<i64: 3, 1, 32>}, {pipeline_mode = #tpu.pipeline_mode<synchronous>, transform_indices = @transform_11, window_bounds = array<i64: 3, 1, 1>}, {pipeline_mode = #tpu.pipeline_mode<synchronous>, transform_indices = @transform_12, window_bounds = array<i64: 16, 128>}]} {
    %c0 = arith.constant 0 : index
    %c0_0 = arith.constant 0 : index
    %0 = vector.load %arg1[%c0, %c0_0] : memref<16x32xf32, #tpu.memory_space<vmem>>, vector<16x32xf32>
    %c0_1 = arith.constant 0 : index
    %c0_2 = arith.constant 0 : index
    %1 = vector.load %arg2[%c0_1, %c0_2] : memref<16x1xf32, #tpu.memory_space<vmem>>, vector<16x1xf32>
    %2 = tpu.iota {dimensions = array<i32: 0>} : vector<16x1xi32>
    %c8_i32 = arith.constant 8 : i32
    %c0_i32 = arith.constant 0 : i32
    %3 = arith.cmpi eq, %c8_i32, %c0_i32 : i32
    %c1_i32 = arith.constant 1 : i32
    %4 = arith.select %3, %c1_i32, %c8_i32 : i32
    %5 = vector.broadcast %4 : i32 to vector<16x1xi32>
    %6 = arith.remsi %2, %5 : vector<16x1xi32>
    %c0_i32_3 = arith.constant 0 : i32
    %7 = vector.broadcast %c0_i32_3 : i32 to vector<16x1xi32>
    %8 = arith.cmpi ne, %6, %7 : vector<16x1xi32>
    %c0_i32_4 = arith.constant 0 : i32
    %9 = vector.broadcast %c0_i32_4 : i32 to vector<16x1xi32>
    %10 = arith.cmpi slt, %6, %9 : vector<16x1xi32>
    %c0_i32_5 = arith.constant 0 : i32
    %11 = arith.cmpi slt, %4, %c0_i32_5 : i32
    %12 = vector.broadcast %11 : i1 to vector<16x1xi1>
    %13 = vector.broadcast %12 : vector<16x1xi1> to vector<16x1xi1>
    %14 = arith.xori %10, %13 : vector<16x1xi1>
    %15 = arith.andi %14, %8 : vector<16x1xi1>
    %16 = vector.broadcast %4 : i32 to vector<16x1xi32>
    %17 = arith.addi %6, %16 : vector<16x1xi32>
    %18 = arith.select %15, %17, %6 : vector<16x1xi1>, vector<16x1xi32>
    %c1_i32_6 = arith.constant 1 : i32
    %19 = tpu.dynamic_rotate %0 by %c1_i32_6 dim 0 : vector<16x32xf32>, i32 -> vector<16x32xf32>
    %c-1_i32 = arith.constant -1 : i32
    %20 = vector.broadcast %c-1_i32 : i32 to vector<16x1xi32>
    %21 = arith.addi %18, %20 : vector<16x1xi32>
    %c0_i32_7 = arith.constant 0 : i32
    %22 = vector.broadcast %c0_i32_7 : i32 to vector<16x1xi32>
    %23 = arith.cmpi sge, %21, %22 : vector<16x1xi32>
    %c-1_i32_8 = arith.constant -1 : i32
    %24 = vector.broadcast %c-1_i32_8 : i32 to vector<16x1xi32>
    %25 = arith.addi %18, %24 : vector<16x1xi32>
    %c8_i32_9 = arith.constant 8 : i32
    %26 = vector.broadcast %c8_i32_9 : i32 to vector<16x1xi32>
    %27 = arith.cmpi slt, %25, %26 : vector<16x1xi32>
    %28 = arith.andi %23, %27 : vector<16x1xi1>
    %cst = arith.constant 0.000000e+00 : f32
    %29 = vector.shape_cast %28 : vector<16x1xi1> to vector<16x1xi1>
    %30 = vector.broadcast %29 : vector<16x1xi1> to vector<16x32xi1>
    %31 = vector.broadcast %cst : f32 to vector<16x32xf32>
    %32 = arith.select %30, %19, %31 : vector<16x32xi1>, vector<16x32xf32>
    %c0_i32_10 = arith.constant 0 : i32
    %33 = vector.broadcast %c0_i32_10 : i32 to vector<16x1xi32>
    %34 = arith.addi %18, %33 : vector<16x1xi32>
    %c0_i32_11 = arith.constant 0 : i32
    %35 = vector.broadcast %c0_i32_11 : i32 to vector<16x1xi32>
    %36 = arith.cmpi sge, %34, %35 : vector<16x1xi32>
    %c0_i32_12 = arith.constant 0 : i32
    %37 = vector.broadcast %c0_i32_12 : i32 to vector<16x1xi32>
    %38 = arith.addi %18, %37 : vector<16x1xi32>
    %c8_i32_13 = arith.constant 8 : i32
    %39 = vector.broadcast %c8_i32_13 : i32 to vector<16x1xi32>
    %40 = arith.cmpi slt, %38, %39 : vector<16x1xi32>
    %41 = arith.andi %36, %40 : vector<16x1xi1>
    %cst_14 = arith.constant 0.000000e+00 : f32
    %42 = vector.shape_cast %41 : vector<16x1xi1> to vector<16x1xi1>
    %43 = vector.broadcast %42 : vector<16x1xi1> to vector<16x32xi1>
    %44 = vector.broadcast %cst_14 : f32 to vector<16x32xf32>
    %45 = arith.select %43, %0, %44 : vector<16x32xi1>, vector<16x32xf32>
    %c15_i32 = arith.constant 15 : i32
    %46 = tpu.dynamic_rotate %0 by %c15_i32 dim 0 : vector<16x32xf32>, i32 -> vector<16x32xf32>
    %c1_i32_15 = arith.constant 1 : i32
    %47 = vector.broadcast %c1_i32_15 : i32 to vector<16x1xi32>
    %48 = arith.addi %18, %47 : vector<16x1xi32>
    %c0_i32_16 = arith.constant 0 : i32
    %49 = vector.broadcast %c0_i32_16 : i32 to vector<16x1xi32>
    %50 = arith.cmpi sge, %48, %49 : vector<16x1xi32>
    %c1_i32_17 = arith.constant 1 : i32
    %51 = vector.broadcast %c1_i32_17 : i32 to vector<16x1xi32>
    %52 = arith.addi %18, %51 : vector<16x1xi32>
    %c8_i32_18 = arith.constant 8 : i32
    %53 = vector.broadcast %c8_i32_18 : i32 to vector<16x1xi32>
    %54 = arith.cmpi slt, %52, %53 : vector<16x1xi32>
    %55 = arith.andi %50, %54 : vector<16x1xi1>
    %cst_19 = arith.constant 0.000000e+00 : f32
    %56 = vector.shape_cast %55 : vector<16x1xi1> to vector<16x1xi1>
    %57 = vector.broadcast %56 : vector<16x1xi1> to vector<16x32xi1>
    %58 = vector.broadcast %cst_19 : f32 to vector<16x32xf32>
    %59 = arith.select %57, %46, %58 : vector<16x32xi1>, vector<16x32xf32>
    %60 = tpu.concatenate %32, %45, %59 in 1 : vector<16x32xf32>, vector<16x32xf32>, vector<16x32xf32> -> vector<16x96xf32>
    %61 = arith.truncf %60 : vector<16x96xf32> to vector<16x96xbf16>
    %c0_20 = arith.constant 0 : index
    %c0_21 = arith.constant 0 : index
    %c0_22 = arith.constant 0 : index
    %62 = vector.load %arg3[%c0_20, %c0_21, %c0_22] : memref<3x96x32xbf16, #tpu.memory_space<vmem>>, vector<1x96x32xbf16>
    %63 = vector.shape_cast %62 : vector<1x96x32xbf16> to vector<96x32xbf16>
    %cst_23 = arith.constant dense<0.000000e+00> : vector<16x32xf32>
    %64 = tpu.matmul %61, %63, %cst_23 {dimension_numbers = #tpu.dot_dimension_numbers<[1], [0], [0], [1], [0, 0, 1, 1], [], []>} : vector<16x96xbf16>, vector<96x32xbf16>, vector<16x32xf32> -> vector<16x32xf32>
    %c0_24 = arith.constant 0 : index
    %c0_25 = arith.constant 0 : index
    %c0_26 = arith.constant 0 : index
    %65 = vector.load %arg4[%c0_24, %c0_25, %c0_26] : memref<3x1x32xf32, #tpu.memory_space<vmem>>, vector<1x1x32xf32>
    %66 = vector.shape_cast %65 : vector<1x1x32xf32> to vector<1x32xf32>
    %67 = vector.broadcast %66 : vector<1x32xf32> to vector<16x32xf32>
    %68 = arith.addf %64, %67 : vector<16x32xf32>
    %cst_27 = arith.constant 0.000000e+00 : f32
    %69 = vector.broadcast %cst_27 : f32 to vector<16x32xf32>
    %70 = arith.maximumf %68, %69 : vector<16x32xf32>
    %c0_28 = arith.constant 0 : index
    %c0_29 = arith.constant 0 : index
    %c0_30 = arith.constant 0 : index
    %71 = vector.load %arg5[%c0_28, %c0_29, %c0_30] : memref<3x1x32xf32, #tpu.memory_space<vmem>>, vector<1x1x32xf32>
    %72 = vector.shape_cast %71 : vector<1x1x32xf32> to vector<1x32xf32>
    %c0_31 = arith.constant 0 : index
    %c0_32 = arith.constant 0 : index
    %c0_33 = arith.constant 0 : index
    %73 = vector.load %arg6[%c0_31, %c0_32, %c0_33] : memref<3x1x32xf32, #tpu.memory_space<vmem>>, vector<1x1x32xf32>
    %74 = vector.shape_cast %73 : vector<1x1x32xf32> to vector<1x32xf32>
    %cst_34 = arith.constant dense<0.000000e+00> : vector<16xf32>
    %75 = vector.multi_reduction <add>, %70, %cst_34 [1] : vector<16x32xf32> to vector<16xf32>
    %76 = vector.shape_cast %75 : vector<16xf32> to vector<16x1xf32>
    %cst_35 = arith.constant 3.200000e+01 : f32
    %77 = vector.broadcast %cst_35 : f32 to vector<16x1xf32>
    %78 = arith.divf %76, %77 : vector<16x1xf32>
    %79 = vector.broadcast %78 : vector<16x1xf32> to vector<16x32xf32>
    %80 = arith.subf %70, %79 : vector<16x32xf32>
    %81 = arith.mulf %80, %80 : vector<16x32xf32>
    %cst_36 = arith.constant dense<0.000000e+00> : vector<16xf32>
    %82 = vector.multi_reduction <add>, %81, %cst_36 [1] : vector<16x32xf32> to vector<16xf32>
    %83 = vector.shape_cast %82 : vector<16xf32> to vector<16x1xf32>
    %cst_37 = arith.constant 3.200000e+01 : f32
    %84 = vector.broadcast %cst_37 : f32 to vector<16x1xf32>
    %85 = arith.divf %83, %84 : vector<16x1xf32>
    %86 = vector.broadcast %78 : vector<16x1xf32> to vector<16x32xf32>
    %87 = arith.subf %70, %86 : vector<16x32xf32>
    %cst_38 = arith.constant 9.99999974E-6 : f32
    %88 = vector.broadcast %cst_38 : f32 to vector<16x1xf32>
    %89 = arith.addf %85, %88 : vector<16x1xf32>
    %90 = math.rsqrt %89 : vector<16x1xf32>
    %91 = vector.broadcast %90 : vector<16x1xf32> to vector<16x32xf32>
    %92 = arith.mulf %87, %91 : vector<16x32xf32>
    %93 = vector.broadcast %72 : vector<1x32xf32> to vector<16x32xf32>
    %94 = arith.mulf %92, %93 : vector<16x32xf32>
    %95 = vector.broadcast %74 : vector<1x32xf32> to vector<16x32xf32>
    %96 = arith.addf %94, %95 : vector<16x32xf32>
    %97 = tpu.iota {dimensions = array<i32: 0>} : vector<16x1xi32>
    %c8_i32_39 = arith.constant 8 : i32
    %c0_i32_40 = arith.constant 0 : i32
    %98 = arith.cmpi eq, %c8_i32_39, %c0_i32_40 : i32
    %c1_i32_41 = arith.constant 1 : i32
    %99 = arith.select %98, %c1_i32_41, %c8_i32_39 : i32
    %100 = vector.broadcast %99 : i32 to vector<16x1xi32>
    %101 = arith.remsi %97, %100 : vector<16x1xi32>
    %c0_i32_42 = arith.constant 0 : i32
    %102 = vector.broadcast %c0_i32_42 : i32 to vector<16x1xi32>
    %103 = arith.cmpi ne, %101, %102 : vector<16x1xi32>
    %c0_i32_43 = arith.constant 0 : i32
    %104 = vector.broadcast %c0_i32_43 : i32 to vector<16x1xi32>
    %105 = arith.cmpi slt, %101, %104 : vector<16x1xi32>
    %c0_i32_44 = arith.constant 0 : i32
    %106 = arith.cmpi slt, %99, %c0_i32_44 : i32
    %107 = vector.broadcast %106 : i1 to vector<16x1xi1>
    %108 = vector.broadcast %107 : vector<16x1xi1> to vector<16x1xi1>
    %109 = arith.xori %105, %108 : vector<16x1xi1>
    %110 = arith.andi %109, %103 : vector<16x1xi1>
    %111 = vector.broadcast %99 : i32 to vector<16x1xi32>
    %112 = arith.addi %101, %111 : vector<16x1xi32>
    %113 = arith.select %110, %112, %101 : vector<16x1xi1>, vector<16x1xi32>
    %c1_i32_45 = arith.constant 1 : i32
    %114 = tpu.dynamic_rotate %96 by %c1_i32_45 dim 0 : vector<16x32xf32>, i32 -> vector<16x32xf32>
    %c-1_i32_46 = arith.constant -1 : i32
    %115 = vector.broadcast %c-1_i32_46 : i32 to vector<16x1xi32>
    %116 = arith.addi %113, %115 : vector<16x1xi32>
    %c0_i32_47 = arith.constant 0 : i32
    %117 = vector.broadcast %c0_i32_47 : i32 to vector<16x1xi32>
    %118 = arith.cmpi sge, %116, %117 : vector<16x1xi32>
    %c-1_i32_48 = arith.constant -1 : i32
    %119 = vector.broadcast %c-1_i32_48 : i32 to vector<16x1xi32>
    %120 = arith.addi %113, %119 : vector<16x1xi32>
    %c8_i32_49 = arith.constant 8 : i32
    %121 = vector.broadcast %c8_i32_49 : i32 to vector<16x1xi32>
    %122 = arith.cmpi slt, %120, %121 : vector<16x1xi32>
    %123 = arith.andi %118, %122 : vector<16x1xi1>
    %cst_50 = arith.constant 0.000000e+00 : f32
    %124 = vector.shape_cast %123 : vector<16x1xi1> to vector<16x1xi1>
    %125 = vector.broadcast %124 : vector<16x1xi1> to vector<16x32xi1>
    %126 = vector.broadcast %cst_50 : f32 to vector<16x32xf32>
    %127 = arith.select %125, %114, %126 : vector<16x32xi1>, vector<16x32xf32>
    %c0_i32_51 = arith.constant 0 : i32
    %128 = vector.broadcast %c0_i32_51 : i32 to vector<16x1xi32>
    %129 = arith.addi %113, %128 : vector<16x1xi32>
    %c0_i32_52 = arith.constant 0 : i32
    %130 = vector.broadcast %c0_i32_52 : i32 to vector<16x1xi32>
    %131 = arith.cmpi sge, %129, %130 : vector<16x1xi32>
    %c0_i32_53 = arith.constant 0 : i32
    %132 = vector.broadcast %c0_i32_53 : i32 to vector<16x1xi32>
    %133 = arith.addi %113, %132 : vector<16x1xi32>
    %c8_i32_54 = arith.constant 8 : i32
    %134 = vector.broadcast %c8_i32_54 : i32 to vector<16x1xi32>
    %135 = arith.cmpi slt, %133, %134 : vector<16x1xi32>
    %136 = arith.andi %131, %135 : vector<16x1xi1>
    %cst_55 = arith.constant 0.000000e+00 : f32
    %137 = vector.shape_cast %136 : vector<16x1xi1> to vector<16x1xi1>
    %138 = vector.broadcast %137 : vector<16x1xi1> to vector<16x32xi1>
    %139 = vector.broadcast %cst_55 : f32 to vector<16x32xf32>
    %140 = arith.select %138, %96, %139 : vector<16x32xi1>, vector<16x32xf32>
    %c15_i32_56 = arith.constant 15 : i32
    %141 = tpu.dynamic_rotate %96 by %c15_i32_56 dim 0 : vector<16x32xf32>, i32 -> vector<16x32xf32>
    %c1_i32_57 = arith.constant 1 : i32
    %142 = vector.broadcast %c1_i32_57 : i32 to vector<16x1xi32>
    %143 = arith.addi %113, %142 : vector<16x1xi32>
    %c0_i32_58 = arith.constant 0 : i32
    %144 = vector.broadcast %c0_i32_58 : i32 to vector<16x1xi32>
    %145 = arith.cmpi sge, %143, %144 : vector<16x1xi32>
    %c1_i32_59 = arith.constant 1 : i32
    %146 = vector.broadcast %c1_i32_59 : i32 to vector<16x1xi32>
    %147 = arith.addi %113, %146 : vector<16x1xi32>
    %c8_i32_60 = arith.constant 8 : i32
    %148 = vector.broadcast %c8_i32_60 : i32 to vector<16x1xi32>
    %149 = arith.cmpi slt, %147, %148 : vector<16x1xi32>
    %150 = arith.andi %145, %149 : vector<16x1xi1>
    %cst_61 = arith.constant 0.000000e+00 : f32
    %151 = vector.shape_cast %150 : vector<16x1xi1> to vector<16x1xi1>
    %152 = vector.broadcast %151 : vector<16x1xi1> to vector<16x32xi1>
    %153 = vector.broadcast %cst_61 : f32 to vector<16x32xf32>
    %154 = arith.select %152, %141, %153 : vector<16x32xi1>, vector<16x32xf32>
    %155 = tpu.concatenate %127, %140, %154 in 1 : vector<16x32xf32>, vector<16x32xf32>, vector<16x32xf32> -> vector<16x96xf32>
    %156 = arith.truncf %155 : vector<16x96xf32> to vector<16x96xbf16>
    %c0_62 = arith.constant 0 : index
    %c0_63 = arith.constant 0 : index
    %c0_64 = arith.constant 0 : index
    %157 = vector.load %arg7[%c0_62, %c0_63, %c0_64] : memref<3x96x32xbf16, #tpu.memory_space<vmem>>, vector<1x96x32xbf16>
    %158 = vector.shape_cast %157 : vector<1x96x32xbf16> to vector<96x32xbf16>
    %cst_65 = arith.constant dense<0.000000e+00> : vector<16x32xf32>
    %159 = tpu.matmul %156, %158, %cst_65 {dimension_numbers = #tpu.dot_dimension_numbers<[1], [0], [0], [1], [0, 0, 1, 1], [], []>} : vector<16x96xbf16>, vector<96x32xbf16>, vector<16x32xf32> -> vector<16x32xf32>
    %c0_66 = arith.constant 0 : index
    %c0_67 = arith.constant 0 : index
    %c0_68 = arith.constant 0 : index
    %160 = vector.load %arg8[%c0_66, %c0_67, %c0_68] : memref<3x1x32xf32, #tpu.memory_space<vmem>>, vector<1x1x32xf32>
    %161 = vector.shape_cast %160 : vector<1x1x32xf32> to vector<1x32xf32>
    %162 = vector.broadcast %161 : vector<1x32xf32> to vector<16x32xf32>
    %163 = arith.addf %159, %162 : vector<16x32xf32>
    %cst_69 = arith.constant 0.000000e+00 : f32
    %164 = vector.broadcast %cst_69 : f32 to vector<16x32xf32>
    %165 = arith.maximumf %163, %164 : vector<16x32xf32>
    %c0_70 = arith.constant 0 : index
    %c0_71 = arith.constant 0 : index
    %c0_72 = arith.constant 0 : index
    %166 = vector.load %arg9[%c0_70, %c0_71, %c0_72] : memref<3x1x32xf32, #tpu.memory_space<vmem>>, vector<1x1x32xf32>
    %167 = vector.shape_cast %166 : vector<1x1x32xf32> to vector<1x32xf32>
    %c0_73 = arith.constant 0 : index
    %c0_74 = arith.constant 0 : index
    %c0_75 = arith.constant 0 : index
    %168 = vector.load %arg10[%c0_73, %c0_74, %c0_75] : memref<3x1x32xf32, #tpu.memory_space<vmem>>, vector<1x1x32xf32>
    %169 = vector.shape_cast %168 : vector<1x1x32xf32> to vector<1x32xf32>
    %cst_76 = arith.constant dense<0.000000e+00> : vector<16xf32>
    %170 = vector.multi_reduction <add>, %165, %cst_76 [1] : vector<16x32xf32> to vector<16xf32>
    %171 = vector.shape_cast %170 : vector<16xf32> to vector<16x1xf32>
    %cst_77 = arith.constant 3.200000e+01 : f32
    %172 = vector.broadcast %cst_77 : f32 to vector<16x1xf32>
    %173 = arith.divf %171, %172 : vector<16x1xf32>
    %174 = vector.broadcast %173 : vector<16x1xf32> to vector<16x32xf32>
    %175 = arith.subf %165, %174 : vector<16x32xf32>
    %176 = arith.mulf %175, %175 : vector<16x32xf32>
    %cst_78 = arith.constant dense<0.000000e+00> : vector<16xf32>
    %177 = vector.multi_reduction <add>, %176, %cst_78 [1] : vector<16x32xf32> to vector<16xf32>
    %178 = vector.shape_cast %177 : vector<16xf32> to vector<16x1xf32>
    %cst_79 = arith.constant 3.200000e+01 : f32
    %179 = vector.broadcast %cst_79 : f32 to vector<16x1xf32>
    %180 = arith.divf %178, %179 : vector<16x1xf32>
    %181 = vector.broadcast %173 : vector<16x1xf32> to vector<16x32xf32>
    %182 = arith.subf %165, %181 : vector<16x32xf32>
    %cst_80 = arith.constant 9.99999974E-6 : f32
    %183 = vector.broadcast %cst_80 : f32 to vector<16x1xf32>
    %184 = arith.addf %180, %183 : vector<16x1xf32>
    %185 = math.rsqrt %184 : vector<16x1xf32>
    %186 = vector.broadcast %185 : vector<16x1xf32> to vector<16x32xf32>
    %187 = arith.mulf %182, %186 : vector<16x32xf32>
    %188 = vector.broadcast %167 : vector<1x32xf32> to vector<16x32xf32>
    %189 = arith.mulf %187, %188 : vector<16x32xf32>
    %190 = vector.broadcast %169 : vector<1x32xf32> to vector<16x32xf32>
    %191 = arith.addf %189, %190 : vector<16x32xf32>
    %c0_81 = arith.constant 0 : index
    %c0_82 = arith.constant 0 : index
    %c0_83 = arith.constant 0 : index
    %192 = vector.load %arg11[%c0_81, %c0_82, %c0_83] : memref<3x1x32xf32, #tpu.memory_space<vmem>>, vector<1x1x32xf32>
    %193 = vector.shape_cast %192 : vector<1x1x32xf32> to vector<1x32xf32>
    %194 = vector.broadcast %193 : vector<1x32xf32> to vector<16x32xf32>
    %195 = arith.mulf %191, %194 : vector<16x32xf32>
    %cst_84 = arith.constant dense<0.000000e+00> : vector<16xf32>
    %196 = vector.multi_reduction <add>, %195, %cst_84 [1] : vector<16x32xf32> to vector<16xf32>
    %197 = vector.shape_cast %196 : vector<16xf32> to vector<16x1xf32>
    %c0_85 = arith.constant 0 : index
    %c0_86 = arith.constant 0 : index
    %c0_87 = arith.constant 0 : index
    %198 = vector.load %arg12[%c0_85, %c0_86, %c0_87] : memref<3x1x1xf32, #tpu.memory_space<vmem>>, vector<1x1x1xf32>
    %199 = vector.shape_cast %198 : vector<1x1x1xf32> to vector<1x1xf32>
    %200 = vector.broadcast %199 : vector<1x1xf32> to vector<16x1xf32>
    %201 = arith.addf %197, %200 : vector<16x1xf32>
    %202 = arith.mulf %201, %1 : vector<16x1xf32>
    %c1 = arith.constant 1 : index
    %c0_88 = arith.constant 0 : index
    %c0_89 = arith.constant 0 : index
    %203 = vector.load %arg3[%c1, %c0_88, %c0_89] : memref<3x96x32xbf16, #tpu.memory_space<vmem>>, vector<1x96x32xbf16>
    %204 = vector.shape_cast %203 : vector<1x96x32xbf16> to vector<96x32xbf16>
    %cst_90 = arith.constant dense<0.000000e+00> : vector<16x32xf32>
    %205 = tpu.matmul %61, %204, %cst_90 {dimension_numbers = #tpu.dot_dimension_numbers<[1], [0], [0], [1], [0, 0, 1, 1], [], []>} : vector<16x96xbf16>, vector<96x32xbf16>, vector<16x32xf32> -> vector<16x32xf32>
    %c1_91 = arith.constant 1 : index
    %c0_92 = arith.constant 0 : index
    %c0_93 = arith.constant 0 : index
    %206 = vector.load %arg4[%c1_91, %c0_92, %c0_93] : memref<3x1x32xf32, #tpu.memory_space<vmem>>, vector<1x1x32xf32>
    %207 = vector.shape_cast %206 : vector<1x1x32xf32> to vector<1x32xf32>
    %208 = vector.broadcast %207 : vector<1x32xf32> to vector<16x32xf32>
    %209 = arith.addf %205, %208 : vector<16x32xf32>
    %cst_94 = arith.constant 0.000000e+00 : f32
    %210 = vector.broadcast %cst_94 : f32 to vector<16x32xf32>
    %211 = arith.maximumf %209, %210 : vector<16x32xf32>
    %c1_95 = arith.constant 1 : index
    %c0_96 = arith.constant 0 : index
    %c0_97 = arith.constant 0 : index
    %212 = vector.load %arg5[%c1_95, %c0_96, %c0_97] : memref<3x1x32xf32, #tpu.memory_space<vmem>>, vector<1x1x32xf32>
    %213 = vector.shape_cast %212 : vector<1x1x32xf32> to vector<1x32xf32>
    %c1_98 = arith.constant 1 : index
    %c0_99 = arith.constant 0 : index
    %c0_100 = arith.constant 0 : index
    %214 = vector.load %arg6[%c1_98, %c0_99, %c0_100] : memref<3x1x32xf32, #tpu.memory_space<vmem>>, vector<1x1x32xf32>
    %215 = vector.shape_cast %214 : vector<1x1x32xf32> to vector<1x32xf32>
    %cst_101 = arith.constant dense<0.000000e+00> : vector<16xf32>
    %216 = vector.multi_reduction <add>, %211, %cst_101 [1] : vector<16x32xf32> to vector<16xf32>
    %217 = vector.shape_cast %216 : vector<16xf32> to vector<16x1xf32>
    %cst_102 = arith.constant 3.200000e+01 : f32
    %218 = vector.broadcast %cst_102 : f32 to vector<16x1xf32>
    %219 = arith.divf %217, %218 : vector<16x1xf32>
    %220 = vector.broadcast %219 : vector<16x1xf32> to vector<16x32xf32>
    %221 = arith.subf %211, %220 : vector<16x32xf32>
    %222 = arith.mulf %221, %221 : vector<16x32xf32>
    %cst_103 = arith.constant dense<0.000000e+00> : vector<16xf32>
    %223 = vector.multi_reduction <add>, %222, %cst_103 [1] : vector<16x32xf32> to vector<16xf32>
    %224 = vector.shape_cast %223 : vector<16xf32> to vector<16x1xf32>
    %cst_104 = arith.constant 3.200000e+01 : f32
    %225 = vector.broadcast %cst_104 : f32 to vector<16x1xf32>
    %226 = arith.divf %224, %225 : vector<16x1xf32>
    %227 = vector.broadcast %219 : vector<16x1xf32> to vector<16x32xf32>
    %228 = arith.subf %211, %227 : vector<16x32xf32>
    %cst_105 = arith.constant 9.99999974E-6 : f32
    %229 = vector.broadcast %cst_105 : f32 to vector<16x1xf32>
    %230 = arith.addf %226, %229 : vector<16x1xf32>
    %231 = math.rsqrt %230 : vector<16x1xf32>
    %232 = vector.broadcast %231 : vector<16x1xf32> to vector<16x32xf32>
    %233 = arith.mulf %228, %232 : vector<16x32xf32>
    %234 = vector.broadcast %213 : vector<1x32xf32> to vector<16x32xf32>
    %235 = arith.mulf %233, %234 : vector<16x32xf32>
    %236 = vector.broadcast %215 : vector<1x32xf32> to vector<16x32xf32>
    %237 = arith.addf %235, %236 : vector<16x32xf32>
    %238 = tpu.iota {dimensions = array<i32: 0>} : vector<16x1xi32>
    %c8_i32_106 = arith.constant 8 : i32
    %c0_i32_107 = arith.constant 0 : i32
    %239 = arith.cmpi eq, %c8_i32_106, %c0_i32_107 : i32
    %c1_i32_108 = arith.constant 1 : i32
    %240 = arith.select %239, %c1_i32_108, %c8_i32_106 : i32
    %241 = vector.broadcast %240 : i32 to vector<16x1xi32>
    %242 = arith.remsi %238, %241 : vector<16x1xi32>
    %c0_i32_109 = arith.constant 0 : i32
    %243 = vector.broadcast %c0_i32_109 : i32 to vector<16x1xi32>
    %244 = arith.cmpi ne, %242, %243 : vector<16x1xi32>
    %c0_i32_110 = arith.constant 0 : i32
    %245 = vector.broadcast %c0_i32_110 : i32 to vector<16x1xi32>
    %246 = arith.cmpi slt, %242, %245 : vector<16x1xi32>
    %c0_i32_111 = arith.constant 0 : i32
    %247 = arith.cmpi slt, %240, %c0_i32_111 : i32
    %248 = vector.broadcast %247 : i1 to vector<16x1xi1>
    %249 = vector.broadcast %248 : vector<16x1xi1> to vector<16x1xi1>
    %250 = arith.xori %246, %249 : vector<16x1xi1>
    %251 = arith.andi %250, %244 : vector<16x1xi1>
    %252 = vector.broadcast %240 : i32 to vector<16x1xi32>
    %253 = arith.addi %242, %252 : vector<16x1xi32>
    %254 = arith.select %251, %253, %242 : vector<16x1xi1>, vector<16x1xi32>
    %c1_i32_112 = arith.constant 1 : i32
    %255 = tpu.dynamic_rotate %237 by %c1_i32_112 dim 0 : vector<16x32xf32>, i32 -> vector<16x32xf32>
    %c-1_i32_113 = arith.constant -1 : i32
    %256 = vector.broadcast %c-1_i32_113 : i32 to vector<16x1xi32>
    %257 = arith.addi %254, %256 : vector<16x1xi32>
    %c0_i32_114 = arith.constant 0 : i32
    %258 = vector.broadcast %c0_i32_114 : i32 to vector<16x1xi32>
    %259 = arith.cmpi sge, %257, %258 : vector<16x1xi32>
    %c-1_i32_115 = arith.constant -1 : i32
    %260 = vector.broadcast %c-1_i32_115 : i32 to vector<16x1xi32>
    %261 = arith.addi %254, %260 : vector<16x1xi32>
    %c8_i32_116 = arith.constant 8 : i32
    %262 = vector.broadcast %c8_i32_116 : i32 to vector<16x1xi32>
    %263 = arith.cmpi slt, %261, %262 : vector<16x1xi32>
    %264 = arith.andi %259, %263 : vector<16x1xi1>
    %cst_117 = arith.constant 0.000000e+00 : f32
    %265 = vector.shape_cast %264 : vector<16x1xi1> to vector<16x1xi1>
    %266 = vector.broadcast %265 : vector<16x1xi1> to vector<16x32xi1>
    %267 = vector.broadcast %cst_117 : f32 to vector<16x32xf32>
    %268 = arith.select %266, %255, %267 : vector<16x32xi1>, vector<16x32xf32>
    %c0_i32_118 = arith.constant 0 : i32
    %269 = vector.broadcast %c0_i32_118 : i32 to vector<16x1xi32>
    %270 = arith.addi %254, %269 : vector<16x1xi32>
    %c0_i32_119 = arith.constant 0 : i32
    %271 = vector.broadcast %c0_i32_119 : i32 to vector<16x1xi32>
    %272 = arith.cmpi sge, %270, %271 : vector<16x1xi32>
    %c0_i32_120 = arith.constant 0 : i32
    %273 = vector.broadcast %c0_i32_120 : i32 to vector<16x1xi32>
    %274 = arith.addi %254, %273 : vector<16x1xi32>
    %c8_i32_121 = arith.constant 8 : i32
    %275 = vector.broadcast %c8_i32_121 : i32 to vector<16x1xi32>
    %276 = arith.cmpi slt, %274, %275 : vector<16x1xi32>
    %277 = arith.andi %272, %276 : vector<16x1xi1>
    %cst_122 = arith.constant 0.000000e+00 : f32
    %278 = vector.shape_cast %277 : vector<16x1xi1> to vector<16x1xi1>
    %279 = vector.broadcast %278 : vector<16x1xi1> to vector<16x32xi1>
    %280 = vector.broadcast %cst_122 : f32 to vector<16x32xf32>
    %281 = arith.select %279, %237, %280 : vector<16x32xi1>, vector<16x32xf32>
    %c15_i32_123 = arith.constant 15 : i32
    %282 = tpu.dynamic_rotate %237 by %c15_i32_123 dim 0 : vector<16x32xf32>, i32 -> vector<16x32xf32>
    %c1_i32_124 = arith.constant 1 : i32
    %283 = vector.broadcast %c1_i32_124 : i32 to vector<16x1xi32>
    %284 = arith.addi %254, %283 : vector<16x1xi32>
    %c0_i32_125 = arith.constant 0 : i32
    %285 = vector.broadcast %c0_i32_125 : i32 to vector<16x1xi32>
    %286 = arith.cmpi sge, %284, %285 : vector<16x1xi32>
    %c1_i32_126 = arith.constant 1 : i32
    %287 = vector.broadcast %c1_i32_126 : i32 to vector<16x1xi32>
    %288 = arith.addi %254, %287 : vector<16x1xi32>
    %c8_i32_127 = arith.constant 8 : i32
    %289 = vector.broadcast %c8_i32_127 : i32 to vector<16x1xi32>
    %290 = arith.cmpi slt, %288, %289 : vector<16x1xi32>
    %291 = arith.andi %286, %290 : vector<16x1xi1>
    %cst_128 = arith.constant 0.000000e+00 : f32
    %292 = vector.shape_cast %291 : vector<16x1xi1> to vector<16x1xi1>
    %293 = vector.broadcast %292 : vector<16x1xi1> to vector<16x32xi1>
    %294 = vector.broadcast %cst_128 : f32 to vector<16x32xf32>
    %295 = arith.select %293, %282, %294 : vector<16x32xi1>, vector<16x32xf32>
    %296 = tpu.concatenate %268, %281, %295 in 1 : vector<16x32xf32>, vector<16x32xf32>, vector<16x32xf32> -> vector<16x96xf32>
    %297 = arith.truncf %296 : vector<16x96xf32> to vector<16x96xbf16>
    %c1_129 = arith.constant 1 : index
    %c0_130 = arith.constant 0 : index
    %c0_131 = arith.constant 0 : index
    %298 = vector.load %arg7[%c1_129, %c0_130, %c0_131] : memref<3x96x32xbf16, #tpu.memory_space<vmem>>, vector<1x96x32xbf16>
    %299 = vector.shape_cast %298 : vector<1x96x32xbf16> to vector<96x32xbf16>
    %cst_132 = arith.constant dense<0.000000e+00> : vector<16x32xf32>
    %300 = tpu.matmul %297, %299, %cst_132 {dimension_numbers = #tpu.dot_dimension_numbers<[1], [0], [0], [1], [0, 0, 1, 1], [], []>} : vector<16x96xbf16>, vector<96x32xbf16>, vector<16x32xf32> -> vector<16x32xf32>
    %c1_133 = arith.constant 1 : index
    %c0_134 = arith.constant 0 : index
    %c0_135 = arith.constant 0 : index
    %301 = vector.load %arg8[%c1_133, %c0_134, %c0_135] : memref<3x1x32xf32, #tpu.memory_space<vmem>>, vector<1x1x32xf32>
    %302 = vector.shape_cast %301 : vector<1x1x32xf32> to vector<1x32xf32>
    %303 = vector.broadcast %302 : vector<1x32xf32> to vector<16x32xf32>
    %304 = arith.addf %300, %303 : vector<16x32xf32>
    %cst_136 = arith.constant 0.000000e+00 : f32
    %305 = vector.broadcast %cst_136 : f32 to vector<16x32xf32>
    %306 = arith.maximumf %304, %305 : vector<16x32xf32>
    %c1_137 = arith.constant 1 : index
    %c0_138 = arith.constant 0 : index
    %c0_139 = arith.constant 0 : index
    %307 = vector.load %arg9[%c1_137, %c0_138, %c0_139] : memref<3x1x32xf32, #tpu.memory_space<vmem>>, vector<1x1x32xf32>
    %308 = vector.shape_cast %307 : vector<1x1x32xf32> to vector<1x32xf32>
    %c1_140 = arith.constant 1 : index
    %c0_141 = arith.constant 0 : index
    %c0_142 = arith.constant 0 : index
    %309 = vector.load %arg10[%c1_140, %c0_141, %c0_142] : memref<3x1x32xf32, #tpu.memory_space<vmem>>, vector<1x1x32xf32>
    %310 = vector.shape_cast %309 : vector<1x1x32xf32> to vector<1x32xf32>
    %cst_143 = arith.constant dense<0.000000e+00> : vector<16xf32>
    %311 = vector.multi_reduction <add>, %306, %cst_143 [1] : vector<16x32xf32> to vector<16xf32>
    %312 = vector.shape_cast %311 : vector<16xf32> to vector<16x1xf32>
    %cst_144 = arith.constant 3.200000e+01 : f32
    %313 = vector.broadcast %cst_144 : f32 to vector<16x1xf32>
    %314 = arith.divf %312, %313 : vector<16x1xf32>
    %315 = vector.broadcast %314 : vector<16x1xf32> to vector<16x32xf32>
    %316 = arith.subf %306, %315 : vector<16x32xf32>
    %317 = arith.mulf %316, %316 : vector<16x32xf32>
    %cst_145 = arith.constant dense<0.000000e+00> : vector<16xf32>
    %318 = vector.multi_reduction <add>, %317, %cst_145 [1] : vector<16x32xf32> to vector<16xf32>
    %319 = vector.shape_cast %318 : vector<16xf32> to vector<16x1xf32>
    %cst_146 = arith.constant 3.200000e+01 : f32
    %320 = vector.broadcast %cst_146 : f32 to vector<16x1xf32>
    %321 = arith.divf %319, %320 : vector<16x1xf32>
    %322 = vector.broadcast %314 : vector<16x1xf32> to vector<16x32xf32>
    %323 = arith.subf %306, %322 : vector<16x32xf32>
    %cst_147 = arith.constant 9.99999974E-6 : f32
    %324 = vector.broadcast %cst_147 : f32 to vector<16x1xf32>
    %325 = arith.addf %321, %324 : vector<16x1xf32>
    %326 = math.rsqrt %325 : vector<16x1xf32>
    %327 = vector.broadcast %326 : vector<16x1xf32> to vector<16x32xf32>
    %328 = arith.mulf %323, %327 : vector<16x32xf32>
    %329 = vector.broadcast %308 : vector<1x32xf32> to vector<16x32xf32>
    %330 = arith.mulf %328, %329 : vector<16x32xf32>
    %331 = vector.broadcast %310 : vector<1x32xf32> to vector<16x32xf32>
    %332 = arith.addf %330, %331 : vector<16x32xf32>
    %c1_148 = arith.constant 1 : index
    %c0_149 = arith.constant 0 : index
    %c0_150 = arith.constant 0 : index
    %333 = vector.load %arg11[%c1_148, %c0_149, %c0_150] : memref<3x1x32xf32, #tpu.memory_space<vmem>>, vector<1x1x32xf32>
    %334 = vector.shape_cast %333 : vector<1x1x32xf32> to vector<1x32xf32>
    %335 = vector.broadcast %334 : vector<1x32xf32> to vector<16x32xf32>
    %336 = arith.mulf %332, %335 : vector<16x32xf32>
    %cst_151 = arith.constant dense<0.000000e+00> : vector<16xf32>
    %337 = vector.multi_reduction <add>, %336, %cst_151 [1] : vector<16x32xf32> to vector<16xf32>
    %338 = vector.shape_cast %337 : vector<16xf32> to vector<16x1xf32>
    %c1_152 = arith.constant 1 : index
    %c0_153 = arith.constant 0 : index
    %c0_154 = arith.constant 0 : index
    %339 = vector.load %arg12[%c1_152, %c0_153, %c0_154] : memref<3x1x1xf32, #tpu.memory_space<vmem>>, vector<1x1x1xf32>
    %340 = vector.shape_cast %339 : vector<1x1x1xf32> to vector<1x1xf32>
    %341 = vector.broadcast %340 : vector<1x1xf32> to vector<16x1xf32>
    %342 = arith.addf %338, %341 : vector<16x1xf32>
    %343 = arith.mulf %342, %1 : vector<16x1xf32>
    %c2 = arith.constant 2 : index
    %c0_155 = arith.constant 0 : index
    %c0_156 = arith.constant 0 : index
    %344 = vector.load %arg3[%c2, %c0_155, %c0_156] : memref<3x96x32xbf16, #tpu.memory_space<vmem>>, vector<1x96x32xbf16>
    %345 = vector.shape_cast %344 : vector<1x96x32xbf16> to vector<96x32xbf16>
    %cst_157 = arith.constant dense<0.000000e+00> : vector<16x32xf32>
    %346 = tpu.matmul %61, %345, %cst_157 {dimension_numbers = #tpu.dot_dimension_numbers<[1], [0], [0], [1], [0, 0, 1, 1], [], []>} : vector<16x96xbf16>, vector<96x32xbf16>, vector<16x32xf32> -> vector<16x32xf32>
    %c2_158 = arith.constant 2 : index
    %c0_159 = arith.constant 0 : index
    %c0_160 = arith.constant 0 : index
    %347 = vector.load %arg4[%c2_158, %c0_159, %c0_160] : memref<3x1x32xf32, #tpu.memory_space<vmem>>, vector<1x1x32xf32>
    %348 = vector.shape_cast %347 : vector<1x1x32xf32> to vector<1x32xf32>
    %349 = vector.broadcast %348 : vector<1x32xf32> to vector<16x32xf32>
    %350 = arith.addf %346, %349 : vector<16x32xf32>
    %cst_161 = arith.constant 0.000000e+00 : f32
    %351 = vector.broadcast %cst_161 : f32 to vector<16x32xf32>
    %352 = arith.maximumf %350, %351 : vector<16x32xf32>
    %c2_162 = arith.constant 2 : index
    %c0_163 = arith.constant 0 : index
    %c0_164 = arith.constant 0 : index
    %353 = vector.load %arg5[%c2_162, %c0_163, %c0_164] : memref<3x1x32xf32, #tpu.memory_space<vmem>>, vector<1x1x32xf32>
    %354 = vector.shape_cast %353 : vector<1x1x32xf32> to vector<1x32xf32>
    %c2_165 = arith.constant 2 : index
    %c0_166 = arith.constant 0 : index
    %c0_167 = arith.constant 0 : index
    %355 = vector.load %arg6[%c2_165, %c0_166, %c0_167] : memref<3x1x32xf32, #tpu.memory_space<vmem>>, vector<1x1x32xf32>
    %356 = vector.shape_cast %355 : vector<1x1x32xf32> to vector<1x32xf32>
    %cst_168 = arith.constant dense<0.000000e+00> : vector<16xf32>
    %357 = vector.multi_reduction <add>, %352, %cst_168 [1] : vector<16x32xf32> to vector<16xf32>
    %358 = vector.shape_cast %357 : vector<16xf32> to vector<16x1xf32>
    %cst_169 = arith.constant 3.200000e+01 : f32
    %359 = vector.broadcast %cst_169 : f32 to vector<16x1xf32>
    %360 = arith.divf %358, %359 : vector<16x1xf32>
    %361 = vector.broadcast %360 : vector<16x1xf32> to vector<16x32xf32>
    %362 = arith.subf %352, %361 : vector<16x32xf32>
    %363 = arith.mulf %362, %362 : vector<16x32xf32>
    %cst_170 = arith.constant dense<0.000000e+00> : vector<16xf32>
    %364 = vector.multi_reduction <add>, %363, %cst_170 [1] : vector<16x32xf32> to vector<16xf32>
    %365 = vector.shape_cast %364 : vector<16xf32> to vector<16x1xf32>
    %cst_171 = arith.constant 3.200000e+01 : f32
    %366 = vector.broadcast %cst_171 : f32 to vector<16x1xf32>
    %367 = arith.divf %365, %366 : vector<16x1xf32>
    %368 = vector.broadcast %360 : vector<16x1xf32> to vector<16x32xf32>
    %369 = arith.subf %352, %368 : vector<16x32xf32>
    %cst_172 = arith.constant 9.99999974E-6 : f32
    %370 = vector.broadcast %cst_172 : f32 to vector<16x1xf32>
    %371 = arith.addf %367, %370 : vector<16x1xf32>
    %372 = math.rsqrt %371 : vector<16x1xf32>
    %373 = vector.broadcast %372 : vector<16x1xf32> to vector<16x32xf32>
    %374 = arith.mulf %369, %373 : vector<16x32xf32>
    %375 = vector.broadcast %354 : vector<1x32xf32> to vector<16x32xf32>
    %376 = arith.mulf %374, %375 : vector<16x32xf32>
    %377 = vector.broadcast %356 : vector<1x32xf32> to vector<16x32xf32>
    %378 = arith.addf %376, %377 : vector<16x32xf32>
    %379 = tpu.iota {dimensions = array<i32: 0>} : vector<16x1xi32>
    %c8_i32_173 = arith.constant 8 : i32
    %c0_i32_174 = arith.constant 0 : i32
    %380 = arith.cmpi eq, %c8_i32_173, %c0_i32_174 : i32
    %c1_i32_175 = arith.constant 1 : i32
    %381 = arith.select %380, %c1_i32_175, %c8_i32_173 : i32
    %382 = vector.broadcast %381 : i32 to vector<16x1xi32>
    %383 = arith.remsi %379, %382 : vector<16x1xi32>
    %c0_i32_176 = arith.constant 0 : i32
    %384 = vector.broadcast %c0_i32_176 : i32 to vector<16x1xi32>
    %385 = arith.cmpi ne, %383, %384 : vector<16x1xi32>
    %c0_i32_177 = arith.constant 0 : i32
    %386 = vector.broadcast %c0_i32_177 : i32 to vector<16x1xi32>
    %387 = arith.cmpi slt, %383, %386 : vector<16x1xi32>
    %c0_i32_178 = arith.constant 0 : i32
    %388 = arith.cmpi slt, %381, %c0_i32_178 : i32
    %389 = vector.broadcast %388 : i1 to vector<16x1xi1>
    %390 = vector.broadcast %389 : vector<16x1xi1> to vector<16x1xi1>
    %391 = arith.xori %387, %390 : vector<16x1xi1>
    %392 = arith.andi %391, %385 : vector<16x1xi1>
    %393 = vector.broadcast %381 : i32 to vector<16x1xi32>
    %394 = arith.addi %383, %393 : vector<16x1xi32>
    %395 = arith.select %392, %394, %383 : vector<16x1xi1>, vector<16x1xi32>
    %c1_i32_179 = arith.constant 1 : i32
    %396 = tpu.dynamic_rotate %378 by %c1_i32_179 dim 0 : vector<16x32xf32>, i32 -> vector<16x32xf32>
    %c-1_i32_180 = arith.constant -1 : i32
    %397 = vector.broadcast %c-1_i32_180 : i32 to vector<16x1xi32>
    %398 = arith.addi %395, %397 : vector<16x1xi32>
    %c0_i32_181 = arith.constant 0 : i32
    %399 = vector.broadcast %c0_i32_181 : i32 to vector<16x1xi32>
    %400 = arith.cmpi sge, %398, %399 : vector<16x1xi32>
    %c-1_i32_182 = arith.constant -1 : i32
    %401 = vector.broadcast %c-1_i32_182 : i32 to vector<16x1xi32>
    %402 = arith.addi %395, %401 : vector<16x1xi32>
    %c8_i32_183 = arith.constant 8 : i32
    %403 = vector.broadcast %c8_i32_183 : i32 to vector<16x1xi32>
    %404 = arith.cmpi slt, %402, %403 : vector<16x1xi32>
    %405 = arith.andi %400, %404 : vector<16x1xi1>
    %cst_184 = arith.constant 0.000000e+00 : f32
    %406 = vector.shape_cast %405 : vector<16x1xi1> to vector<16x1xi1>
    %407 = vector.broadcast %406 : vector<16x1xi1> to vector<16x32xi1>
    %408 = vector.broadcast %cst_184 : f32 to vector<16x32xf32>
    %409 = arith.select %407, %396, %408 : vector<16x32xi1>, vector<16x32xf32>
    %c0_i32_185 = arith.constant 0 : i32
    %410 = vector.broadcast %c0_i32_185 : i32 to vector<16x1xi32>
    %411 = arith.addi %395, %410 : vector<16x1xi32>
    %c0_i32_186 = arith.constant 0 : i32
    %412 = vector.broadcast %c0_i32_186 : i32 to vector<16x1xi32>
    %413 = arith.cmpi sge, %411, %412 : vector<16x1xi32>
    %c0_i32_187 = arith.constant 0 : i32
    %414 = vector.broadcast %c0_i32_187 : i32 to vector<16x1xi32>
    %415 = arith.addi %395, %414 : vector<16x1xi32>
    %c8_i32_188 = arith.constant 8 : i32
    %416 = vector.broadcast %c8_i32_188 : i32 to vector<16x1xi32>
    %417 = arith.cmpi slt, %415, %416 : vector<16x1xi32>
    %418 = arith.andi %413, %417 : vector<16x1xi1>
    %cst_189 = arith.constant 0.000000e+00 : f32
    %419 = vector.shape_cast %418 : vector<16x1xi1> to vector<16x1xi1>
    %420 = vector.broadcast %419 : vector<16x1xi1> to vector<16x32xi1>
    %421 = vector.broadcast %cst_189 : f32 to vector<16x32xf32>
    %422 = arith.select %420, %378, %421 : vector<16x32xi1>, vector<16x32xf32>
    %c15_i32_190 = arith.constant 15 : i32
    %423 = tpu.dynamic_rotate %378 by %c15_i32_190 dim 0 : vector<16x32xf32>, i32 -> vector<16x32xf32>
    %c1_i32_191 = arith.constant 1 : i32
    %424 = vector.broadcast %c1_i32_191 : i32 to vector<16x1xi32>
    %425 = arith.addi %395, %424 : vector<16x1xi32>
    %c0_i32_192 = arith.constant 0 : i32
    %426 = vector.broadcast %c0_i32_192 : i32 to vector<16x1xi32>
    %427 = arith.cmpi sge, %425, %426 : vector<16x1xi32>
    %c1_i32_193 = arith.constant 1 : i32
    %428 = vector.broadcast %c1_i32_193 : i32 to vector<16x1xi32>
    %429 = arith.addi %395, %428 : vector<16x1xi32>
    %c8_i32_194 = arith.constant 8 : i32
    %430 = vector.broadcast %c8_i32_194 : i32 to vector<16x1xi32>
    %431 = arith.cmpi slt, %429, %430 : vector<16x1xi32>
    %432 = arith.andi %427, %431 : vector<16x1xi1>
    %cst_195 = arith.constant 0.000000e+00 : f32
    %433 = vector.shape_cast %432 : vector<16x1xi1> to vector<16x1xi1>
    %434 = vector.broadcast %433 : vector<16x1xi1> to vector<16x32xi1>
    %435 = vector.broadcast %cst_195 : f32 to vector<16x32xf32>
    %436 = arith.select %434, %423, %435 : vector<16x32xi1>, vector<16x32xf32>
    %437 = tpu.concatenate %409, %422, %436 in 1 : vector<16x32xf32>, vector<16x32xf32>, vector<16x32xf32> -> vector<16x96xf32>
    %438 = arith.truncf %437 : vector<16x96xf32> to vector<16x96xbf16>
    %c2_196 = arith.constant 2 : index
    %c0_197 = arith.constant 0 : index
    %c0_198 = arith.constant 0 : index
    %439 = vector.load %arg7[%c2_196, %c0_197, %c0_198] : memref<3x96x32xbf16, #tpu.memory_space<vmem>>, vector<1x96x32xbf16>
    %440 = vector.shape_cast %439 : vector<1x96x32xbf16> to vector<96x32xbf16>
    %cst_199 = arith.constant dense<0.000000e+00> : vector<16x32xf32>
    %441 = tpu.matmul %438, %440, %cst_199 {dimension_numbers = #tpu.dot_dimension_numbers<[1], [0], [0], [1], [0, 0, 1, 1], [], []>} : vector<16x96xbf16>, vector<96x32xbf16>, vector<16x32xf32> -> vector<16x32xf32>
    %c2_200 = arith.constant 2 : index
    %c0_201 = arith.constant 0 : index
    %c0_202 = arith.constant 0 : index
    %442 = vector.load %arg8[%c2_200, %c0_201, %c0_202] : memref<3x1x32xf32, #tpu.memory_space<vmem>>, vector<1x1x32xf32>
    %443 = vector.shape_cast %442 : vector<1x1x32xf32> to vector<1x32xf32>
    %444 = vector.broadcast %443 : vector<1x32xf32> to vector<16x32xf32>
    %445 = arith.addf %441, %444 : vector<16x32xf32>
    %cst_203 = arith.constant 0.000000e+00 : f32
    %446 = vector.broadcast %cst_203 : f32 to vector<16x32xf32>
    %447 = arith.maximumf %445, %446 : vector<16x32xf32>
    %c2_204 = arith.constant 2 : index
    %c0_205 = arith.constant 0 : index
    %c0_206 = arith.constant 0 : index
    %448 = vector.load %arg9[%c2_204, %c0_205, %c0_206] : memref<3x1x32xf32, #tpu.memory_space<vmem>>, vector<1x1x32xf32>
    %449 = vector.shape_cast %448 : vector<1x1x32xf32> to vector<1x32xf32>
    %c2_207 = arith.constant 2 : index
    %c0_208 = arith.constant 0 : index
    %c0_209 = arith.constant 0 : index
    %450 = vector.load %arg10[%c2_207, %c0_208, %c0_209] : memref<3x1x32xf32, #tpu.memory_space<vmem>>, vector<1x1x32xf32>
    %451 = vector.shape_cast %450 : vector<1x1x32xf32> to vector<1x32xf32>
    %cst_210 = arith.constant dense<0.000000e+00> : vector<16xf32>
    %452 = vector.multi_reduction <add>, %447, %cst_210 [1] : vector<16x32xf32> to vector<16xf32>
    %453 = vector.shape_cast %452 : vector<16xf32> to vector<16x1xf32>
    %cst_211 = arith.constant 3.200000e+01 : f32
    %454 = vector.broadcast %cst_211 : f32 to vector<16x1xf32>
    %455 = arith.divf %453, %454 : vector<16x1xf32>
    %456 = vector.broadcast %455 : vector<16x1xf32> to vector<16x32xf32>
    %457 = arith.subf %447, %456 : vector<16x32xf32>
    %458 = arith.mulf %457, %457 : vector<16x32xf32>
    %cst_212 = arith.constant dense<0.000000e+00> : vector<16xf32>
    %459 = vector.multi_reduction <add>, %458, %cst_212 [1] : vector<16x32xf32> to vector<16xf32>
    %460 = vector.shape_cast %459 : vector<16xf32> to vector<16x1xf32>
    %cst_213 = arith.constant 3.200000e+01 : f32
    %461 = vector.broadcast %cst_213 : f32 to vector<16x1xf32>
    %462 = arith.divf %460, %461 : vector<16x1xf32>
    %463 = vector.broadcast %455 : vector<16x1xf32> to vector<16x32xf32>
    %464 = arith.subf %447, %463 : vector<16x32xf32>
    %cst_214 = arith.constant 9.99999974E-6 : f32
    %465 = vector.broadcast %cst_214 : f32 to vector<16x1xf32>
    %466 = arith.addf %462, %465 : vector<16x1xf32>
    %467 = math.rsqrt %466 : vector<16x1xf32>
    %468 = vector.broadcast %467 : vector<16x1xf32> to vector<16x32xf32>
    %469 = arith.mulf %464, %468 : vector<16x32xf32>
    %470 = vector.broadcast %449 : vector<1x32xf32> to vector<16x32xf32>
    %471 = arith.mulf %469, %470 : vector<16x32xf32>
    %472 = vector.broadcast %451 : vector<1x32xf32> to vector<16x32xf32>
    %473 = arith.addf %471, %472 : vector<16x32xf32>
    %c2_215 = arith.constant 2 : index
    %c0_216 = arith.constant 0 : index
    %c0_217 = arith.constant 0 : index
    %474 = vector.load %arg11[%c2_215, %c0_216, %c0_217] : memref<3x1x32xf32, #tpu.memory_space<vmem>>, vector<1x1x32xf32>
    %475 = vector.shape_cast %474 : vector<1x1x32xf32> to vector<1x32xf32>
    %476 = vector.broadcast %475 : vector<1x32xf32> to vector<16x32xf32>
    %477 = arith.mulf %473, %476 : vector<16x32xf32>
    %cst_218 = arith.constant dense<0.000000e+00> : vector<16xf32>
    %478 = vector.multi_reduction <add>, %477, %cst_218 [1] : vector<16x32xf32> to vector<16xf32>
    %479 = vector.shape_cast %478 : vector<16xf32> to vector<16x1xf32>
    %c2_219 = arith.constant 2 : index
    %c0_220 = arith.constant 0 : index
    %c0_221 = arith.constant 0 : index
    %480 = vector.load %arg12[%c2_219, %c0_220, %c0_221] : memref<3x1x1xf32, #tpu.memory_space<vmem>>, vector<1x1x1xf32>
    %481 = vector.shape_cast %480 : vector<1x1x1xf32> to vector<1x1xf32>
    %482 = vector.broadcast %481 : vector<1x1xf32> to vector<16x1xf32>
    %483 = arith.addf %479, %482 : vector<16x1xf32>
    %484 = arith.mulf %483, %1 : vector<16x1xf32>
    %cst_222 = arith.constant 0.000000e+00 : f32
    %485 = vector.broadcast %cst_222 : f32 to vector<16x125xf32>
    %486 = tpu.concatenate %202, %343, %484, %485 in 1 : vector<16x1xf32>, vector<16x1xf32>, vector<16x1xf32>, vector<16x125xf32> -> vector<16x128xf32>
    %c0_223 = arith.constant 0 : index
    %c0_224 = arith.constant 0 : index
    %487 = vector.load %arg13[%c0_223, %c0_224] : memref<16x128xf32, #tpu.memory_space<vmem>>, vector<16x128xf32>
    tpu.vector_store %arg13[%c0_223, %c0_224], %486 {strides = array<i32>} : memref<16x128xf32, #tpu.memory_space<vmem>>, vector<16x128xf32>,
    return
  }
  func.func @transform_0(%arg0: i32) -> (i32, i32) {
    %c0_i32 = arith.constant 0 : i32
    %c0_i32_0 = arith.constant 0 : i32
    %c0_i32_1 = arith.constant 0 : i32
    return %c0_i32, %c0_i32_0 : i32, i32
  }
  func.func @transform_1(%arg0: i32) -> (i32, i32) {
    %c0_i32 = arith.constant 0 : i32
    %c0_i32_0 = arith.constant 0 : i32
    %c0_i32_1 = arith.constant 0 : i32
    return %c0_i32, %c0_i32_0 : i32, i32
  }
  func.func @transform_2(%arg0: i32) -> (i32, i32, i32) {
    %c0_i32 = arith.constant 0 : i32
    %c0_i32_0 = arith.constant 0 : i32
    %c0_i32_1 = arith.constant 0 : i32
    %c0_i32_2 = arith.constant 0 : i32
    return %c0_i32, %c0_i32_0, %c0_i32_1 : i32, i32, i32
  }
  func.func @transform_3(%arg0: i32) -> (i32, i32, i32) {
    %c0_i32 = arith.constant 0 : i32
    %c0_i32_0 = arith.constant 0 : i32
    %c0_i32_1 = arith.constant 0 : i32
    %c0_i32_2 = arith.constant 0 : i32
    return %c0_i32, %c0_i32_0, %c0_i32_1 : i32, i32, i32
  }
  func.func @transform_4(%arg0: i32) -> (i32, i32, i32) {
    %c0_i32 = arith.constant 0 : i32
    %c0_i32_0 = arith.constant 0 : i32
    %c0_i32_1 = arith.constant 0 : i32
    %c0_i32_2 = arith.constant 0 : i32
    return %c0_i32, %c0_i32_0, %c0_i32_1 : i32, i32, i32
  }
  func.func @transform_5(%arg0: i32) -> (i32, i32, i32) {
    %c0_i32 = arith.constant 0 : i32
    %c0_i32_0 = arith.constant 0 : i32
    %c0_i32_1 = arith.constant 0 : i32
    %c0_i32_2 = arith.constant 0 : i32
    return %c0_i32, %c0_i32_0, %c0_i32_1 : i32, i32, i32
  }
  func.func @transform_6(%arg0: i32) -> (i32, i32, i32) {
    %c0_i32 = arith.constant 0 : i32
    %c0_i32_0 = arith.constant 0 : i32
    %c0_i32_1 = arith.constant 0 : i32
    %c0_i32_2 = arith.constant 0 : i32
    return %c0_i32, %c0_i32_0, %c0_i32_1 : i32, i32, i32
  }
  func.func @transform_7(%arg0: i32) -> (i32, i32, i32) {
    %c0_i32 = arith.constant 0 : i32
    %c0_i32_0 = arith.constant 0 : i32
    %c0_i32_1 = arith.constant 0 : i32
    %c0_i32_2 = arith.constant 0 : i32
    return %c0_i32, %c0_i32_0, %c0_i32_1 : i32, i32, i32
  }
  func.func @transform_8(%arg0: i32) -> (i32, i32, i32) {
    %c0_i32 = arith.constant 0 : i32
    %c0_i32_0 = arith.constant 0 : i32
    %c0_i32_1 = arith.constant 0 : i32
    %c0_i32_2 = arith.constant 0 : i32
    return %c0_i32, %c0_i32_0, %c0_i32_1 : i32, i32, i32
  }
  func.func @transform_9(%arg0: i32) -> (i32, i32, i32) {
    %c0_i32 = arith.constant 0 : i32
    %c0_i32_0 = arith.constant 0 : i32
    %c0_i32_1 = arith.constant 0 : i32
    %c0_i32_2 = arith.constant 0 : i32
    return %c0_i32, %c0_i32_0, %c0_i32_1 : i32, i32, i32
  }
  func.func @transform_10(%arg0: i32) -> (i32, i32, i32) {
    %c0_i32 = arith.constant 0 : i32
    %c0_i32_0 = arith.constant 0 : i32
    %c0_i32_1 = arith.constant 0 : i32
    %c0_i32_2 = arith.constant 0 : i32
    return %c0_i32, %c0_i32_0, %c0_i32_1 : i32, i32, i32
  }
  func.func @transform_11(%arg0: i32) -> (i32, i32, i32) {
    %c0_i32 = arith.constant 0 : i32
    %c0_i32_0 = arith.constant 0 : i32
    %c0_i32_1 = arith.constant 0 : i32
    %c0_i32_2 = arith.constant 0 : i32
    return %c0_i32, %c0_i32_0, %c0_i32_1 : i32, i32, i32
  }
  func.func @transform_12(%arg0: i32) -> (i32, i32) {
    %c0_i32 = arith.constant 0 : i32
    %c0_i32_0 = arith.constant 0 : i32
    %c0_i32_1 = arith.constant 0 : i32
    return %c0_i32, %c0_i32_0 : i32, i32
  }
}

module attributes {stable_mosaic.version = 11 : i64} {
  func.func @_fft_stack_mel_kernel(%arg0: i32, %arg1: memref<1x32x32xf32, #tpu.memory_space<vmem>>, %arg2: memref<1x32x1xf32, #tpu.memory_space<vmem>>, %arg3: memref<1x1x32xf32, #tpu.memory_space<vmem>>, %arg4: memref<2x2x32x16xbf16, #tpu.memory_space<vmem>>, %arg5: memref<2x2x1x16xf32, #tpu.memory_space<vmem>>, %arg6: memref<2x2x32x16xbf16, #tpu.memory_space<vmem>>, %arg7: memref<2x2x1x16xf32, #tpu.memory_space<vmem>>, %arg8: memref<2x2x32x16xbf16, #tpu.memory_space<vmem>>, %arg9: memref<2x2x1x16xf32, #tpu.memory_space<vmem>>, %arg10: memref<2x2x16x32xbf16, #tpu.memory_space<vmem>>, %arg11: memref<2x1x32xf32, #tpu.memory_space<vmem>>, %arg12: memref<2x1x32xf32, #tpu.memory_space<vmem>>, %arg13: memref<2x1x32xf32, #tpu.memory_space<vmem>>, %arg14: memref<2x288x64xbf16, #tpu.memory_space<vmem>>, %arg15: memref<2x1x64xf32, #tpu.memory_space<vmem>>, %arg16: memref<2x64x32xbf16, #tpu.memory_space<vmem>>, %arg17: memref<2x1x32xf32, #tpu.memory_space<vmem>>, %arg18: memref<2x1x32xf32, #tpu.memory_space<vmem>>, %arg19: memref<2x1x32xf32, #tpu.memory_space<vmem>>, %arg20: memref<32x128xbf16, #tpu.memory_space<vmem>>, %arg21: memref<1x128xf32, #tpu.memory_space<vmem>>, %arg22: memref<1x32x128xf32, #tpu.memory_space<vmem>>) attributes {dimension_semantics = [#tpu.dimension_semantics<parallel>], iteration_bounds = array<i64: 2>, scalar_prefetch = 0 : i64, scratch_operands = 0 : i64, tpu.core_type = #tpu.core_type<tc>, window_params = [{transform_indices = @transform_0, window_bounds = array<i64: 1, 32, 32>}, {transform_indices = @transform_1, window_bounds = array<i64: 1, 32, 1>}, {transform_indices = @transform_2, window_bounds = array<i64: 1, 1, 32>}, {pipeline_mode = #tpu.pipeline_mode<synchronous>, transform_indices = @transform_3, window_bounds = array<i64: 2, 2, 32, 16>}, {pipeline_mode = #tpu.pipeline_mode<synchronous>, transform_indices = @transform_4, window_bounds = array<i64: 2, 2, 1, 16>}, {pipeline_mode = #tpu.pipeline_mode<synchronous>, transform_indices = @transform_5, window_bounds = array<i64: 2, 2, 32, 16>}, {pipeline_mode = #tpu.pipeline_mode<synchronous>, transform_indices = @transform_6, window_bounds = array<i64: 2, 2, 1, 16>}, {pipeline_mode = #tpu.pipeline_mode<synchronous>, transform_indices = @transform_7, window_bounds = array<i64: 2, 2, 32, 16>}, {pipeline_mode = #tpu.pipeline_mode<synchronous>, transform_indices = @transform_8, window_bounds = array<i64: 2, 2, 1, 16>}, {pipeline_mode = #tpu.pipeline_mode<synchronous>, transform_indices = @transform_9, window_bounds = array<i64: 2, 2, 16, 32>}, {pipeline_mode = #tpu.pipeline_mode<synchronous>, transform_indices = @transform_10, window_bounds = array<i64: 2, 1, 32>}, {pipeline_mode = #tpu.pipeline_mode<synchronous>, transform_indices = @transform_11, window_bounds = array<i64: 2, 1, 32>}, {pipeline_mode = #tpu.pipeline_mode<synchronous>, transform_indices = @transform_12, window_bounds = array<i64: 2, 1, 32>}, {pipeline_mode = #tpu.pipeline_mode<synchronous>, transform_indices = @transform_13, window_bounds = array<i64: 2, 288, 64>}, {pipeline_mode = #tpu.pipeline_mode<synchronous>, transform_indices = @transform_14, window_bounds = array<i64: 2, 1, 64>}, {pipeline_mode = #tpu.pipeline_mode<synchronous>, transform_indices = @transform_15, window_bounds = array<i64: 2, 64, 32>}, {pipeline_mode = #tpu.pipeline_mode<synchronous>, transform_indices = @transform_16, window_bounds = array<i64: 2, 1, 32>}, {pipeline_mode = #tpu.pipeline_mode<synchronous>, transform_indices = @transform_17, window_bounds = array<i64: 2, 1, 32>}, {pipeline_mode = #tpu.pipeline_mode<synchronous>, transform_indices = @transform_18, window_bounds = array<i64: 2, 1, 32>}, {pipeline_mode = #tpu.pipeline_mode<synchronous>, transform_indices = @transform_19, window_bounds = array<i64: 32, 128>}, {pipeline_mode = #tpu.pipeline_mode<synchronous>, transform_indices = @transform_20, window_bounds = array<i64: 1, 128>}, {transform_indices = @transform_21, window_bounds = array<i64: 1, 32, 128>}]} {
    %c0 = arith.constant 0 : index
    %c0_0 = arith.constant 0 : index
    %c0_1 = arith.constant 0 : index
    %0 = vector.load %arg1[%c0, %c0_0, %c0_1] : memref<1x32x32xf32, #tpu.memory_space<vmem>>, vector<1x32x32xf32>
    %1 = vector.shape_cast %0 : vector<1x32x32xf32> to vector<32x32xf32>
    %c0_2 = arith.constant 0 : index
    %c0_3 = arith.constant 0 : index
    %c0_4 = arith.constant 0 : index
    %2 = vector.load %arg2[%c0_2, %c0_3, %c0_4] : memref<1x32x1xf32, #tpu.memory_space<vmem>>, vector<1x32x1xf32>
    %3 = vector.shape_cast %2 : vector<1x32x1xf32> to vector<32x1xf32>
    %c0_5 = arith.constant 0 : index
    %c0_6 = arith.constant 0 : index
    %c0_7 = arith.constant 0 : index
    %4 = vector.load %arg3[%c0_5, %c0_6, %c0_7] : memref<1x1x32xf32, #tpu.memory_space<vmem>>, vector<1x1x32xf32>
    %5 = vector.shape_cast %4 : vector<1x1x32xf32> to vector<1x32xf32>
    %6 = arith.truncf %1 : vector<32x32xf32> to vector<32x32xbf16>
    %cst = arith.constant 0.000000e+00 : f32
    %7 = vector.broadcast %cst : f32 to vector<32x32xf32>
    %c0_8 = arith.constant 0 : index
    %c0_9 = arith.constant 0 : index
    %c0_10 = arith.constant 0 : index
    %8 = vector.load %arg11[%c0_8, %c0_9, %c0_10] : memref<2x1x32xf32, #tpu.memory_space<vmem>>, vector<1x1x32xf32>
    %9 = vector.shape_cast %8 : vector<1x1x32xf32> to vector<1x32xf32>
    %10 = vector.broadcast %9 : vector<1x32xf32> to vector<32x32xf32>
    %11 = arith.addf %7, %10 : vector<32x32xf32>
    %c0_11 = arith.constant 0 : index
    %c0_12 = arith.constant 0 : index
    %c0_13 = arith.constant 0 : index
    %c0_14 = arith.constant 0 : index
    %12 = vector.load %arg4[%c0_11, %c0_12, %c0_13, %c0_14] : memref<2x2x32x16xbf16, #tpu.memory_space<vmem>>, vector<1x1x32x16xbf16>
    %13 = vector.shape_cast %12 : vector<1x1x32x16xbf16> to vector<32x16xbf16>
    %cst_15 = arith.constant dense<0.000000e+00> : vector<32x16xf32>
    %14 = tpu.matmul %6, %13, %cst_15 {dimension_numbers = #tpu.dot_dimension_numbers<[1], [0], [0], [1], [0, 0, 1, 1], [], []>} : vector<32x32xbf16>, vector<32x16xbf16>, vector<32x16xf32> -> vector<32x16xf32>
    %c0_16 = arith.constant 0 : index
    %c0_17 = arith.constant 0 : index
    %c0_18 = arith.constant 0 : index
    %c0_19 = arith.constant 0 : index
    %15 = vector.load %arg5[%c0_16, %c0_17, %c0_18, %c0_19] : memref<2x2x1x16xf32, #tpu.memory_space<vmem>>, vector<1x1x1x16xf32>
    %16 = vector.shape_cast %15 : vector<1x1x1x16xf32> to vector<1x16xf32>
    %17 = vector.broadcast %16 : vector<1x16xf32> to vector<32x16xf32>
    %18 = arith.addf %14, %17 : vector<32x16xf32>
    %c0_20 = arith.constant 0 : index
    %c0_21 = arith.constant 0 : index
    %c0_22 = arith.constant 0 : index
    %c0_23 = arith.constant 0 : index
    %19 = vector.load %arg6[%c0_20, %c0_21, %c0_22, %c0_23] : memref<2x2x32x16xbf16, #tpu.memory_space<vmem>>, vector<1x1x32x16xbf16>
    %20 = vector.shape_cast %19 : vector<1x1x32x16xbf16> to vector<32x16xbf16>
    %cst_24 = arith.constant dense<0.000000e+00> : vector<32x16xf32>
    %21 = tpu.matmul %6, %20, %cst_24 {dimension_numbers = #tpu.dot_dimension_numbers<[1], [0], [0], [1], [0, 0, 1, 1], [], []>} : vector<32x32xbf16>, vector<32x16xbf16>, vector<32x16xf32> -> vector<32x16xf32>
    %c0_25 = arith.constant 0 : index
    %c0_26 = arith.constant 0 : index
    %c0_27 = arith.constant 0 : index
    %c0_28 = arith.constant 0 : index
    %22 = vector.load %arg7[%c0_25, %c0_26, %c0_27, %c0_28] : memref<2x2x1x16xf32, #tpu.memory_space<vmem>>, vector<1x1x1x16xf32>
    %23 = vector.shape_cast %22 : vector<1x1x1x16xf32> to vector<1x16xf32>
    %24 = vector.broadcast %23 : vector<1x16xf32> to vector<32x16xf32>
    %25 = arith.addf %21, %24 : vector<32x16xf32>
    %c0_29 = arith.constant 0 : index
    %c0_30 = arith.constant 0 : index
    %c0_31 = arith.constant 0 : index
    %c0_32 = arith.constant 0 : index
    %26 = vector.load %arg8[%c0_29, %c0_30, %c0_31, %c0_32] : memref<2x2x32x16xbf16, #tpu.memory_space<vmem>>, vector<1x1x32x16xbf16>
    %27 = vector.shape_cast %26 : vector<1x1x32x16xbf16> to vector<32x16xbf16>
    %cst_33 = arith.constant dense<0.000000e+00> : vector<32x16xf32>
    %28 = tpu.matmul %6, %27, %cst_33 {dimension_numbers = #tpu.dot_dimension_numbers<[1], [0], [0], [1], [0, 0, 1, 1], [], []>} : vector<32x32xbf16>, vector<32x16xbf16>, vector<32x16xf32> -> vector<32x16xf32>
    %c0_34 = arith.constant 0 : index
    %c0_35 = arith.constant 0 : index
    %c0_36 = arith.constant 0 : index
    %c0_37 = arith.constant 0 : index
    %29 = vector.load %arg9[%c0_34, %c0_35, %c0_36, %c0_37] : memref<2x2x1x16xf32, #tpu.memory_space<vmem>>, vector<1x1x1x16xf32>
    %30 = vector.shape_cast %29 : vector<1x1x1x16xf32> to vector<1x16xf32>
    %31 = vector.broadcast %30 : vector<1x16xf32> to vector<32x16xf32>
    %32 = arith.addf %28, %31 : vector<32x16xf32>
    %33 = arith.truncf %18 : vector<32x16xf32> to vector<32x16xbf16>
    %34 = arith.truncf %25 : vector<32x16xf32> to vector<32x16xbf16>
    %cst_38 = arith.constant dense<0.000000e+00> : vector<32x32xf32>
    %35 = tpu.matmul %33, %34, %cst_38 {dimension_numbers = #tpu.dot_dimension_numbers<[1], [1], [0], [0], [0, 0, 1, 0], [], []>} : vector<32x16xbf16>, vector<32x16xbf16>, vector<32x32xf32> -> vector<32x32xf32>
    %36 = vector.broadcast %5 : vector<1x32xf32> to vector<32x32xf32>
    %37 = arith.addf %35, %36 : vector<32x32xf32>
    %cst_39 = arith.constant dense<0xFF800000> : vector<32xf32>
    %38 = vector.multi_reduction <maximumf>, %37, %cst_39 [1] : vector<32x32xf32> to vector<32xf32>
    %39 = vector.shape_cast %38 : vector<32xf32> to vector<32x1xf32>
    %40 = vector.broadcast %39 : vector<32x1xf32> to vector<32x32xf32>
    %41 = arith.subf %37, %40 : vector<32x32xf32>
    %42 = math.exp %41 : vector<32x32xf32>
    %cst_40 = arith.constant dense<0.000000e+00> : vector<32xf32>
    %43 = vector.multi_reduction <add>, %42, %cst_40 [1] : vector<32x32xf32> to vector<32xf32>
    %44 = vector.shape_cast %43 : vector<32xf32> to vector<32x1xf32>
    %45 = tpu.reciprocal %44 {approx = true} : vector<32x1xf32> -> vector<32x1xf32>
    %46 = vector.broadcast %45 : vector<32x1xf32> to vector<32x32xf32>
    %47 = arith.mulf %42, %46 : vector<32x32xf32>
    %48 = arith.truncf %47 : vector<32x32xf32> to vector<32x32xbf16>
    %49 = arith.truncf %32 : vector<32x16xf32> to vector<32x16xbf16>
    %cst_41 = arith.constant dense<0.000000e+00> : vector<32x16xf32>
    %50 = tpu.matmul %48, %49, %cst_41 {dimension_numbers = #tpu.dot_dimension_numbers<[1], [0], [0], [1], [0, 0, 1, 1], [], []>} : vector<32x32xbf16>, vector<32x16xbf16>, vector<32x16xf32> -> vector<32x16xf32>
    %51 = arith.truncf %50 : vector<32x16xf32> to vector<32x16xbf16>
    %c0_42 = arith.constant 0 : index
    %c0_43 = arith.constant 0 : index
    %c0_44 = arith.constant 0 : index
    %c0_45 = arith.constant 0 : index
    %52 = vector.load %arg10[%c0_42, %c0_43, %c0_44, %c0_45] : memref<2x2x16x32xbf16, #tpu.memory_space<vmem>>, vector<1x1x16x32xbf16>
    %53 = vector.shape_cast %52 : vector<1x1x16x32xbf16> to vector<16x32xbf16>
    %cst_46 = arith.constant dense<0.000000e+00> : vector<32x32xf32>
    %54 = tpu.matmul %51, %53, %cst_46 {dimension_numbers = #tpu.dot_dimension_numbers<[1], [0], [0], [1], [0, 0, 1, 1], [], []>} : vector<32x16xbf16>, vector<16x32xbf16>, vector<32x32xf32> -> vector<32x32xf32>
    %55 = arith.addf %11, %54 : vector<32x32xf32>
    %c0_47 = arith.constant 0 : index
    %c1 = arith.constant 1 : index
    %c0_48 = arith.constant 0 : index
    %c0_49 = arith.constant 0 : index
    %56 = vector.load %arg4[%c0_47, %c1, %c0_48, %c0_49] : memref<2x2x32x16xbf16, #tpu.memory_space<vmem>>, vector<1x1x32x16xbf16>
    %57 = vector.shape_cast %56 : vector<1x1x32x16xbf16> to vector<32x16xbf16>
    %cst_50 = arith.constant dense<0.000000e+00> : vector<32x16xf32>
    %58 = tpu.matmul %6, %57, %cst_50 {dimension_numbers = #tpu.dot_dimension_numbers<[1], [0], [0], [1], [0, 0, 1, 1], [], []>} : vector<32x32xbf16>, vector<32x16xbf16>, vector<32x16xf32> -> vector<32x16xf32>
    %c0_51 = arith.constant 0 : index
    %c1_52 = arith.constant 1 : index
    %c0_53 = arith.constant 0 : index
    %c0_54 = arith.constant 0 : index
    %59 = vector.load %arg5[%c0_51, %c1_52, %c0_53, %c0_54] : memref<2x2x1x16xf32, #tpu.memory_space<vmem>>, vector<1x1x1x16xf32>
    %60 = vector.shape_cast %59 : vector<1x1x1x16xf32> to vector<1x16xf32>
    %61 = vector.broadcast %60 : vector<1x16xf32> to vector<32x16xf32>
    %62 = arith.addf %58, %61 : vector<32x16xf32>
    %c0_55 = arith.constant 0 : index
    %c1_56 = arith.constant 1 : index
    %c0_57 = arith.constant 0 : index
    %c0_58 = arith.constant 0 : index
    %63 = vector.load %arg6[%c0_55, %c1_56, %c0_57, %c0_58] : memref<2x2x32x16xbf16, #tpu.memory_space<vmem>>, vector<1x1x32x16xbf16>
    %64 = vector.shape_cast %63 : vector<1x1x32x16xbf16> to vector<32x16xbf16>
    %cst_59 = arith.constant dense<0.000000e+00> : vector<32x16xf32>
    %65 = tpu.matmul %6, %64, %cst_59 {dimension_numbers = #tpu.dot_dimension_numbers<[1], [0], [0], [1], [0, 0, 1, 1], [], []>} : vector<32x32xbf16>, vector<32x16xbf16>, vector<32x16xf32> -> vector<32x16xf32>
    %c0_60 = arith.constant 0 : index
    %c1_61 = arith.constant 1 : index
    %c0_62 = arith.constant 0 : index
    %c0_63 = arith.constant 0 : index
    %66 = vector.load %arg7[%c0_60, %c1_61, %c0_62, %c0_63] : memref<2x2x1x16xf32, #tpu.memory_space<vmem>>, vector<1x1x1x16xf32>
    %67 = vector.shape_cast %66 : vector<1x1x1x16xf32> to vector<1x16xf32>
    %68 = vector.broadcast %67 : vector<1x16xf32> to vector<32x16xf32>
    %69 = arith.addf %65, %68 : vector<32x16xf32>
    %c0_64 = arith.constant 0 : index
    %c1_65 = arith.constant 1 : index
    %c0_66 = arith.constant 0 : index
    %c0_67 = arith.constant 0 : index
    %70 = vector.load %arg8[%c0_64, %c1_65, %c0_66, %c0_67] : memref<2x2x32x16xbf16, #tpu.memory_space<vmem>>, vector<1x1x32x16xbf16>
    %71 = vector.shape_cast %70 : vector<1x1x32x16xbf16> to vector<32x16xbf16>
    %cst_68 = arith.constant dense<0.000000e+00> : vector<32x16xf32>
    %72 = tpu.matmul %6, %71, %cst_68 {dimension_numbers = #tpu.dot_dimension_numbers<[1], [0], [0], [1], [0, 0, 1, 1], [], []>} : vector<32x32xbf16>, vector<32x16xbf16>, vector<32x16xf32> -> vector<32x16xf32>
    %c0_69 = arith.constant 0 : index
    %c1_70 = arith.constant 1 : index
    %c0_71 = arith.constant 0 : index
    %c0_72 = arith.constant 0 : index
    %73 = vector.load %arg9[%c0_69, %c1_70, %c0_71, %c0_72] : memref<2x2x1x16xf32, #tpu.memory_space<vmem>>, vector<1x1x1x16xf32>
    %74 = vector.shape_cast %73 : vector<1x1x1x16xf32> to vector<1x16xf32>
    %75 = vector.broadcast %74 : vector<1x16xf32> to vector<32x16xf32>
    %76 = arith.addf %72, %75 : vector<32x16xf32>
    %77 = arith.truncf %62 : vector<32x16xf32> to vector<32x16xbf16>
    %78 = arith.truncf %69 : vector<32x16xf32> to vector<32x16xbf16>
    %cst_73 = arith.constant dense<0.000000e+00> : vector<32x32xf32>
    %79 = tpu.matmul %77, %78, %cst_73 {dimension_numbers = #tpu.dot_dimension_numbers<[1], [1], [0], [0], [0, 0, 1, 0], [], []>} : vector<32x16xbf16>, vector<32x16xbf16>, vector<32x32xf32> -> vector<32x32xf32>
    %80 = vector.broadcast %5 : vector<1x32xf32> to vector<32x32xf32>
    %81 = arith.addf %79, %80 : vector<32x32xf32>
    %cst_74 = arith.constant dense<0xFF800000> : vector<32xf32>
    %82 = vector.multi_reduction <maximumf>, %81, %cst_74 [1] : vector<32x32xf32> to vector<32xf32>
    %83 = vector.shape_cast %82 : vector<32xf32> to vector<32x1xf32>
    %84 = vector.broadcast %83 : vector<32x1xf32> to vector<32x32xf32>
    %85 = arith.subf %81, %84 : vector<32x32xf32>
    %86 = math.exp %85 : vector<32x32xf32>
    %cst_75 = arith.constant dense<0.000000e+00> : vector<32xf32>
    %87 = vector.multi_reduction <add>, %86, %cst_75 [1] : vector<32x32xf32> to vector<32xf32>
    %88 = vector.shape_cast %87 : vector<32xf32> to vector<32x1xf32>
    %89 = tpu.reciprocal %88 {approx = true} : vector<32x1xf32> -> vector<32x1xf32>
    %90 = vector.broadcast %89 : vector<32x1xf32> to vector<32x32xf32>
    %91 = arith.mulf %86, %90 : vector<32x32xf32>
    %92 = arith.truncf %91 : vector<32x32xf32> to vector<32x32xbf16>
    %93 = arith.truncf %76 : vector<32x16xf32> to vector<32x16xbf16>
    %cst_76 = arith.constant dense<0.000000e+00> : vector<32x16xf32>
    %94 = tpu.matmul %92, %93, %cst_76 {dimension_numbers = #tpu.dot_dimension_numbers<[1], [0], [0], [1], [0, 0, 1, 1], [], []>} : vector<32x32xbf16>, vector<32x16xbf16>, vector<32x16xf32> -> vector<32x16xf32>
    %95 = arith.truncf %94 : vector<32x16xf32> to vector<32x16xbf16>
    %c0_77 = arith.constant 0 : index
    %c1_78 = arith.constant 1 : index
    %c0_79 = arith.constant 0 : index
    %c0_80 = arith.constant 0 : index
    %96 = vector.load %arg10[%c0_77, %c1_78, %c0_79, %c0_80] : memref<2x2x16x32xbf16, #tpu.memory_space<vmem>>, vector<1x1x16x32xbf16>
    %97 = vector.shape_cast %96 : vector<1x1x16x32xbf16> to vector<16x32xbf16>
    %cst_81 = arith.constant dense<0.000000e+00> : vector<32x32xf32>
    %98 = tpu.matmul %95, %97, %cst_81 {dimension_numbers = #tpu.dot_dimension_numbers<[1], [0], [0], [1], [0, 0, 1, 1], [], []>} : vector<32x16xbf16>, vector<16x32xbf16>, vector<32x32xf32> -> vector<32x32xf32>
    %99 = arith.addf %55, %98 : vector<32x32xf32>
    %100 = arith.addf %99, %1 : vector<32x32xf32>
    %c0_82 = arith.constant 0 : index
    %c0_83 = arith.constant 0 : index
    %c0_84 = arith.constant 0 : index
    %101 = vector.load %arg12[%c0_82, %c0_83, %c0_84] : memref<2x1x32xf32, #tpu.memory_space<vmem>>, vector<1x1x32xf32>
    %102 = vector.shape_cast %101 : vector<1x1x32xf32> to vector<1x32xf32>
    %c0_85 = arith.constant 0 : index
    %c0_86 = arith.constant 0 : index
    %c0_87 = arith.constant 0 : index
    %103 = vector.load %arg13[%c0_85, %c0_86, %c0_87] : memref<2x1x32xf32, #tpu.memory_space<vmem>>, vector<1x1x32xf32>
    %104 = vector.shape_cast %103 : vector<1x1x32xf32> to vector<1x32xf32>
    %cst_88 = arith.constant dense<0.000000e+00> : vector<32xf32>
    %105 = vector.multi_reduction <add>, %100, %cst_88 [1] : vector<32x32xf32> to vector<32xf32>
    %106 = vector.shape_cast %105 : vector<32xf32> to vector<32x1xf32>
    %cst_89 = arith.constant 3.200000e+01 : f32
    %107 = vector.broadcast %cst_89 : f32 to vector<32x1xf32>
    %108 = arith.divf %106, %107 : vector<32x1xf32>
    %109 = vector.broadcast %108 : vector<32x1xf32> to vector<32x32xf32>
    %110 = arith.subf %100, %109 : vector<32x32xf32>
    %111 = arith.mulf %110, %110 : vector<32x32xf32>
    %cst_90 = arith.constant dense<0.000000e+00> : vector<32xf32>
    %112 = vector.multi_reduction <add>, %111, %cst_90 [1] : vector<32x32xf32> to vector<32xf32>
    %113 = vector.shape_cast %112 : vector<32xf32> to vector<32x1xf32>
    %cst_91 = arith.constant 3.200000e+01 : f32
    %114 = vector.broadcast %cst_91 : f32 to vector<32x1xf32>
    %115 = arith.divf %113, %114 : vector<32x1xf32>
    %116 = vector.broadcast %108 : vector<32x1xf32> to vector<32x32xf32>
    %117 = arith.subf %100, %116 : vector<32x32xf32>
    %cst_92 = arith.constant 9.99999974E-6 : f32
    %118 = vector.broadcast %cst_92 : f32 to vector<32x1xf32>
    %119 = arith.addf %115, %118 : vector<32x1xf32>
    %120 = math.rsqrt %119 : vector<32x1xf32>
    %121 = vector.broadcast %120 : vector<32x1xf32> to vector<32x32xf32>
    %122 = arith.mulf %117, %121 : vector<32x32xf32>
    %123 = vector.broadcast %102 : vector<1x32xf32> to vector<32x32xf32>
    %124 = arith.mulf %122, %123 : vector<32x32xf32>
    %125 = vector.broadcast %104 : vector<1x32xf32> to vector<32x32xf32>
    %126 = arith.addf %124, %125 : vector<32x32xf32>
    %127 = vector.broadcast %3 : vector<32x1xf32> to vector<32x32xf32>
    %128 = arith.mulf %126, %127 : vector<32x32xf32>
    %129 = tpu.iota {dimensions = array<i32: 0>} : vector<32x1xi32>
    %c32_i32 = arith.constant 32 : i32
    %c0_i32 = arith.constant 0 : i32
    %130 = arith.cmpi eq, %c32_i32, %c0_i32 : i32
    %c1_i32 = arith.constant 1 : i32
    %131 = arith.select %130, %c1_i32, %c32_i32 : i32
    %132 = vector.broadcast %131 : i32 to vector<32x1xi32>
    %133 = arith.remsi %129, %132 : vector<32x1xi32>
    %c0_i32_93 = arith.constant 0 : i32
    %134 = vector.broadcast %c0_i32_93 : i32 to vector<32x1xi32>
    %135 = arith.cmpi ne, %133, %134 : vector<32x1xi32>
    %c0_i32_94 = arith.constant 0 : i32
    %136 = vector.broadcast %c0_i32_94 : i32 to vector<32x1xi32>
    %137 = arith.cmpi slt, %133, %136 : vector<32x1xi32>
    %c0_i32_95 = arith.constant 0 : i32
    %138 = arith.cmpi slt, %131, %c0_i32_95 : i32
    %139 = vector.broadcast %138 : i1 to vector<32x1xi1>
    %140 = vector.broadcast %139 : vector<32x1xi1> to vector<32x1xi1>
    %141 = arith.xori %137, %140 : vector<32x1xi1>
    %142 = arith.andi %141, %135 : vector<32x1xi1>
    %143 = vector.broadcast %131 : i32 to vector<32x1xi32>
    %144 = arith.addi %133, %143 : vector<32x1xi32>
    %145 = arith.select %142, %144, %133 : vector<32x1xi1>, vector<32x1xi32>
    %c4_i32 = arith.constant 4 : i32
    %146 = tpu.dynamic_rotate %128 by %c4_i32 dim 0 : vector<32x32xf32>, i32 -> vector<32x32xf32>
    %c-4_i32 = arith.constant -4 : i32
    %147 = vector.broadcast %c-4_i32 : i32 to vector<32x1xi32>
    %148 = arith.addi %145, %147 : vector<32x1xi32>
    %c0_i32_96 = arith.constant 0 : i32
    %149 = vector.broadcast %c0_i32_96 : i32 to vector<32x1xi32>
    %150 = arith.cmpi sge, %148, %149 : vector<32x1xi32>
    %c-4_i32_97 = arith.constant -4 : i32
    %151 = vector.broadcast %c-4_i32_97 : i32 to vector<32x1xi32>
    %152 = arith.addi %145, %151 : vector<32x1xi32>
    %c32_i32_98 = arith.constant 32 : i32
    %153 = vector.broadcast %c32_i32_98 : i32 to vector<32x1xi32>
    %154 = arith.cmpi slt, %152, %153 : vector<32x1xi32>
    %155 = arith.andi %150, %154 : vector<32x1xi1>
    %cst_99 = arith.constant 0.000000e+00 : f32
    %156 = vector.shape_cast %155 : vector<32x1xi1> to vector<32x1xi1>
    %157 = vector.broadcast %156 : vector<32x1xi1> to vector<32x32xi1>
    %158 = vector.broadcast %cst_99 : f32 to vector<32x32xf32>
    %159 = arith.select %157, %146, %158 : vector<32x32xi1>, vector<32x32xf32>
    %c3_i32 = arith.constant 3 : i32
    %160 = tpu.dynamic_rotate %128 by %c3_i32 dim 0 : vector<32x32xf32>, i32 -> vector<32x32xf32>
    %c-3_i32 = arith.constant -3 : i32
    %161 = vector.broadcast %c-3_i32 : i32 to vector<32x1xi32>
    %162 = arith.addi %145, %161 : vector<32x1xi32>
    %c0_i32_100 = arith.constant 0 : i32
    %163 = vector.broadcast %c0_i32_100 : i32 to vector<32x1xi32>
    %164 = arith.cmpi sge, %162, %163 : vector<32x1xi32>
    %c-3_i32_101 = arith.constant -3 : i32
    %165 = vector.broadcast %c-3_i32_101 : i32 to vector<32x1xi32>
    %166 = arith.addi %145, %165 : vector<32x1xi32>
    %c32_i32_102 = arith.constant 32 : i32
    %167 = vector.broadcast %c32_i32_102 : i32 to vector<32x1xi32>
    %168 = arith.cmpi slt, %166, %167 : vector<32x1xi32>
    %169 = arith.andi %164, %168 : vector<32x1xi1>
    %cst_103 = arith.constant 0.000000e+00 : f32
    %170 = vector.shape_cast %169 : vector<32x1xi1> to vector<32x1xi1>
    %171 = vector.broadcast %170 : vector<32x1xi1> to vector<32x32xi1>
    %172 = vector.broadcast %cst_103 : f32 to vector<32x32xf32>
    %173 = arith.select %171, %160, %172 : vector<32x32xi1>, vector<32x32xf32>
    %c2_i32 = arith.constant 2 : i32
    %174 = tpu.dynamic_rotate %128 by %c2_i32 dim 0 : vector<32x32xf32>, i32 -> vector<32x32xf32>
    %c-2_i32 = arith.constant -2 : i32
    %175 = vector.broadcast %c-2_i32 : i32 to vector<32x1xi32>
    %176 = arith.addi %145, %175 : vector<32x1xi32>
    %c0_i32_104 = arith.constant 0 : i32
    %177 = vector.broadcast %c0_i32_104 : i32 to vector<32x1xi32>
    %178 = arith.cmpi sge, %176, %177 : vector<32x1xi32>
    %c-2_i32_105 = arith.constant -2 : i32
    %179 = vector.broadcast %c-2_i32_105 : i32 to vector<32x1xi32>
    %180 = arith.addi %145, %179 : vector<32x1xi32>
    %c32_i32_106 = arith.constant 32 : i32
    %181 = vector.broadcast %c32_i32_106 : i32 to vector<32x1xi32>
    %182 = arith.cmpi slt, %180, %181 : vector<32x1xi32>
    %183 = arith.andi %178, %182 : vector<32x1xi1>
    %cst_107 = arith.constant 0.000000e+00 : f32
    %184 = vector.shape_cast %183 : vector<32x1xi1> to vector<32x1xi1>
    %185 = vector.broadcast %184 : vector<32x1xi1> to vector<32x32xi1>
    %186 = vector.broadcast %cst_107 : f32 to vector<32x32xf32>
    %187 = arith.select %185, %174, %186 : vector<32x32xi1>, vector<32x32xf32>
    %c1_i32_108 = arith.constant 1 : i32
    %188 = tpu.dynamic_rotate %128 by %c1_i32_108 dim 0 : vector<32x32xf32>, i32 -> vector<32x32xf32>
    %c-1_i32 = arith.constant -1 : i32
    %189 = vector.broadcast %c-1_i32 : i32 to vector<32x1xi32>
    %190 = arith.addi %145, %189 : vector<32x1xi32>
    %c0_i32_109 = arith.constant 0 : i32
    %191 = vector.broadcast %c0_i32_109 : i32 to vector<32x1xi32>
    %192 = arith.cmpi sge, %190, %191 : vector<32x1xi32>
    %c-1_i32_110 = arith.constant -1 : i32
    %193 = vector.broadcast %c-1_i32_110 : i32 to vector<32x1xi32>
    %194 = arith.addi %145, %193 : vector<32x1xi32>
    %c32_i32_111 = arith.constant 32 : i32
    %195 = vector.broadcast %c32_i32_111 : i32 to vector<32x1xi32>
    %196 = arith.cmpi slt, %194, %195 : vector<32x1xi32>
    %197 = arith.andi %192, %196 : vector<32x1xi1>
    %cst_112 = arith.constant 0.000000e+00 : f32
    %198 = vector.shape_cast %197 : vector<32x1xi1> to vector<32x1xi1>
    %199 = vector.broadcast %198 : vector<32x1xi1> to vector<32x32xi1>
    %200 = vector.broadcast %cst_112 : f32 to vector<32x32xf32>
    %201 = arith.select %199, %188, %200 : vector<32x32xi1>, vector<32x32xf32>
    %c0_i32_113 = arith.constant 0 : i32
    %202 = vector.broadcast %c0_i32_113 : i32 to vector<32x1xi32>
    %203 = arith.addi %145, %202 : vector<32x1xi32>
    %c0_i32_114 = arith.constant 0 : i32
    %204 = vector.broadcast %c0_i32_114 : i32 to vector<32x1xi32>
    %205 = arith.cmpi sge, %203, %204 : vector<32x1xi32>
    %c0_i32_115 = arith.constant 0 : i32
    %206 = vector.broadcast %c0_i32_115 : i32 to vector<32x1xi32>
    %207 = arith.addi %145, %206 : vector<32x1xi32>
    %c32_i32_116 = arith.constant 32 : i32
    %208 = vector.broadcast %c32_i32_116 : i32 to vector<32x1xi32>
    %209 = arith.cmpi slt, %207, %208 : vector<32x1xi32>
    %210 = arith.andi %205, %209 : vector<32x1xi1>
    %cst_117 = arith.constant 0.000000e+00 : f32
    %211 = vector.shape_cast %210 : vector<32x1xi1> to vector<32x1xi1>
    %212 = vector.broadcast %211 : vector<32x1xi1> to vector<32x32xi1>
    %213 = vector.broadcast %cst_117 : f32 to vector<32x32xf32>
    %214 = arith.select %212, %128, %213 : vector<32x32xi1>, vector<32x32xf32>
    %c31_i32 = arith.constant 31 : i32
    %215 = tpu.dynamic_rotate %128 by %c31_i32 dim 0 : vector<32x32xf32>, i32 -> vector<32x32xf32>
    %c1_i32_118 = arith.constant 1 : i32
    %216 = vector.broadcast %c1_i32_118 : i32 to vector<32x1xi32>
    %217 = arith.addi %145, %216 : vector<32x1xi32>
    %c0_i32_119 = arith.constant 0 : i32
    %218 = vector.broadcast %c0_i32_119 : i32 to vector<32x1xi32>
    %219 = arith.cmpi sge, %217, %218 : vector<32x1xi32>
    %c1_i32_120 = arith.constant 1 : i32
    %220 = vector.broadcast %c1_i32_120 : i32 to vector<32x1xi32>
    %221 = arith.addi %145, %220 : vector<32x1xi32>
    %c32_i32_121 = arith.constant 32 : i32
    %222 = vector.broadcast %c32_i32_121 : i32 to vector<32x1xi32>
    %223 = arith.cmpi slt, %221, %222 : vector<32x1xi32>
    %224 = arith.andi %219, %223 : vector<32x1xi1>
    %cst_122 = arith.constant 0.000000e+00 : f32
    %225 = vector.shape_cast %224 : vector<32x1xi1> to vector<32x1xi1>
    %226 = vector.broadcast %225 : vector<32x1xi1> to vector<32x32xi1>
    %227 = vector.broadcast %cst_122 : f32 to vector<32x32xf32>
    %228 = arith.select %226, %215, %227 : vector<32x32xi1>, vector<32x32xf32>
    %c30_i32 = arith.constant 30 : i32
    %229 = tpu.dynamic_rotate %128 by %c30_i32 dim 0 : vector<32x32xf32>, i32 -> vector<32x32xf32>
    %c2_i32_123 = arith.constant 2 : i32
    %230 = vector.broadcast %c2_i32_123 : i32 to vector<32x1xi32>
    %231 = arith.addi %145, %230 : vector<32x1xi32>
    %c0_i32_124 = arith.constant 0 : i32
    %232 = vector.broadcast %c0_i32_124 : i32 to vector<32x1xi32>
    %233 = arith.cmpi sge, %231, %232 : vector<32x1xi32>
    %c2_i32_125 = arith.constant 2 : i32
    %234 = vector.broadcast %c2_i32_125 : i32 to vector<32x1xi32>
    %235 = arith.addi %145, %234 : vector<32x1xi32>
    %c32_i32_126 = arith.constant 32 : i32
    %236 = vector.broadcast %c32_i32_126 : i32 to vector<32x1xi32>
    %237 = arith.cmpi slt, %235, %236 : vector<32x1xi32>
    %238 = arith.andi %233, %237 : vector<32x1xi1>
    %cst_127 = arith.constant 0.000000e+00 : f32
    %239 = vector.shape_cast %238 : vector<32x1xi1> to vector<32x1xi1>
    %240 = vector.broadcast %239 : vector<32x1xi1> to vector<32x32xi1>
    %241 = vector.broadcast %cst_127 : f32 to vector<32x32xf32>
    %242 = arith.select %240, %229, %241 : vector<32x32xi1>, vector<32x32xf32>
    %c29_i32 = arith.constant 29 : i32
    %243 = tpu.dynamic_rotate %128 by %c29_i32 dim 0 : vector<32x32xf32>, i32 -> vector<32x32xf32>
    %c3_i32_128 = arith.constant 3 : i32
    %244 = vector.broadcast %c3_i32_128 : i32 to vector<32x1xi32>
    %245 = arith.addi %145, %244 : vector<32x1xi32>
    %c0_i32_129 = arith.constant 0 : i32
    %246 = vector.broadcast %c0_i32_129 : i32 to vector<32x1xi32>
    %247 = arith.cmpi sge, %245, %246 : vector<32x1xi32>
    %c3_i32_130 = arith.constant 3 : i32
    %248 = vector.broadcast %c3_i32_130 : i32 to vector<32x1xi32>
    %249 = arith.addi %145, %248 : vector<32x1xi32>
    %c32_i32_131 = arith.constant 32 : i32
    %250 = vector.broadcast %c32_i32_131 : i32 to vector<32x1xi32>
    %251 = arith.cmpi slt, %249, %250 : vector<32x1xi32>
    %252 = arith.andi %247, %251 : vector<32x1xi1>
    %cst_132 = arith.constant 0.000000e+00 : f32
    %253 = vector.shape_cast %252 : vector<32x1xi1> to vector<32x1xi1>
    %254 = vector.broadcast %253 : vector<32x1xi1> to vector<32x32xi1>
    %255 = vector.broadcast %cst_132 : f32 to vector<32x32xf32>
    %256 = arith.select %254, %243, %255 : vector<32x32xi1>, vector<32x32xf32>
    %c28_i32 = arith.constant 28 : i32
    %257 = tpu.dynamic_rotate %128 by %c28_i32 dim 0 : vector<32x32xf32>, i32 -> vector<32x32xf32>
    %c4_i32_133 = arith.constant 4 : i32
    %258 = vector.broadcast %c4_i32_133 : i32 to vector<32x1xi32>
    %259 = arith.addi %145, %258 : vector<32x1xi32>
    %c0_i32_134 = arith.constant 0 : i32
    %260 = vector.broadcast %c0_i32_134 : i32 to vector<32x1xi32>
    %261 = arith.cmpi sge, %259, %260 : vector<32x1xi32>
    %c4_i32_135 = arith.constant 4 : i32
    %262 = vector.broadcast %c4_i32_135 : i32 to vector<32x1xi32>
    %263 = arith.addi %145, %262 : vector<32x1xi32>
    %c32_i32_136 = arith.constant 32 : i32
    %264 = vector.broadcast %c32_i32_136 : i32 to vector<32x1xi32>
    %265 = arith.cmpi slt, %263, %264 : vector<32x1xi32>
    %266 = arith.andi %261, %265 : vector<32x1xi1>
    %cst_137 = arith.constant 0.000000e+00 : f32
    %267 = vector.shape_cast %266 : vector<32x1xi1> to vector<32x1xi1>
    %268 = vector.broadcast %267 : vector<32x1xi1> to vector<32x32xi1>
    %269 = vector.broadcast %cst_137 : f32 to vector<32x32xf32>
    %270 = arith.select %268, %257, %269 : vector<32x32xi1>, vector<32x32xf32>
    %271 = tpu.concatenate %159, %173, %187, %201, %214, %228, %242, %256, %270 in 1 : vector<32x32xf32>, vector<32x32xf32>, vector<32x32xf32>, vector<32x32xf32>, vector<32x32xf32>, vector<32x32xf32>, vector<32x32xf32>, vector<32x32xf32>, vector<32x32xf32> -> vector<32x288xf32>
    %272 = arith.truncf %271 : vector<32x288xf32> to vector<32x288xbf16>
    %c0_138 = arith.constant 0 : index
    %c0_139 = arith.constant 0 : index
    %c0_140 = arith.constant 0 : index
    %273 = vector.load %arg14[%c0_138, %c0_139, %c0_140] : memref<2x288x64xbf16, #tpu.memory_space<vmem>>, vector<1x288x64xbf16>
    %274 = vector.shape_cast %273 : vector<1x288x64xbf16> to vector<288x64xbf16>
    %cst_141 = arith.constant dense<0.000000e+00> : vector<32x64xf32>
    %275 = tpu.matmul %272, %274, %cst_141 {dimension_numbers = #tpu.dot_dimension_numbers<[1], [0], [0], [1], [0, 0, 1, 1], [], []>} : vector<32x288xbf16>, vector<288x64xbf16>, vector<32x64xf32> -> vector<32x64xf32>
    %c0_142 = arith.constant 0 : index
    %c0_143 = arith.constant 0 : index
    %c0_144 = arith.constant 0 : index
    %276 = vector.load %arg15[%c0_142, %c0_143, %c0_144] : memref<2x1x64xf32, #tpu.memory_space<vmem>>, vector<1x1x64xf32>
    %277 = vector.shape_cast %276 : vector<1x1x64xf32> to vector<1x64xf32>
    %278 = vector.broadcast %277 : vector<1x64xf32> to vector<32x64xf32>
    %279 = arith.addf %275, %278 : vector<32x64xf32>
    %cst_145 = arith.constant 0.000000e+00 : f32
    %280 = vector.broadcast %cst_145 : f32 to vector<32x64xf32>
    %281 = arith.maximumf %279, %280 : vector<32x64xf32>
    %282 = arith.truncf %281 : vector<32x64xf32> to vector<32x64xbf16>
    %c0_146 = arith.constant 0 : index
    %c0_147 = arith.constant 0 : index
    %c0_148 = arith.constant 0 : index
    %283 = vector.load %arg16[%c0_146, %c0_147, %c0_148] : memref<2x64x32xbf16, #tpu.memory_space<vmem>>, vector<1x64x32xbf16>
    %284 = vector.shape_cast %283 : vector<1x64x32xbf16> to vector<64x32xbf16>
    %cst_149 = arith.constant dense<0.000000e+00> : vector<32x32xf32>
    %285 = tpu.matmul %282, %284, %cst_149 {dimension_numbers = #tpu.dot_dimension_numbers<[1], [0], [0], [1], [0, 0, 1, 1], [], []>} : vector<32x64xbf16>, vector<64x32xbf16>, vector<32x32xf32> -> vector<32x32xf32>
    %c0_150 = arith.constant 0 : index
    %c0_151 = arith.constant 0 : index
    %c0_152 = arith.constant 0 : index
    %286 = vector.load %arg17[%c0_150, %c0_151, %c0_152] : memref<2x1x32xf32, #tpu.memory_space<vmem>>, vector<1x1x32xf32>
    %287 = vector.shape_cast %286 : vector<1x1x32xf32> to vector<1x32xf32>
    %288 = vector.broadcast %287 : vector<1x32xf32> to vector<32x32xf32>
    %289 = arith.addf %285, %288 : vector<32x32xf32>
    %290 = arith.addf %289, %128 : vector<32x32xf32>
    %c0_153 = arith.constant 0 : index
    %c0_154 = arith.constant 0 : index
    %c0_155 = arith.constant 0 : index
    %291 = vector.load %arg18[%c0_153, %c0_154, %c0_155] : memref<2x1x32xf32, #tpu.memory_space<vmem>>, vector<1x1x32xf32>
    %292 = vector.shape_cast %291 : vector<1x1x32xf32> to vector<1x32xf32>
    %c0_156 = arith.constant 0 : index
    %c0_157 = arith.constant 0 : index
    %c0_158 = arith.constant 0 : index
    %293 = vector.load %arg19[%c0_156, %c0_157, %c0_158] : memref<2x1x32xf32, #tpu.memory_space<vmem>>, vector<1x1x32xf32>
    %294 = vector.shape_cast %293 : vector<1x1x32xf32> to vector<1x32xf32>
    %cst_159 = arith.constant dense<0.000000e+00> : vector<32xf32>
    %295 = vector.multi_reduction <add>, %290, %cst_159 [1] : vector<32x32xf32> to vector<32xf32>
    %296 = vector.shape_cast %295 : vector<32xf32> to vector<32x1xf32>
    %cst_160 = arith.constant 3.200000e+01 : f32
    %297 = vector.broadcast %cst_160 : f32 to vector<32x1xf32>
    %298 = arith.divf %296, %297 : vector<32x1xf32>
    %299 = vector.broadcast %298 : vector<32x1xf32> to vector<32x32xf32>
    %300 = arith.subf %290, %299 : vector<32x32xf32>
    %301 = arith.mulf %300, %300 : vector<32x32xf32>
    %cst_161 = arith.constant dense<0.000000e+00> : vector<32xf32>
    %302 = vector.multi_reduction <add>, %301, %cst_161 [1] : vector<32x32xf32> to vector<32xf32>
    %303 = vector.shape_cast %302 : vector<32xf32> to vector<32x1xf32>
    %cst_162 = arith.constant 3.200000e+01 : f32
    %304 = vector.broadcast %cst_162 : f32 to vector<32x1xf32>
    %305 = arith.divf %303, %304 : vector<32x1xf32>
    %306 = vector.broadcast %298 : vector<32x1xf32> to vector<32x32xf32>
    %307 = arith.subf %290, %306 : vector<32x32xf32>
    %cst_163 = arith.constant 9.99999974E-6 : f32
    %308 = vector.broadcast %cst_163 : f32 to vector<32x1xf32>
    %309 = arith.addf %305, %308 : vector<32x1xf32>
    %310 = math.rsqrt %309 : vector<32x1xf32>
    %311 = vector.broadcast %310 : vector<32x1xf32> to vector<32x32xf32>
    %312 = arith.mulf %307, %311 : vector<32x32xf32>
    %313 = vector.broadcast %292 : vector<1x32xf32> to vector<32x32xf32>
    %314 = arith.mulf %312, %313 : vector<32x32xf32>
    %315 = vector.broadcast %294 : vector<1x32xf32> to vector<32x32xf32>
    %316 = arith.addf %314, %315 : vector<32x32xf32>
    %317 = vector.broadcast %3 : vector<32x1xf32> to vector<32x32xf32>
    %318 = arith.mulf %316, %317 : vector<32x32xf32>
    %319 = arith.truncf %318 : vector<32x32xf32> to vector<32x32xbf16>
    %cst_164 = arith.constant 0.000000e+00 : f32
    %320 = vector.broadcast %cst_164 : f32 to vector<32x32xf32>
    %c1_165 = arith.constant 1 : index
    %c0_166 = arith.constant 0 : index
    %c0_167 = arith.constant 0 : index
    %321 = vector.load %arg11[%c1_165, %c0_166, %c0_167] : memref<2x1x32xf32, #tpu.memory_space<vmem>>, vector<1x1x32xf32>
    %322 = vector.shape_cast %321 : vector<1x1x32xf32> to vector<1x32xf32>
    %323 = vector.broadcast %322 : vector<1x32xf32> to vector<32x32xf32>
    %324 = arith.addf %320, %323 : vector<32x32xf32>
    %c1_168 = arith.constant 1 : index
    %c0_169 = arith.constant 0 : index
    %c0_170 = arith.constant 0 : index
    %c0_171 = arith.constant 0 : index
    %325 = vector.load %arg4[%c1_168, %c0_169, %c0_170, %c0_171] : memref<2x2x32x16xbf16, #tpu.memory_space<vmem>>, vector<1x1x32x16xbf16>
    %326 = vector.shape_cast %325 : vector<1x1x32x16xbf16> to vector<32x16xbf16>
    %cst_172 = arith.constant dense<0.000000e+00> : vector<32x16xf32>
    %327 = tpu.matmul %319, %326, %cst_172 {dimension_numbers = #tpu.dot_dimension_numbers<[1], [0], [0], [1], [0, 0, 1, 1], [], []>} : vector<32x32xbf16>, vector<32x16xbf16>, vector<32x16xf32> -> vector<32x16xf32>
    %c1_173 = arith.constant 1 : index
    %c0_174 = arith.constant 0 : index
    %c0_175 = arith.constant 0 : index
    %c0_176 = arith.constant 0 : index
    %328 = vector.load %arg5[%c1_173, %c0_174, %c0_175, %c0_176] : memref<2x2x1x16xf32, #tpu.memory_space<vmem>>, vector<1x1x1x16xf32>
    %329 = vector.shape_cast %328 : vector<1x1x1x16xf32> to vector<1x16xf32>
    %330 = vector.broadcast %329 : vector<1x16xf32> to vector<32x16xf32>
    %331 = arith.addf %327, %330 : vector<32x16xf32>
    %c1_177 = arith.constant 1 : index
    %c0_178 = arith.constant 0 : index
    %c0_179 = arith.constant 0 : index
    %c0_180 = arith.constant 0 : index
    %332 = vector.load %arg6[%c1_177, %c0_178, %c0_179, %c0_180] : memref<2x2x32x16xbf16, #tpu.memory_space<vmem>>, vector<1x1x32x16xbf16>
    %333 = vector.shape_cast %332 : vector<1x1x32x16xbf16> to vector<32x16xbf16>
    %cst_181 = arith.constant dense<0.000000e+00> : vector<32x16xf32>
    %334 = tpu.matmul %319, %333, %cst_181 {dimension_numbers = #tpu.dot_dimension_numbers<[1], [0], [0], [1], [0, 0, 1, 1], [], []>} : vector<32x32xbf16>, vector<32x16xbf16>, vector<32x16xf32> -> vector<32x16xf32>
    %c1_182 = arith.constant 1 : index
    %c0_183 = arith.constant 0 : index
    %c0_184 = arith.constant 0 : index
    %c0_185 = arith.constant 0 : index
    %335 = vector.load %arg7[%c1_182, %c0_183, %c0_184, %c0_185] : memref<2x2x1x16xf32, #tpu.memory_space<vmem>>, vector<1x1x1x16xf32>
    %336 = vector.shape_cast %335 : vector<1x1x1x16xf32> to vector<1x16xf32>
    %337 = vector.broadcast %336 : vector<1x16xf32> to vector<32x16xf32>
    %338 = arith.addf %334, %337 : vector<32x16xf32>
    %c1_186 = arith.constant 1 : index
    %c0_187 = arith.constant 0 : index
    %c0_188 = arith.constant 0 : index
    %c0_189 = arith.constant 0 : index
    %339 = vector.load %arg8[%c1_186, %c0_187, %c0_188, %c0_189] : memref<2x2x32x16xbf16, #tpu.memory_space<vmem>>, vector<1x1x32x16xbf16>
    %340 = vector.shape_cast %339 : vector<1x1x32x16xbf16> to vector<32x16xbf16>
    %cst_190 = arith.constant dense<0.000000e+00> : vector<32x16xf32>
    %341 = tpu.matmul %319, %340, %cst_190 {dimension_numbers = #tpu.dot_dimension_numbers<[1], [0], [0], [1], [0, 0, 1, 1], [], []>} : vector<32x32xbf16>, vector<32x16xbf16>, vector<32x16xf32> -> vector<32x16xf32>
    %c1_191 = arith.constant 1 : index
    %c0_192 = arith.constant 0 : index
    %c0_193 = arith.constant 0 : index
    %c0_194 = arith.constant 0 : index
    %342 = vector.load %arg9[%c1_191, %c0_192, %c0_193, %c0_194] : memref<2x2x1x16xf32, #tpu.memory_space<vmem>>, vector<1x1x1x16xf32>
    %343 = vector.shape_cast %342 : vector<1x1x1x16xf32> to vector<1x16xf32>
    %344 = vector.broadcast %343 : vector<1x16xf32> to vector<32x16xf32>
    %345 = arith.addf %341, %344 : vector<32x16xf32>
    %346 = arith.truncf %331 : vector<32x16xf32> to vector<32x16xbf16>
    %347 = arith.truncf %338 : vector<32x16xf32> to vector<32x16xbf16>
    %cst_195 = arith.constant dense<0.000000e+00> : vector<32x32xf32>
    %348 = tpu.matmul %346, %347, %cst_195 {dimension_numbers = #tpu.dot_dimension_numbers<[1], [1], [0], [0], [0, 0, 1, 0], [], []>} : vector<32x16xbf16>, vector<32x16xbf16>, vector<32x32xf32> -> vector<32x32xf32>
    %349 = vector.broadcast %5 : vector<1x32xf32> to vector<32x32xf32>
    %350 = arith.addf %348, %349 : vector<32x32xf32>
    %cst_196 = arith.constant dense<0xFF800000> : vector<32xf32>
    %351 = vector.multi_reduction <maximumf>, %350, %cst_196 [1] : vector<32x32xf32> to vector<32xf32>
    %352 = vector.shape_cast %351 : vector<32xf32> to vector<32x1xf32>
    %353 = vector.broadcast %352 : vector<32x1xf32> to vector<32x32xf32>
    %354 = arith.subf %350, %353 : vector<32x32xf32>
    %355 = math.exp %354 : vector<32x32xf32>
    %cst_197 = arith.constant dense<0.000000e+00> : vector<32xf32>
    %356 = vector.multi_reduction <add>, %355, %cst_197 [1] : vector<32x32xf32> to vector<32xf32>
    %357 = vector.shape_cast %356 : vector<32xf32> to vector<32x1xf32>
    %358 = tpu.reciprocal %357 {approx = true} : vector<32x1xf32> -> vector<32x1xf32>
    %359 = vector.broadcast %358 : vector<32x1xf32> to vector<32x32xf32>
    %360 = arith.mulf %355, %359 : vector<32x32xf32>
    %361 = arith.truncf %360 : vector<32x32xf32> to vector<32x32xbf16>
    %362 = arith.truncf %345 : vector<32x16xf32> to vector<32x16xbf16>
    %cst_198 = arith.constant dense<0.000000e+00> : vector<32x16xf32>
    %363 = tpu.matmul %361, %362, %cst_198 {dimension_numbers = #tpu.dot_dimension_numbers<[1], [0], [0], [1], [0, 0, 1, 1], [], []>} : vector<32x32xbf16>, vector<32x16xbf16>, vector<32x16xf32> -> vector<32x16xf32>
    %364 = arith.truncf %363 : vector<32x16xf32> to vector<32x16xbf16>
    %c1_199 = arith.constant 1 : index
    %c0_200 = arith.constant 0 : index
    %c0_201 = arith.constant 0 : index
    %c0_202 = arith.constant 0 : index
    %365 = vector.load %arg10[%c1_199, %c0_200, %c0_201, %c0_202] : memref<2x2x16x32xbf16, #tpu.memory_space<vmem>>, vector<1x1x16x32xbf16>
    %366 = vector.shape_cast %365 : vector<1x1x16x32xbf16> to vector<16x32xbf16>
    %cst_203 = arith.constant dense<0.000000e+00> : vector<32x32xf32>
    %367 = tpu.matmul %364, %366, %cst_203 {dimension_numbers = #tpu.dot_dimension_numbers<[1], [0], [0], [1], [0, 0, 1, 1], [], []>} : vector<32x16xbf16>, vector<16x32xbf16>, vector<32x32xf32> -> vector<32x32xf32>
    %368 = arith.addf %324, %367 : vector<32x32xf32>
    %c1_204 = arith.constant 1 : index
    %c1_205 = arith.constant 1 : index
    %c0_206 = arith.constant 0 : index
    %c0_207 = arith.constant 0 : index
    %369 = vector.load %arg4[%c1_204, %c1_205, %c0_206, %c0_207] : memref<2x2x32x16xbf16, #tpu.memory_space<vmem>>, vector<1x1x32x16xbf16>
    %370 = vector.shape_cast %369 : vector<1x1x32x16xbf16> to vector<32x16xbf16>
    %cst_208 = arith.constant dense<0.000000e+00> : vector<32x16xf32>
    %371 = tpu.matmul %319, %370, %cst_208 {dimension_numbers = #tpu.dot_dimension_numbers<[1], [0], [0], [1], [0, 0, 1, 1], [], []>} : vector<32x32xbf16>, vector<32x16xbf16>, vector<32x16xf32> -> vector<32x16xf32>
    %c1_209 = arith.constant 1 : index
    %c1_210 = arith.constant 1 : index
    %c0_211 = arith.constant 0 : index
    %c0_212 = arith.constant 0 : index
    %372 = vector.load %arg5[%c1_209, %c1_210, %c0_211, %c0_212] : memref<2x2x1x16xf32, #tpu.memory_space<vmem>>, vector<1x1x1x16xf32>
    %373 = vector.shape_cast %372 : vector<1x1x1x16xf32> to vector<1x16xf32>
    %374 = vector.broadcast %373 : vector<1x16xf32> to vector<32x16xf32>
    %375 = arith.addf %371, %374 : vector<32x16xf32>
    %c1_213 = arith.constant 1 : index
    %c1_214 = arith.constant 1 : index
    %c0_215 = arith.constant 0 : index
    %c0_216 = arith.constant 0 : index
    %376 = vector.load %arg6[%c1_213, %c1_214, %c0_215, %c0_216] : memref<2x2x32x16xbf16, #tpu.memory_space<vmem>>, vector<1x1x32x16xbf16>
    %377 = vector.shape_cast %376 : vector<1x1x32x16xbf16> to vector<32x16xbf16>
    %cst_217 = arith.constant dense<0.000000e+00> : vector<32x16xf32>
    %378 = tpu.matmul %319, %377, %cst_217 {dimension_numbers = #tpu.dot_dimension_numbers<[1], [0], [0], [1], [0, 0, 1, 1], [], []>} : vector<32x32xbf16>, vector<32x16xbf16>, vector<32x16xf32> -> vector<32x16xf32>
    %c1_218 = arith.constant 1 : index
    %c1_219 = arith.constant 1 : index
    %c0_220 = arith.constant 0 : index
    %c0_221 = arith.constant 0 : index
    %379 = vector.load %arg7[%c1_218, %c1_219, %c0_220, %c0_221] : memref<2x2x1x16xf32, #tpu.memory_space<vmem>>, vector<1x1x1x16xf32>
    %380 = vector.shape_cast %379 : vector<1x1x1x16xf32> to vector<1x16xf32>
    %381 = vector.broadcast %380 : vector<1x16xf32> to vector<32x16xf32>
    %382 = arith.addf %378, %381 : vector<32x16xf32>
    %c1_222 = arith.constant 1 : index
    %c1_223 = arith.constant 1 : index
    %c0_224 = arith.constant 0 : index
    %c0_225 = arith.constant 0 : index
    %383 = vector.load %arg8[%c1_222, %c1_223, %c0_224, %c0_225] : memref<2x2x32x16xbf16, #tpu.memory_space<vmem>>, vector<1x1x32x16xbf16>
    %384 = vector.shape_cast %383 : vector<1x1x32x16xbf16> to vector<32x16xbf16>
    %cst_226 = arith.constant dense<0.000000e+00> : vector<32x16xf32>
    %385 = tpu.matmul %319, %384, %cst_226 {dimension_numbers = #tpu.dot_dimension_numbers<[1], [0], [0], [1], [0, 0, 1, 1], [], []>} : vector<32x32xbf16>, vector<32x16xbf16>, vector<32x16xf32> -> vector<32x16xf32>
    %c1_227 = arith.constant 1 : index
    %c1_228 = arith.constant 1 : index
    %c0_229 = arith.constant 0 : index
    %c0_230 = arith.constant 0 : index
    %386 = vector.load %arg9[%c1_227, %c1_228, %c0_229, %c0_230] : memref<2x2x1x16xf32, #tpu.memory_space<vmem>>, vector<1x1x1x16xf32>
    %387 = vector.shape_cast %386 : vector<1x1x1x16xf32> to vector<1x16xf32>
    %388 = vector.broadcast %387 : vector<1x16xf32> to vector<32x16xf32>
    %389 = arith.addf %385, %388 : vector<32x16xf32>
    %390 = arith.truncf %375 : vector<32x16xf32> to vector<32x16xbf16>
    %391 = arith.truncf %382 : vector<32x16xf32> to vector<32x16xbf16>
    %cst_231 = arith.constant dense<0.000000e+00> : vector<32x32xf32>
    %392 = tpu.matmul %390, %391, %cst_231 {dimension_numbers = #tpu.dot_dimension_numbers<[1], [1], [0], [0], [0, 0, 1, 0], [], []>} : vector<32x16xbf16>, vector<32x16xbf16>, vector<32x32xf32> -> vector<32x32xf32>
    %393 = vector.broadcast %5 : vector<1x32xf32> to vector<32x32xf32>
    %394 = arith.addf %392, %393 : vector<32x32xf32>
    %cst_232 = arith.constant dense<0xFF800000> : vector<32xf32>
    %395 = vector.multi_reduction <maximumf>, %394, %cst_232 [1] : vector<32x32xf32> to vector<32xf32>
    %396 = vector.shape_cast %395 : vector<32xf32> to vector<32x1xf32>
    %397 = vector.broadcast %396 : vector<32x1xf32> to vector<32x32xf32>
    %398 = arith.subf %394, %397 : vector<32x32xf32>
    %399 = math.exp %398 : vector<32x32xf32>
    %cst_233 = arith.constant dense<0.000000e+00> : vector<32xf32>
    %400 = vector.multi_reduction <add>, %399, %cst_233 [1] : vector<32x32xf32> to vector<32xf32>
    %401 = vector.shape_cast %400 : vector<32xf32> to vector<32x1xf32>
    %402 = tpu.reciprocal %401 {approx = true} : vector<32x1xf32> -> vector<32x1xf32>
    %403 = vector.broadcast %402 : vector<32x1xf32> to vector<32x32xf32>
    %404 = arith.mulf %399, %403 : vector<32x32xf32>
    %405 = arith.truncf %404 : vector<32x32xf32> to vector<32x32xbf16>
    %406 = arith.truncf %389 : vector<32x16xf32> to vector<32x16xbf16>
    %cst_234 = arith.constant dense<0.000000e+00> : vector<32x16xf32>
    %407 = tpu.matmul %405, %406, %cst_234 {dimension_numbers = #tpu.dot_dimension_numbers<[1], [0], [0], [1], [0, 0, 1, 1], [], []>} : vector<32x32xbf16>, vector<32x16xbf16>, vector<32x16xf32> -> vector<32x16xf32>
    %408 = arith.truncf %407 : vector<32x16xf32> to vector<32x16xbf16>
    %c1_235 = arith.constant 1 : index
    %c1_236 = arith.constant 1 : index
    %c0_237 = arith.constant 0 : index
    %c0_238 = arith.constant 0 : index
    %409 = vector.load %arg10[%c1_235, %c1_236, %c0_237, %c0_238] : memref<2x2x16x32xbf16, #tpu.memory_space<vmem>>, vector<1x1x16x32xbf16>
    %410 = vector.shape_cast %409 : vector<1x1x16x32xbf16> to vector<16x32xbf16>
    %cst_239 = arith.constant dense<0.000000e+00> : vector<32x32xf32>
    %411 = tpu.matmul %408, %410, %cst_239 {dimension_numbers = #tpu.dot_dimension_numbers<[1], [0], [0], [1], [0, 0, 1, 1], [], []>} : vector<32x16xbf16>, vector<16x32xbf16>, vector<32x32xf32> -> vector<32x32xf32>
    %412 = arith.addf %368, %411 : vector<32x32xf32>
    %413 = arith.addf %412, %318 : vector<32x32xf32>
    %c1_240 = arith.constant 1 : index
    %c0_241 = arith.constant 0 : index
    %c0_242 = arith.constant 0 : index
    %414 = vector.load %arg12[%c1_240, %c0_241, %c0_242] : memref<2x1x32xf32, #tpu.memory_space<vmem>>, vector<1x1x32xf32>
    %415 = vector.shape_cast %414 : vector<1x1x32xf32> to vector<1x32xf32>
    %c1_243 = arith.constant 1 : index
    %c0_244 = arith.constant 0 : index
    %c0_245 = arith.constant 0 : index
    %416 = vector.load %arg13[%c1_243, %c0_244, %c0_245] : memref<2x1x32xf32, #tpu.memory_space<vmem>>, vector<1x1x32xf32>
    %417 = vector.shape_cast %416 : vector<1x1x32xf32> to vector<1x32xf32>
    %cst_246 = arith.constant dense<0.000000e+00> : vector<32xf32>
    %418 = vector.multi_reduction <add>, %413, %cst_246 [1] : vector<32x32xf32> to vector<32xf32>
    %419 = vector.shape_cast %418 : vector<32xf32> to vector<32x1xf32>
    %cst_247 = arith.constant 3.200000e+01 : f32
    %420 = vector.broadcast %cst_247 : f32 to vector<32x1xf32>
    %421 = arith.divf %419, %420 : vector<32x1xf32>
    %422 = vector.broadcast %421 : vector<32x1xf32> to vector<32x32xf32>
    %423 = arith.subf %413, %422 : vector<32x32xf32>
    %424 = arith.mulf %423, %423 : vector<32x32xf32>
    %cst_248 = arith.constant dense<0.000000e+00> : vector<32xf32>
    %425 = vector.multi_reduction <add>, %424, %cst_248 [1] : vector<32x32xf32> to vector<32xf32>
    %426 = vector.shape_cast %425 : vector<32xf32> to vector<32x1xf32>
    %cst_249 = arith.constant 3.200000e+01 : f32
    %427 = vector.broadcast %cst_249 : f32 to vector<32x1xf32>
    %428 = arith.divf %426, %427 : vector<32x1xf32>
    %429 = vector.broadcast %421 : vector<32x1xf32> to vector<32x32xf32>
    %430 = arith.subf %413, %429 : vector<32x32xf32>
    %cst_250 = arith.constant 9.99999974E-6 : f32
    %431 = vector.broadcast %cst_250 : f32 to vector<32x1xf32>
    %432 = arith.addf %428, %431 : vector<32x1xf32>
    %433 = math.rsqrt %432 : vector<32x1xf32>
    %434 = vector.broadcast %433 : vector<32x1xf32> to vector<32x32xf32>
    %435 = arith.mulf %430, %434 : vector<32x32xf32>
    %436 = vector.broadcast %415 : vector<1x32xf32> to vector<32x32xf32>
    %437 = arith.mulf %435, %436 : vector<32x32xf32>
    %438 = vector.broadcast %417 : vector<1x32xf32> to vector<32x32xf32>
    %439 = arith.addf %437, %438 : vector<32x32xf32>
    %440 = vector.broadcast %3 : vector<32x1xf32> to vector<32x32xf32>
    %441 = arith.mulf %439, %440 : vector<32x32xf32>
    %442 = tpu.iota {dimensions = array<i32: 0>} : vector<32x1xi32>
    %c32_i32_251 = arith.constant 32 : i32
    %c0_i32_252 = arith.constant 0 : i32
    %443 = arith.cmpi eq, %c32_i32_251, %c0_i32_252 : i32
    %c1_i32_253 = arith.constant 1 : i32
    %444 = arith.select %443, %c1_i32_253, %c32_i32_251 : i32
    %445 = vector.broadcast %444 : i32 to vector<32x1xi32>
    %446 = arith.remsi %442, %445 : vector<32x1xi32>
    %c0_i32_254 = arith.constant 0 : i32
    %447 = vector.broadcast %c0_i32_254 : i32 to vector<32x1xi32>
    %448 = arith.cmpi ne, %446, %447 : vector<32x1xi32>
    %c0_i32_255 = arith.constant 0 : i32
    %449 = vector.broadcast %c0_i32_255 : i32 to vector<32x1xi32>
    %450 = arith.cmpi slt, %446, %449 : vector<32x1xi32>
    %c0_i32_256 = arith.constant 0 : i32
    %451 = arith.cmpi slt, %444, %c0_i32_256 : i32
    %452 = vector.broadcast %451 : i1 to vector<32x1xi1>
    %453 = vector.broadcast %452 : vector<32x1xi1> to vector<32x1xi1>
    %454 = arith.xori %450, %453 : vector<32x1xi1>
    %455 = arith.andi %454, %448 : vector<32x1xi1>
    %456 = vector.broadcast %444 : i32 to vector<32x1xi32>
    %457 = arith.addi %446, %456 : vector<32x1xi32>
    %458 = arith.select %455, %457, %446 : vector<32x1xi1>, vector<32x1xi32>
    %c4_i32_257 = arith.constant 4 : i32
    %459 = tpu.dynamic_rotate %441 by %c4_i32_257 dim 0 : vector<32x32xf32>, i32 -> vector<32x32xf32>
    %c-4_i32_258 = arith.constant -4 : i32
    %460 = vector.broadcast %c-4_i32_258 : i32 to vector<32x1xi32>
    %461 = arith.addi %458, %460 : vector<32x1xi32>
    %c0_i32_259 = arith.constant 0 : i32
    %462 = vector.broadcast %c0_i32_259 : i32 to vector<32x1xi32>
    %463 = arith.cmpi sge, %461, %462 : vector<32x1xi32>
    %c-4_i32_260 = arith.constant -4 : i32
    %464 = vector.broadcast %c-4_i32_260 : i32 to vector<32x1xi32>
    %465 = arith.addi %458, %464 : vector<32x1xi32>
    %c32_i32_261 = arith.constant 32 : i32
    %466 = vector.broadcast %c32_i32_261 : i32 to vector<32x1xi32>
    %467 = arith.cmpi slt, %465, %466 : vector<32x1xi32>
    %468 = arith.andi %463, %467 : vector<32x1xi1>
    %cst_262 = arith.constant 0.000000e+00 : f32
    %469 = vector.shape_cast %468 : vector<32x1xi1> to vector<32x1xi1>
    %470 = vector.broadcast %469 : vector<32x1xi1> to vector<32x32xi1>
    %471 = vector.broadcast %cst_262 : f32 to vector<32x32xf32>
    %472 = arith.select %470, %459, %471 : vector<32x32xi1>, vector<32x32xf32>
    %c3_i32_263 = arith.constant 3 : i32
    %473 = tpu.dynamic_rotate %441 by %c3_i32_263 dim 0 : vector<32x32xf32>, i32 -> vector<32x32xf32>
    %c-3_i32_264 = arith.constant -3 : i32
    %474 = vector.broadcast %c-3_i32_264 : i32 to vector<32x1xi32>
    %475 = arith.addi %458, %474 : vector<32x1xi32>
    %c0_i32_265 = arith.constant 0 : i32
    %476 = vector.broadcast %c0_i32_265 : i32 to vector<32x1xi32>
    %477 = arith.cmpi sge, %475, %476 : vector<32x1xi32>
    %c-3_i32_266 = arith.constant -3 : i32
    %478 = vector.broadcast %c-3_i32_266 : i32 to vector<32x1xi32>
    %479 = arith.addi %458, %478 : vector<32x1xi32>
    %c32_i32_267 = arith.constant 32 : i32
    %480 = vector.broadcast %c32_i32_267 : i32 to vector<32x1xi32>
    %481 = arith.cmpi slt, %479, %480 : vector<32x1xi32>
    %482 = arith.andi %477, %481 : vector<32x1xi1>
    %cst_268 = arith.constant 0.000000e+00 : f32
    %483 = vector.shape_cast %482 : vector<32x1xi1> to vector<32x1xi1>
    %484 = vector.broadcast %483 : vector<32x1xi1> to vector<32x32xi1>
    %485 = vector.broadcast %cst_268 : f32 to vector<32x32xf32>
    %486 = arith.select %484, %473, %485 : vector<32x32xi1>, vector<32x32xf32>
    %c2_i32_269 = arith.constant 2 : i32
    %487 = tpu.dynamic_rotate %441 by %c2_i32_269 dim 0 : vector<32x32xf32>, i32 -> vector<32x32xf32>
    %c-2_i32_270 = arith.constant -2 : i32
    %488 = vector.broadcast %c-2_i32_270 : i32 to vector<32x1xi32>
    %489 = arith.addi %458, %488 : vector<32x1xi32>
    %c0_i32_271 = arith.constant 0 : i32
    %490 = vector.broadcast %c0_i32_271 : i32 to vector<32x1xi32>
    %491 = arith.cmpi sge, %489, %490 : vector<32x1xi32>
    %c-2_i32_272 = arith.constant -2 : i32
    %492 = vector.broadcast %c-2_i32_272 : i32 to vector<32x1xi32>
    %493 = arith.addi %458, %492 : vector<32x1xi32>
    %c32_i32_273 = arith.constant 32 : i32
    %494 = vector.broadcast %c32_i32_273 : i32 to vector<32x1xi32>
    %495 = arith.cmpi slt, %493, %494 : vector<32x1xi32>
    %496 = arith.andi %491, %495 : vector<32x1xi1>
    %cst_274 = arith.constant 0.000000e+00 : f32
    %497 = vector.shape_cast %496 : vector<32x1xi1> to vector<32x1xi1>
    %498 = vector.broadcast %497 : vector<32x1xi1> to vector<32x32xi1>
    %499 = vector.broadcast %cst_274 : f32 to vector<32x32xf32>
    %500 = arith.select %498, %487, %499 : vector<32x32xi1>, vector<32x32xf32>
    %c1_i32_275 = arith.constant 1 : i32
    %501 = tpu.dynamic_rotate %441 by %c1_i32_275 dim 0 : vector<32x32xf32>, i32 -> vector<32x32xf32>
    %c-1_i32_276 = arith.constant -1 : i32
    %502 = vector.broadcast %c-1_i32_276 : i32 to vector<32x1xi32>
    %503 = arith.addi %458, %502 : vector<32x1xi32>
    %c0_i32_277 = arith.constant 0 : i32
    %504 = vector.broadcast %c0_i32_277 : i32 to vector<32x1xi32>
    %505 = arith.cmpi sge, %503, %504 : vector<32x1xi32>
    %c-1_i32_278 = arith.constant -1 : i32
    %506 = vector.broadcast %c-1_i32_278 : i32 to vector<32x1xi32>
    %507 = arith.addi %458, %506 : vector<32x1xi32>
    %c32_i32_279 = arith.constant 32 : i32
    %508 = vector.broadcast %c32_i32_279 : i32 to vector<32x1xi32>
    %509 = arith.cmpi slt, %507, %508 : vector<32x1xi32>
    %510 = arith.andi %505, %509 : vector<32x1xi1>
    %cst_280 = arith.constant 0.000000e+00 : f32
    %511 = vector.shape_cast %510 : vector<32x1xi1> to vector<32x1xi1>
    %512 = vector.broadcast %511 : vector<32x1xi1> to vector<32x32xi1>
    %513 = vector.broadcast %cst_280 : f32 to vector<32x32xf32>
    %514 = arith.select %512, %501, %513 : vector<32x32xi1>, vector<32x32xf32>
    %c0_i32_281 = arith.constant 0 : i32
    %515 = vector.broadcast %c0_i32_281 : i32 to vector<32x1xi32>
    %516 = arith.addi %458, %515 : vector<32x1xi32>
    %c0_i32_282 = arith.constant 0 : i32
    %517 = vector.broadcast %c0_i32_282 : i32 to vector<32x1xi32>
    %518 = arith.cmpi sge, %516, %517 : vector<32x1xi32>
    %c0_i32_283 = arith.constant 0 : i32
    %519 = vector.broadcast %c0_i32_283 : i32 to vector<32x1xi32>
    %520 = arith.addi %458, %519 : vector<32x1xi32>
    %c32_i32_284 = arith.constant 32 : i32
    %521 = vector.broadcast %c32_i32_284 : i32 to vector<32x1xi32>
    %522 = arith.cmpi slt, %520, %521 : vector<32x1xi32>
    %523 = arith.andi %518, %522 : vector<32x1xi1>
    %cst_285 = arith.constant 0.000000e+00 : f32
    %524 = vector.shape_cast %523 : vector<32x1xi1> to vector<32x1xi1>
    %525 = vector.broadcast %524 : vector<32x1xi1> to vector<32x32xi1>
    %526 = vector.broadcast %cst_285 : f32 to vector<32x32xf32>
    %527 = arith.select %525, %441, %526 : vector<32x32xi1>, vector<32x32xf32>
    %c31_i32_286 = arith.constant 31 : i32
    %528 = tpu.dynamic_rotate %441 by %c31_i32_286 dim 0 : vector<32x32xf32>, i32 -> vector<32x32xf32>
    %c1_i32_287 = arith.constant 1 : i32
    %529 = vector.broadcast %c1_i32_287 : i32 to vector<32x1xi32>
    %530 = arith.addi %458, %529 : vector<32x1xi32>
    %c0_i32_288 = arith.constant 0 : i32
    %531 = vector.broadcast %c0_i32_288 : i32 to vector<32x1xi32>
    %532 = arith.cmpi sge, %530, %531 : vector<32x1xi32>
    %c1_i32_289 = arith.constant 1 : i32
    %533 = vector.broadcast %c1_i32_289 : i32 to vector<32x1xi32>
    %534 = arith.addi %458, %533 : vector<32x1xi32>
    %c32_i32_290 = arith.constant 32 : i32
    %535 = vector.broadcast %c32_i32_290 : i32 to vector<32x1xi32>
    %536 = arith.cmpi slt, %534, %535 : vector<32x1xi32>
    %537 = arith.andi %532, %536 : vector<32x1xi1>
    %cst_291 = arith.constant 0.000000e+00 : f32
    %538 = vector.shape_cast %537 : vector<32x1xi1> to vector<32x1xi1>
    %539 = vector.broadcast %538 : vector<32x1xi1> to vector<32x32xi1>
    %540 = vector.broadcast %cst_291 : f32 to vector<32x32xf32>
    %541 = arith.select %539, %528, %540 : vector<32x32xi1>, vector<32x32xf32>
    %c30_i32_292 = arith.constant 30 : i32
    %542 = tpu.dynamic_rotate %441 by %c30_i32_292 dim 0 : vector<32x32xf32>, i32 -> vector<32x32xf32>
    %c2_i32_293 = arith.constant 2 : i32
    %543 = vector.broadcast %c2_i32_293 : i32 to vector<32x1xi32>
    %544 = arith.addi %458, %543 : vector<32x1xi32>
    %c0_i32_294 = arith.constant 0 : i32
    %545 = vector.broadcast %c0_i32_294 : i32 to vector<32x1xi32>
    %546 = arith.cmpi sge, %544, %545 : vector<32x1xi32>
    %c2_i32_295 = arith.constant 2 : i32
    %547 = vector.broadcast %c2_i32_295 : i32 to vector<32x1xi32>
    %548 = arith.addi %458, %547 : vector<32x1xi32>
    %c32_i32_296 = arith.constant 32 : i32
    %549 = vector.broadcast %c32_i32_296 : i32 to vector<32x1xi32>
    %550 = arith.cmpi slt, %548, %549 : vector<32x1xi32>
    %551 = arith.andi %546, %550 : vector<32x1xi1>
    %cst_297 = arith.constant 0.000000e+00 : f32
    %552 = vector.shape_cast %551 : vector<32x1xi1> to vector<32x1xi1>
    %553 = vector.broadcast %552 : vector<32x1xi1> to vector<32x32xi1>
    %554 = vector.broadcast %cst_297 : f32 to vector<32x32xf32>
    %555 = arith.select %553, %542, %554 : vector<32x32xi1>, vector<32x32xf32>
    %c29_i32_298 = arith.constant 29 : i32
    %556 = tpu.dynamic_rotate %441 by %c29_i32_298 dim 0 : vector<32x32xf32>, i32 -> vector<32x32xf32>
    %c3_i32_299 = arith.constant 3 : i32
    %557 = vector.broadcast %c3_i32_299 : i32 to vector<32x1xi32>
    %558 = arith.addi %458, %557 : vector<32x1xi32>
    %c0_i32_300 = arith.constant 0 : i32
    %559 = vector.broadcast %c0_i32_300 : i32 to vector<32x1xi32>
    %560 = arith.cmpi sge, %558, %559 : vector<32x1xi32>
    %c3_i32_301 = arith.constant 3 : i32
    %561 = vector.broadcast %c3_i32_301 : i32 to vector<32x1xi32>
    %562 = arith.addi %458, %561 : vector<32x1xi32>
    %c32_i32_302 = arith.constant 32 : i32
    %563 = vector.broadcast %c32_i32_302 : i32 to vector<32x1xi32>
    %564 = arith.cmpi slt, %562, %563 : vector<32x1xi32>
    %565 = arith.andi %560, %564 : vector<32x1xi1>
    %cst_303 = arith.constant 0.000000e+00 : f32
    %566 = vector.shape_cast %565 : vector<32x1xi1> to vector<32x1xi1>
    %567 = vector.broadcast %566 : vector<32x1xi1> to vector<32x32xi1>
    %568 = vector.broadcast %cst_303 : f32 to vector<32x32xf32>
    %569 = arith.select %567, %556, %568 : vector<32x32xi1>, vector<32x32xf32>
    %c28_i32_304 = arith.constant 28 : i32
    %570 = tpu.dynamic_rotate %441 by %c28_i32_304 dim 0 : vector<32x32xf32>, i32 -> vector<32x32xf32>
    %c4_i32_305 = arith.constant 4 : i32
    %571 = vector.broadcast %c4_i32_305 : i32 to vector<32x1xi32>
    %572 = arith.addi %458, %571 : vector<32x1xi32>
    %c0_i32_306 = arith.constant 0 : i32
    %573 = vector.broadcast %c0_i32_306 : i32 to vector<32x1xi32>
    %574 = arith.cmpi sge, %572, %573 : vector<32x1xi32>
    %c4_i32_307 = arith.constant 4 : i32
    %575 = vector.broadcast %c4_i32_307 : i32 to vector<32x1xi32>
    %576 = arith.addi %458, %575 : vector<32x1xi32>
    %c32_i32_308 = arith.constant 32 : i32
    %577 = vector.broadcast %c32_i32_308 : i32 to vector<32x1xi32>
    %578 = arith.cmpi slt, %576, %577 : vector<32x1xi32>
    %579 = arith.andi %574, %578 : vector<32x1xi1>
    %cst_309 = arith.constant 0.000000e+00 : f32
    %580 = vector.shape_cast %579 : vector<32x1xi1> to vector<32x1xi1>
    %581 = vector.broadcast %580 : vector<32x1xi1> to vector<32x32xi1>
    %582 = vector.broadcast %cst_309 : f32 to vector<32x32xf32>
    %583 = arith.select %581, %570, %582 : vector<32x32xi1>, vector<32x32xf32>
    %584 = tpu.concatenate %472, %486, %500, %514, %527, %541, %555, %569, %583 in 1 : vector<32x32xf32>, vector<32x32xf32>, vector<32x32xf32>, vector<32x32xf32>, vector<32x32xf32>, vector<32x32xf32>, vector<32x32xf32>, vector<32x32xf32>, vector<32x32xf32> -> vector<32x288xf32>
    %585 = arith.truncf %584 : vector<32x288xf32> to vector<32x288xbf16>
    %c1_310 = arith.constant 1 : index
    %c0_311 = arith.constant 0 : index
    %c0_312 = arith.constant 0 : index
    %586 = vector.load %arg14[%c1_310, %c0_311, %c0_312] : memref<2x288x64xbf16, #tpu.memory_space<vmem>>, vector<1x288x64xbf16>
    %587 = vector.shape_cast %586 : vector<1x288x64xbf16> to vector<288x64xbf16>
    %cst_313 = arith.constant dense<0.000000e+00> : vector<32x64xf32>
    %588 = tpu.matmul %585, %587, %cst_313 {dimension_numbers = #tpu.dot_dimension_numbers<[1], [0], [0], [1], [0, 0, 1, 1], [], []>} : vector<32x288xbf16>, vector<288x64xbf16>, vector<32x64xf32> -> vector<32x64xf32>
    %c1_314 = arith.constant 1 : index
    %c0_315 = arith.constant 0 : index
    %c0_316 = arith.constant 0 : index
    %589 = vector.load %arg15[%c1_314, %c0_315, %c0_316] : memref<2x1x64xf32, #tpu.memory_space<vmem>>, vector<1x1x64xf32>
    %590 = vector.shape_cast %589 : vector<1x1x64xf32> to vector<1x64xf32>
    %591 = vector.broadcast %590 : vector<1x64xf32> to vector<32x64xf32>
    %592 = arith.addf %588, %591 : vector<32x64xf32>
    %cst_317 = arith.constant 0.000000e+00 : f32
    %593 = vector.broadcast %cst_317 : f32 to vector<32x64xf32>
    %594 = arith.maximumf %592, %593 : vector<32x64xf32>
    %595 = arith.truncf %594 : vector<32x64xf32> to vector<32x64xbf16>
    %c1_318 = arith.constant 1 : index
    %c0_319 = arith.constant 0 : index
    %c0_320 = arith.constant 0 : index
    %596 = vector.load %arg16[%c1_318, %c0_319, %c0_320] : memref<2x64x32xbf16, #tpu.memory_space<vmem>>, vector<1x64x32xbf16>
    %597 = vector.shape_cast %596 : vector<1x64x32xbf16> to vector<64x32xbf16>
    %cst_321 = arith.constant dense<0.000000e+00> : vector<32x32xf32>
    %598 = tpu.matmul %595, %597, %cst_321 {dimension_numbers = #tpu.dot_dimension_numbers<[1], [0], [0], [1], [0, 0, 1, 1], [], []>} : vector<32x64xbf16>, vector<64x32xbf16>, vector<32x32xf32> -> vector<32x32xf32>
    %c1_322 = arith.constant 1 : index
    %c0_323 = arith.constant 0 : index
    %c0_324 = arith.constant 0 : index
    %599 = vector.load %arg17[%c1_322, %c0_323, %c0_324] : memref<2x1x32xf32, #tpu.memory_space<vmem>>, vector<1x1x32xf32>
    %600 = vector.shape_cast %599 : vector<1x1x32xf32> to vector<1x32xf32>
    %601 = vector.broadcast %600 : vector<1x32xf32> to vector<32x32xf32>
    %602 = arith.addf %598, %601 : vector<32x32xf32>
    %603 = arith.addf %602, %441 : vector<32x32xf32>
    %c1_325 = arith.constant 1 : index
    %c0_326 = arith.constant 0 : index
    %c0_327 = arith.constant 0 : index
    %604 = vector.load %arg18[%c1_325, %c0_326, %c0_327] : memref<2x1x32xf32, #tpu.memory_space<vmem>>, vector<1x1x32xf32>
    %605 = vector.shape_cast %604 : vector<1x1x32xf32> to vector<1x32xf32>
    %c1_328 = arith.constant 1 : index
    %c0_329 = arith.constant 0 : index
    %c0_330 = arith.constant 0 : index
    %606 = vector.load %arg19[%c1_328, %c0_329, %c0_330] : memref<2x1x32xf32, #tpu.memory_space<vmem>>, vector<1x1x32xf32>
    %607 = vector.shape_cast %606 : vector<1x1x32xf32> to vector<1x32xf32>
    %cst_331 = arith.constant dense<0.000000e+00> : vector<32xf32>
    %608 = vector.multi_reduction <add>, %603, %cst_331 [1] : vector<32x32xf32> to vector<32xf32>
    %609 = vector.shape_cast %608 : vector<32xf32> to vector<32x1xf32>
    %cst_332 = arith.constant 3.200000e+01 : f32
    %610 = vector.broadcast %cst_332 : f32 to vector<32x1xf32>
    %611 = arith.divf %609, %610 : vector<32x1xf32>
    %612 = vector.broadcast %611 : vector<32x1xf32> to vector<32x32xf32>
    %613 = arith.subf %603, %612 : vector<32x32xf32>
    %614 = arith.mulf %613, %613 : vector<32x32xf32>
    %cst_333 = arith.constant dense<0.000000e+00> : vector<32xf32>
    %615 = vector.multi_reduction <add>, %614, %cst_333 [1] : vector<32x32xf32> to vector<32xf32>
    %616 = vector.shape_cast %615 : vector<32xf32> to vector<32x1xf32>
    %cst_334 = arith.constant 3.200000e+01 : f32
    %617 = vector.broadcast %cst_334 : f32 to vector<32x1xf32>
    %618 = arith.divf %616, %617 : vector<32x1xf32>
    %619 = vector.broadcast %611 : vector<32x1xf32> to vector<32x32xf32>
    %620 = arith.subf %603, %619 : vector<32x32xf32>
    %cst_335 = arith.constant 9.99999974E-6 : f32
    %621 = vector.broadcast %cst_335 : f32 to vector<32x1xf32>
    %622 = arith.addf %618, %621 : vector<32x1xf32>
    %623 = math.rsqrt %622 : vector<32x1xf32>
    %624 = vector.broadcast %623 : vector<32x1xf32> to vector<32x32xf32>
    %625 = arith.mulf %620, %624 : vector<32x32xf32>
    %626 = vector.broadcast %605 : vector<1x32xf32> to vector<32x32xf32>
    %627 = arith.mulf %625, %626 : vector<32x32xf32>
    %628 = vector.broadcast %607 : vector<1x32xf32> to vector<32x32xf32>
    %629 = arith.addf %627, %628 : vector<32x32xf32>
    %630 = vector.broadcast %3 : vector<32x1xf32> to vector<32x32xf32>
    %631 = arith.mulf %629, %630 : vector<32x32xf32>
    %632 = arith.truncf %631 : vector<32x32xf32> to vector<32x32xbf16>
    %c0_336 = arith.constant 0 : index
    %c0_337 = arith.constant 0 : index
    %633 = vector.load %arg20[%c0_336, %c0_337] : memref<32x128xbf16, #tpu.memory_space<vmem>>, vector<32x128xbf16>
    %cst_338 = arith.constant dense<0.000000e+00> : vector<32x128xf32>
    %634 = tpu.matmul %632, %633, %cst_338 {dimension_numbers = #tpu.dot_dimension_numbers<[1], [0], [0], [1], [0, 0, 1, 1], [], []>} : vector<32x32xbf16>, vector<32x128xbf16>, vector<32x128xf32> -> vector<32x128xf32>
    %c0_339 = arith.constant 0 : index
    %c0_340 = arith.constant 0 : index
    %635 = vector.load %arg21[%c0_339, %c0_340] : memref<1x128xf32, #tpu.memory_space<vmem>>, vector<1x128xf32>
    %636 = vector.broadcast %635 : vector<1x128xf32> to vector<32x128xf32>
    %637 = arith.addf %634, %636 : vector<32x128xf32>
    %c0_341 = arith.constant 0 : index
    %c0_342 = arith.constant 0 : index
    %c0_343 = arith.constant 0 : index
    %638 = vector.load %arg22[%c0_341, %c0_342, %c0_343] : memref<1x32x128xf32, #tpu.memory_space<vmem>>, vector<1x32x128xf32>
    %639 = vector.shape_cast %638 : vector<1x32x128xf32> to vector<32x128xf32>
    %640 = vector.shape_cast %637 : vector<32x128xf32> to vector<1x32x128xf32>
    tpu.vector_store %arg22[%c0_341, %c0_342, %c0_343], %640 {strides = array<i32>} : memref<1x32x128xf32, #tpu.memory_space<vmem>>, vector<1x32x128xf32>,
    return
  }
  func.func @transform_0(%arg0: i32) -> (i32, i32, i32) {
    %c0_i32 = arith.constant 0 : i32
    %c0_i32_0 = arith.constant 0 : i32
    %c0_i32_1 = arith.constant 0 : i32
    return %arg0, %c0_i32, %c0_i32_0 : i32, i32, i32
  }
  func.func @transform_1(%arg0: i32) -> (i32, i32, i32) {
    %c0_i32 = arith.constant 0 : i32
    %c0_i32_0 = arith.constant 0 : i32
    %c0_i32_1 = arith.constant 0 : i32
    return %arg0, %c0_i32, %c0_i32_0 : i32, i32, i32
  }
  func.func @transform_2(%arg0: i32) -> (i32, i32, i32) {
    %c0_i32 = arith.constant 0 : i32
    %c0_i32_0 = arith.constant 0 : i32
    %c0_i32_1 = arith.constant 0 : i32
    return %arg0, %c0_i32, %c0_i32_0 : i32, i32, i32
  }
  func.func @transform_3(%arg0: i32) -> (i32, i32, i32, i32) {
    %c0_i32 = arith.constant 0 : i32
    %c0_i32_0 = arith.constant 0 : i32
    %c0_i32_1 = arith.constant 0 : i32
    %c0_i32_2 = arith.constant 0 : i32
    %c0_i32_3 = arith.constant 0 : i32
    return %c0_i32, %c0_i32_0, %c0_i32_1, %c0_i32_2 : i32, i32, i32, i32
  }
  func.func @transform_4(%arg0: i32) -> (i32, i32, i32, i32) {
    %c0_i32 = arith.constant 0 : i32
    %c0_i32_0 = arith.constant 0 : i32
    %c0_i32_1 = arith.constant 0 : i32
    %c0_i32_2 = arith.constant 0 : i32
    %c0_i32_3 = arith.constant 0 : i32
    return %c0_i32, %c0_i32_0, %c0_i32_1, %c0_i32_2 : i32, i32, i32, i32
  }
  func.func @transform_5(%arg0: i32) -> (i32, i32, i32, i32) {
    %c0_i32 = arith.constant 0 : i32
    %c0_i32_0 = arith.constant 0 : i32
    %c0_i32_1 = arith.constant 0 : i32
    %c0_i32_2 = arith.constant 0 : i32
    %c0_i32_3 = arith.constant 0 : i32
    return %c0_i32, %c0_i32_0, %c0_i32_1, %c0_i32_2 : i32, i32, i32, i32
  }
  func.func @transform_6(%arg0: i32) -> (i32, i32, i32, i32) {
    %c0_i32 = arith.constant 0 : i32
    %c0_i32_0 = arith.constant 0 : i32
    %c0_i32_1 = arith.constant 0 : i32
    %c0_i32_2 = arith.constant 0 : i32
    %c0_i32_3 = arith.constant 0 : i32
    return %c0_i32, %c0_i32_0, %c0_i32_1, %c0_i32_2 : i32, i32, i32, i32
  }
  func.func @transform_7(%arg0: i32) -> (i32, i32, i32, i32) {
    %c0_i32 = arith.constant 0 : i32
    %c0_i32_0 = arith.constant 0 : i32
    %c0_i32_1 = arith.constant 0 : i32
    %c0_i32_2 = arith.constant 0 : i32
    %c0_i32_3 = arith.constant 0 : i32
    return %c0_i32, %c0_i32_0, %c0_i32_1, %c0_i32_2 : i32, i32, i32, i32
  }
  func.func @transform_8(%arg0: i32) -> (i32, i32, i32, i32) {
    %c0_i32 = arith.constant 0 : i32
    %c0_i32_0 = arith.constant 0 : i32
    %c0_i32_1 = arith.constant 0 : i32
    %c0_i32_2 = arith.constant 0 : i32
    %c0_i32_3 = arith.constant 0 : i32
    return %c0_i32, %c0_i32_0, %c0_i32_1, %c0_i32_2 : i32, i32, i32, i32
  }
  func.func @transform_9(%arg0: i32) -> (i32, i32, i32, i32) {
    %c0_i32 = arith.constant 0 : i32
    %c0_i32_0 = arith.constant 0 : i32
    %c0_i32_1 = arith.constant 0 : i32
    %c0_i32_2 = arith.constant 0 : i32
    %c0_i32_3 = arith.constant 0 : i32
    return %c0_i32, %c0_i32_0, %c0_i32_1, %c0_i32_2 : i32, i32, i32, i32
  }
  func.func @transform_10(%arg0: i32) -> (i32, i32, i32) {
    %c0_i32 = arith.constant 0 : i32
    %c0_i32_0 = arith.constant 0 : i32
    %c0_i32_1 = arith.constant 0 : i32
    %c0_i32_2 = arith.constant 0 : i32
    return %c0_i32, %c0_i32_0, %c0_i32_1 : i32, i32, i32
  }
  func.func @transform_11(%arg0: i32) -> (i32, i32, i32) {
    %c0_i32 = arith.constant 0 : i32
    %c0_i32_0 = arith.constant 0 : i32
    %c0_i32_1 = arith.constant 0 : i32
    %c0_i32_2 = arith.constant 0 : i32
    return %c0_i32, %c0_i32_0, %c0_i32_1 : i32, i32, i32
  }
  func.func @transform_12(%arg0: i32) -> (i32, i32, i32) {
    %c0_i32 = arith.constant 0 : i32
    %c0_i32_0 = arith.constant 0 : i32
    %c0_i32_1 = arith.constant 0 : i32
    %c0_i32_2 = arith.constant 0 : i32
    return %c0_i32, %c0_i32_0, %c0_i32_1 : i32, i32, i32
  }
  func.func @transform_13(%arg0: i32) -> (i32, i32, i32) {
    %c0_i32 = arith.constant 0 : i32
    %c0_i32_0 = arith.constant 0 : i32
    %c0_i32_1 = arith.constant 0 : i32
    %c0_i32_2 = arith.constant 0 : i32
    return %c0_i32, %c0_i32_0, %c0_i32_1 : i32, i32, i32
  }
  func.func @transform_14(%arg0: i32) -> (i32, i32, i32) {
    %c0_i32 = arith.constant 0 : i32
    %c0_i32_0 = arith.constant 0 : i32
    %c0_i32_1 = arith.constant 0 : i32
    %c0_i32_2 = arith.constant 0 : i32
    return %c0_i32, %c0_i32_0, %c0_i32_1 : i32, i32, i32
  }
  func.func @transform_15(%arg0: i32) -> (i32, i32, i32) {
    %c0_i32 = arith.constant 0 : i32
    %c0_i32_0 = arith.constant 0 : i32
    %c0_i32_1 = arith.constant 0 : i32
    %c0_i32_2 = arith.constant 0 : i32
    return %c0_i32, %c0_i32_0, %c0_i32_1 : i32, i32, i32
  }
  func.func @transform_16(%arg0: i32) -> (i32, i32, i32) {
    %c0_i32 = arith.constant 0 : i32
    %c0_i32_0 = arith.constant 0 : i32
    %c0_i32_1 = arith.constant 0 : i32
    %c0_i32_2 = arith.constant 0 : i32
    return %c0_i32, %c0_i32_0, %c0_i32_1 : i32, i32, i32
  }
  func.func @transform_17(%arg0: i32) -> (i32, i32, i32) {
    %c0_i32 = arith.constant 0 : i32
    %c0_i32_0 = arith.constant 0 : i32
    %c0_i32_1 = arith.constant 0 : i32
    %c0_i32_2 = arith.constant 0 : i32
    return %c0_i32, %c0_i32_0, %c0_i32_1 : i32, i32, i32
  }
  func.func @transform_18(%arg0: i32) -> (i32, i32, i32) {
    %c0_i32 = arith.constant 0 : i32
    %c0_i32_0 = arith.constant 0 : i32
    %c0_i32_1 = arith.constant 0 : i32
    %c0_i32_2 = arith.constant 0 : i32
    return %c0_i32, %c0_i32_0, %c0_i32_1 : i32, i32, i32
  }
  func.func @transform_19(%arg0: i32) -> (i32, i32) {
    %c0_i32 = arith.constant 0 : i32
    %c0_i32_0 = arith.constant 0 : i32
    %c0_i32_1 = arith.constant 0 : i32
    return %c0_i32, %c0_i32_0 : i32, i32
  }
  func.func @transform_20(%arg0: i32) -> (i32, i32) {
    %c0_i32 = arith.constant 0 : i32
    %c0_i32_0 = arith.constant 0 : i32
    %c0_i32_1 = arith.constant 0 : i32
    return %c0_i32, %c0_i32_0 : i32, i32
  }
  func.func @transform_21(%arg0: i32) -> (i32, i32, i32) {
    %c0_i32 = arith.constant 0 : i32
    %c0_i32_0 = arith.constant 0 : i32
    %c0_i32_1 = arith.constant 0 : i32
    return %arg0, %c0_i32, %c0_i32_0 : i32, i32, i32
  }
}

</mosaic_0001>

<bundles_post_ra>
// kernel: custom-call.16
= control target key start
LH: loop header
LB: loop body
LE: loop exit
PB: predicated region body
PF: predicated region fallthrough
CT: control target
= control target key end

     0   :  { %s6_s0 = inlined_call_operand.vmem [shape: u32[2,8], index: 0, kind: output, shape index: {}]  }

// kernel: squeeze.27
= control target key start
LH: loop header
LB: loop body
LE: loop exit
PB: predicated region body
PF: predicated region fallthrough
CT: control target
= control target key end

     0   :  { %vm7_vm0 = vcmask 64512   ;;  %s39_s0 = inlined_call_operand.vmem [shape: f32[16], index: 0, kind: input, shape index: {}]   ;;  %s40_s1 = inlined_call_operand.vmem [shape: f32[2,8], index: 1, kind: output, shape index: {}]  }
   0x1   :  { %v4_v0 = vld [vmem:[%s39_s0] sm:$0x1]  ;;  %s22_s0 = smov 120  }
   0x2   :  { %5 = vst [vmem:[#allocation1] sm:$0x1] %v4_v0 }
   0x9   :  { %v9_v1 = vld [vmem:[#allocation1] sm:$0x1]  }
   0xa   :  { %v6_v2 = vld [vmem:[#allocation1] sm:$0x1]   ;;  %10 = vrot.lane.b32.xlu0 %v9_v1, %s22_s0 }
   0xb   :  { %8 = vst.msk [vmem:[#allocation0] sm:$0x1] %vm7_vm0, %v6_v2  }
  0x7c   :  { %v11_v3 = vpop.permute.xlu0 %10  }
  0x7d   :  { %14 = vst.msk [vmem:[#allocation0 + $0x1] sm:$0x1] %vm7_vm0, %v11_v3  }
  0x84   :  { %v17_v4 = vld [vmem:[#allocation0] sm:$0x3] }
  0x85   :  { %20 = vst [vmem:[%s40_s1] sm:$0x3] %v17_v4 }

// kernel: forward.4
= control target key start
LH: loop header
LB: loop body
LE: loop exit
PB: predicated region body
PF: predicated region fallthrough
CT: control target
= control target key end

     0   :  { %v46_v0 = vlaneseq  ;;  %s1471_s13 = smov 32   ;;  %s1472_s21 = smov 64   ;;  %vm139_vm6 = vcmask 261120   ;;  %vm142_vm7 = vcmask 523264   ;;  %vm198_vm8 = vcmask 785408   ;;  %s2016_s0 = inlined_call_operand.vmem [shape: f32[16,32], index: 0, kind: input, shape index: {}]   ;;  %s2017_s2 = inlined_call_operand.vmem [shape: bf16[3,96,32], index: 2, kind: input, shape index: {}]   ;;  %s2018_s3 = inlined_call_operand.vmem [shape: f32[3,1,32], index: 3, kind: input, shape index: {}]   ;;  %s2019_s4 = inlined_call_operand.vmem [shape: f32[3,1,32], index: 4, kind: input, shape index: {}]   ;;  %s2020_s5 = inlined_call_operand.vmem [shape: f32[3,1,32], index: 5, kind: input, shape index: {}]   ;;  %s2021_s7 = inlined_call_operand.vmem [shape: f32[3,1,32], index: 7, kind: input, shape index: {}]   ;;  %s2022_s6 = inlined_call_operand.vmem [shape: bf16[3,96,32], index: 6, kind: input, shape index: {}]   ;;  %s2023_s8 = inlined_call_operand.vmem [shape: f32[3,1,32], index: 8, kind: input, shape index: {}]   ;;  %s2024_s9 = inlined_call_operand.vmem [shape: f32[3,1,32], index: 9, kind: input, shape index: {}]   ;;  %s2025_s10 = inlined_call_operand.vmem [shape: f32[3,1,32], index: 10, kind: input, shape index: {}]   ;;  %s2026_s11 = inlined_call_operand.vmem [shape: f32[3,1,1], index: 11, kind: input, shape index: {}]   ;;  %s2027_s1 = inlined_call_operand.vmem [shape: f32[16,1], index: 1, kind: input, shape index: {}]   ;;  %s2028_s12 = inlined_call_operand.vmem [shape: f32[16,128], index: 12, kind: output, shape index: {}]  }
   0x1   :  { %v42_v1 = vld [vmem:[%s2016_s0] sm:$0xff]  ;;  %v43_v2 = vld [vmem:[%s2016_s0 + $0x8] sm:$0xff]  ;;  %v1357_v5 = vld [vmem:[%s2017_s2 + $0x58] sm:$0xff]  ;;  %s1474_s16 = smov 1   ;;  %s1475_s19 = smov 2  }
   0x2   :  { %v1345_v3 = vld [vmem:[%s2017_s2 + $0x28] sm:$0xff]  ;;  %v1381_v4 = vpack.i.bf16 %v43_v2, %v42_v1  ;;  %v105_v6 = vrot.slane %v43_v2, 1  ;;  %v104_v7 = vrot.slane %v42_v1, 1  ;;  %v1553_v8 = vshrl.u32 %v46_v0, 7  ;;  %v1344_v9 = vld [vmem:[%s2017_s2 + $0x20] sm:$0xff]  ;;  %519 = vmatpush.bf16.msra.mxu2 %v1357_v5  ;;  %v1356_v10 = vld [vmem:[%s2017_s2 + $0x50] sm:$0xff] }
   0x3   :  { %204 = vmatpush.bf16.msra.mxu0 %v1345_v3  ;;  %v1343_v16 = vld [vmem:[%s2017_s2 + $0x18] sm:$0xff]  ;;  %v1355_v17 = vld [vmem:[%s2017_s2 + $0x48] sm:$0xff]  ;;  %v1342_v21 = vld [vmem:[%s2017_s2 + $0x10] sm:$0xff]  ;;  %v74_v24 = vrot.slane %v43_v2, 7  ;;  %v73_v25 = vrot.slane %v42_v1, 7 }
   0x4   :  { %1382 = vrot.lane.b32.xlu0 %v1381_v4, %s1471_s13  ;;  %v48_v11 = vadd.s32 8, %v1553_v8  ;;  %v53_v12 = vand.u32 7, %v1553_v8  ;;  %vm106_vm0 = vcmp.lt.s32.totalorder %v1553_v8, 7  ;;  %vm75_vm3 = vcmp.lt.s32.totalorder %v1553_v8, 1  ;;  %v1341_v28 = vld [vmem:[%s2017_s2 + $0x8] sm:$0xff]  ;;  %v1354_v29 = vld [vmem:[%s2017_s2 + $0x40] sm:$0xff] }
   0x5   :  { %v107_v14 = vsel %vm106_vm0, %v104_v7, %v105_v6  ;;  %v108_v18 = vsel %vm106_vm0, %v105_v6, %v104_v7  ;;  %v76_v26 = vsel %vm75_vm3, %v73_v25, %v74_v24  ;;  %v77_v27 = vsel %vm75_vm3, %v74_v24, %v73_v25  ;;  %v1340_v30 = vld [vmem:[%s2017_s2] sm:$0xff]  ;;  %v1353_v31 = vld [vmem:[%s2017_s2 + $0x38] sm:$0xff]  ;;  %v1369_v32 = vld [vmem:[%s2017_s2 + $0x88] sm:$0xff] }
   0x6   :  { %v60_v13 = vand.u32 7, %v48_v11  ;;  %v1567_v15 = vadd.s32 1, %v53_v12  ;;  %520 = vmatpush.bf16.msra.mxu2 %v1356_v10  ;;  %v1352_v33 = vld [vmem:[%s2017_s2 + $0x30] sm:$0xff]  ;;  %v1368_v34 = vld [vmem:[%s2017_s2 + $0x80] sm:$0xff]  ;;  %v1367_v35 = vld [vmem:[%s2017_s2 + $0x78] sm:$0xff]  ;;  %v1627_v40 = vadd.s32 4294967295, %v53_v12 }
   0x7   :  { %205 = vmatpush.bf16.msra.mxu0 %v1344_v9  ;;  %v1366_v36 = vld [vmem:[%s2017_s2 + $0x70] sm:$0xff]  ;;  %v1365_v37 = vld [vmem:[%s2017_s2 + $0x68] sm:$0xff]  ;;  %v1364_v38 = vld [vmem:[%s2017_s2 + $0x60] sm:$0xff] }
   0x8   :  { %v1577_v19 = vadd.s32 1, %v60_v13  ;;  %vm113_vm1 = vcmp.lt.s32.totalorder %v1567_v15, 8  ;;  %v1629_v41 = vadd.s32 4294967295, %v60_v13  ;;  %vm80_vm4 = vcmp.ge.s32.totalorder %v1627_v40, 0  ;;  %v1421_v54 = vld [vmem:[%s2018_s3] ss:$0 sm:$0xff] }
   0x9   :  { %v121_v20 = vsel %vm113_vm1, %v107_v14, 0.0  ;;  %v90_v44 = vsel %vm80_vm4, %v77_v27, 0.0  ;;  %v1422_v58 = vld [vmem:[%s2018_s3 + $0x1] ss:$0 sm:$0xff]  ;;  %v1423_v4 = vld [vmem:[%s2018_s3 + $0x2] ss:$0 sm:$0xff] }
   0xa   :  { %vm114_vm2 = vcmp.lt.s32.totalorder %v1577_v19, 8  ;;  %521 = vmatpush.bf16.msra.mxu2 %v1355_v17  ;;  %vm81_vm5 = vcmp.ge.s32.totalorder %v1629_v41, 0  ;;  %v1350_v8 = vld [vmem:[%s2022_s6 + $0x20] sm:$0xff]  ;;  %v1349_v15 = vld [vmem:[%s2022_s6 + $0x18] sm:$0xff] }
   0xb   :  { %206 = vmatpush.bf16.msra.mxu0 %v1343_v16  ;;  %v122_v22 = vsel %vm114_vm2, %v108_v18, 0.0  ;;  %v91_v45 = vsel %vm81_vm5, %v76_v26, 0.0  ;;  %v1363_v19 = vld [vmem:[%s2022_s6 + $0x58] sm:$0xff]  ;;  %v1431_v40 = vld [vmem:[%s2021_s7 + $0x1] ss:$0 sm:$0xff] }
   0xc   :  { %v1386_v23 = vpack.i.bf16 %v122_v22, %v121_v20  ;;  %v1473_v20 = vmov 32.0   ;;  %685 = vmatpush.bf16.msra.mxu3 %v1363_v19 }
   0xd   :  { %1445 = vrcp.f32 %v1473_v20 }
   0xe   :  { %1387 = vrot.lane.b32.xlu0 %v1386_v23, %s1472_s21  ;;  %522 = vmatpush.bf16.msra.mxu2 %v1354_v29 }
   0xf   :  { %207 = vmatpush.bf16.msra.mxu0 %v1342_v21 }
  0x12   :  { %523 = vmatpush.bf16.msra.mxu2 %v1353_v31 }
  0x13   :  { %208 = vmatpush.bf16.msra.mxu0 %v1341_v28  ;;  %v1446_v21 = vpop.eup %1445 }
  0x14   :  { %v227_v22 = vmul.f32 32.0, %v1446_v21  ;;  %vm231_vm9 = vweird.f32 %v1446_v21 }
  0x16   :  { %524 = vmatpush.bf16.msra.mxu2 %v1352_v33  ;;  %v228_v23 = vsub.f32 1.0, %v227_v22 }
  0x17   :  { %209 = vmatpush.bf16.msra.mxu0 %v1340_v30 }
  0x18   :  { %v229_v24 = vmul.f32 %v1446_v21, %v228_v23 }
  0x1a   :  { %v230_v25 = vadd.f32 %v1446_v21, %v229_v24 }
  0x1b   :  { %835 = vmatpush.bf16.msrb.mxu0 %v1369_v32 }
  0x1c   :  { %v1659_v26 = vsel %vm231_vm9, %v1446_v21, %v230_v25 }
  0x1f   :  { %836 = vmatpush.bf16.msrb.mxu0 %v1368_v34 }
  0x23   :  { %837 = vmatpush.bf16.msrb.mxu0 %v1367_v35 }
  0x27   :  { %838 = vmatpush.bf16.msrb.mxu0 %v1366_v36 }
  0x2b   :  { %839 = vmatpush.bf16.msrb.mxu0 %v1365_v37 }
  0x2f   :  { %840 = vmatpush.bf16.msrb.mxu0 %v1364_v38 }
  0x76   :  { %v1383_v39 = vpop.permute.xlu0 %1382 }
  0x77   :  { %v1385_v42 = vunpack.i.h.bf16 %v1383_v39  ;;  %v1384_v43 = vunpack.i.l.bf16 %v1383_v39 }
  0x79   :  { %v140_v49 = vsel %vm139_vm6, %v90_v44, %v1384_v43  ;;  %v141_v50 = vsel %vm139_vm6, %v91_v45, %v1385_v42 }
  0x80   :  { %v1388_v46 = vpop.permute.xlu0 %1387 }
  0x81   :  { %v1390_v47 = vunpack.i.h.bf16 %v1388_v46  ;;  %v1389_v48 = vunpack.i.l.bf16 %v1388_v46 }
  0x83   :  { %v143_v51 = vsel %vm142_vm7, %v140_v49, %v1389_v48  ;;  %v144_v52 = vsel %vm142_vm7, %v141_v50, %v1390_v47 }
  0x84   :  { %v145_v53 = vpack.c.bf16 %v144_v52, %v143_v51 }
  0x86   :  { %1150 = vmatmul.msk.bf16.vlgmr.msra.gmra.mxu0 %vm198_vm8, %v145_v53  ;;  %1213 = vmatmul.msk.bf16.vlgmr.msra.gmra.mxu2 %vm198_vm8, %v145_v53 }
  0x96   :  { %1295 = vmatmul.msk.bf16.vlgmr.msrb.gmra.mxu0 %vm198_vm8, %v145_v53 }
 0x103   :  { %v211_v55 = vpop.f32.mrf.mxu0 }
 0x104   :  { %v212_v56 = vadd.f32 %v1421_v54, %v211_v55 }
 0x106   :  { %v216_v57 = vmax.f32 %v212_v56, 0.0 }
 0x108   :  { %v220_v59 = vsel %vm139_vm6, %v216_v57, 0.0 }
 0x109   :  { %v526_v60 = vpop.f32.mrf.mxu2  ;;  %221 = vadd.xlane.f32.xlu1 %v220_v59 }
 0x10a   :  { %v527_v61 = vadd.f32 %v1422_v58, %v526_v60 }
 0x10b   :  { %v213_v62 = vpop.f32.mrf.mxu0 }
 0x10c   :  { %v531_v63 = vmax.f32 %v527_v61, 0.0  ;;  %v214_v0 = vadd.f32 %v1421_v54, %v213_v62 }
 0x10e   :  { %v217_v1 = vmax.f32 %v214_v0, 0.0  ;;  %v537_v2 = vsel %vm139_vm6, %v531_v63, 0.0 }
 0x10f   :  { %538 = vadd.xlane.f32.xlu2 %v537_v2 }
 0x110   :  { %v223_v3 = vsel %vm139_vm6, %v217_v1, 0.0 }
 0x111   :  { %v528_v5 = vpop.f32.mrf.mxu2  ;;  %224 = vadd.xlane.f32.xlu1 %v223_v3 }
 0x112   :  { %v529_v6 = vadd.f32 %v1422_v58, %v528_v5 }
 0x113   :  { %v842_v7 = vpop.f32.mrf.mxu0 }
 0x114   :  { %v532_v9 = vmax.f32 %v529_v6, 0.0  ;;  %v843_v10 = vadd.f32 %v1423_v4, %v842_v7 }
 0x116   :  { %v847_v11 = vmax.f32 %v843_v10, 0.0  ;;  %v540_v12 = vsel %vm139_vm6, %v532_v9, 0.0 }
 0x117   :  { %541 = vadd.xlane.f32.xlu2 %v540_v12 }
 0x118   :  { %v853_v13 = vsel %vm139_vm6, %v847_v11, 0.0 }
 0x119   :  { %854 = vadd.xlane.f32.xlu0 %v853_v13 }
 0x11b   :  { %v844_v14 = vpop.f32.mrf.mxu0 }
 0x11c   :  { %v845_v16 = vadd.f32 %v1423_v4, %v844_v14 }
 0x11e   :  { %v848_v17 = vmax.f32 %v845_v16, 0.0 }
 0x120   :  { %v856_v18 = vsel %vm139_vm6, %v848_v17, 0.0 }
 0x121   :  { %857 = vadd.xlane.f32.xlu1 %v856_v18 }
 0x17c   :  { %v222_v27 = vpop.xlane.xlu1 %221 }
 0x17d   :  { %v233_v28 = vmul.f32 %v1659_v26, %v222_v27 }
 0x17f   :  { %v1662_v29 = vsub.f32 %v216_v57, %v233_v28 }
 0x181   :  { %v237_v30 = vmul.f32 %v1662_v29, %v1662_v29 }
 0x182   :  { %v539_v31 = vpop.xlane.xlu2 %538 }
 0x183   :  { %v543_v32 = vmul.f32 %v539_v31, %v1659_v26  ;;  %v239_v33 = vsel %vm139_vm6, %v237_v30, 0.0 }
 0x184   :  { %240 = vadd.xlane.f32.xlu2 %v239_v33  ;;  %v225_v34 = vpop.xlane.xlu1 %224  ;;  %v1424_v33 = vld [vmem:[%s2019_s4] ss:$0 sm:$0xff] }
 0x185   :  { %v1668_v35 = vsub.f32 %v531_v63, %v543_v32  ;;  %v234_v36 = vmul.f32 %v1659_v26, %v225_v34 }
 0x187   :  { %v1671_v37 = vsub.f32 %v217_v1, %v234_v36  ;;  %v547_v38 = vmul.f32 %v1668_v35, %v1668_v35 }
 0x189   :  { %v238_v39 = vmul.f32 %v1671_v37, %v1671_v37  ;;  %v549_v44 = vsel %vm139_vm6, %v547_v38, 0.0 }
 0x18a   :  { %v542_v42 = vpop.xlane.xlu2 %541 }
 0x18b   :  { %v544_v43 = vmul.f32 %v542_v42, %v1659_v26  ;;  %v242_v45 = vsel %vm139_vm6, %v238_v39, 0.0 }
 0x18c   :  { %v855_v46 = vpop.xlane.xlu0 %854  ;;  %550 = vadd.xlane.f32.xlu2 %v549_v44  ;;  %243 = vadd.xlane.f32.xlu1 %v242_v45 }
 0x18d   :  { %v1680_v47 = vsub.f32 %v532_v9, %v544_v43  ;;  %v859_v48 = vmul.f32 %v855_v46, %v1659_v26 }
 0x18f   :  { %v1683_v49 = vsub.f32 %v847_v11, %v859_v48  ;;  %v548_v50 = vmul.f32 %v1680_v47, %v1680_v47  ;;  %v1425_v48 = vld [vmem:[%s2020_s5] ss:$0 sm:$0xff] }
 0x191   :  { %v863_v51 = vmul.f32 %v1683_v49, %v1683_v49  ;;  %v552_v53 = vsel %vm139_vm6, %v548_v50, 0.0 }
 0x193   :  { %v865_v52 = vsel %vm139_vm6, %v863_v51, 0.0 }
 0x194   :  { %866 = vadd.xlane.f32.xlu2 %v865_v52  ;;  %553 = vadd.xlane.f32.xlu1 %v552_v53  ;;  %v858_v54 = vpop.xlane.xlu1 %857 }
 0x195   :  { %v860_v55 = vmul.f32 %v858_v54, %v1659_v26 }
 0x197   :  { %v1692_v56 = vsub.f32 %v848_v17, %v860_v55  ;;  %v1426_v55 = vld [vmem:[%s2019_s4 + $0x1] ss:$0 sm:$0xff] }
 0x199   :  { %v864_v57 = vmul.f32 %v1692_v56, %v1692_v56 }
 0x19b   :  { %v868_v58 = vsel %vm139_vm6, %v864_v57, 0.0 }
 0x19c   :  { %869 = vadd.xlane.f32.xlu1 %v868_v58 }
 0x1f7   :  { %v241_v59 = vpop.xlane.xlu2 %240 }
 0x1f8   :  { %v245_v60 = vmul.f32 %v241_v59, %v1659_v26 }
 0x1fa   :  { %v247_v61 = vadd.f32 1e-05, %v245_v60 }
 0x1fc   :  { %1447 = vrsqrt.f32 %v247_v61  ;;  %vm255_vm11 = vweird.f32 %v247_v61 }
 0x1ff   :  { %v551_v62 = vpop.xlane.xlu2 %550  ;;  %v244_v63 = vpop.xlane.xlu1 %243 }
 0x200   :  { %v555_v0 = vmul.f32 %v551_v62, %v1659_v26  ;;  %v246_v1 = vmul.f32 %v244_v63, %v1659_v26 }
 0x202   :  { %v1448_v2 = vpop.eup %1447  ;;  %v557_v3 = vadd.f32 1e-05, %v555_v0  ;;  %v248_v4 = vadd.f32 1e-05, %v246_v1 }
 0x203   :  { %v250_v5 = vmul.f32 %v1448_v2, %v247_v61  ;;  %vm256_vm10 = vweird.f32 %v1448_v2 }
 0x204   :  { %1449 = vrsqrt.f32 %v557_v3  ;;  %vm257_vm12 = vmor %vm255_vm11, %vm256_vm10  ;;  %vm565_vm15 = vweird.f32 %v557_v3  ;;  %vm265_vm9 = vweird.f32 %v248_v4 }
 0x205   :  { %v251_v6 = vmul.f32 %v1448_v2, %v250_v5  ;;  %1451 = vrsqrt.f32 %v248_v4 }
 0x207   :  { %v252_v7 = vmul.f32 0.5, %v251_v6  ;;  %v867_v9 = vpop.xlane.xlu2 %866  ;;  %v554_v10 = vpop.xlane.xlu1 %553 }
 0x208   :  { %v871_v11 = vmul.f32 %v867_v9, %v1659_v26  ;;  %v556_v12 = vmul.f32 %v554_v10, %v1659_v26 }
 0x209   :  { %v253_v13 = vsub.f32 1.5, %v252_v7 }
 0x20a   :  { %v1450_v14 = vpop.eup %1449  ;;  %v873_v16 = vadd.f32 1e-05, %v871_v11  ;;  %v1702_v17 = vadd.f32 1e-05, %v556_v12 }
 0x20b   :  { %v1452_v18 = vpop.eup %1451  ;;  %v254_v20 = vmul.f32 %v1448_v2, %v253_v13  ;;  %v560_v21 = vmul.f32 %v1450_v14, %v557_v3  ;;  %vm566_vm13 = vweird.f32 %v1450_v14 }
 0x20c   :  { %v260_v22 = vmul.f32 %v1452_v18, %v248_v4  ;;  %1453 = vrsqrt.f32 %v873_v16  ;;  %vm266_vm14 = vweird.f32 %v1452_v18  ;;  %vm567_vm10 = vmor %vm565_vm15, %vm566_vm13 }
 0x20d   :  { %v258_v23 = vsel %vm257_vm12, %v1448_v2, %v254_v20  ;;  %v561_v24 = vmul.f32 %v1450_v14, %v560_v21  ;;  %1455 = vrsqrt.f32 %v1702_v17  ;;  %vm267_vm11 = vmor %vm265_vm9, %vm266_vm14  ;;  %vm881_vm14 = vweird.f32 %v873_v16 }
 0x20e   :  { %v261_v25 = vmul.f32 %v1452_v18, %v260_v22  ;;  %v269_v30 = vmul.f32 %v258_v23, %v1662_v29  ;;  %vm575_vm9 = vweird.f32 %v1702_v17 }
 0x20f   :  { %v562_v27 = vmul.f32 0.5, %v561_v24  ;;  %v870_v28 = vpop.xlane.xlu1 %869  ;;  %v1428_v24 = vld [vmem:[%s2019_s4 + $0x2] ss:$0 sm:$0xff] }
 0x210   :  { %v262_v31 = vmul.f32 0.5, %v261_v25  ;;  %v872_v32 = vmul.f32 %v870_v28, %v1659_v26  ;;  %v274_v46 = vmul.f32 %v1424_v33, %v269_v30 }
 0x211   :  { %v563_v34 = vsub.f32 1.5, %v562_v27 }
 0x212   :  { %v1454_v36 = vpop.eup %1453  ;;  %v263_v38 = vsub.f32 1.5, %v262_v31  ;;  %v1710_v39 = vadd.f32 1e-05, %v872_v32  ;;  %v279_v60 = vadd.f32 %v1425_v48, %v274_v46 }
 0x213   :  { %v1456_v42 = vpop.eup %1455  ;;  %v564_v43 = vmul.f32 %v1450_v14, %v563_v34  ;;  %v876_v44 = vmul.f32 %v1454_v36, %v873_v16  ;;  %vm882_vm12 = vweird.f32 %v1454_v36 }
 0x214   :  { %v264_v29 = vmul.f32 %v1452_v18, %v263_v38  ;;  %v570_v45 = vmul.f32 %v1456_v42, %v1702_v17  ;;  %1457 = vrsqrt.f32 %v1710_v39  ;;  %vm576_vm13 = vweird.f32 %v1456_v42  ;;  %vm1726_vm15 = vmor %vm881_vm14, %vm882_vm12  ;;  %v1429_v38 = vld [vmem:[%s2020_s5 + $0x2] ss:$0 sm:$0xff] }
 0x215   :  { %v568_v50 = vsel %vm567_vm10, %v1450_v14, %v564_v43  ;;  %v877_v51 = vmul.f32 %v1454_v36, %v876_v44  ;;  %v281_v6 = vrot.slane %v279_v60, 7  ;;  %vm577_vm10 = vmor %vm575_vm9, %vm576_vm13  ;;  %v289_v13 = vrot.slane %v279_v60, 1 }
 0x216   :  { %v579_v52 = vmul.f32 %v568_v50, %v1668_v35  ;;  %v268_v53 = vsel %vm267_vm11, %v1452_v18, %v264_v29  ;;  %v571_v54 = vmul.f32 %v1456_v42, %v570_v45  ;;  %v1427_v35 = vld [vmem:[%s2020_s5 + $0x1] ss:$0 sm:$0xff]  ;;  %vm891_vm12 = vweird.f32 %v1710_v39 }
 0x217   :  { %v270_v57 = vmul.f32 %v268_v53, %v1671_v37  ;;  %v878_v58 = vmul.f32 0.5, %v877_v51  ;;  %v1348_v37 = vld [vmem:[%s2022_s6 + $0x10] sm:$0xff] }
 0x218   :  { %v572_v59 = vmul.f32 0.5, %v571_v54  ;;  %v584_v1 = vmul.f32 %v1426_v55, %v579_v52 }
 0x219   :  { %v879_v61 = vsub.f32 1.5, %v878_v58  ;;  %v275_v62 = vmul.f32 %v1424_v33, %v270_v57 }
 0x21a   :  { %v1458_v63 = vpop.eup %1457  ;;  %v573_v0 = vsub.f32 1.5, %v572_v59  ;;  %v589_v16 = vadd.f32 %v1427_v35, %v584_v1 }
 0x21b   :  { %v880_v2 = vmul.f32 %v1454_v36, %v879_v61  ;;  %v886_v3 = vmul.f32 %v1458_v63, %v1710_v39  ;;  %v280_v4 = vadd.f32 %v1425_v48, %v275_v62  ;;  %vm892_vm11 = vweird.f32 %v1458_v63 }
 0x21c   :  { %v574_v5 = vmul.f32 %v1456_v42, %v573_v0  ;;  %vm893_vm13 = vmor %vm891_vm12, %vm892_vm11  ;;  %v591_v33 = vrot.slane %v589_v16, 7  ;;  %v599_v34 = vrot.slane %v589_v16, 1 }
 0x21d   :  { %v884_v7 = vsel %vm1726_vm15, %v1454_v36, %v880_v2  ;;  %v887_v9 = vmul.f32 %v1458_v63, %v886_v3  ;;  %v1391_v10 = vpack.i.bf16 %v280_v4, %v279_v60  ;;  %v282_v11 = vrot.slane %v280_v4, 7 }
 0x21e   :  { %v578_v12 = vsel %vm577_vm10, %v1456_v42, %v574_v5  ;;  %v290_v14 = vrot.slane %v280_v4, 1  ;;  %v895_v22 = vmul.f32 %v884_v7, %v1683_v49  ;;  %v1351_v4 = vld [vmem:[%s2022_s6 + $0x28] sm:$0xff]  ;;  %v1362_v5 = vld [vmem:[%s2022_s6 + $0x50] sm:$0xff] }
 0x21f   :  { %v580_v18 = vmul.f32 %v578_v12, %v1680_v47  ;;  %v888_v20 = vmul.f32 0.5, %v887_v9  ;;  %1392 = vrot.lane.b32.xlu2 %v1391_v10, %s1471_s13  ;;  %v1737_v17 = vsel %vm75_vm3, %v281_v6, %v282_v11  ;;  %v1741_v21 = vsel %vm75_vm3, %v282_v11, %v281_v6  ;;  %373 = vmatpush.bf16.msra.mxu1 %v1351_v4  ;;  %v1347_v6 = vld [vmem:[%s2022_s6 + $0x8] sm:$0xff]  ;;  %v1346_v9 = vld [vmem:[%s2022_s6] sm:$0xff] }
 0x220   :  { %v291_v23 = vsel %vm106_vm0, %v289_v13, %v290_v14  ;;  %v292_v47 = vsel %vm106_vm0, %v290_v14, %v289_v13  ;;  %v900_v36 = vmul.f32 %v1428_v24, %v895_v22  ;;  %686 = vmatpush.bf16.msra.mxu3 %v1362_v5  ;;  %v1361_v7 = vld [vmem:[%s2022_s6 + $0x48] sm:$0xff]  ;;  %v1360_v11 = vld [vmem:[%s2022_s6 + $0x40] sm:$0xff]  ;;  %v1359_v13 = vld [vmem:[%s2022_s6 + $0x38] sm:$0xff] }
 0x221   :  { %v889_v25 = vsub.f32 1.5, %v888_v20  ;;  %v293_v27 = vsel %vm113_vm1, %v291_v23, 0.0  ;;  %v294_v28 = vsel %vm114_vm2, %v292_v47, 0.0  ;;  %v585_v30 = vmul.f32 %v1426_v55, %v580_v18  ;;  %v1375_v10 = vld [vmem:[%s2022_s6 + $0x88] sm:$0xff]  ;;  %v1374_v12 = vld [vmem:[%s2022_s6 + $0x80] sm:$0xff]  ;;  %v1373_v14 = vld [vmem:[%s2022_s6 + $0x78] sm:$0xff] }
 0x222   :  { %v1396_v49 = vpack.i.bf16 %v294_v28, %v293_v27  ;;  %v905_v53 = vadd.f32 %v1429_v38, %v900_v36  ;;  %v1372_v18 = vld [vmem:[%s2022_s6 + $0x70] sm:$0xff]  ;;  %v1371_v20 = vld [vmem:[%s2022_s6 + $0x68] sm:$0xff]  ;;  %v1370_v22 = vld [vmem:[%s2022_s6 + $0x60] sm:$0xff]  ;;  %v285_v28 = vsel %vm80_vm4, %v1741_v21, 0.0 }
 0x223   :  { %v890_v31 = vmul.f32 %v1458_v63, %v889_v25  ;;  %v590_v32 = vadd.f32 %v1427_v35, %v585_v30  ;;  %374 = vmatpush.bf16.msra.mxu1 %v1350_v8  ;;  %v286_v30 = vsel %vm81_vm5, %v1737_v17, 0.0  ;;  %v1432_v4 = vld [vmem:[%s2021_s7 + $0x2] ss:$0 sm:$0xff]  ;;  %v1430_v5 = vld [vmem:[%s2021_s7] ss:$0 sm:$0xff] }
 0x224   :  { %1397 = vrot.lane.b32.xlu1 %v1396_v49, %s1472_s21  ;;  %v907_v57 = vrot.slane %v905_v53, 7  ;;  %v915_v59 = vrot.slane %v905_v53, 1  ;;  %687 = vmatpush.bf16.msra.mxu3 %v1361_v7 }
 0x225   :  { %v894_v42 = vsel %vm893_vm13, %v1458_v63, %v890_v31  ;;  %v1401_v43 = vpack.i.bf16 %v590_v32, %v589_v16  ;;  %v592_v44 = vrot.slane %v590_v32, 7  ;;  %v600_v29 = vrot.slane %v590_v32, 1  ;;  %v1358_v16 = vld [vmem:[%s2022_s6 + $0x30] sm:$0xff] }
 0x226   :  { %v896_v45 = vmul.f32 %v894_v42, %v1692_v56 }
 0x227   :  { %1402 = vrot.lane.b32.xlu0 %v1401_v43, %s1471_s13  ;;  %v601_v39 = vsel %vm106_vm0, %v599_v34, %v600_v29  ;;  %v602_v46 = vsel %vm106_vm0, %v600_v29, %v599_v34  ;;  %v1768_v48 = vsel %vm75_vm3, %v591_v33, %v592_v44  ;;  %v1772_v50 = vsel %vm75_vm3, %v592_v44, %v591_v33 }
 0x228   :  { %v603_v51 = vsel %vm113_vm1, %v601_v39, 0.0  ;;  %v604_v56 = vsel %vm114_vm2, %v602_v46, 0.0  ;;  %v901_v52 = vmul.f32 %v1428_v24, %v896_v45  ;;  %375 = vmatpush.bf16.msra.mxu1 %v1349_v15  ;;  %688 = vmatpush.bf16.msra.mxu3 %v1360_v11  ;;  %v595_v17 = vsel %vm80_vm4, %v1772_v50, 0.0 }
 0x229   :  { %v1406_v54 = vpack.i.bf16 %v604_v56, %v603_v51  ;;  %v596_v45 = vsel %vm81_vm5, %v1768_v48, 0.0 }
 0x22a   :  { %v906_v55 = vadd.f32 %v1429_v38, %v901_v52 }
 0x22b   :  { %1407 = vrot.lane.b32.xlu2 %v1406_v54, %s1472_s21 }
 0x22c   :  { %v908_v58 = vrot.slane %v906_v55, 7  ;;  %v916_v60 = vrot.slane %v906_v55, 1  ;;  %v1411_v3 = vpack.i.bf16 %v906_v55, %v905_v53  ;;  %376 = vmatpush.bf16.msra.mxu1 %v1348_v37  ;;  %689 = vmatpush.bf16.msra.mxu3 %v1359_v13 }
 0x22e   :  { %v917_v61 = vsel %vm106_vm0, %v915_v59, %v916_v60  ;;  %v918_v62 = vsel %vm106_vm0, %v916_v60, %v915_v59  ;;  %v1785_v63 = vsel %vm75_vm3, %v907_v57, %v908_v58  ;;  %v1789_v0 = vsel %vm75_vm3, %v908_v58, %v907_v57 }
 0x22f   :  { %v919_v1 = vsel %vm113_vm1, %v917_v61, 0.0  ;;  %v920_v35 = vsel %vm114_vm2, %v918_v62, 0.0  ;;  %v911_v48 = vsel %vm80_vm4, %v1789_v0, 0.0  ;;  %v912_v57 = vsel %vm81_vm5, %v1785_v63, 0.0 }
 0x230   :  { %v1416_v2 = vpack.i.bf16 %v920_v35, %v919_v1  ;;  %377 = vmatpush.bf16.msra.mxu1 %v1347_v6  ;;  %690 = vmatpush.bf16.msra.mxu3 %v1358_v16 }
 0x232   :  { %1417 = vrot.lane.b32.xlu1 %v1416_v2, %s1472_s21 }
 0x233   :  { %1412 = vrot.lane.b32.xlu2 %v1411_v3, %s1471_s13 }
 0x234   :  { %378 = vmatpush.bf16.msra.mxu1 %v1346_v9 }
 0x238   :  { %1001 = vmatpush.bf16.msrb.mxu1 %v1375_v10 }
 0x23c   :  { %1002 = vmatpush.bf16.msrb.mxu1 %v1374_v12 }
 0x240   :  { %1003 = vmatpush.bf16.msrb.mxu1 %v1373_v14 }
 0x244   :  { %1004 = vmatpush.bf16.msrb.mxu1 %v1372_v18 }
 0x248   :  { %1005 = vmatpush.bf16.msrb.mxu1 %v1371_v20 }
 0x24c   :  { %1006 = vmatpush.bf16.msrb.mxu1 %v1370_v22 }
 0x279   :  { %v1393_v23 = vpop.permute.xlu2 %1392 }
 0x27a   :  { %v1395_v47 = vunpack.i.h.bf16 %v1393_v23  ;;  %v1394_v24 = vunpack.i.l.bf16 %v1393_v23 }
 0x27c   :  { %v311_v32 = vsel %vm139_vm6, %v285_v28, %v1394_v24  ;;  %v312_v33 = vsel %vm139_vm6, %v286_v30, %v1395_v47 }
 0x285   :  { %v1408_v25 = vpop.permute.xlu2 %1407 }
 0x286   :  { %v1410_v29 = vunpack.i.h.bf16 %v1408_v25  ;;  %v1409_v21 = vunpack.i.l.bf16 %v1408_v25 }
 0x28d   :  { %v1413_v53 = vpop.permute.xlu2 %1412 }
 0x28e   :  { %v1415_v54 = vunpack.i.h.bf16 %v1413_v53  ;;  %v1414_v50 = vunpack.i.l.bf16 %v1413_v53 }
 0x290   :  { %v937_v60 = vsel %vm139_vm6, %v911_v48, %v1414_v50  ;;  %v938_v61 = vsel %vm139_vm6, %v912_v57, %v1415_v54 }
 0x296   :  { %v1398_v27 = vpop.permute.xlu1 %1397 }
 0x297   :  { %v1400_v49 = vunpack.i.h.bf16 %v1398_v27  ;;  %v1399_v31 = vunpack.i.l.bf16 %v1398_v27 }
 0x299   :  { %v1403_v34 = vpop.permute.xlu0 %1402  ;;  %v313_v36 = vsel %vm142_vm7, %v311_v32, %v1399_v31  ;;  %v314_v38 = vsel %vm142_vm7, %v312_v33, %v1400_v49 }
 0x29a   :  { %v1405_v42 = vunpack.i.h.bf16 %v1403_v34  ;;  %v1404_v43 = vunpack.i.l.bf16 %v1403_v34  ;;  %v315_v44 = vpack.c.bf16 %v314_v38, %v313_v36 }
 0x29c   :  { %v621_v39 = vsel %vm139_vm6, %v595_v17, %v1404_v43  ;;  %v622_v46 = vsel %vm139_vm6, %v596_v45, %v1405_v42  ;;  %1175 = vmatmul.msk.bf16.vlgmr.msra.gmra.mxu1 %vm198_vm8, %v315_v44 }
 0x29d   :  { %v623_v51 = vsel %vm142_vm7, %v621_v39, %v1409_v21  ;;  %v624_v56 = vsel %vm142_vm7, %v622_v46, %v1410_v29 }
 0x29e   :  { %v625_v52 = vpack.c.bf16 %v624_v56, %v623_v51 }
 0x2a0   :  { %1253 = vmatmul.msk.bf16.vlgmr.msra.gmra.mxu3 %vm198_vm8, %v625_v52 }
 0x2a4   :  { %v1418_v55 = vpop.permute.xlu1 %1417 }
 0x2a5   :  { %v1420_v58 = vunpack.i.h.bf16 %v1418_v55  ;;  %v1419_v59 = vunpack.i.l.bf16 %v1418_v55 }
 0x2a7   :  { %v940_v62 = vsel %vm142_vm7, %v938_v61, %v1420_v58  ;;  %v939_v1 = vsel %vm142_vm7, %v937_v60, %v1419_v59 }
 0x2a8   :  { %v941_v35 = vpack.c.bf16 %v940_v62, %v939_v1 }
 0x2ac   :  { %1335 = vmatmul.msk.bf16.vlgmr.msrb.gmra.mxu1 %vm198_vm8, %v941_v35 }
 0x319   :  { %v380_v2 = vpop.f32.mrf.mxu1 }
 0x31a   :  { %v381_v12 = vadd.f32 %v1430_v5, %v380_v2 }
 0x31c   :  { %v385_v20 = vmax.f32 %v381_v12, 0.0 }
 0x31e   :  { %v389_v24 = vsel %vm139_vm6, %v385_v20, 0.0 }
 0x321   :  { %v382_v41 = vpop.f32.mrf.mxu1 }
 0x322   :  { %v383_v9 = vadd.f32 %v1430_v5, %v382_v41 }
 0x323   :  { %v692_v63 = vpop.f32.mrf.mxu3 }
 0x324   :  { %v693_v0 = vadd.f32 %v1431_v40, %v692_v63  ;;  %v386_v16 = vmax.f32 %v383_v9, 0.0 }
 0x326   :  { %v697_v3 = vmax.f32 %v693_v0, 0.0  ;;  %v392_v47 = vsel %vm139_vm6, %v386_v16, 0.0 }
 0x328   :  { %v703_v8 = vsel %vm139_vm6, %v697_v3, 0.0 }
 0x329   :  { %v1008_v15 = vpop.f32.mrf.mxu1  ;;  %704 = vadd.xlane.f32.xlu0 %v703_v8 }
 0x32a   :  { %v1009_v19 = vadd.f32 %v1432_v4, %v1008_v15 }
 0x32b   :  { %v694_v37 = vpop.f32.mrf.mxu3 }
 0x32c   :  { %v1013_v6 = vmax.f32 %v1009_v19, 0.0  ;;  %v695_v7 = vadd.f32 %v1431_v40, %v694_v37 }
 0x32e   :  { %v698_v10 = vmax.f32 %v695_v7, 0.0  ;;  %v1019_v11 = vsel %vm139_vm6, %v1013_v6, 0.0 }
 0x32f   :  { %1020 = vadd.xlane.f32.xlu1 %v1019_v11 }
 0x330   :  { %v706_v13 = vsel %vm139_vm6, %v698_v10, 0.0 }
 0x331   :  { %v1010_v14 = vpop.f32.mrf.mxu1  ;;  %707 = vadd.xlane.f32.xlu2 %v706_v13 }
 0x332   :  { %v1011_v18 = vadd.f32 %v1432_v4, %v1010_v14 }
 0x334   :  { %v1014_v22 = vmax.f32 %v1011_v18, 0.0 }
 0x336   :  { %v1022_v23 = vsel %vm139_vm6, %v1014_v22, 0.0 }
 0x337   :  { %1023 = vadd.xlane.f32.xlu0 %v1022_v23  ;;  %393 = vadd.xlane.f32.xlu1 %v392_v47 }
 0x339   :  { %390 = vadd.xlane.f32.xlu2 %v389_v24 }
 0x39c   :  { %v705_v25 = vpop.xlane.xlu0 %704 }
 0x39d   :  { %v709_v27 = vmul.f32 %v705_v25, %v1659_v26  ;;  %v1434_v25 = vld [vmem:[%s2024_s9 + $0x1] ss:$0 sm:$0xff] }
 0x39f   :  { %v1900_v28 = vsub.f32 %v697_v3, %v709_v27 }
 0x3a1   :  { %v713_v30 = vmul.f32 %v1900_v28, %v1900_v28 }
 0x3a2   :  { %v1021_v49 = vpop.xlane.xlu1 %1020 }
 0x3a3   :  { %v1025_v31 = vmul.f32 %v1021_v49, %v1659_v26  ;;  %v715_v32 = vsel %vm139_vm6, %v713_v30, 0.0 }
 0x3a4   :  { %v708_v33 = vpop.xlane.xlu2 %707  ;;  %716 = vadd.xlane.f32.xlu0 %v715_v32  ;;  %v1435_v32 = vld [vmem:[%s2025_s10 + $0x1] ss:$0 sm:$0xff] }
 0x3a5   :  { %v1906_v34 = vsub.f32 %v1013_v6, %v1025_v31  ;;  %v710_v36 = vmul.f32 %v708_v33, %v1659_v26 }
 0x3a7   :  { %v1909_v38 = vsub.f32 %v698_v10, %v710_v36  ;;  %v1029_v42 = vmul.f32 %v1906_v34, %v1906_v34 }
 0x3a9   :  { %v1031_v43 = vsel %vm139_vm6, %v1029_v42, 0.0  ;;  %v714_v44 = vmul.f32 %v1909_v38, %v1909_v38 }
 0x3aa   :  { %v1024_v29 = vpop.xlane.xlu0 %1023  ;;  %1032 = vadd.xlane.f32.xlu1 %v1031_v43  ;;  %v394_v21 = vpop.xlane.xlu1 %393 }
 0x3ab   :  { %v1026_v17 = vmul.f32 %v1024_v29, %v1659_v26  ;;  %v396_v45 = vmul.f32 %v394_v21, %v1659_v26  ;;  %v718_v39 = vsel %vm139_vm6, %v714_v44, 0.0 }
 0x3ac   :  { %719 = vadd.xlane.f32.xlu2 %v718_v39  ;;  %v391_v46 = vpop.xlane.xlu2 %390  ;;  %v1436_v39 = vld [vmem:[%s2023_s8 + $0x2] ss:$0 sm:$0xff] }
 0x3ad   :  { %v1919_v51 = vsub.f32 %v1014_v22, %v1026_v17  ;;  %v1921_v56 = vsub.f32 %v386_v16, %v396_v45  ;;  %v395_v52 = vmul.f32 %v391_v46, %v1659_v26  ;;  %v1433_v22 = vld [vmem:[%s2023_s8 + $0x1] ss:$0 sm:$0xff] }
 0x3af   :  { %v1924_v53 = vsub.f32 %v385_v20, %v395_v52  ;;  %v1030_v54 = vmul.f32 %v1919_v51, %v1919_v51  ;;  %v400_v50 = vmul.f32 %v1921_v56, %v1921_v56 }
 0x3b1   :  { %v1034_v55 = vsel %vm139_vm6, %v1030_v54, 0.0  ;;  %v404_v48 = vsel %vm139_vm6, %v400_v50, 0.0  ;;  %v399_v57 = vmul.f32 %v1924_v53, %v1924_v53 }
 0x3b2   :  { %1035 = vadd.xlane.f32.xlu0 %v1034_v55  ;;  %405 = vadd.xlane.f32.xlu1 %v404_v48 }
 0x3b3   :  { %v401_v58 = vsel %vm139_vm6, %v399_v57, 0.0  ;;  %v1437_v57 = vld [vmem:[%s2024_s9 + $0x2] ss:$0 sm:$0xff] }
 0x3b4   :  { %402 = vadd.xlane.f32.xlu2 %v401_v58 }
 0x417   :  { %v717_v59 = vpop.xlane.xlu0 %716 }
 0x418   :  { %v721_v60 = vmul.f32 %v717_v59, %v1659_v26 }
 0x41a   :  { %v723_v61 = vadd.f32 1e-05, %v721_v60 }
 0x41c   :  { %1459 = vrsqrt.f32 %v723_v61  ;;  %vm731_vm1 = vweird.f32 %v723_v61 }
 0x41d   :  { %v1033_v62 = vpop.xlane.xlu1 %1032 }
 0x41e   :  { %v1037_v1 = vmul.f32 %v1033_v62, %v1659_v26 }
 0x41f   :  { %v720_v35 = vpop.xlane.xlu2 %719 }
 0x420   :  { %v1039_v2 = vadd.f32 1e-05, %v1037_v1  ;;  %v722_v40 = vmul.f32 %v720_v35, %v1659_v26  ;;  %v1438_v35 = vld [vmem:[%s2025_s10 + $0x2] ss:$0 sm:$0xff] }
 0x422   :  { %v1460_v41 = vpop.eup %1459  ;;  %1461 = vrsqrt.f32 %v1039_v2  ;;  %v724_v63 = vadd.f32 1e-05, %v722_v40  ;;  %vm1047_vm4 = vweird.f32 %v1039_v2 }
 0x423   :  { %v726_v0 = vmul.f32 %v1460_v41, %v723_v61  ;;  %vm732_vm0 = vweird.f32 %v1460_v41 }
 0x424   :  { %1463 = vrsqrt.f32 %v724_v63  ;;  %vm733_vm2 = vmor %vm731_vm1, %vm732_vm0  ;;  %vm741_vm8 = vweird.f32 %v724_v63 }
 0x425   :  { %v727_v3 = vmul.f32 %v1460_v41, %v726_v0  ;;  %v1036_v4 = vpop.xlane.xlu0 %1035  ;;  %v406_v8 = vpop.xlane.xlu1 %405 }
 0x426   :  { %v1038_v15 = vmul.f32 %v1036_v4, %v1659_v26  ;;  %v408_v19 = vmul.f32 %v406_v8, %v1659_v26 }
 0x427   :  { %v728_v37 = vmul.f32 0.5, %v727_v3  ;;  %v403_v5 = vpop.xlane.xlu2 %402 }
 0x428   :  { %v1462_v6 = vpop.eup %1461  ;;  %v1940_v7 = vadd.f32 1e-05, %v1038_v15  ;;  %v1942_v9 = vadd.f32 1e-05, %v408_v19  ;;  %v407_v10 = vmul.f32 %v403_v5, %v1659_v26  ;;  %v1439_v5 = vld [vmem:[%s2023_s8] ss:$0 sm:$0xff] }
 0x429   :  { %v729_v11 = vsub.f32 1.5, %v728_v37  ;;  %v1042_v12 = vmul.f32 %v1462_v6, %v1039_v2  ;;  %vm1048_vm3 = vweird.f32 %v1462_v6 }
 0x42a   :  { %v1464_v13 = vpop.eup %1463  ;;  %1465 = vrsqrt.f32 %v1940_v7  ;;  %v1946_v14 = vadd.f32 1e-05, %v407_v10  ;;  %vm1049_vm7 = vmor %vm1047_vm4, %vm1048_vm3  ;;  %vm1057_vm9 = vweird.f32 %v1940_v7  ;;  %vm427_vm13 = vweird.f32 %v1942_v9 }
 0x42b   :  { %v730_v16 = vmul.f32 %v1460_v41, %v729_v11  ;;  %v1043_v18 = vmul.f32 %v1462_v6, %v1042_v12  ;;  %v736_v20 = vmul.f32 %v1464_v13, %v724_v63  ;;  %1467 = vrsqrt.f32 %v1942_v9 }
 0x42c   :  { %1469 = vrsqrt.f32 %v1946_v14  ;;  %vm742_vm5 = vweird.f32 %v1464_v13  ;;  %vm417_vm1 = vweird.f32 %v1946_v14  ;;  %vm1111_vm3 = vcmask 7168  }
 0x42d   :  { %v734_v26 = vsel %vm733_vm2, %v1460_v41, %v730_v16  ;;  %v1044_v23 = vmul.f32 0.5, %v1043_v18  ;;  %v737_v47 = vmul.f32 %v1464_v13, %v736_v20  ;;  %vm743_vm14 = vmor %vm741_vm8, %vm742_vm5  ;;  %v1441_v18 = vld [vmem:[%s2025_s10] ss:$0 sm:$0xff]  ;;  %vm1117_vm4 = vcmask 23552  }
 0x42e   :  { %v745_v24 = vmul.f32 %v734_v26, %v1900_v28 }
 0x42f   :  { %v1045_v27 = vsub.f32 1.5, %v1044_v23  ;;  %v738_v30 = vmul.f32 0.5, %v737_v47 }
 0x430   :  { %v1466_v49 = vpop.eup %1465  ;;  %v750_v31 = vmul.f32 %v1433_v22, %v745_v24 }
 0x431   :  { %v1046_v33 = vmul.f32 %v1462_v6, %v1045_v27  ;;  %v739_v36 = vsub.f32 1.5, %v738_v30  ;;  %v1052_v42 = vmul.f32 %v1466_v49, %v1940_v7  ;;  %v1468_v28 = vpop.eup %1467  ;;  %vm1058_vm15 = vweird.f32 %v1466_v49  ;;  %v1442_v27 = vld [vmem:[%s2026_s11 + $0x1] ss:$0 sm:$0xff] }
 0x432   :  { %v755_v43 = vadd.f32 %v1434_v25, %v750_v31  ;;  %v1470_v44 = vpop.eup %1469  ;;  %v422_v45 = vmul.f32 %v1468_v28, %v1942_v9  ;;  %vm428_vm10 = vweird.f32 %v1468_v28  ;;  %vm1059_vm11 = vmor %vm1057_vm9, %vm1058_vm15  ;;  %v44_v30 = vld [vmem:[%s2027_s1] sm:$0xff] }
 0x433   :  { %v1050_v29 = vsel %vm1049_vm7, %v1462_v6, %v1046_v33  ;;  %v740_v21 = vmul.f32 %v1464_v13, %v739_v36  ;;  %v1053_v17 = vmul.f32 %v1466_v49, %v1052_v42  ;;  %v412_v46 = vmul.f32 %v1470_v44, %v1946_v14  ;;  %vm429_vm0 = vmor %vm427_vm13, %vm428_vm10  ;;  %v1443_v33 = vld [vmem:[%s2026_s11 + $0x2] ss:$0 sm:$0xff] }
 0x434   :  { %v762_v52 = vmul.f32 %v1435_v32, %v755_v43  ;;  %v423_v55 = vmul.f32 %v1468_v28, %v422_v45  ;;  %v1061_v48 = vmul.f32 %v1050_v29, %v1906_v34  ;;  %vm418_vm12 = vweird.f32 %v1470_v44 }
 0x435   :  { %v744_v54 = vsel %vm743_vm14, %v1464_v13, %v740_v21  ;;  %v1054_v50 = vmul.f32 0.5, %v1053_v17  ;;  %v413_v58 = vmul.f32 %v1470_v44, %v412_v46  ;;  %vm419_vm2 = vmor %vm417_vm1, %vm418_vm12  ;;  %v1440_v13 = vld [vmem:[%s2024_s9] ss:$0 sm:$0xff] }
 0x436   :  { %v764_v59 = vsel %vm139_vm6, %v762_v52, 0.0  ;;  %v746_v60 = vmul.f32 %v744_v54, %v1909_v38  ;;  %v424_v62 = vmul.f32 0.5, %v423_v55  ;;  %v1066_v1 = vmul.f32 %v1436_v39, %v1061_v48  ;;  %v1444_v52 = vld [vmem:[%s2026_s11] ss:$0 sm:$0xff] }
 0x437   :  { %v1055_v61 = vsub.f32 1.5, %v1054_v50  ;;  %765 = vadd.xlane.f32.xlu0 %v764_v59  ;;  %v414_v34 = vmul.f32 0.5, %v413_v58 }
 0x438   :  { %v751_v2 = vmul.f32 %v1433_v22, %v746_v60  ;;  %v425_v41 = vsub.f32 1.5, %v424_v62  ;;  %v1071_v63 = vadd.f32 %v1437_v57, %v1066_v1 }
 0x439   :  { %v1056_v40 = vmul.f32 %v1466_v49, %v1055_v61  ;;  %v415_v0 = vsub.f32 1.5, %v414_v34 }
 0x43a   :  { %v756_v38 = vadd.f32 %v1434_v25, %v751_v2  ;;  %v426_v4 = vmul.f32 %v1468_v28, %v425_v41  ;;  %v1078_v8 = vmul.f32 %v1438_v35, %v1071_v63 }
 0x43b   :  { %v1060_v3 = vsel %vm1059_vm11, %v1466_v49, %v1056_v40  ;;  %v416_v15 = vmul.f32 %v1470_v44, %v415_v0 }
 0x43c   :  { %v763_v19 = vmul.f32 %v1435_v32, %v756_v38  ;;  %v1062_v37 = vmul.f32 %v1060_v3, %v1919_v51  ;;  %v430_v6 = vsel %vm429_vm0, %v1468_v28, %v426_v4  ;;  %v1080_v7 = vsel %vm139_vm6, %v1078_v8, 0.0  ;;  %v45_v28 = vld [vmem:[%s2027_s1 + $0x8] sm:$0xff] }
 0x43d   :  { %v420_v10 = vsel %vm419_vm2, %v1470_v44, %v416_v15  ;;  %1081 = vadd.xlane.f32.xlu1 %v1080_v7  ;;  %v432_v12 = vmul.f32 %v430_v6, %v1921_v56 }
 0x43e   :  { %v767_v9 = vsel %vm139_vm6, %v763_v19, 0.0  ;;  %v1067_v11 = vmul.f32 %v1436_v39, %v1062_v37  ;;  %v431_v51 = vmul.f32 %v420_v10, %v1924_v53 }
 0x43f   :  { %768 = vadd.xlane.f32.xlu2 %v767_v9  ;;  %v437_v16 = vmul.f32 %v1439_v5, %v432_v12 }
 0x440   :  { %v1072_v14 = vadd.f32 %v1437_v57, %v1067_v11  ;;  %v436_v20 = vmul.f32 %v1439_v5, %v431_v51 }
 0x441   :  { %v442_v26 = vadd.f32 %v1440_v13, %v437_v16 }
 0x442   :  { %v1079_v22 = vmul.f32 %v1438_v35, %v1072_v14  ;;  %v441_v23 = vadd.f32 %v1440_v13, %v436_v20 }
 0x443   :  { %v448_v56 = vmul.f32 %v1441_v18, %v442_v26 }
 0x444   :  { %v1083_v47 = vsel %vm139_vm6, %v1079_v22, 0.0  ;;  %v447_v24 = vmul.f32 %v1441_v18, %v441_v23 }
 0x445   :  { %1084 = vadd.xlane.f32.xlu0 %v1083_v47  ;;  %v452_v25 = vsel %vm139_vm6, %v448_v56, 0.0 }
 0x446   :  { %453 = vadd.xlane.f32.xlu1 %v452_v25  ;;  %v449_v53 = vsel %vm139_vm6, %v447_v24, 0.0  ;;  %vm1114_vm6 = vcmask 15360  }
 0x447   :  { %450 = vadd.xlane.f32.xlu2 %v449_v53 }
 0x4aa   :  { %v766_v49 = vpop.xlane.xlu0 %765 }
 0x4ab   :  { %v775_v31 = vadd.f32 %v1442_v27, %v766_v49 }
 0x4ad   :  { %v777_v32 = vmul.f32 %v775_v31, %v44_v30 }
 0x4af   :  { %1097 = vrot.lane.b32.xlu0 %v777_v32, %s1474_s16 }
 0x4b0   :  { %v1082_v36 = vpop.xlane.xlu1 %1081 }
 0x4b1   :  { %v1091_v42 = vadd.f32 %v1443_v33, %v1082_v36 }
 0x4b2   :  { %v769_v43 = vpop.xlane.xlu2 %768 }
 0x4b3   :  { %v776_v44 = vadd.f32 %v1442_v27, %v769_v43  ;;  %v1093_v29 = vmul.f32 %v1091_v42, %v44_v30 }
 0x4b5   :  { %v778_v21 = vmul.f32 %v776_v44, %v45_v28  ;;  %1105 = vrot.lane.b32.xlu1 %v1093_v29, %s1475_s19 }
 0x4b7   :  { %1099 = vrot.lane.b32.xlu2 %v778_v21, %s1474_s16 }
 0x4b8   :  { %v1085_v17 = vpop.xlane.xlu0 %1084 }
 0x4b9   :  { %v1092_v45 = vadd.f32 %v1443_v33, %v1085_v17  ;;  %v454_v54 = vpop.xlane.xlu1 %453 }
 0x4ba   :  { %v451_v46 = vpop.xlane.xlu2 %450  ;;  %v460_v59 = vadd.f32 %v1444_v52, %v454_v54 }
 0x4bb   :  { %v1094_v39 = vmul.f32 %v1092_v45, %v45_v28  ;;  %v459_v50 = vadd.f32 %v1444_v52, %v451_v46 }
 0x4bc   :  { %v462_v1 = vmul.f32 %v460_v59, %v45_v28 }
 0x4bd   :  { %1107 = vrot.lane.b32.xlu0 %v1094_v39, %s1475_s19  ;;  %v461_v48 = vmul.f32 %v459_v50, %v44_v30 }
 0x511   :  { %v1100_v62 = vpop.permute.xlu2 %1099 }
 0x512   :  { %v1113_v35 = vsel %vm1111_vm3, %v462_v1, %v1100_v62 }
 0x521   :  { %v1098_v55 = vpop.permute.xlu0 %1097 }
 0x522   :  { %v1112_v57 = vsel %vm1111_vm3, %v461_v48, %v1098_v55 }
 0x527   :  { %v1106_v58 = vpop.permute.xlu1 %1105 }
 0x528   :  { %v1115_v60 = vsel %vm1114_vm6, %v1112_v57, %v1106_v58 }
 0x529   :  { %v1118_v61 = vsel %vm1117_vm4, %v1115_v60, 0.0 }
 0x52a   :  { %1120 = vst [vmem:[%s2028_s12] sm:$0xff] %v1118_v61 }
 0x52f   :  { %v1108_v34 = vpop.permute.xlu0 %1107 }
 0x530   :  { %v1116_v2 = vsel %vm1114_vm6, %v1113_v35, %v1108_v34 }
 0x531   :  { %v1119_v40 = vsel %vm1117_vm4, %v1116_v2, 0.0 }
 0x532   :  { %1121 = vst [vmem:[%s2028_s12 + $0x8] sm:$0xff] %v1119_v40 }

// kernel: forward.3
= control target key start
LH: loop header
LB: loop body
LE: loop exit
PB: predicated region body
PF: predicated region fallthrough
CT: control target
= control target key end

     0   :  { %s3525_s0 = inlined_call_operand.vmem [shape: f32[2,8,32], index: 0, kind: input, shape index: {}]   ;;  %s3526_s1 = inlined_call_operand.vmem [shape: f32[2,8,1], index: 1, kind: input, shape index: {}]   ;;  %s3527_s2 = inlined_call_operand.vmem [shape: f32[2,1,8], index: 2, kind: input, shape index: {}]   ;;  %s3528_s3 = inlined_call_operand.vmem [shape: bf16[2,2,32,16], index: 3, kind: input, shape index: {}]   ;;  %s3529_s4 = inlined_call_operand.vmem [shape: f32[2,2,1,16], index: 4, kind: input, shape index: {}]   ;;  %s3530_s5 = inlined_call_operand.vmem [shape: bf16[2,2,32,16], index: 5, kind: input, shape index: {}]   ;;  %s3531_s6 = inlined_call_operand.vmem [shape: f32[2,2,1,16], index: 6, kind: input, shape index: {}]   ;;  %s3532_s7 = inlined_call_operand.vmem [shape: bf16[2,2,32,16], index: 7, kind: input, shape index: {}]   ;;  %s3533_s8 = inlined_call_operand.vmem [shape: f32[2,2,1,16], index: 8, kind: input, shape index: {}]   ;;  %s3534_s9 = inlined_call_operand.vmem [shape: bf16[2,2,16,32], index: 9, kind: input, shape index: {}]   ;;  %s3535_s10 = inlined_call_operand.vmem [shape: f32[2,1,32], index: 10, kind: input, shape index: {}]   ;;  %s3536_s11 = inlined_call_operand.vmem [shape: f32[2,1,32], index: 11, kind: input, shape index: {}]   ;;  %s3537_s12 = inlined_call_operand.vmem [shape: f32[2,1,32], index: 12, kind: input, shape index: {}]   ;;  %s3538_s13 = inlined_call_operand.vmem [shape: bf16[2,288,64], index: 13, kind: input, shape index: {}]   ;;  %s3539_s14 = inlined_call_operand.vmem [shape: f32[2,1,64], index: 14, kind: input, shape index: {}]   ;;  %s3540_s15 = inlined_call_operand.vmem [shape: bf16[2,64,32], index: 15, kind: input, shape index: {}]   ;;  %s3541_s16 = inlined_call_operand.vmem [shape: f32[2,1,32], index: 16, kind: input, shape index: {}]   ;;  %s3542_s17 = inlined_call_operand.vmem [shape: f32[2,1,32], index: 17, kind: input, shape index: {}]   ;;  %s3543_s18 = inlined_call_operand.vmem [shape: f32[2,1,32], index: 18, kind: input, shape index: {}]   ;;  %s3544_s19 = inlined_call_operand.vmem [shape: f32[2,8,32], index: 19, kind: output, shape index: {}]  }
   0x1   :  { %3548 = sst [smem:[#allocation2_spill]] %s3525_s0  ;;  %s2988_s0 = smov 0  }
   0x2   :  { %3549 = sst [smem:[#allocation3_spill]] %s3526_s1 }
   0x3   :  { %3550 = sst [smem:[#allocation4_spill]] %s3527_s2 }
   0x4   :  { %3551 = sst [smem:[#allocation5_spill]] %s3528_s3 }
   0x5 LB: > { %s2278_s30 = sadd.s32 4294967295, %s2881_s0   ;;  %p2282_p0 = scmp.ge.s32.totalorder %s2881_s0, 1  ;;  %s2881_s0 = sphi %s2988_s0, %s29_s0  }
   0x6   : > { %p553_p1 = scmp.lt.s32.totalorder %s2881_s0, 3 }
   0x8   : > { %p554_p2 = pnand %p2282_p0, %p553_p1 }
   0x9   : > { %s3552_s1 = sld [smem:[#allocation5_spill]] (!%p554_p2)  ;;  %p614_p3 = scmp.lt.s32.totalorder (!%p554_p2), %s2278_s30, 1 }
   0xa   : > { %557 = sbr.rel (%p554_p2) target bundleno = 4558 (0x11ce), region = 96  ;;  %s3553_s29 = sld [smem:[#allocation2_spill]] (!%p554_p2) }
   0xb   : > { %s3554_s2 = sld [smem:[#allocation4_spill]] (!%p554_p2) }
   0xc   : > { %s3555_s24 = sld [smem:[#allocation3_spill]] (!%p554_p2) }
   0xf   : > { %v2707_v0 = vld [vmem:[%s3552_s1 + $0x8] sm:$0xff]  ;;  %v2706_v2 = vld [vmem:[%s3552_s1] sm:$0xff]  ;;  %s3560_s30 = smov (!%p614_p3, %s2278_s30), 1  ;;  %vm659_vm0 = vcmask 261120   ;;  %vm747_vm1 = vcmask 130048   ;;  %vm767_vm2 = vcmask 64512  }
  0x10   : > { %v2709_v1 = vld [vmem:[%s3530_s5 + $0x8] sm:$0xff]  ;;  %669 = vmatpush.bf16.msra.mxu0 %v2707_v0  ;;  %v2708_v3 = vld [vmem:[%s3530_s5] sm:$0xff]  ;;  %s3011_s26 = sshll.u32 %s3560_s30, 3  ;;  %v2716_v24 = vld [vmem:[%s3530_s5 + $0x18] sm:$0xff]  ;;  %vm784_vm3 = vcmask 1043456  }
  0x11   : > { %702 = vmatpush.bf16.msra.mxu1 %v2709_v1  ;;  %s617_s20 = scalar_lea.vmem %s3553_s29, %s3011_s26  ;;  %s624_s23 = scalar_lea.vmem %s3554_s2, %s3560_s30  ;;  %v2823_v6 = vld [vmem:[%s3531_s6] ss:$0 sm:$0xff]  ;;  %v2711_v17 = vld [vmem:[%s3532_s7 + $0x8] sm:$0xff]  ;;  %v2715_v33 = vld [vmem:[%s3530_s5 + $0x10] sm:$0xff] }
  0x12   : > { %v3017_v4 = vld [vmem:[%s617_s20] sm:$0xff]  ;;  %735 = vmatpush.bf16.msra.mxu2 %v2711_v17  ;;  %v2714_v35 = vld [vmem:[%s3552_s1 + $0x18] sm:$0xff]  ;;  %v2713_v37 = vld [vmem:[%s3552_s1 + $0x10] sm:$0xff]  ;;  %s621_s25 = scalar_lea.vmem %s3555_s24, %s3011_s26  ;;  %s2885_s2 = smov 64  }
  0x13   : > { %v3021_v5 = vpack.c.bf16 %v3017_v4, %v3017_v4  ;;  %v2822_v9 = vld [vmem:[%s3529_s4] ss:$0 sm:$0xff]  ;;  %v2826_v44 = vld [vmem:[%s3531_s6 + $0x1] ss:$0 sm:$0xff]  ;;  %v2718_v58 = vld [vmem:[%s3532_s7 + $0x18] sm:$0xff]  ;;  %s2887_s24 = smov 96   ;;  %s628_s3 = scalar_lea.vmem %s3544_s19, %s3011_s26 }
  0x14   : > { %670 = vmatpush.bf16.msra.mxu0 %v2706_v2  ;;  %v2710_v18 = vld [vmem:[%s3532_s7] sm:$0xff]  ;;  %v2717_v59 = vld [vmem:[%s3532_s7 + $0x10] sm:$0xff] }
  0x15   : > { %703 = vmatpush.bf16.msra.mxu1 %v2708_v3  ;;  %v3047_v19 = vld [vmem:[%s624_s23] ss:$0 sm:$0xff]  ;;  %v2827_v54 = vld [vmem:[%s3529_s4 + $0x1] ss:$0 sm:$0xff]  ;;  %s3546_s23 = smov 32  }
  0x16   : > { %736 = vmatpush.bf16.msra.mxu2 %v2710_v18  ;;  %v2825_v32 = vld [vmem:[%s3533_s8] ss:$0 sm:$0xff]  ;;  %v2829_v2 = vld [vmem:[%s3533_s8 + $0x1] ss:$0 sm:$0xff] }
  0x17   : > { %2294 = vmatmul.msk.bf16.vlgmr.msra.gmra.mxu0 %vm659_vm0, %v3021_v5  ;;  %v2712_v39 = vld [vmem:[%s3534_s9] sm:$0xff] }
  0x18   : > { %2303 = vmatmul.msk.bf16.vlgmr.msra.gmra.mxu1 %vm659_vm0, %v3021_v5 }
  0x19   : > { %2312 = vmatmul.msk.bf16.vlgmr.msra.gmra.mxu2 %vm659_vm0, %v3021_v5  ;;  %820 = vmatpush.bf16.msrb.mxu1 %v2712_v39 }
  0x1a   : > { %855 = vmatpush.bf16.msrb.mxu2 %v2714_v35 }
  0x1e   : > { %856 = vmatpush.bf16.msrb.mxu2 %v2713_v37 }
  0x29   : > { %2333 = vmatmul.msk.bf16.vlgmr.msrb.gmra.mxu2 %vm659_vm0, %v3021_v5 }
  0x94   : > { %v672_v7 = vpop.f32.mrf.mxu0 }
  0x95   : > { %v705_v8 = vpop.f32.mrf.mxu1  ;;  %v673_v12 = vadd.f32 %v2822_v9, %v672_v7 }
  0x96   : > { %v706_v10 = vadd.f32 %v2823_v6, %v705_v8 }
  0x97   : > { %v742_v16 = vpack.c.bf16 %v673_v12, %v673_v12 }
  0x98   : > { %v743_v11 = vpack.c.bf16 %v706_v10, %v706_v10 }
  0x9a   : > { %v752_v13 = vsel %vm747_vm1, %v743_v11, 0 }
  0x9b   : > { %761 = vmatpush.bf16.xpose.msra.mxu3 %v752_v13 }
  0x9c   : > { %v674_v14 = vpop.f32.mrf.mxu0  ;;  %v738_v25 = vpop.f32.mrf.mxu2 }
  0x9d   : > { %v707_v15 = vpop.f32.mrf.mxu1  ;;  %v739_v34 = vadd.f32 %v2825_v32, %v738_v25  ;;  %v2719_v14 = vld [vmem:[%s3534_s9 + $0x8] sm:$0xff]  ;;  %v2884_v32 = vmov 0  }
  0x9e   : > { %2791 = vset.pattern.permute.xlu0 %v2884_v32  ;;  %v2725_v32 = vld [vmem:[%s3538_s13 + $0x28] sm:$0xff] }
  0x9f   : > { %v780_v36 = vpack.c.bf16 %v739_v34, %v739_v34 }
  0xa1   : > { %v786_v38 = vsel %vm784_vm3, %v780_v36, 0 }
  0xa2   : > { %2313 = vmatmul.msk.bf16.vlgmr.msra.gmra.mxu3 %vm747_vm1, %v742_v16  ;;  %795 = vmatpush.bf16.msrb.mxu0 %v786_v38 }
  0xa3   : > { %890 = vmatpush.bf16.msrb.mxu3 %v2716_v24 }
  0xa4   : > { %v740_v29 = vpop.f32.mrf.mxu2 }
  0xa6   : > { %925 = vmatpush.bf16.msra.mxu0 %v2718_v58 }
  0xa7   : > { %891 = vmatpush.bf16.msrb.mxu3 %v2715_v33 }
  0xaa   : > { %926 = vmatpush.bf16.msra.mxu0 %v2717_v59 }
  0xab   : > { %1005 = vmatpush.bf16.msra.mxu3 %v2719_v14 }
  0xac   : > { %v858_v49 = vpop.f32.mrf.mxu2 }
  0xad   : > { %v859_v56 = vadd.f32 %v2827_v54, %v858_v49 }
  0xaf   : > { %v932_v57 = vpack.c.bf16 %v859_v56, %v859_v56  ;;  %v2830_v56 = vld [vmem:[%s3536_s11] ss:$0 sm:$0xff] }
  0xb2   : > { %2347 = vmatmul.msk.bf16.vlgmr.msrb.gmra.mxu3 %vm659_vm0, %v3021_v5 }
  0xb4   : > { %v860_v51 = vpop.f32.mrf.mxu2 }
 0x125   : > { %v763_v20 = vpop.f32.mrf.mxu3 }
 0x126   : > { %v764_v21 = vadd.f32 %v3047_v19, %v763_v20 }
 0x128   : > { %v768_v22 = vsel %vm767_vm2, %v764_v21, -inf }
 0x129   : > { %769 = vmax.xlane.f32.xlu0 %v768_v22 }
 0x12d   : > { %v765_v23 = vpop.f32.mrf.mxu3 }
 0x12e   : > { %v2828_v23 = vld [vmem:[%s3535_s10] ss:$0 sm:$0xff] }
 0x135   : > { %v893_v45 = vpop.f32.mrf.mxu3 }
 0x136   : > { %v894_v46 = vadd.f32 %v2826_v44, %v893_v45  ;;  %v2736_v44 = vld [vmem:[%s3538_s13 + $0x80] sm:$0xff] }
 0x138   : > { %v933_v47 = vpack.c.bf16 %v894_v46, %v894_v46 }
 0x13a   : > { %v938_v48 = vsel %vm747_vm1, %v933_v47, 0 }
 0x13b   : > { %947 = vmatpush.bf16.xpose.msra.mxu1 %v938_v48 }
 0x13d   : > { %v895_v50 = vpop.f32.mrf.mxu3 }
 0x13e   : > { %v1058_v50 = vlaneseq }
 0x19c   : > { %v770_v26 = vpop.xlane.xlu0 %769 }
 0x19d   : > { %v771_v27 = vsub.f32 %v764_v21, %v770_v26 }
 0x19f   : > { %v772_v28 = vmul.f32 1.442695, %v771_v27 }
 0x1a1   : > { %2849 = vpow2.f32 %v772_v28 }
 0x1a7   : > { %v2850_v30 = vpop.eup %2849 }
 0x1a8   : > { %v774_v31 = vsel %vm767_vm2, %v2850_v30, 0.0 }
 0x1a9   : > { %775 = vadd.xlane.f32.xlu0 %v774_v31  ;;  %v631_v31 = vld [vmem:[%s621_s25] sm:$0xff] }
 0x1bd   : > { %1054 = vperm.xlu0 %2791, %v631_v31   ;;  %v2734_v31 = vld [vmem:[%s3538_s13 + $0x70] sm:$0xff] }
 0x21c   : > { %v776_v40 = vpop.xlane.xlu0 %775 }
 0x21d   : > { %2851 = vrcp.f32 %v776_v40 }
 0x223   : > { %v2852_v41 = vpop.eup %2851 }
 0x224   : > { %v778_v42 = vmul.f32 %v2852_v41, %v2850_v30  ;;  %v2883_v30 = vmov 32.0  }
 0x226   : > { %v779_v43 = vpack.c.bf16 %v778_v42, %v778_v42 }
 0x228   : > { %2314 = vmatmul.msk.bf16.vlgmr.msrb.gmra.mxu0 %vm767_vm2, %v779_v43  ;;  %v2737_v43 = vld [vmem:[%s3538_s13 + $0x88] sm:$0xff] }
 0x238   : > { %2361 = vmatmul.msk.bf16.vlgmr.msra.gmra.mxu0 %vm659_vm0, %v3021_v5 }
 0x2a5   : > { %v797_v52 = vpop.f32.mrf.mxu0 }
 0x2a6   : > { %v801_v53 = vpack.c.bf16 %v797_v52, %v797_v52 }
 0x2a8   : > { %2319 = vmatmul.msk.bf16.vlgmr.msrb.gmra.mxu1 %vm747_vm1, %v801_v53  ;;  %v1059_v53 = vshrl.u32 %v1058_v50, 7 }
 0x2ad   : > { %v799_v55 = vpop.f32.mrf.mxu0 }
 0x2b5   : > { %v928_v3 = vpop.f32.mrf.mxu0 }
 0x2b6   : > { %v929_v6 = vadd.f32 %v2829_v2, %v928_v3 }
 0x2b8   : > { %2362 = vmatmul.msk.bf16.vlgmr.msra.gmra.mxu1 %vm747_vm1, %v932_v57  ;;  %v965_v7 = vpack.c.bf16 %v929_v6, %v929_v6  ;;  %v3128_v57 = vand.u32 7, %v1059_v53 }
 0x2ba   : > { %v970_v8 = vsel %vm784_vm3, %v965_v7, 0  ;;  %v3145_v2 = vadd.s32 1, %v3128_v57  ;;  %v3148_v3 = vadd.s32 4, %v3128_v57 }
 0x2bb   : > { %979 = vmatpush.bf16.msra.mxu2 %v970_v8 }
 0x2bc   : > { %vm1113_vm11 = vcmp.lt.s32.totalorder %v3145_v2, 8  ;;  %vm1136_vm12 = vcmp.lt.s32.totalorder %v3148_v3, 8  ;;  %v2762_v2 = vld [vmem:[%s3538_s13 + $0xc0] sm:$0xff] }
 0x2bd   : > { %v930_v9 = vpop.f32.mrf.mxu0  ;;  %v2770_v3 = vld [vmem:[%s3538_s13 + $0x100] sm:$0xff] }
 0x2bf   : > { %1359 = vmatpush.bf16.msrb.mxu2 %v2737_v43  ;;  %v2728_v43 = vld [vmem:[%s3538_s13 + $0x40] sm:$0xff] }
 0x2c3   : > { %1360 = vmatpush.bf16.msrb.mxu2 %v2736_v44 }
 0x325   : > { %v822_v60 = vpop.f32.mrf.mxu1 }
 0x326   : > { %v826_v24 = vadd.f32 %v2828_v23, %v822_v60  ;;  %v2831_v60 = vld [vmem:[%s3537_s12] ss:$0 sm:$0xff] }
 0x32d   : > { %v824_v61 = vpop.f32.mrf.mxu1 }
 0x335   : > { %v949_v62 = vpop.f32.mrf.mxu1 }
 0x336   : > { %v950_v63 = vadd.f32 %v3047_v19, %v949_v62  ;;  %v3134_v62 = vadd.s32 4294967294, %v3128_v57 }
 0x338   : > { %v953_v0 = vsel %vm767_vm2, %v950_v63, -inf  ;;  %vm1090_vm8 = vcmp.ge.s32.totalorder %v3134_v62, 0 }
 0x339   : > { %954 = vmax.xlane.f32.xlu1 %v953_v0  ;;  %v3139_v0 = vadd.s32 2, %v3128_v57 }
 0x33b   : > { %vm1121_vm9 = vcmp.lt.s32.totalorder %v3139_v0, 8  ;;  %v2763_v0 = vld [vmem:[%s3538_s13 + $0xc8] sm:$0xff] }
 0x33d   : > { %v951_v1 = vpop.f32.mrf.mxu1 }
 0x33e   : > { %v3142_v1 = vadd.s32 4294967293, %v3128_v57 }
 0x340   : > { %vm1082_vm10 = vcmp.ge.s32.totalorder %v3142_v1, 0  ;;  %v2771_v1 = vld [vmem:[%s3538_s13 + $0x108] sm:$0xff] }
 0x3ac   : > { %v955_v5 = vpop.xlane.xlu1 %954 }
 0x3ad   : > { %v956_v10 = vsub.f32 %v950_v63, %v955_v5  ;;  %v3136_v63 = vpop.permute.xlu0 %1054 }
 0x3af   : > { %v957_v11 = vmul.f32 1.442695, %v956_v10 }
 0x3b1   : > { %2853 = vpow2.f32 %v957_v11 }
 0x3b7   : > { %v2854_v12 = vpop.eup %2853 }
 0x3b8   : > { %v959_v13 = vsel %vm767_vm2, %v2854_v12, 0.0 }
 0x3b9   : > { %960 = vadd.xlane.f32.xlu1 %v959_v13  ;;  %v3167_v13 = vadd.s32 3, %v3128_v57 }
 0x3bb   : > { %vm1129_vm14 = vcmp.lt.s32.totalorder %v3167_v13, 8  ;;  %v2761_v13 = vld [vmem:[%s3538_s13 + $0xb8] sm:$0xff] }
 0x42c   : > { %v961_v15 = vpop.xlane.xlu1 %960 }
 0x42d   : > { %2855 = vrcp.f32 %v961_v15 }
 0x42e   : > { %2857 = vrcp.f32 %v2883_v30  ;;  %v2726_v30 = vld [vmem:[%s3538_s13 + $0x30] sm:$0xff] }
 0x433   : > { %v2856_v16 = vpop.eup %2855 }
 0x434   : > { %v963_v17 = vmul.f32 %v2856_v16, %v2854_v12  ;;  %v2858_v33 = vpop.eup %2857  ;;  %v3164_v12 = vadd.s32 4294967295, %v3128_v57 }
 0x435   : > { %v1019_v34 = vmul.f32 32.0, %v2858_v33  ;;  %vm1023_vm4 = vweird.f32 %v2858_v33 }
 0x436   : > { %v964_v18 = vpack.c.bf16 %v963_v17, %v963_v17  ;;  %vm1098_vm13 = vcmp.ge.s32.totalorder %v3164_v12, 0 }
 0x437   : > { %v1020_v35 = vsub.f32 1.0, %v1019_v34  ;;  %v2724_v34 = vld [vmem:[%s3538_s13 + $0x20] sm:$0xff] }
 0x438   : > { %2363 = vmatmul.msk.bf16.vlgmr.msra.gmra.mxu2 %vm767_vm2, %v964_v18 }
 0x439   : > { %v1021_v36 = vmul.f32 %v2858_v33, %v1020_v35  ;;  %v2732_v35 = vld [vmem:[%s3538_s13 + $0x60] sm:$0xff] }
 0x43b   : > { %v1022_v37 = vadd.f32 %v2858_v33, %v1021_v36  ;;  %v2723_v36 = vld [vmem:[%s3538_s13 + $0x18] sm:$0xff] }
 0x4bb   : > { %v981_v20 = vpop.f32.mrf.mxu2 }
 0x4bc   : > { %v985_v21 = vpack.c.bf16 %v981_v20, %v981_v20 }
 0x4be   : > { %2370 = vmatmul.msk.bf16.vlgmr.msra.gmra.mxu3 %vm747_vm1, %v985_v21 }
 0x4c3   : > { %v983_v22 = vpop.f32.mrf.mxu2 }
 0x541   : > { %v1007_v25 = vpop.f32.mrf.mxu3 }
 0x542   : > { %v1011_v26 = vadd.f32 %v1007_v25, %v826_v24 }
 0x544   : > { %v1012_v27 = vadd.f32 %v1011_v26, %v3017_v4  ;;  %v3114_v4 = vsel %vm1023_vm4, %v2858_v33, %v1022_v37  ;;  %v2733_v33 = vld [vmem:[%s3538_s13 + $0x68] sm:$0xff]  ;;  %v2731_v37 = vld [vmem:[%s3538_s13 + $0x58] sm:$0xff]  ;;  %vm1166_vm4 = vcmask 523264  }
 0x546   : > { %v1015_v28 = vsel %vm659_vm0, %v1012_v27, 0.0 }
 0x547   : > { %1016 = vadd.xlane.f32.xlu2 %v1015_v28  ;;  %v2727_v28 = vld [vmem:[%s3538_s13 + $0x38] sm:$0xff] }
 0x548   : > { %1327 = vmatpush.bf16.msrb.mxu0 %v2727_v28 }
 0x549   : > { %v1009_v29 = vpop.f32.mrf.mxu3 }
 0x54a   : > { %v2735_v29 = vld [vmem:[%s3538_s13 + $0x78] sm:$0xff] }
 0x54b   : > { %1340 = vmatpush.bf16.msrb.mxu1 %v2735_v29 }
 0x54c   : > { %1328 = vmatpush.bf16.msrb.mxu0 %v2726_v30 }
 0x54f   : > { %1341 = vmatpush.bf16.msrb.mxu1 %v2734_v31 }
 0x550   : > { %1329 = vmatpush.bf16.msrb.mxu0 %v2725_v32 }
 0x553   : > { %1342 = vmatpush.bf16.msrb.mxu1 %v2733_v33 }
 0x554   : > { %1330 = vmatpush.bf16.msrb.mxu0 %v2724_v34 }
 0x557   : > { %1343 = vmatpush.bf16.msrb.mxu1 %v2732_v35 }
 0x558   : > { %1331 = vmatpush.bf16.msrb.mxu0 %v2723_v36 }
 0x55b   : > { %1344 = vmatpush.bf16.msrb.mxu1 %v2731_v37  ;;  %v2743_v37 = vld [vmem:[%s3552_s1 + $0x28] sm:$0xff] }
 0x55c   : > { %1492 = vmatpush.bf16.msra.mxu2 %v2743_v37 }
 0x5ba   : > { %v1017_v38 = vpop.xlane.xlu2 %1016 }
 0x5bb   : > { %v1025_v39 = vmul.f32 %v3114_v4, %v1017_v38  ;;  %v2722_v38 = vld [vmem:[%s3538_s13 + $0x10] sm:$0xff] }
 0x5bc   : > { %1332 = vmatpush.bf16.msrb.mxu0 %v2722_v38  ;;  %v2747_v38 = vld [vmem:[%s3532_s7 + $0x28] sm:$0xff] }
 0x5bd   : > { %v1026_v40 = vsub.f32 %v1012_v27, %v1025_v39  ;;  %v2730_v39 = vld [vmem:[%s3538_s13 + $0x50] sm:$0xff] }
 0x5be   : > { %1345 = vmatpush.bf16.msrb.mxu1 %v2730_v39  ;;  %v2742_v39 = vld [vmem:[%s3552_s1 + $0x20] sm:$0xff] }
 0x5bf   : > { %v1027_v41 = vmul.f32 %v1026_v40, %v1026_v40  ;;  %1493 = vmatpush.bf16.msra.mxu2 %v2742_v39 }
 0x5c1   : > { %v1028_v42 = vsel %vm659_vm0, %v1027_v41, 0.0  ;;  %v2729_v41 = vld [vmem:[%s3538_s13 + $0x48] sm:$0xff] }
 0x5c2   : > { %1029 = vadd.xlane.f32.xlu2 %v1028_v42  ;;  %1346 = vmatpush.bf16.msrb.mxu1 %v2729_v41  ;;  %v2720_v42 = vld [vmem:[%s3538_s13] sm:$0xff] }
 0x5c3   : > { %v2746_v41 = vld [vmem:[%s3532_s7 + $0x20] sm:$0xff] }
 0x5c6   : > { %1347 = vmatpush.bf16.msrb.mxu1 %v2728_v43 }
 0x635   : > { %v1030_v45 = vpop.xlane.xlu2 %1029 }
 0x636   : > { %v1031_v46 = vmul.f32 %v1030_v45, %v3114_v4  ;;  %v2741_v45 = vld [vmem:[%s3540_s15 + $0x18] sm:$0xff] }
 0x637   : > { %1411 = vmatpush.bf16.msrb.mxu3 %v2741_v45 }
 0x638   : > { %v1032_v47 = vadd.f32 1e-05, %v1031_v46  ;;  %v3245_v46 = vadd.s32 4294967292, %v3128_v57 }
 0x63a   : > { %2859 = vrsqrt.f32 %v1032_v47  ;;  %vm1039_vm6 = vweird.f32 %v1032_v47  ;;  %vm1074_vm15 = vcmp.ge.s32.totalorder %v3245_v46, 0 }
 0x640   : > { %v2860_v48 = vpop.eup %2859 }
 0x641   : > { %v1034_v49 = vmul.f32 %v2860_v48, %v1032_v47  ;;  %vm1040_vm5 = vweird.f32 %v2860_v48 }
 0x642   : > { %vm1041_vm7 = vmor %vm1039_vm6, %vm1040_vm5  ;;  %vm3547_vm5 = vcmask 785408  }
 0x643   : > { %v1035_v51 = vmul.f32 %v2860_v48, %v1034_v49 }
 0x645   : > { %v1036_v52 = vmul.f32 0.5, %v1035_v51 }
 0x647   : > { %v1037_v54 = vsub.f32 1.5, %v1036_v52 }
 0x649   : > { %v1038_v55 = vmul.f32 %v2860_v48, %v1037_v54 }
 0x64b   : > { %v1042_v58 = vsel %vm1041_vm7, %v2860_v48, %v1038_v55 }
 0x64c   : > { %v1043_v59 = vmul.f32 %v1042_v58, %v1026_v40  ;;  %v2721_v40 = vld [vmem:[%s3538_s13 + $0x8] sm:$0xff] }
 0x64d   : > { %1333 = vmatpush.bf16.msrb.mxu0 %v2721_v40  ;;  %v2744_v40 = vld [vmem:[%s3530_s5 + $0x20] sm:$0xff] }
 0x64e   : > { %v1047_v61 = vmul.f32 %v2830_v56, %v1043_v59 }
 0x650   : > { %v1051_v6 = vadd.f32 %v2831_v60, %v1047_v61 }
 0x651   : > { %1334 = vmatpush.bf16.msrb.mxu0 %v2720_v42 }
 0x652   : > { %v3151_v7 = vmul.f32 %v3136_v63, %v1051_v6 }
 0x654   : > { %v1088_v8 = vrot.slane %v3151_v7, 6  ;;  %v1118_v9 = vrot.slane %v3151_v7, 2  ;;  %v1080_v5 = vrot.slane %v3151_v7, 5  ;;  %v1110_v10 = vrot.slane %v3151_v7, 1 }
 0x655   : > { %v1072_v11 = vrot.slane %v3151_v7, 4  ;;  %v1096_v23 = vrot.slane %v3151_v7, 7  ;;  %v1126_v24 = vrot.slane %v3151_v7, 3  ;;  %1562 = vmatpush.bf16.msra.mxu0 %v2747_v38 }
 0x656   : > { %v1095_v14 = vsel %vm1090_vm8, %v1088_v8, 0.0  ;;  %v1125_v15 = vsel %vm1121_vm9, %v1118_v9, 0.0  ;;  %v1087_v16 = vsel %vm1082_vm10, %v1080_v5, 0.0  ;;  %v1117_v17 = vsel %vm1113_vm11, %v1110_v10, 0.0  ;;  %v2740_v10 = vld [vmem:[%s3540_s15 + $0x10] sm:$0xff] }
 0x657   : > { %v2797_v18 = vpack.i.bf16 %v1125_v15, %v1095_v14  ;;  %v2792_v20 = vpack.i.bf16 %v1117_v17, %v1087_v16  ;;  %v1140_v21 = vsel %vm1136_vm12, %v1072_v11, 0.0  ;;  %v1103_v25 = vsel %vm1098_vm13, %v1096_v23, 0.0  ;;  %1412 = vmatpush.bf16.msrb.mxu3 %v2740_v10  ;;  %v2738_v14 = vld [vmem:[%s3540_s15] sm:$0xff] }
 0x658   : > { %v1175_v22 = vpack.c.bf16 %v1140_v21, %v1140_v21  ;;  %v1133_v26 = vsel %vm1129_vm14, %v1126_v24, 0.0  ;;  %v1079_v53 = vsel %vm1074_vm15, %v1072_v11, 0.0  ;;  %v2739_v11 = vld [vmem:[%s3540_s15 + $0x8] sm:$0xff]  ;;  %v2832_v15 = vld [vmem:[%s3539_s14] ss:$0 sm:$0xff] }
 0x659   : > { %2798 = vrot.lane.b32.xlu2 %v2797_v18, %s2885_s2  ;;  %2793 = vrot.lane.b32.xlu1 %v2792_v20, %s3546_s23  ;;  %v2802_v27 = vpack.i.bf16 %v1133_v26, %v1103_v25  ;;  %v2833_v26 = vld [vmem:[%s3541_s16] ss:$0 sm:$0xff]  ;;  %s3556_s23 = smov 32  }
 0x65a   : > { %2443 = vmatmul.msk.bf16.vlgmr.msrb.gmra.mxu2 %vm659_vm0, %v1175_v22  ;;  %1563 = vmatpush.bf16.msra.mxu0 %v2746_v41 }
 0x65b   : > { %1413 = vmatpush.bf16.msrb.mxu3 %v2739_v11 }
 0x65f   : > { %1414 = vmatpush.bf16.msrb.mxu3 %v2738_v14 }
 0x661   : > { %2803 = vrot.lane.b32.xlu2 %v2802_v27, %s2887_s24 }
 0x6b3   : > { %v2799_v44 = vpop.permute.xlu2 %2798 }
 0x6b4   : > { %v2801_v51 = vunpack.i.h.bf16 %v2799_v44  ;;  %v2800_v52 = vunpack.i.l.bf16 %v2799_v44  ;;  %v2750_v44 = vld [vmem:[%s3552_s1 + $0x38] sm:$0xff] }
 0x6bb   : > { %v2804_v47 = vpop.permute.xlu2 %2803 }
 0x6bc   : > { %v2806_v54 = vunpack.i.h.bf16 %v2804_v47  ;;  %v2805_v55 = vunpack.i.l.bf16 %v2804_v47  ;;  %v2749_v47 = vld [vmem:[%s3552_s1 + $0x30] sm:$0xff] }
 0x6cb   : > { %v2794_v48 = vpop.permute.xlu1 %2793 }
 0x6cc   : > { %v2796_v49 = vunpack.i.h.bf16 %v2794_v48  ;;  %v2795_v50 = vunpack.i.l.bf16 %v2794_v48 }
 0x6ce   : > { %v1170_v56 = vsel %vm659_vm0, %v3151_v7, %v2796_v49  ;;  %v1165_v57 = vsel %vm659_vm0, %v1079_v53, %v2795_v50 }
 0x6cf   : > { %v1171_v58 = vsel %vm1166_vm4, %v1170_v56, %v2801_v51  ;;  %v1167_v59 = vsel %vm1166_vm4, %v1165_v57, %v2800_v52  ;;  %v2835_v56 = vld [vmem:[%s3543_s18] ss:$0 sm:$0xff] }
 0x6d0   : > { %v1169_v60 = vsel %vm3547_vm5, %v1167_v59, %v2805_v55  ;;  %v1172_v61 = vsel %vm3547_vm5, %v1171_v58, %v2806_v54  ;;  %v2834_v54 = vld [vmem:[%s3542_s17] ss:$0 sm:$0xff] }
 0x6d1   : > { %v1173_v6 = vpack.c.bf16 %v1169_v60, %v1169_v60  ;;  %v1174_v8 = vpack.c.bf16 %v1172_v61, %v1172_v61 }
 0x6d3   : > { %1335 = vmatmul.bf16.vlgmr.msrb.gmra.mxu0 %v1173_v6  ;;  %1348 = vmatmul.bf16.vlgmr.msrb.gmra.mxu1 %v1174_v8  ;;  %v2836_v6 = vld [vmem:[%s3533_s8 + $0x2] ss:$0 sm:$0xff] }
 0x6d4   : > { %1677 = vmatpush.bf16.msrb.mxu0 %v2750_v44 }
 0x6d8   : > { %1678 = vmatpush.bf16.msrb.mxu0 %v2749_v47  ;;  %v2753_v47 = vld [vmem:[%s3532_s7 + $0x30] sm:$0xff] }
 0x6dd   : > { %v1362_v9 = vpop.f32.mrf.mxu2 }
 0x6e5   : > { %v1364_v5 = vpop.f32.mrf.mxu2 }
 0x6e6   : > { %v2838_v5 = vld [vmem:[%s3531_s6 + $0x2] ss:$0 sm:$0xff] }
 0x750   : > { %v1336_v16 = vpop.f32.mrf.mxu0  ;;  %v1349_v17 = vpop.f32.mrf.mxu1 }
 0x751   : > { %v1337_v18 = vadd.f32 %v2832_v15, %v1336_v16 }
 0x753   : > { %v1350_v20 = vadd.f32 %v1349_v17, %v1337_v18  ;;  %v2837_v17 = vld [vmem:[%s3529_s4 + $0x2] ss:$0 sm:$0xff] }
 0x755   : > { %v1363_v21 = vadd.f32 %v1362_v9, %v1350_v20 }
 0x757   : > { %v1366_v22 = vmax.f32 %v1363_v21, 0.0  ;;  %v2752_v21 = vld [vmem:[%s3530_s5 + $0x38] sm:$0xff] }
 0x758   : > { %v1338_v23 = vpop.f32.mrf.mxu0  ;;  %v1351_v24 = vpop.f32.mrf.mxu1 }
 0x759   : > { %v1367_v25 = vpack.c.bf16 %v1366_v22, %v1366_v22  ;;  %v2751_v24 = vld [vmem:[%s3530_s5 + $0x30] sm:$0xff] }
 0x75b   : > { %2460 = vmatmul.msk.bf16.vlgmr.msrb.gmra.mxu3 %vm1166_vm4, %v1367_v25 }
 0x7de   : > { %v1416_v27 = vpop.f32.mrf.mxu3 }
 0x7df   : > { %v1417_v28 = vadd.f32 %v2833_v26, %v1416_v27 }
 0x7e1   : > { %v1420_v29 = vadd.f32 %v1417_v28, %v3151_v7  ;;  %v2745_v7 = vld [vmem:[%s3530_s5 + $0x28] sm:$0xff] }
 0x7e2   : > { %1527 = vmatpush.bf16.msra.mxu3 %v2745_v7 }
 0x7e3   : > { %v1423_v30 = vsel %vm659_vm0, %v1420_v29, 0.0 }
 0x7e4   : > { %1424 = vadd.xlane.f32.xlu1 %v1423_v30  ;;  %v2748_v30 = vld [vmem:[%s3534_s9 + $0x10] sm:$0xff] }
 0x7e6   : > { %v1418_v31 = vpop.f32.mrf.mxu3  ;;  %1528 = vmatpush.bf16.msra.mxu3 %v2744_v40 }
 0x7ea   : > { %1642 = vmatpush.bf16.msrb.mxu3 %v2748_v30  ;;  %v2842_v30 = vld [vmem:[%s3535_s10 + $0x1] ss:$0 sm:$0xff] }
 0x857   : > { %v1425_v32 = vpop.xlane.xlu1 %1424 }
 0x858   : > { %v1426_v33 = vmul.f32 %v1425_v32, %v3114_v4 }
 0x85a   : > { %v1427_v34 = vsub.f32 %v1420_v29, %v1426_v33 }
 0x85c   : > { %v1428_v35 = vmul.f32 %v1427_v34, %v1427_v34 }
 0x85e   : > { %v1429_v36 = vsel %vm659_vm0, %v1428_v35, 0.0  ;;  %v2840_v35 = vld [vmem:[%s3531_s6 + $0x3] ss:$0 sm:$0xff] }
 0x85f   : > { %1430 = vadd.xlane.f32.xlu2 %v1429_v36 }
 0x8d2   : > { %v1431_v42 = vpop.xlane.xlu2 %1430 }
 0x8d3   : > { %v1432_v43 = vmul.f32 %v1431_v42, %v3114_v4 }
 0x8d5   : > { %v1433_v45 = vadd.f32 1e-05, %v1432_v43 }
 0x8d7   : > { %2861 = vrsqrt.f32 %v1433_v45  ;;  %vm1440_vm7 = vweird.f32 %v1433_v45 }
 0x8dd   : > { %v2862_v48 = vpop.eup %2861 }
 0x8de   : > { %v1435_v49 = vmul.f32 %v2862_v48, %v1433_v45  ;;  %vm1441_vm6 = vweird.f32 %v2862_v48  ;;  %v2754_v45 = vld [vmem:[%s3532_s7 + $0x38] sm:$0xff] }
 0x8df   : > { %vm1442_vm5 = vmor %vm1440_vm7, %vm1441_vm6 }
 0x8e0   : > { %v1436_v50 = vmul.f32 %v2862_v48, %v1435_v49 }
 0x8e2   : > { %v1437_v51 = vmul.f32 0.5, %v1436_v50 }
 0x8e4   : > { %v1438_v52 = vsub.f32 1.5, %v1437_v51 }
 0x8e6   : > { %v1439_v53 = vmul.f32 %v2862_v48, %v1438_v52 }
 0x8e8   : > { %v1443_v55 = vsel %vm1442_vm5, %v2862_v48, %v1439_v53 }
 0x8e9   : > { %v1444_v57 = vmul.f32 %v1443_v55, %v1427_v34  ;;  %v2839_v55 = vld [vmem:[%s3529_s4 + $0x3] ss:$0 sm:$0xff] }
 0x8eb   : > { %v1448_v58 = vmul.f32 %v2834_v54, %v1444_v57  ;;  %v2841_v57 = vld [vmem:[%s3533_s8 + $0x3] ss:$0 sm:$0xff] }
 0x8ed   : > { %v1452_v59 = vadd.f32 %v2835_v56, %v1448_v58 }
 0x8ef   : > { %v3311_v60 = vmul.f32 %v1452_v59, %v3136_v63 }
 0x8f1   : > { %v3315_v61 = vpack.c.bf16 %v3311_v60, %v3311_v60 }
 0x8f3   : > { %2475 = vmatmul.msk.bf16.vlgmr.msra.gmra.mxu2 %vm659_vm0, %v3315_v61  ;;  %2489 = vmatmul.msk.bf16.vlgmr.msra.gmra.mxu3 %vm659_vm0, %v3315_v61 }
 0x8f4   : > { %2503 = vmatmul.msk.bf16.vlgmr.msra.gmra.mxu0 %vm659_vm0, %v3315_v61 }
 0x904   : > { %2526 = vmatmul.msk.bf16.vlgmr.msrb.gmra.mxu0 %vm659_vm0, %v3315_v61 }
 0x971   : > { %v1565_v8 = vpop.f32.mrf.mxu0 }
 0x972   : > { %v1566_v9 = vadd.f32 %v2836_v6, %v1565_v8 }
 0x974   : > { %v1602_v10 = vpack.c.bf16 %v1566_v9, %v1566_v9 }
 0x976   : > { %v1607_v11 = vsel %vm784_vm3, %v1602_v10, 0  ;;  %v1495_v14 = vpop.f32.mrf.mxu2  ;;  %v1530_v15 = vpop.f32.mrf.mxu3 }
 0x977   : > { %v1531_v16 = vadd.f32 %v2838_v5, %v1530_v15  ;;  %1616 = vmatpush.bf16.msrb.mxu2 %v1607_v11  ;;  %v1496_v23 = vadd.f32 %v2837_v17, %v1495_v14 }
 0x979   : > { %v1570_v18 = vpack.c.bf16 %v1531_v16, %v1531_v16  ;;  %v1567_v20 = vpop.f32.mrf.mxu0  ;;  %v1569_v27 = vpack.c.bf16 %v1496_v23, %v1496_v23  ;;  %v2755_v23 = vld [vmem:[%s3534_s9 + $0x18] sm:$0xff] }
 0x97b   : > { %v1575_v22 = vsel %vm747_vm1, %v1570_v18, 0  ;;  %1747 = vmatpush.bf16.msra.mxu2 %v2754_v45 }
 0x97c   : > { %1584 = vmatpush.bf16.xpose.msra.mxu1 %v1575_v22 }
 0x97e   : > { %v1497_v25 = vpop.f32.mrf.mxu2  ;;  %v1532_v26 = vpop.f32.mrf.mxu3 }
 0x97f   : > { %1748 = vmatpush.bf16.msra.mxu2 %v2753_v47 }
 0x981   : > { %v1680_v28 = vpop.f32.mrf.mxu0 }
 0x982   : > { %v1681_v56 = vadd.f32 %v2839_v55, %v1680_v28 }
 0x983   : > { %2504 = vmatmul.msk.bf16.vlgmr.msra.gmra.mxu1 %vm747_vm1, %v1569_v27 }
 0x984   : > { %1712 = vmatpush.bf16.msrb.mxu1 %v2752_v21  ;;  %v1754_v59 = vpack.c.bf16 %v1681_v56, %v1681_v56 }
 0x988   : > { %1713 = vmatpush.bf16.msrb.mxu1 %v2751_v24 }
 0x989   : > { %v1682_v29 = vpop.f32.mrf.mxu0 }
 0x98c   : > { %1827 = vmatpush.bf16.msra.mxu1 %v2755_v23  ;;  %v2769_v23 = vld [vmem:[%s3538_s13 + $0xf8] sm:$0xff] }
 0x993   : > { %2540 = vmatmul.msk.bf16.vlgmr.msrb.gmra.mxu1 %vm659_vm0, %v3315_v61 }
 0xa00   : > { %v1586_v31 = vpop.f32.mrf.mxu1 }
 0xa01   : > { %v1587_v32 = vadd.f32 %v3047_v19, %v1586_v31 }
 0xa03   : > { %v1590_v33 = vsel %vm767_vm2, %v1587_v32, -inf }
 0xa04   : > { %1591 = vmax.xlane.f32.xlu0 %v1590_v33 }
 0xa08   : > { %v1588_v34 = vpop.f32.mrf.mxu1 }
 0xa10   : > { %v1715_v36 = vpop.f32.mrf.mxu1 }
 0xa11   : > { %v1716_v37 = vadd.f32 %v2840_v35, %v1715_v36 }
 0xa13   : > { %v1755_v7 = vpack.c.bf16 %v1716_v37, %v1716_v37 }
 0xa15   : > { %v1760_v38 = vsel %vm747_vm1, %v1755_v7, 0 }
 0xa16   : > { %1769 = vmatpush.bf16.xpose.msra.mxu3 %v1760_v38 }
 0xa18   : > { %v1717_v39 = vpop.f32.mrf.mxu1 }
 0xa77   : > { %v1592_v40 = vpop.xlane.xlu0 %1591 }
 0xa78   : > { %v1593_v41 = vsub.f32 %v1587_v32, %v1592_v40 }
 0xa7a   : > { %v1594_v42 = vmul.f32 1.442695, %v1593_v41  ;;  %v2773_v41 = vld [vmem:[%s3538_s13 + $0x118] sm:$0xff] }
 0xa7c   : > { %2863 = vpow2.f32 %v1594_v42 }
 0xa82   : > { %v2864_v43 = vpop.eup %2863 }
 0xa83   : > { %v1596_v44 = vsel %vm767_vm2, %v2864_v43, 0.0 }
 0xa84   : > { %1597 = vadd.xlane.f32.xlu1 %v1596_v44 }
 0xaf7   : > { %v1598_v48 = vpop.xlane.xlu1 %1597 }
 0xaf8   : > { %2865 = vrcp.f32 %v1598_v48 }
 0xafe   : > { %v2866_v49 = vpop.eup %2865 }
 0xaff   : > { %v1600_v50 = vmul.f32 %v2866_v49, %v2864_v43 }
 0xb01   : > { %v1601_v51 = vpack.c.bf16 %v1600_v50, %v1600_v50 }
 0xb03   : > { %2505 = vmatmul.msk.bf16.vlgmr.msrb.gmra.mxu2 %vm767_vm2, %v1601_v51 }
 0xb04   : > { %2072 = vmatpush.bf16.msrb.mxu2 %v2763_v0 }
 0xb08   : > { %2073 = vmatpush.bf16.msrb.mxu2 %v2762_v2 }
 0xb0c   : > { %2074 = vmatpush.bf16.msrb.mxu2 %v2761_v13 }
 0xb13   : > { %2554 = vmatmul.msk.bf16.vlgmr.msra.gmra.mxu2 %vm659_vm0, %v3315_v61 }
 0xb86   : > { %v1618_v52 = vpop.f32.mrf.mxu2 }
 0xb87   : > { %v1622_v53 = vpack.c.bf16 %v1618_v52, %v1618_v52  ;;  %v2843_v52 = vld [vmem:[%s3536_s11 + $0x1] ss:$0 sm:$0xff] }
 0xb89   : > { %2512 = vmatmul.msk.bf16.vlgmr.msrb.gmra.mxu3 %vm747_vm1, %v1622_v53 }
 0xb8a   : > { %2085 = vmatpush.bf16.msrb.mxu3 %v2771_v1 }
 0xb8e   : > { %v1620_v54 = vpop.f32.mrf.mxu2  ;;  %2086 = vmatpush.bf16.msrb.mxu3 %v2770_v3 }
 0xb8f   : > { %v2844_v54 = vld [vmem:[%s3537_s12 + $0x1] ss:$0 sm:$0xff] }
 0xb92   : > { %2087 = vmatpush.bf16.msrb.mxu3 %v2769_v23 }
 0xb96   : > { %v1750_v58 = vpop.f32.mrf.mxu2 }
 0xb97   : > { %v1751_v6 = vadd.f32 %v2841_v57, %v1750_v58 }
 0xb99   : > { %v1787_v8 = vpack.c.bf16 %v1751_v6, %v1751_v6  ;;  %2555 = vmatmul.msk.bf16.vlgmr.msra.gmra.mxu3 %vm747_vm1, %v1754_v59 }
 0xb9b   : > { %v1792_v61 = vsel %vm784_vm3, %v1787_v8, 0 }
 0xb9c   : > { %1801 = vmatpush.bf16.msra.mxu0 %v1792_v61 }
 0xb9e   : > { %v1752_v9 = vpop.f32.mrf.mxu2 }
 0xba0   : > { %2104 = vmatpush.bf16.msrb.mxu0 %v2773_v41 }
 0xc0c   : > { %v1644_v5 = vpop.f32.mrf.mxu3 }
 0xc0d   : > { %v1648_v31 = vadd.f32 %v2842_v30, %v1644_v5  ;;  %v2765_v30 = vld [vmem:[%s3538_s13 + $0xd8] sm:$0xff] }
 0xc14   : > { %v1646_v10 = vpop.f32.mrf.mxu3 }
 0xc1c   : > { %v1771_v11 = vpop.f32.mrf.mxu3 }
 0xc1d   : > { %v1772_v14 = vadd.f32 %v3047_v19, %v1771_v11 }
 0xc1f   : > { %v1775_v15 = vsel %vm767_vm2, %v1772_v14, -inf }
 0xc20   : > { %1776 = vmax.xlane.f32.xlu2 %v1775_v15 }
 0xc24   : > { %v1773_v16 = vpop.f32.mrf.mxu3 }
 0xc93   : > { %v1777_v17 = vpop.xlane.xlu2 %1776 }
 0xc94   : > { %v1778_v18 = vsub.f32 %v1772_v14, %v1777_v17 }
 0xc96   : > { %v1779_v20 = vmul.f32 1.442695, %v1778_v18 }
 0xc98   : > { %2867 = vpow2.f32 %v1779_v20 }
 0xc9e   : > { %v2868_v21 = vpop.eup %2867 }
 0xc9f   : > { %v1781_v22 = vsel %vm767_vm2, %v2868_v21, 0.0 }
 0xca0   : > { %1782 = vadd.xlane.f32.xlu1 %v1781_v22 }
 0xd13   : > { %v1783_v24 = vpop.xlane.xlu1 %1782 }
 0xd14   : > { %2869 = vrcp.f32 %v1783_v24  ;;  %v2760_v24 = vld [vmem:[%s3538_s13 + $0xb0] sm:$0xff] }
 0xd15   : > { %2075 = vmatpush.bf16.msrb.mxu2 %v2760_v24 }
 0xd1a   : > { %v2870_v19 = vpop.eup %2869 }
 0xd1b   : > { %v1785_v25 = vmul.f32 %v2870_v19, %v2868_v21  ;;  %v2768_v19 = vld [vmem:[%s3538_s13 + $0xf0] sm:$0xff] }
 0xd1c   : > { %2088 = vmatpush.bf16.msrb.mxu3 %v2768_v19 }
 0xd1d   : > { %v1786_v26 = vpack.c.bf16 %v1785_v25, %v1785_v25  ;;  %v2759_v25 = vld [vmem:[%s3538_s13 + $0xa8] sm:$0xff] }
 0xd1e   : > { %2076 = vmatpush.bf16.msrb.mxu2 %v2759_v25  ;;  %v2847_v25 = vld [vmem:[%s3542_s17 + $0x1] ss:$0 sm:$0xff] }
 0xd1f   : > { %2556 = vmatmul.msk.bf16.vlgmr.msra.gmra.mxu0 %vm767_vm2, %v1786_v26  ;;  %v2767_v26 = vld [vmem:[%s3538_s13 + $0xe8] sm:$0xff] }
 0xd20   : > { %2089 = vmatpush.bf16.msrb.mxu3 %v2767_v26 }
 0xd9c   : > { %v1803_v27 = vpop.f32.mrf.mxu0 }
 0xd9d   : > { %v1807_v28 = vpack.c.bf16 %v1803_v27, %v1803_v27  ;;  %v2758_v27 = vld [vmem:[%s3538_s13 + $0xa0] sm:$0xff] }
 0xd9e   : > { %2077 = vmatpush.bf16.msrb.mxu2 %v2758_v27 }
 0xd9f   : > { %2563 = vmatmul.msk.bf16.vlgmr.msra.gmra.mxu1 %vm747_vm1, %v1807_v28  ;;  %v2766_v28 = vld [vmem:[%s3538_s13 + $0xe0] sm:$0xff] }
 0xda0   : > { %2090 = vmatpush.bf16.msrb.mxu3 %v2766_v28 }
 0xda4   : > { %v1805_v29 = vpop.f32.mrf.mxu0  ;;  %2091 = vmatpush.bf16.msrb.mxu3 %v2765_v30 }
 0xda5   : > { %v2757_v29 = vld [vmem:[%s3538_s13 + $0x98] sm:$0xff] }
 0xda6   : > { %2078 = vmatpush.bf16.msrb.mxu2 %v2757_v29 }
 0xe1c   : > { %v1829_v32 = vpop.f32.mrf.mxu1 }
 0xe1d   : > { %v1833_v33 = vadd.f32 %v1829_v32, %v1648_v31  ;;  %v2756_v31 = vld [vmem:[%s3538_s13 + $0x90] sm:$0xff] }
 0xe1e   : > { %v2764_v32 = vld [vmem:[%s3538_s13 + $0xd0] sm:$0xff]  ;;  %2079 = vmatpush.bf16.msrb.mxu2 %v2756_v31 }
 0xe1f   : > { %v1834_v34 = vadd.f32 %v1833_v33, %v3311_v60  ;;  %v2772_v60 = vld [vmem:[%s3538_s13 + $0x110] sm:$0xff]  ;;  %2092 = vmatpush.bf16.msrb.mxu3 %v2764_v32  ;;  %v2777_v33 = vld [vmem:[%s3540_s15 + $0x38] sm:$0xff] }
 0xe20   : > { %2105 = vmatpush.bf16.msrb.mxu0 %v2772_v60  ;;  %2158 = vmatpush.bf16.msrb.mxu1 %v2777_v33 }
 0xe21   : > { %v1839_v35 = vsel %vm659_vm0, %v1834_v34, 0.0 }
 0xe22   : > { %1840 = vadd.xlane.f32.xlu2 %v1839_v35 }
 0xe24   : > { %v1831_v36 = vpop.f32.mrf.mxu1 }
 0xe95   : > { %v1841_v37 = vpop.xlane.xlu2 %1840 }
 0xe96   : > { %v1842_v7 = vmul.f32 %v1841_v37, %v3114_v4 }
 0xe98   : > { %v1843_v38 = vsub.f32 %v1834_v34, %v1842_v7 }
 0xe9a   : > { %v1844_v39 = vmul.f32 %v1843_v38, %v1843_v38 }
 0xe9c   : > { %v1845_v40 = vsel %vm659_vm0, %v1844_v39, 0.0 }
 0xe9d   : > { %1846 = vadd.xlane.f32.xlu0 %v1845_v40 }
 0xf10   : > { %v1847_v42 = vpop.xlane.xlu0 %1846 }
 0xf11   : > { %v1848_v43 = vmul.f32 %v1847_v42, %v3114_v4 }
 0xf13   : > { %v1849_v44 = vadd.f32 1e-05, %v1848_v43 }
 0xf15   : > { %2871 = vrsqrt.f32 %v1849_v44  ;;  %vm1856_vm2 = vweird.f32 %v1849_v44 }
 0xf1b   : > { %v2872_v45 = vpop.eup %2871 }
 0xf1c   : > { %v1851_v47 = vmul.f32 %v2872_v45, %v1849_v44  ;;  %vm1857_vm1 = vweird.f32 %v2872_v45 }
 0xf1d   : > { %vm1858_vm3 = vmor %vm1856_vm2, %vm1857_vm1 }
 0xf1e   : > { %v1852_v48 = vmul.f32 %v2872_v45, %v1851_v47 }
 0xf20   : > { %v1853_v49 = vmul.f32 0.5, %v1852_v48 }
 0xf22   : > { %v1854_v50 = vsub.f32 1.5, %v1853_v49 }
 0xf24   : > { %v1855_v51 = vmul.f32 %v2872_v45, %v1854_v50 }
 0xf26   : > { %v1859_v53 = vsel %vm1858_vm3, %v2872_v45, %v1855_v51 }
 0xf27   : > { %v1860_v55 = vmul.f32 %v1859_v53, %v1843_v38  ;;  %v2775_v53 = vld [vmem:[%s3540_s15 + $0x28] sm:$0xff] }
 0xf29   : > { %v1864_v56 = vmul.f32 %v2843_v52, %v1860_v55  ;;  %v2776_v52 = vld [vmem:[%s3540_s15 + $0x30] sm:$0xff]  ;;  %v2845_v55 = vld [vmem:[%s3539_s14 + $0x1] ss:$0 sm:$0xff] }
 0xf2a   : > { %2159 = vmatpush.bf16.msrb.mxu1 %v2776_v52 }
 0xf2b   : > { %v1868_v57 = vadd.f32 %v2844_v54, %v1864_v56  ;;  %v2774_v54 = vld [vmem:[%s3540_s15 + $0x20] sm:$0xff] }
 0xf2d   : > { %v3402_v58 = vmul.f32 %v1868_v57, %v3136_v63 }
 0xf2e   : > { %2160 = vmatpush.bf16.msrb.mxu1 %v2775_v53 }
 0xf2f   : > { %v1876_v59 = vrot.slane %v3402_v58, 7  ;;  %v1883_v6 = vrot.slane %v3402_v58, 3  ;;  %v1874_v8 = vrot.slane %v3402_v58, 6  ;;  %v1881_v61 = vrot.slane %v3402_v58, 2 }
 0xf30   : > { %v1872_v9 = vrot.slane %v3402_v58, 5  ;;  %v1879_v5 = vrot.slane %v3402_v58, 1  ;;  %v1870_v10 = vrot.slane %v3402_v58, 4 }
 0xf31   : > { %v1877_v11 = vsel %vm1098_vm13, %v1876_v59, 0.0  ;;  %v1884_v14 = vsel %vm1129_vm14, %v1883_v6, 0.0  ;;  %v1875_v15 = vsel %vm1090_vm8, %v1874_v8, 0.0  ;;  %v1882_v16 = vsel %vm1121_vm9, %v1881_v61, 0.0 }
 0xf32   : > { %v2817_v17 = vpack.i.bf16 %v1884_v14, %v1877_v11  ;;  %v2812_v18 = vpack.i.bf16 %v1882_v16, %v1875_v15  ;;  %v1873_v20 = vsel %vm1082_vm10, %v1872_v9, 0.0  ;;  %v1880_v21 = vsel %vm1113_vm11, %v1879_v5, 0.0  ;;  %2161 = vmatpush.bf16.msrb.mxu1 %v2774_v54  ;;  %v2846_v11 = vld [vmem:[%s3541_s16 + $0x1] ss:$0 sm:$0xff] }
 0xf33   : > { %v2807_v22 = vpack.i.bf16 %v1880_v21, %v1873_v20  ;;  %v1885_v12 = vsel %vm1136_vm12, %v1870_v10, 0.0  ;;  %v1871_v40 = vsel %vm1074_vm15, %v1870_v10, 0.0  ;;  %vm3557_vm8 = vcmask 785408  }
 0xf34   : > { %2818 = vrot.lane.b32.xlu0 %v2817_v17, %s2887_s24  ;;  %2813 = vrot.lane.b32.xlu2 %v2812_v18, %s2885_s2  ;;  %v1918_v62 = vpack.c.bf16 %v1885_v12, %v1885_v12  ;;  %vm3558_vm9 = vmmov %vm3557_vm8 }
 0xf35   : > { %2808 = vrot.lane.b32.xlu1 %v2807_v22, %s3556_s23 }
 0xf36   : > { %2675 = vmatmul.msk.bf16.vlgmr.msrb.gmra.mxu0 %vm659_vm0, %v1918_v62 }
 0xf8e   : > { %v2814_v34 = vpop.permute.xlu2 %2813 }
 0xf8f   : > { %v2816_v38 = vunpack.i.h.bf16 %v2814_v34  ;;  %v2815_v39 = vunpack.i.l.bf16 %v2814_v34 }
 0xfa6   : > { %v2819_v35 = vpop.permute.xlu0 %2818 }
 0xfa7   : > { %v2809_v36 = vpop.permute.xlu1 %2808  ;;  %v2821_v41 = vunpack.i.h.bf16 %v2819_v35  ;;  %v2820_v60 = vunpack.i.l.bf16 %v2819_v35 }
 0xfa8   : > { %v2811_v37 = vunpack.i.h.bf16 %v2809_v36  ;;  %v2810_v7 = vunpack.i.l.bf16 %v2809_v36 }
 0xfaa   : > { %v1913_v42 = vsel %vm659_vm0, %v3402_v58, %v2811_v37  ;;  %v1910_v43 = vsel %vm659_vm0, %v1871_v40, %v2810_v7 }
 0xfab   : > { %v1914_v44 = vsel %vm1166_vm4, %v1913_v42, %v2816_v38  ;;  %v1911_v45 = vsel %vm1166_vm4, %v1910_v43, %v2815_v39 }
 0xfac   : > { %v1912_v47 = vsel %vm3557_vm8, %v1911_v45, %v2820_v60  ;;  %v1915_v48 = vsel %vm3558_vm9, %v1914_v44, %v2821_v41 }
 0xfad   : > { %v1916_v49 = vpack.c.bf16 %v1912_v47, %v1912_v47  ;;  %v1917_v50 = vpack.c.bf16 %v1915_v48, %v1915_v48 }
 0xfaf   : > { %2080 = vmatmul.bf16.vlgmr.msrb.gmra.mxu2 %v1916_v49  ;;  %2093 = vmatmul.bf16.vlgmr.msrb.gmra.mxu3 %v1917_v50 }
 0xfb3   : > { %v2107_v46 = vpop.f32.mrf.mxu0 }
 0xfbb   : > { %v2109_v51 = vpop.f32.mrf.mxu0 }
0x1032   : > { %v2081_v56 = vpop.f32.mrf.mxu2  ;;  %v2094_v57 = vpop.f32.mrf.mxu3 }
0x1033   : > { %v2082_v59 = vadd.f32 %v2845_v55, %v2081_v56 }
0x1035   : > { %v2095_v6 = vadd.f32 %v2094_v57, %v2082_v59 }
0x1037   : > { %v2108_v8 = vadd.f32 %v2107_v46, %v2095_v6 }
0x1039   : > { %v2111_v61 = vmax.f32 %v2108_v8, 0.0 }
0x103a   : > { %v2083_v9 = vpop.f32.mrf.mxu2  ;;  %v2096_v5 = vpop.f32.mrf.mxu3 }
0x103b   : > { %v2112_v10 = vpack.c.bf16 %v2111_v61, %v2111_v61 }
0x103d   : > { %2701 = vmatmul.msk.bf16.vlgmr.msrb.gmra.mxu1 %vm1166_vm4, %v2112_v10 }
0x10ba   : > { %v2163_v14 = vpop.f32.mrf.mxu1 }
0x10bb   : > { %v2164_v15 = vadd.f32 %v2846_v11, %v2163_v14 }
0x10bd   : > { %v2167_v16 = vadd.f32 %v2164_v15, %v3402_v58 }
0x10bf   : > { %v2172_v17 = vsel %vm659_vm0, %v2167_v16, 0.0 }
0x10c0   : > { %2173 = vadd.xlane.f32.xlu1 %v2172_v17 }
0x10c2   : > { %v2165_v18 = vpop.f32.mrf.mxu1 }
0x1133   : > { %v2174_v20 = vpop.xlane.xlu1 %2173 }
0x1134   : > { %v2175_v21 = vmul.f32 %v2174_v20, %v3114_v4 }
0x1136   : > { %v2176_v22 = vsub.f32 %v2167_v16, %v2175_v21 }
0x1138   : > { %v2177_v12 = vmul.f32 %v2176_v22, %v2176_v22 }
0x113a   : > { %v2178_v62 = vsel %vm659_vm0, %v2177_v12, 0.0 }
0x113b   : > { %2179 = vadd.xlane.f32.xlu0 %v2178_v62 }
0x11ae   : > { %v2180_v0 = vpop.xlane.xlu0 %2179 }
0x11af   : > { %v2181_v1 = vmul.f32 %v2180_v0, %v3114_v4  ;;  %v2848_v4 = vld [vmem:[%s3543_s18 + $0x1] ss:$0 sm:$0xff] }
0x11b1   : > { %v2182_v2 = vadd.f32 1e-05, %v2181_v1 }
0x11b3   : > { %2873 = vrsqrt.f32 %v2182_v2  ;;  %vm2189_vm11 = vweird.f32 %v2182_v2 }
0x11b9   : > { %v2874_v3 = vpop.eup %2873 }
0x11ba   : > { %v2184_v58 = vmul.f32 %v2874_v3, %v2182_v2  ;;  %vm2190_vm10 = vweird.f32 %v2874_v3 }
0x11bb   : > { %vm2191_vm12 = vmor %vm2189_vm11, %vm2190_vm10 }
0x11bc   : > { %v2185_v13 = vmul.f32 %v2874_v3, %v2184_v58 }
0x11be   : > { %v2186_v23 = vmul.f32 0.5, %v2185_v13 }
0x11c0   : > { %v2187_v24 = vsub.f32 1.5, %v2186_v23 }
0x11c2   : > { %v2188_v19 = vmul.f32 %v2874_v3, %v2187_v24 }
0x11c4   : > { %v2192_v26 = vsel %vm2191_vm12, %v2874_v3, %v2188_v19 }
0x11c5   : > { %v2193_v27 = vmul.f32 %v2192_v26, %v2176_v22 }
0x11c7   : > { %v2197_v28 = vmul.f32 %v2847_v25, %v2193_v27 }
0x11c9   : > { %v2201_v29 = vadd.f32 %v2848_v4, %v2197_v28 }
0x11cb   : > { %v2202_v30 = vmul.f32 %v2201_v29, %v3136_v63 }
0x11cd   : > { %2203 = vst.msk [vmem:[%s628_s3] sm:$0xff] %vm659_vm0, %v2202_v30 }
0x11ce PF: > { %s29_s0 = sadd.s32 1, %s2881_s0  }
0x11cf   : > { %p26_p4 = scmp.ge.s32.totalorder %s29_s0, 4  }
0x11d1   :  { %28 = sbr.rel (!%p26_p4) target bundleno = 5 (0x5), region = 162 }

// kernel: forward.5
= control target key start
LH: loop header
LB: loop body
LE: loop exit
PB: predicated region body
PF: predicated region fallthrough
CT: control target
= control target key end

     0   :  { %s5711_s0 = inlined_call_operand.vmem [shape: f32[2,32,32], index: 0, kind: input, shape index: {}]   ;;  %s5712_s1 = inlined_call_operand.vmem [shape: f32[2,32,1], index: 1, kind: input, shape index: {}]   ;;  %s5713_s2 = inlined_call_operand.vmem [shape: f32[2,1,32], index: 2, kind: input, shape index: {}]   ;;  %s5714_s3 = inlined_call_operand.vmem [shape: bf16[2,2,32,16], index: 3, kind: input, shape index: {}]   ;;  %s5715_s4 = inlined_call_operand.vmem [shape: f32[2,2,1,16], index: 4, kind: input, shape index: {}]   ;;  %s5716_s5 = inlined_call_operand.vmem [shape: bf16[2,2,32,16], index: 5, kind: input, shape index: {}]   ;;  %s5717_s6 = inlined_call_operand.vmem [shape: f32[2,2,1,16], index: 6, kind: input, shape index: {}]   ;;  %s5718_s7 = inlined_call_operand.vmem [shape: bf16[2,2,32,16], index: 7, kind: input, shape index: {}]   ;;  %s5719_s8 = inlined_call_operand.vmem [shape: f32[2,2,1,16], index: 8, kind: input, shape index: {}]   ;;  %s5720_s9 = inlined_call_operand.vmem [shape: bf16[2,2,16,32], index: 9, kind: input, shape index: {}]   ;;  %s5721_s10 = inlined_call_operand.vmem [shape: f32[2,1,32], index: 10, kind: input, shape index: {}]   ;;  %s5722_s11 = inlined_call_operand.vmem [shape: f32[2,1,32], index: 11, kind: input, shape index: {}]   ;;  %s5723_s12 = inlined_call_operand.vmem [shape: f32[2,1,32], index: 12, kind: input, shape index: {}]   ;;  %s5724_s13 = inlined_call_operand.vmem [shape: bf16[2,288,64], index: 13, kind: input, shape index: {}]   ;;  %s5725_s14 = inlined_call_operand.vmem [shape: f32[2,1,64], index: 14, kind: input, shape index: {}]   ;;  %s5726_s15 = inlined_call_operand.vmem [shape: bf16[2,64,32], index: 15, kind: input, shape index: {}]   ;;  %s5727_s16 = inlined_call_operand.vmem [shape: f32[2,1,32], index: 16, kind: input, shape index: {}]   ;;  %s5728_s17 = inlined_call_operand.vmem [shape: f32[2,1,32], index: 17, kind: input, shape index: {}]   ;;  %s5729_s18 = inlined_call_operand.vmem [shape: f32[2,1,32], index: 18, kind: input, shape index: {}]   ;;  %s5730_s19 = inlined_call_operand.vmem [shape: bf16[32,128], index: 19, kind: input, shape index: {}]   ;;  %s5731_s20 = inlined_call_operand.vmem [shape: f32[1,128], index: 20, kind: input, shape index: {}]   ;;  %s5732_s21 = inlined_call_operand.vmem [shape: f32[2,32,128], index: 21, kind: output, shape index: {}]  }
   0x1   :  { %5749 = sst [smem:[#allocation3_spill]] %s5711_s0 }
   0x2   :  { %5750 = sst [smem:[#allocation4_spill]] %s5712_s1 }
   0x3   :  { %5751 = sst [smem:[#allocation5_spill]] %s5713_s2  ;;  %s4620_s2 = smov 0  }
   0x4   :  { %5752 = sst [smem:[#allocation6_spill]] %s5714_s3 }
   0x5   :  { %5753 = sst [smem:[#allocation7_spill]] %s5715_s4 }
   0x6   :  { %5754 = sst [smem:[#allocation8_spill]] %s5716_s5 }
   0x7   :  { %5755 = sst [smem:[#allocation9_spill]] %s5732_s21 }
   0x8 LB: > { %5756 = sst [smem:[#allocation2_spill]] %s4503_s2  ;;  %s3686_s25 = sadd.s32 4294967295, %s4503_s2   ;;  %s4503_s2 = sphi %s4620_s2, %s31_s2  }
   0x9   : > { %p3690_p0 = scmp.ge.s32.totalorder %s4503_s2, 1  ;;  %p605_p1 = scmp.lt.s32.totalorder %s4503_s2, 3 }
   0xb   : > { %p606_p2 = pnand %p3690_p0, %p605_p1 }
   0xc   : > { %s5757_s3 = sld [smem:[#allocation6_spill]] (!%p606_p2)  ;;  %p673_p3 = scmp.lt.s32.totalorder (!%p606_p2), %s3686_s25, 1 }
   0xd   : > { %609 = sbr.rel (%p606_p2) target bundleno = 4990 (0x137e), region = 104  ;;  %s5758_s30 = sld [smem:[#allocation8_spill]] (!%p606_p2) }
   0xe   : > { %s5759_s1 = sld [smem:[#allocation5_spill]] (!%p606_p2)  ;;  %s5763_s29 = smov (!%p606_p2), 64  }
   0xf   : > { %s5760_s2 = sld [smem:[#allocation3_spill]] (!%p606_p2)  ;;  %s5764_s21 = smov (!%p606_p2), 32  }
  0x10   : > { %s5761_s4 = sld [smem:[#allocation7_spill]] (!%p606_p2) }
  0x11   : > { %s5762_s0 = sld [smem:[#allocation4_spill]] (!%p606_p2) }
  0x12   : > { %v4159_v0 = vld [vmem:[%s5757_s3 + $0x8] sm:$0xff]  ;;  %v4158_v1 = vld [vmem:[%s5757_s3] sm:$0xff]  ;;  %s5798_s25 = smov (!%p673_p3, %s3686_s25), 1  ;;  %vm728_vm0 = vcmask 261120   ;;  %vm839_vm1 = vcmask 130048  }
  0x13   : > { %4232 = vmatpush.bf16.msra.mxu1 %v4159_v0  ;;  %v4161_v2 = vld [vmem:[%s5758_s30 + $0x8] sm:$0xff]  ;;  %741 = vmatpush.bf16.msra.mxu0 %v4159_v0  ;;  %s4637_s5 = sshll.u32 %s5798_s25, 5  ;;  %v4160_v3 = vld [vmem:[%s5758_s30] sm:$0xff]  ;;  %v4168_v52 = vld [vmem:[%s5758_s30 + $0x18] sm:$0xff] }
  0x14   : > { %s4642_s24 = scalar_lea.vmem %s5759_s1, %s5798_s25  ;;  %v4372_v15 = vld [vmem:[%s5717_s6] ss:$0 sm:$0xff]  ;;  %v4163_v34 = vld [vmem:[%s5718_s7 + $0x8] sm:$0xff]  ;;  %v4167_v53 = vld [vmem:[%s5758_s30 + $0x10] sm:$0xff]  ;;  %s5737_s25 = smov 32  }
  0x15   : > { %s677_s28 = scalar_lea.vmem %s5760_s2, %s4637_s5  ;;  %v4689_v35 = vld [vmem:[%s4642_s24] ss:$0 sm:$0xff]  ;;  %819 = vmatpush.bf16.msra.mxu2 %v4163_v34 }
  0x16   : > { %v4651_v4 = vld [vmem:[%s677_s28 + $0x10] sm:$0xff]  ;;  %v4653_v5 = vld [vmem:[%s677_s28 + $0x18] sm:$0xff]  ;;  %v4655_v6 = vld [vmem:[%s677_s28] sm:$0xff] }
  0x17   : > { %4233 = vmatpush.bf16.msra.mxu1 %v4158_v1  ;;  %742 = vmatpush.bf16.msra.mxu0 %v4158_v1  ;;  %v4659_v7 = vpack.c.bf16 %v4653_v5, %v4651_v4  ;;  %v4661_v8 = vld [vmem:[%s677_s28 + $0x8] sm:$0xff]  ;;  %v4371_v26 = vld [vmem:[%s5761_s4] ss:$0 sm:$0xff]  ;;  %s682_s22 = scalar_lea.vmem %s5762_s0, %s4637_s5  ;;  %s5739_s0 = smov 64  }
  0x18   : > { %v4665_v9 = vpack.c.bf16 %v4661_v8, %v4655_v6  ;;  %v4162_v36 = vld [vmem:[%s5718_s7] sm:$0xff] }
  0x19   : > { %820 = vmatpush.bf16.msra.mxu2 %v4162_v36 }
  0x1a   : > { %3706 = vmatmul.msk.bf16.vlgmr.msra.gmra.mxu1 %vm728_vm0, %v4659_v7  ;;  %3705 = vmatmul.msk.bf16.vlgmr.msra.gmra.mxu0 %vm728_vm0, %v4665_v9 }
  0x1b   : > { %780 = vmatpush.bf16.msrb.mxu1 %v4161_v2 }
  0x1c   : > { %3725 = vmatmul.msk.bf16.vlgmr.msra.gmra.mxu2 %vm728_vm0, %v4665_v9 }
  0x1f   : > { %781 = vmatpush.bf16.msrb.mxu1 %v4160_v3 }
  0x2a   : > { %3715 = vmatmul.msk.bf16.vlgmr.msrb.gmra.mxu1 %vm728_vm0, %v4665_v9 }
  0x2c   : > { %3726 = vmatmul.msk.bf16.gmra.mxu2 %vm728_vm0, %v4659_v7 }
  0x3a   : > { %3716 = vmatmul.msk.bf16.gmra.mxu1 %vm728_vm0, %v4659_v7 }
  0x97   : > { %v749_v10 = vpop.f32.mrf.mxu1  ;;  %v744_v19 = vpop.f32.mrf.mxu0 }
  0x98   : > { %v745_v28 = vadd.f32 %v4371_v26, %v744_v19  ;;  %v750_v32 = vadd.f32 %v4371_v26, %v749_v10 }
  0x9f   : > { %v751_v11 = vpop.f32.mrf.mxu1  ;;  %v746_v25 = vpop.f32.mrf.mxu0 }
  0xa0   : > { %v747_v29 = vadd.f32 %v4371_v26, %v746_v25  ;;  %v752_v31 = vadd.f32 %v4371_v26, %v751_v11  ;;  %v822_v61 = vpop.f32.mrf.mxu2  ;;  %v4165_v25 = vld [vmem:[%s5757_s3 + $0x10] sm:$0xff] }
  0xa2   : > { %v832_v30 = vpack.c.bf16 %v747_v29, %v745_v28  ;;  %v833_v33 = vpack.c.bf16 %v752_v31, %v750_v32  ;;  %v4164_v28 = vld [vmem:[%s5720_s9] sm:$0xff] }
  0xa3   : > { %967 = vmatpush.bf16.msra.mxu1 %v4164_v28 }
  0xa7   : > { %v783_v12 = vpop.f32.mrf.mxu1 }
  0xa8   : > { %v784_v23 = vadd.f32 %v4372_v15, %v783_v12  ;;  %v824_v3 = vpop.f32.mrf.mxu2 }
  0xaf   : > { %v785_v13 = vpop.f32.mrf.mxu1 }
  0xb0   : > { %v786_v21 = vadd.f32 %v4372_v15, %v785_v13  ;;  %v827_v13 = vpop.f32.mrf.mxu2 }
  0xb2   : > { %v834_v24 = vpack.c.bf16 %v786_v21, %v784_v23 }
  0xb4   : > { %v847_v27 = vsel %vm839_vm1, %v834_v24, 0  ;;  %v4166_v24 = vld [vmem:[%s5757_s3 + $0x18] sm:$0xff] }
  0xb5   : > { %1011 = vmatpush.bf16.msrb.mxu2 %v4166_v24 }
  0xb7   : > { %v788_v14 = vpop.f32.mrf.mxu1 }
  0xb8   : > { %v789_v17 = vadd.f32 %v4372_v15, %v788_v14 }
  0xb9   : > { %1012 = vmatpush.bf16.msrb.mxu2 %v4165_v25 }
  0xbc   : > { %3750 = vmatmul.msk.bf16.vlgmr.msrb.gmra.mxu2 %vm728_vm0, %v4665_v9 }
  0xbf   : > { %v790_v16 = vpop.f32.mrf.mxu1 }
  0xc0   : > { %v791_v18 = vadd.f32 %v4372_v15, %v790_v16  ;;  %v4373_v16 = vld [vmem:[%s5719_s8] ss:$0 sm:$0xff] }
  0xc1   : > { %v823_v19 = vadd.f32 %v4373_v16, %v822_v61 }
  0xc2   : > { %v835_v20 = vpack.c.bf16 %v791_v18, %v789_v17  ;;  %v828_v17 = vadd.f32 %v4373_v16, %v827_v13  ;;  %v829_v18 = vpop.f32.mrf.mxu2 }
  0xc3   : > { %v830_v21 = vadd.f32 %v4373_v16, %v829_v18  ;;  %v4170_v18 = vld [vmem:[%s5718_s7 + $0x18] sm:$0xff] }
  0xc4   : > { %v850_v22 = vsel %vm839_vm1, %v835_v20, 0  ;;  %v825_v20 = vadd.f32 %v4373_v16, %v824_v3 }
  0xc5   : > { %858 = vmatpush.bf16.xpose.msra.mxu3 %v850_v22  ;;  %v918_v22 = vpack.c.bf16 %v830_v21, %v828_v17 }
  0xc6   : > { %v917_v23 = vpack.c.bf16 %v825_v20, %v823_v19  ;;  %v4169_v19 = vld [vmem:[%s5718_s7 + $0x10] sm:$0xff] }
  0xc7   : > { %931 = vmatpush.bf16.msrb.mxu0 %v918_v22 }
  0xcb   : > { %932 = vmatpush.bf16.msrb.mxu0 %v917_v23 }
  0xcc   : > { %3751 = vmatmul.msk.bf16.gmra.mxu2 %vm728_vm0, %v4659_v7 }
  0xcd   : > { %859 = vmatpush.bf16.xpose.msra.mxu3 %v847_v27 }
  0xcf   : > { %1093 = vmatpush.bf16.msra.mxu0 %v4170_v18 }
  0xd3   : > { %1094 = vmatpush.bf16.msra.mxu0 %v4169_v19 }
  0xd4   : > { %3727 = vmatmul.msk.bf16.vlgmr.msra.gmra.mxu3 %vm839_vm1, %v832_v30 }
  0xd5   : > { %1052 = vmatpush.bf16.msrb.mxu3 %v4168_v52 }
  0xd9   : > { %1053 = vmatpush.bf16.msrb.mxu3 %v4167_v53 }
  0xe4   : > { %3728 = vmatmul.msk.bf16.gmra.mxu3 %vm839_vm1, %v833_v33  ;;  %v4374_v33 = vld [vmem:[%s5717_s6 + $0x1] ss:$0 sm:$0xff] }
  0xf4   : > { %3765 = vmatmul.msk.bf16.vlgmr.msrb.gmra.mxu3 %vm728_vm0, %v4665_v9 }
 0x104   : > { %3766 = vmatmul.msk.bf16.gmra.mxu3 %vm728_vm0, %v4659_v7 }
 0x157   : > { %v861_v37 = vpop.f32.mrf.mxu3 }
 0x158   : > { %v862_v38 = vadd.f32 %v4689_v35, %v861_v37 }
 0x15a   : > { %v871_v39 = vsel %vm728_vm0, %v862_v38, -inf }
 0x15b   : > { %872 = vmax.xlane.f32.xlu0 %v871_v39 }
 0x15f   : > { %v863_v40 = vpop.f32.mrf.mxu3 }
 0x160   : > { %v864_v41 = vadd.f32 %v4689_v35, %v863_v40 }
 0x162   : > { %v874_v42 = vsel %vm728_vm0, %v864_v41, -inf }
 0x163   : > { %875 = vmax.xlane.f32.xlu0 %v874_v42 }
 0x167   : > { %v866_v43 = vpop.f32.mrf.mxu3 }
 0x168   : > { %v867_v44 = vadd.f32 %v4689_v35, %v866_v43 }
 0x16a   : > { %v877_v45 = vsel %vm728_vm0, %v867_v44, -inf }
 0x16b   : > { %878 = vmax.xlane.f32.xlu1 %v877_v45 }
 0x16f   : > { %v868_v46 = vpop.f32.mrf.mxu3 }
 0x170   : > { %v869_v47 = vadd.f32 %v4689_v35, %v868_v46 }
 0x172   : > { %v880_v48 = vsel %vm728_vm0, %v869_v47, -inf }
 0x173   : > { %881 = vmax.xlane.f32.xlu1 %v880_v48 }
 0x177   : > { %v1055_v34 = vpop.f32.mrf.mxu3 }
 0x178   : > { %v1056_v37 = vadd.f32 %v4374_v33, %v1055_v34 }
 0x17f   : > { %v1057_v40 = vpop.f32.mrf.mxu3 }
 0x180   : > { %v1058_v52 = vadd.f32 %v4374_v33, %v1057_v40 }
 0x182   : > { %v1108_v53 = vpack.c.bf16 %v1058_v52, %v1056_v37 }
 0x187   : > { %v1060_v45 = vpop.f32.mrf.mxu3 }
 0x18f   : > { %v1062_v48 = vpop.f32.mrf.mxu3 }
 0x1ce   : > { %v873_v49 = vpop.xlane.xlu0 %872 }
 0x1cf   : > { %v883_v50 = vsub.f32 %v862_v38, %v873_v49  ;;  %v1063_v49 = vadd.f32 %v4374_v33, %v1062_v48 }
 0x1d1   : > { %v887_v51 = vmul.f32 1.442695, %v883_v50 }
 0x1d3   : > { %4398 = vpow2.f32 %v887_v51 }
 0x1d6   : > { %v876_v54 = vpop.xlane.xlu0 %875 }
 0x1d7   : > { %v884_v55 = vsub.f32 %v864_v41, %v876_v54  ;;  %v1117_v54 = vsel %vm839_vm1, %v1108_v53, 0 }
 0x1d9   : > { %v4399_v56 = vpop.eup %4398  ;;  %v889_v57 = vmul.f32 1.442695, %v884_v55 }
 0x1da   : > { %v895_v58 = vsel %vm728_vm0, %v4399_v56, 0.0 }
 0x1db   : > { %4400 = vpow2.f32 %v889_v57  ;;  %896 = vadd.xlane.f32.xlu2 %v895_v58 }
 0x1de   : > { %v879_v59 = vpop.xlane.xlu1 %878 }
 0x1df   : > { %v885_v60 = vsub.f32 %v867_v44, %v879_v59  ;;  %v1014_v59 = vpop.f32.mrf.mxu2 }
 0x1e1   : > { %v4401_v62 = vpop.eup %4400  ;;  %v891_v63 = vmul.f32 1.442695, %v885_v60 }
 0x1e2   : > { %v898_v0 = vsel %vm728_vm0, %v4401_v62, 0.0 }
 0x1e3   : > { %4402 = vpow2.f32 %v891_v63  ;;  %899 = vadd.xlane.f32.xlu2 %v898_v0  ;;  %v4375_v63 = vld [vmem:[%s5761_s4 + $0x1] ss:$0 sm:$0xff] }
 0x1e4   : > { %v1015_v0 = vadd.f32 %v4375_v63, %v1014_v59 }
 0x1e6   : > { %v882_v1 = vpop.xlane.xlu1 %881 }
 0x1e7   : > { %v886_v2 = vsub.f32 %v869_v47, %v882_v1  ;;  %v1061_v47 = vadd.f32 %v4374_v33, %v1060_v45 }
 0x1e9   : > { %v4403_v10 = vpop.eup %4402  ;;  %v893_v11 = vmul.f32 1.442695, %v886_v2  ;;  %v1109_v50 = vpack.c.bf16 %v1063_v49, %v1061_v47 }
 0x1ea   : > { %v901_v12 = vsel %vm728_vm0, %v4403_v10, 0.0 }
 0x1eb   : > { %4404 = vpow2.f32 %v893_v11  ;;  %902 = vadd.xlane.f32.xlu0 %v901_v12  ;;  %v1120_v51 = vsel %vm839_vm1, %v1109_v50, 0 }
 0x1ec   : > { %1128 = vmatpush.bf16.xpose.msrb.mxu1 %v1120_v51  ;;  %v4377_v51 = vld [vmem:[%s5719_s8 + $0x1] ss:$0 sm:$0xff] }
 0x1f1   : > { %v4405_v14 = vpop.eup %4404 }
 0x1f2   : > { %v904_v15 = vsel %vm728_vm0, %v4405_v14, 0.0 }
 0x1f3   : > { %905 = vadd.xlane.f32.xlu1 %v904_v15 }
 0x1f4   : > { %1129 = vmatpush.bf16.xpose.msrb.mxu1 %v1117_v54 }
 0x24e   : > { %v897_v26 = vpop.xlane.xlu2 %896 }
 0x24f   : > { %4406 = vrcp.f32 %v897_v26 }
 0x255   : > { %v4407_v29 = vpop.eup %4406 }
 0x256   : > { %v900_v27 = vpop.xlane.xlu2 %899  ;;  %v911_v31 = vmul.f32 %v4407_v29, %v4399_v56 }
 0x257   : > { %4408 = vrcp.f32 %v900_v27 }
 0x25d   : > { %v4409_v30 = vpop.eup %4408 }
 0x25e   : > { %v912_v32 = vmul.f32 %v4409_v30, %v4401_v62  ;;  %v903_v38 = vpop.xlane.xlu0 %902  ;;  %v1016_v62 = vpop.f32.mrf.mxu2 }
 0x25f   : > { %4410 = vrcp.f32 %v903_v38  ;;  %v1017_v1 = vadd.f32 %v4375_v63, %v1016_v62  ;;  %v4171_v62 = vld [vmem:[%s5720_s9 + $0x8] sm:$0xff] }
 0x260   : > { %v915_v36 = vpack.c.bf16 %v912_v32, %v911_v31  ;;  %1238 = vmatpush.bf16.msra.mxu3 %v4171_v62 }
 0x261   : > { %v1106_v3 = vpack.c.bf16 %v1017_v1, %v1015_v0 }
 0x262   : > { %3729 = vmatmul.msk.bf16.vlgmr.msrb.gmra.mxu0 %vm728_vm0, %v915_v36 }
 0x265   : > { %v4411_v41 = vpop.eup %4410 }
 0x266   : > { %v906_v39 = vpop.xlane.xlu1 %905  ;;  %v913_v43 = vmul.f32 %v4411_v41, %v4403_v10  ;;  %v1019_v2 = vpop.f32.mrf.mxu2 }
 0x267   : > { %4412 = vrcp.f32 %v906_v39  ;;  %v1020_v11 = vadd.f32 %v4375_v63, %v1019_v2 }
 0x26d   : > { %v4413_v42 = vpop.eup %4412 }
 0x26e   : > { %v914_v44 = vmul.f32 %v4413_v42, %v4405_v14  ;;  %v1021_v10 = vpop.f32.mrf.mxu2 }
 0x26f   : > { %v1022_v12 = vadd.f32 %v4375_v63, %v1021_v10 }
 0x270   : > { %v916_v46 = vpack.c.bf16 %v914_v44, %v913_v43 }
 0x271   : > { %v1107_v13 = vpack.c.bf16 %v1022_v12, %v1020_v11 }
 0x272   : > { %3730 = vmatmul.msk.bf16.gmra.mxu0 %vm728_vm0, %v916_v46 }
 0x282   : > { %3780 = vmatmul.msk.bf16.vlgmr.msra.gmra.mxu0 %vm728_vm0, %v4665_v9 }
 0x292   : > { %3781 = vmatmul.msk.bf16.gmra.mxu0 %vm728_vm0, %v4659_v7 }
 0x2df   : > { %v934_v55 = vpop.f32.mrf.mxu0 }
 0x2e7   : > { %v936_v56 = vpop.f32.mrf.mxu0 }
 0x2e8   : > { %v944_v57 = vpack.c.bf16 %v936_v56, %v934_v55 }
 0x2ea   : > { %3735 = vmatmul.msk.bf16.vlgmr.msra.gmra.mxu1 %vm839_vm1, %v944_v57 }
 0x2ef   : > { %v939_v58 = vpop.f32.mrf.mxu0 }
 0x2f7   : > { %v941_v60 = vpop.f32.mrf.mxu0 }
 0x2f8   : > { %v945_v61 = vpack.c.bf16 %v941_v60, %v939_v58 }
 0x2fa   : > { %3736 = vmatmul.msk.bf16.gmra.mxu1 %vm839_vm1, %v945_v61 }
 0x2ff   : > { %v1096_v39 = vpop.f32.mrf.mxu0 }
 0x300   : > { %v1097_v56 = vadd.f32 %v4377_v51, %v1096_v39 }
 0x307   : > { %v1098_v43 = vpop.f32.mrf.mxu0 }
 0x308   : > { %v1099_v57 = vadd.f32 %v4377_v51, %v1098_v43  ;;  %v4505_v43 = vmov 32.0  }
 0x30a   : > { %3782 = vmatmul.msk.bf16.vlgmr.msrb.gmra.mxu1 %vm839_vm1, %v1106_v3  ;;  %v1187_v60 = vpack.c.bf16 %v1099_v57, %v1097_v56 }
 0x30f   : > { %v1101_v49 = vpop.f32.mrf.mxu0 }
 0x310   : > { %v1102_v52 = vadd.f32 %v4377_v51, %v1101_v49  ;;  %v4506_v49 = vmov 0  }
 0x311   : > { %4247 = vset.pattern.permute.xlu0 %v4506_v49  ;;  %4248 = vset.pattern.permute.xlu1 %v4506_v49 }
 0x312   : > { %4249 = vset.pattern.permute.xlu2 %v4506_v49 }
 0x317   : > { %v1103_v54 = vpop.f32.mrf.mxu0 }
 0x318   : > { %v1104_v58 = vadd.f32 %v4377_v51, %v1103_v54 }
 0x31a   : > { %3783 = vmatmul.msk.bf16.gmra.mxu1 %vm839_vm1, %v1107_v13  ;;  %v1188_v59 = vpack.c.bf16 %v1104_v58, %v1102_v52 }
 0x31c   : > { %1201 = vmatpush.bf16.msra.mxu2 %v1188_v59 }
 0x320   : > { %1202 = vmatpush.bf16.msra.mxu2 %v1187_v60 }
 0x367   : > { %v4750_v14 = vpop.f32.mrf.mxu1 }
 0x36f   : > { %v4752_v15 = vpop.f32.mrf.mxu1 }
 0x377   : > { %v4754_v16 = vpop.f32.mrf.mxu1 }
 0x37f   : > { %v4756_v17 = vpop.f32.mrf.mxu1 }
 0x387   : > { %v1131_v20 = vpop.f32.mrf.mxu1 }
 0x388   : > { %v1132_v21 = vadd.f32 %v4689_v35, %v1131_v20 }
 0x38a   : > { %v1141_v22 = vsel %vm728_vm0, %v1132_v21, -inf }
 0x38b   : > { %1142 = vmax.xlane.f32.xlu2 %v1141_v22 }
 0x38f   : > { %v1133_v23 = vpop.f32.mrf.mxu1 }
 0x390   : > { %v1134_v24 = vadd.f32 %v4689_v35, %v1133_v23 }
 0x392   : > { %v1144_v25 = vsel %vm728_vm0, %v1134_v24, -inf }
 0x393   : > { %1145 = vmax.xlane.f32.xlu0 %v1144_v25 }
 0x397   : > { %v1136_v26 = vpop.f32.mrf.mxu1 }
 0x398   : > { %v1137_v27 = vadd.f32 %v4689_v35, %v1136_v26 }
 0x39a   : > { %v1147_v28 = vsel %vm728_vm0, %v1137_v27, -inf }
 0x39b   : > { %1148 = vmax.xlane.f32.xlu1 %v1147_v28  ;;  %v4376_v28 = vld [vmem:[%s5721_s10] ss:$0 sm:$0xff] }
 0x39c   : > { %v981_v39 = vadd.f32 %v4376_v28, %v4754_v16 }
 0x39f   : > { %v1138_v29 = vpop.f32.mrf.mxu1 }
 0x3a0   : > { %v1139_v30 = vadd.f32 %v4689_v35, %v1138_v29  ;;  %v979_v29 = vadd.f32 %v4376_v28, %v4750_v14 }
 0x3a2   : > { %v1150_v9 = vsel %vm728_vm0, %v1139_v30, -inf }
 0x3a3   : > { %1151 = vmax.xlane.f32.xlu2 %v1150_v9 }
 0x3fe   : > { %v1143_v31 = vpop.xlane.xlu2 %1142 }
 0x3ff   : > { %v1153_v32 = vsub.f32 %v1132_v21, %v1143_v31 }
 0x401   : > { %v1157_v33 = vmul.f32 1.442695, %v1153_v32 }
 0x403   : > { %4414 = vpow2.f32 %v1157_v33  ;;  %v980_v33 = vadd.f32 %v4376_v28, %v4752_v15 }
 0x406   : > { %v1146_v34 = vpop.xlane.xlu0 %1145 }
 0x407   : > { %v1154_v36 = vsub.f32 %v1134_v24, %v1146_v34 }
 0x409   : > { %v4415_v37 = vpop.eup %4414  ;;  %v1159_v38 = vmul.f32 1.442695, %v1154_v36 }
 0x40a   : > { %v1165_v40 = vsel %vm728_vm0, %v4415_v37, 0.0 }
 0x40b   : > { %4416 = vpow2.f32 %v1159_v38  ;;  %1166 = vadd.xlane.f32.xlu0 %v1165_v40 }
 0x40e   : > { %v1149_v7 = vpop.xlane.xlu1 %1148 }
 0x40f   : > { %v1155_v41 = vsub.f32 %v1137_v27, %v1149_v7 }
 0x411   : > { %v4417_v42 = vpop.eup %4416  ;;  %v1161_v35 = vmul.f32 1.442695, %v1155_v41  ;;  %v982_v41 = vadd.f32 %v4376_v28, %v4756_v17 }
 0x412   : > { %v1168_v44 = vsel %vm728_vm0, %v4417_v42, 0.0 }
 0x413   : > { %4418 = vpow2.f32 %v1161_v35  ;;  %1169 = vadd.xlane.f32.xlu1 %v1168_v44 }
 0x416   : > { %v1152_v45 = vpop.xlane.xlu2 %1151 }
 0x417   : > { %v1156_v46 = vsub.f32 %v1139_v30, %v1152_v45 }
 0x419   : > { %v4419_v47 = vpop.eup %4418  ;;  %v1163_v48 = vmul.f32 1.442695, %v1156_v46 }
 0x41a   : > { %v1171_v50 = vsel %vm728_vm0, %v4419_v47, 0.0 }
 0x41b   : > { %4420 = vpow2.f32 %v1163_v48  ;;  %1172 = vadd.xlane.f32.xlu2 %v1171_v50 }
 0x421   : > { %v4421_v53 = vpop.eup %4420 }
 0x422   : > { %v1174_v55 = vsel %vm728_vm0, %v4421_v53, 0.0 }
 0x423   : > { %1175 = vadd.xlane.f32.xlu0 %v1174_v55 }
 0x47e   : > { %v1167_v61 = vpop.xlane.xlu0 %1166 }
 0x47f   : > { %4422 = vrcp.f32 %v1167_v61 }
 0x485   : > { %v4423_v0 = vpop.eup %4422 }
 0x486   : > { %v1170_v63 = vpop.xlane.xlu1 %1169  ;;  %v1181_v2 = vmul.f32 %v4423_v0, %v4415_v37 }
 0x487   : > { %4424 = vrcp.f32 %v1170_v63 }
 0x48d   : > { %v4425_v1 = vpop.eup %4424 }
 0x48e   : > { %v1182_v3 = vmul.f32 %v4425_v1, %v4417_v42  ;;  %v1173_v11 = vpop.xlane.xlu2 %1172 }
 0x48f   : > { %4426 = vrcp.f32 %v1173_v11  ;;  %v696_v11 = vld [vmem:[%s682_s22] sm:$0xff] }
 0x490   : > { %v1185_v10 = vpack.c.bf16 %v1182_v3, %v1181_v2  ;;  %v699_v3 = vld [vmem:[%s682_s22 + $0x18] sm:$0xff] }
 0x492   : > { %3784 = vmatmul.msk.bf16.vlgmr.msra.gmra.mxu2 %vm728_vm0, %v1185_v10  ;;  %v697_v10 = vld [vmem:[%s682_s22 + $0x8] sm:$0xff] }
 0x495   : > { %v4427_v13 = vpop.eup %4426 }
 0x496   : > { %v1176_v12 = vpop.xlane.xlu0 %1175  ;;  %v1183_v19 = vmul.f32 %v4427_v13, %v4419_v47 }
 0x497   : > { %4428 = vrcp.f32 %v1176_v12  ;;  %v698_v12 = vld [vmem:[%s682_s22 + $0x10] sm:$0xff]  ;;  %s4509_s22 = smov 96  }
 0x498   : > { %4430 = vrcp.f32 %v4505_v43  ;;  %v4378_v43 = vld [vmem:[%s5722_s11] ss:$0 sm:$0xff] }
 0x49d   : > { %v4429_v18 = vpop.eup %4428 }
 0x49e   : > { %v1184_v20 = vmul.f32 %v4429_v18, %v4421_v53  ;;  %v4431_v44 = vpop.eup %4430 }
 0x49f   : > { %v1273_v16 = vmul.f32 32.0, %v4431_v44  ;;  %vm1277_vm2 = vweird.f32 %v4431_v44 }
 0x4a0   : > { %v1186_v21 = vpack.c.bf16 %v1184_v20, %v1183_v19 }
 0x4a1   : > { %v1274_v45 = vsub.f32 1.0, %v1273_v16 }
 0x4a2   : > { %3785 = vmatmul.msk.bf16.gmra.mxu2 %vm728_vm0, %v1186_v21 }
 0x4a3   : > { %v1275_v46 = vmul.f32 %v4431_v44, %v1274_v45 }
 0x4a5   : > { %v1276_v47 = vadd.f32 %v4431_v44, %v1275_v46 }
 0x515   : > { %v1204_v22 = vpop.f32.mrf.mxu2 }
 0x51d   : > { %v1206_v23 = vpop.f32.mrf.mxu2 }
 0x51e   : > { %v1214_v24 = vpack.c.bf16 %v1206_v23, %v1204_v22 }
 0x520   : > { %3792 = vmatmul.msk.bf16.vlgmr.msra.gmra.mxu3 %vm839_vm1, %v1214_v24  ;;  %v4189_v24 = vld [vmem:[%s5724_s13 + $0x88] sm:$0xff] }
 0x521   : > { %2083 = vmatpush.bf16.msrb.mxu2 %v4189_v24 }
 0x525   : > { %v1209_v25 = vpop.f32.mrf.mxu2 }
 0x52d   : > { %v1211_v26 = vpop.f32.mrf.mxu2 }
 0x52e   : > { %v1215_v27 = vpack.c.bf16 %v1211_v26, %v1209_v25 }
 0x530   : > { %3793 = vmatmul.msk.bf16.gmra.mxu3 %vm839_vm1, %v1215_v27  ;;  %v4188_v27 = vld [vmem:[%s5724_s13 + $0x80] sm:$0xff] }
 0x531   : > { %2084 = vmatpush.bf16.msrb.mxu2 %v4188_v27 }
 0x5a3   : > { %v1240_v30 = vpop.f32.mrf.mxu3 }
 0x5a4   : > { %v1250_v9 = vadd.f32 %v1240_v30, %v979_v29 }
 0x5a6   : > { %v1254_v31 = vadd.f32 %v1250_v9, %v4655_v6 }
 0x5a8   : > { %v1260_v32 = vsel %vm728_vm0, %v1254_v31, 0.0 }
 0x5a9   : > { %1261 = vadd.xlane.f32.xlu1 %v1260_v32 }
 0x5ab   : > { %v1242_v34 = vpop.f32.mrf.mxu3 }
 0x5ac   : > { %v1251_v36 = vadd.f32 %v1242_v34, %v980_v33 }
 0x5ae   : > { %v1255_v37 = vadd.f32 %v1251_v36, %v4661_v8 }
 0x5b0   : > { %v1263_v38 = vsel %vm728_vm0, %v1255_v37, 0.0 }
 0x5b1   : > { %1264 = vadd.xlane.f32.xlu0 %v1263_v38 }
 0x5b3   : > { %v1245_v40 = vpop.f32.mrf.mxu3 }
 0x5b4   : > { %v1252_v14 = vadd.f32 %v1245_v40, %v981_v39 }
 0x5b6   : > { %v1256_v7 = vadd.f32 %v1252_v14, %v4651_v4  ;;  %v4805_v4 = vsel %vm1277_vm2, %v4431_v44, %v1276_v47 }
 0x5b8   : > { %v1266_v6 = vsel %vm728_vm0, %v1256_v7, 0.0 }
 0x5b9   : > { %1267 = vadd.xlane.f32.xlu1 %v1266_v6 }
 0x5bb   : > { %v1247_v42 = vpop.f32.mrf.mxu3 }
 0x5bc   : > { %v1253_v15 = vadd.f32 %v1247_v42, %v982_v41 }
 0x5be   : > { %v1257_v35 = vadd.f32 %v1253_v15, %v4653_v5 }
 0x5c0   : > { %v1269_v8 = vsel %vm728_vm0, %v1257_v35, 0.0 }
 0x5c1   : > { %1270 = vadd.xlane.f32.xlu2 %v1269_v8 }
 0x61c   : > { %v1262_v48 = vpop.xlane.xlu1 %1261 }
 0x61d   : > { %v1279_v17 = vmul.f32 %v4805_v4, %v1262_v48 }
 0x61f   : > { %v4808_v5 = vsub.f32 %v1254_v31, %v1279_v17  ;;  %v4379_v17 = vld [vmem:[%s5723_s12] ss:$0 sm:$0xff] }
 0x621   : > { %v1287_v50 = vmul.f32 %v4808_v5, %v4808_v5 }
 0x623   : > { %v1291_v51 = vsel %vm728_vm0, %v1287_v50, 0.0 }
 0x624   : > { %v1265_v52 = vpop.xlane.xlu0 %1264  ;;  %1292 = vadd.xlane.f32.xlu2 %v1291_v51  ;;  %v1393_v51 = vlaneseq }
 0x625   : > { %v1280_v53 = vmul.f32 %v4805_v4, %v1265_v52 }
 0x627   : > { %v4814_v54 = vsub.f32 %v1255_v37, %v1280_v53 }
 0x629   : > { %v1288_v55 = vmul.f32 %v4814_v54, %v4814_v54 }
 0x62b   : > { %v1294_v56 = vsel %vm728_vm0, %v1288_v55, 0.0 }
 0x62c   : > { %1295 = vadd.xlane.f32.xlu1 %v1294_v56  ;;  %v1268_v57 = vpop.xlane.xlu1 %1267 }
 0x62d   : > { %v1281_v58 = vmul.f32 %v4805_v4, %v1268_v57 }
 0x62f   : > { %v4820_v59 = vsub.f32 %v1256_v7, %v1281_v58 }
 0x631   : > { %v1289_v60 = vmul.f32 %v4820_v59, %v4820_v59 }
 0x633   : > { %v1297_v61 = vsel %vm728_vm0, %v1289_v60, 0.0 }
 0x634   : > { %1298 = vadd.xlane.f32.xlu2 %v1297_v61  ;;  %v1271_v62 = vpop.xlane.xlu2 %1270 }
 0x635   : > { %v1282_v63 = vmul.f32 %v4805_v4, %v1271_v62 }
 0x637   : > { %v4826_v0 = vsub.f32 %v1257_v35, %v1282_v63 }
 0x639   : > { %v1290_v1 = vmul.f32 %v4826_v0, %v4826_v0 }
 0x63b   : > { %v1300_v2 = vsel %vm728_vm0, %v1290_v1, 0.0 }
 0x63c   : > { %1301 = vadd.xlane.f32.xlu0 %v1300_v2 }
 0x645   : > { %1386 = vperm.xlu1 %4248, %v699_v3  }
 0x64c   : > { %1376 = vperm.xlu2 %4249, %v697_v10  }
 0x650   : > { %1371 = vperm.xlu0 %4247, %v696_v11  }
 0x654   : > { %1381 = vperm.xlu2 %4249, %v698_v12  }
 0x697   : > { %v1293_v13 = vpop.xlane.xlu2 %1292 }
 0x698   : > { %v1303_v18 = vmul.f32 %v1293_v13, %v4805_v4 }
 0x69a   : > { %v1307_v19 = vadd.f32 1e-05, %v1303_v18 }
 0x69c   : > { %4432 = vrsqrt.f32 %v1307_v19  ;;  %vm1317_vm6 = vweird.f32 %v1307_v19 }
 0x69f   : > { %v1296_v20 = vpop.xlane.xlu1 %1295 }
 0x6a0   : > { %v1304_v21 = vmul.f32 %v1296_v20, %v4805_v4 }
 0x6a2   : > { %v4433_v22 = vpop.eup %4432  ;;  %v1308_v23 = vadd.f32 1e-05, %v1304_v21 }
 0x6a3   : > { %v1312_v25 = vmul.f32 %v4433_v22, %v1307_v19  ;;  %vm1318_vm4 = vweird.f32 %v4433_v22 }
 0x6a4   : > { %4434 = vrsqrt.f32 %v1308_v23  ;;  %vm1327_vm5 = vweird.f32 %v1308_v23  ;;  %vm1319_vm8 = vmor %vm1317_vm6, %vm1318_vm4 }
 0x6a5   : > { %v1313_v26 = vmul.f32 %v4433_v22, %v1312_v25 }
 0x6a7   : > { %v1299_v28 = vpop.xlane.xlu2 %1298  ;;  %v1314_v9 = vmul.f32 0.5, %v1313_v26 }
 0x6a8   : > { %v1305_v29 = vmul.f32 %v1299_v28, %v4805_v4 }
 0x6a9   : > { %v1315_v34 = vsub.f32 1.5, %v1314_v9 }
 0x6aa   : > { %v4435_v30 = vpop.eup %4434  ;;  %v1309_v31 = vadd.f32 1e-05, %v1305_v29 }
 0x6ab   : > { %v1322_v32 = vmul.f32 %v4435_v30, %v1308_v23  ;;  %vm1328_vm3 = vweird.f32 %v4435_v30  ;;  %v1316_v14 = vmul.f32 %v4433_v22, %v1315_v34 }
 0x6ac   : > { %4436 = vrsqrt.f32 %v1309_v31  ;;  %vm1329_vm7 = vmor %vm1327_vm5, %vm1328_vm3  ;;  %vm1337_vm10 = vweird.f32 %v1309_v31 }
 0x6ad   : > { %v1323_v33 = vmul.f32 %v4435_v30, %v1322_v32  ;;  %v1320_v35 = vsel %vm1319_vm8, %v4433_v22, %v1316_v14 }
 0x6ae   : > { %v1351_v46 = vmul.f32 %v1320_v35, %v4808_v5  ;;  %v4856_v5 = vshrl.u32 %v1393_v51, 7 }
 0x6af   : > { %v1324_v36 = vmul.f32 0.5, %v1323_v33  ;;  %v1302_v37 = vpop.xlane.xlu0 %1301  ;;  %v4849_v16 = vpop.permute.xlu2 %1376 }
 0x6b0   : > { %v1306_v38 = vmul.f32 %v1302_v37, %v4805_v4  ;;  %v1358_v55 = vmul.f32 %v4378_v43, %v1351_v46  ;;  %v1397_v3 = vadd.s32 24, %v4856_v5  ;;  %vm5747_vm14 = vcmp.lt.s32.totalorder %v4856_v5, 7 }
 0x6b1   : > { %v1325_v39 = vsub.f32 1.5, %v1324_v36  ;;  %vm1450_vm2 = vcmp.lt.s32.totalorder %v4856_v5, 4  ;;  %v4876_v13 = vand.u32 31, %v4856_v5  ;;  %vm1487_vm3 = vcmp.lt.s32.totalorder %v4856_v5, 3 }
 0x6b2   : > { %v4437_v40 = vpop.eup %4436  ;;  %v1310_v7 = vadd.f32 1e-05, %v1306_v38  ;;  %v1365_v62 = vadd.f32 %v4379_v17, %v1358_v55  ;;  %v4884_v25 = vand.u32 31, %v1397_v3  ;;  %vm1524_vm4 = vcmp.lt.s32.totalorder %v4856_v5, 2 }
 0x6b3   : > { %v1326_v6 = vmul.f32 %v4435_v30, %v1325_v39  ;;  %v1332_v41 = vmul.f32 %v4437_v40, %v1309_v31  ;;  %vm1338_vm9 = vweird.f32 %v4437_v40  ;;  %v4910_v33 = vadd.s32 4294967293, %v4876_v13 }
 0x6b4   : > { %4438 = vrsqrt.f32 %v1310_v7  ;;  %vm1339_vm11 = vmor %vm1337_vm10, %vm1338_vm9  ;;  %vm1347_vm13 = vweird.f32 %v1310_v7  ;;  %v4913_v36 = vadd.s32 1, %v4884_v25  ;;  %vm1561_vm6 = vcmp.lt.s32.totalorder %v4856_v5, 1 }
 0x6b5   : > { %v1330_v42 = vsel %vm1329_vm7, %v4435_v30, %v1326_v6  ;;  %v1333_v15 = vmul.f32 %v4437_v40, %v1332_v41  ;;  %v4903_v30 = vadd.s32 4294967294, %v4876_v13  ;;  %vm1496_vm7 = vcmp.ge.s32.totalorder %v4910_v33, 0 }
 0x6b6   : > { %v1352_v8 = vmul.f32 %v1330_v42, %v4814_v54  ;;  %vm5741_vm8 = vcmp.lt.s32.totalorder %v4913_v36, 32 }
 0x6b7   : > { %v1334_v44 = vmul.f32 0.5, %v1333_v15  ;;  %v4861_v63 = vpop.permute.xlu2 %1381  ;;  %v4905_v9 = vpop.permute.xlu1 %1386  ;;  %vm1533_vm5 = vcmp.ge.s32.totalorder %v4903_v30, 0  ;;  %v4937_v15 = vadd.s32 4294967295, %v4876_v13 }
 0x6b8   : > { %v1359_v45 = vmul.f32 %v4378_v43, %v1352_v8 }
 0x6b9   : > { %v1335_v47 = vsub.f32 1.5, %v1334_v44  ;;  %vm1570_vm10 = vcmp.ge.s32.totalorder %v4937_v15, 0 }
 0x6ba   : > { %v4439_v48 = vpop.eup %4438  ;;  %v1366_v52 = vadd.f32 %v4379_v17, %v1359_v45 }
 0x6bb   : > { %v1336_v49 = vmul.f32 %v4437_v40, %v1335_v47  ;;  %v1342_v50 = vmul.f32 %v4439_v48, %v1310_v7  ;;  %vm1348_vm12 = vweird.f32 %v4439_v48 }
 0x6bc   : > { %v4859_v58 = vmul.f32 %v4849_v16, %v1366_v52  ;;  %vm1349_vm15 = vmor %vm1347_vm13, %vm1348_vm12  ;;  %vm1696_vm12 = vcmp.lt.s32.totalorder %v4856_v5, 5 }
 0x6bd   : > { %v1340_v53 = vsel %vm1339_vm11, %v4437_v40, %v1336_v49  ;;  %v1343_v54 = vmul.f32 %v4439_v48, %v1342_v50  ;;  %v4926_v40 = vadd.s32 4, %v4884_v25  ;;  %vm5748_vm11 = vcmp.lt.s32.totalorder %v4856_v5, 6 }
 0x6be   : > { %v1353_v56 = vmul.f32 %v1340_v53, %v4820_v59  ;;  %v1619_v12 = vrot.slane %v4859_v58, 1  ;;  %v1447_v21 = vrot.slane %v4859_v58, 4  ;;  %v1484_v14 = vrot.slane %v4859_v58, 5 }
 0x6bf   : > { %v1344_v57 = vmul.f32 0.5, %v1343_v54  ;;  %v1521_v7 = vrot.slane %v4859_v58, 6  ;;  %vm1740_vm9 = vcmp.lt.s32.totalorder %v4926_v40, 32 }
 0x6c0   : > { %v1360_v60 = vmul.f32 %v4378_v43, %v1353_v56 }
 0x6c1   : > { %v1345_v61 = vsub.f32 1.5, %v1344_v57 }
 0x6c2   : > { %v4863_v1 = vpop.permute.xlu0 %1371  ;;  %v1367_v2 = vadd.f32 %v4379_v17, %v1360_v60 }
 0x6c3   : > { %v1346_v10 = vmul.f32 %v4439_v48, %v1345_v61  ;;  %v4867_v59 = vmul.f32 %v4863_v1, %v1365_v62  ;;  %v1656_v62 = vrot.slane %v4859_v58, 2 }
 0x6c4   : > { %v4871_v11 = vmul.f32 %v4861_v63, %v1367_v2 }
 0x6c5   : > { %v1350_v18 = vsel %vm1349_vm15, %v4439_v48, %v1346_v10  ;;  %v1618_v19 = vrot.slane %v4867_v59, 1  ;;  %v1446_v20 = vrot.slane %v4867_v59, 4  ;;  %v1520_v38 = vrot.slane %v4867_v59, 6 }
 0x6c6   : > { %v1354_v22 = vmul.f32 %v1350_v18, %v4826_v0  ;;  %v1620_v23 = vrot.slane %v4871_v11, 1  ;;  %v1448_v24 = vrot.slane %v4871_v11, 4  ;;  %v1485_v37 = vrot.slane %v4871_v11, 5 }
 0x6c7   : > { %v1625_v26 = vsel %vm5747_vm14, %v1618_v19, %v1619_v12  ;;  %v4890_v27 = vsel %vm1450_vm2, %v1446_v20, %v1447_v21  ;;  %v1483_v6 = vrot.slane %v4867_v59, 5  ;;  %v1527_v8 = vsel %vm1524_vm4, %v1520_v38, %v1521_v7 }
 0x6c8   : > { %v1361_v28 = vmul.f32 %v4378_v43, %v1354_v22  ;;  %v1624_v29 = vsel %vm5747_vm14, %v1619_v12, %v1620_v23  ;;  %v4900_v0 = vsel %vm1450_vm2, %v1447_v21, %v1448_v24  ;;  %v1489_v35 = vsel %vm1487_vm3, %v1484_v14, %v1485_v37 }
 0x6c9   : > { %v4250_v31 = vpack.i.bf16 %v1624_v29, %v1625_v26  ;;  %v1881_v32 = vpack.c.bf16 %v4900_v0, %v4890_v27  ;;  %v1490_v50 = vsel %vm1487_vm3, %v1483_v6, %v1484_v14  ;;  %v1557_v54 = vrot.slane %v4867_v59, 7 }
 0x6ca   : > { %v1368_v34 = vadd.f32 %v4379_v17, %v1361_v28  ;;  %v1655_v57 = vrot.slane %v4867_v59, 2  ;;  %v1657_v60 = vrot.slane %v4871_v11, 2  ;;  %v1558_v18 = vrot.slane %v4859_v58, 7 }
 0x6cb   : > { %4251 = vrot.lane.b32.xlu0 %v4250_v31, %s5737_s25  ;;  %3866 = vmatmul.msk.bf16.vlgmr.msrb.gmra.mxu2 %vm728_vm0, %v1881_v32  ;;  %v1692_v29 = vrot.slane %v4867_v59, 3  ;;  %v1694_v31 = vrot.slane %v4871_v11, 3  ;;  %v1693_v32 = vrot.slane %v4859_v58, 3 }
 0x6cc   : > { %v4922_v39 = vmul.f32 %v4905_v9, %v1368_v34  ;;  %v1662_v21 = vsel %vm5748_vm11, %v1655_v57, %v1656_v62  ;;  %v1522_v34 = vrot.slane %v4871_v11, 6 }
 0x6ce   : > { %v1486_v41 = vrot.slane %v4922_v39, 5  ;;  %v1523_v42 = vrot.slane %v4922_v39, 6  ;;  %v1621_v43 = vrot.slane %v4922_v39, 1  ;;  %v1449_v44 = vrot.slane %v4922_v39, 4 }
 0x6cf   : > { %v1560_v48 = vrot.slane %v4922_v39, 7 }
 0x6d0   : > { %v1488_v45 = vsel %vm1487_vm3, %v1485_v37, %v1486_v41  ;;  %v1528_v46 = vsel %vm1524_vm4, %v1523_v42, %v1520_v38  ;;  %v1491_v47 = vsel %vm1487_vm3, %v1486_v41, %v1483_v6  ;;  %v1626_v55 = vsel %vm5747_vm14, %v1621_v43, %v1618_v19 }
 0x6d1   : > { %v4280_v17 = vpack.i.bf16 %v1488_v45, %v1489_v35  ;;  %v1553_v49 = vsel %vm1533_vm5, %v1528_v46, 0.0  ;;  %v1516_v51 = vsel %vm1496_vm7, %v1491_v47, 0.0  ;;  %v4967_v56 = vsel %vm1450_vm2, %v1449_v44, %v1446_v20 }
 0x6d2   : > { %v4260_v52 = vpack.i.bf16 %v1527_v8, %v1553_v49  ;;  %v4255_v53 = vpack.i.bf16 %v1490_v50, %v1516_v51  ;;  %v1565_v61 = vsel %vm1561_vm6, %v1560_v48, %v1557_v54  ;;  %v1623_v2 = vsel %vm5747_vm14, %v1620_v23, %v1621_v43 }
 0x6d3   : > { %4281 = vrot.lane.b32.xlu0 %v4280_v17, %s5737_s25  ;;  %v1654_v3 = vsel %vm5741_vm8, %v1626_v55, 0.0  ;;  %v4988_v10 = vsel %vm1450_vm2, %v1448_v24, %v1449_v44  ;;  %v1756_v12 = vsel %vm1740_vm9, %v4967_v56, 0.0  ;;  %v1590_v19 = vsel %vm1570_vm10, %v1565_v61, 0.0  ;;  %v4178_v55 = vld [vmem:[%s5724_s13 + $0x30] sm:$0xff]  ;;  %v4176_v61 = vld [vmem:[%s5724_s13 + $0x20] sm:$0xff] }
 0x6d4   : > { %4261 = vrot.lane.b32.xlu2 %v4260_v52, %s5739_s0  ;;  %4256 = vrot.lane.b32.xlu1 %v4255_v53, %s5737_s25  ;;  %v1661_v20 = vsel %vm5748_vm11, %v1656_v62, %v1657_v60  ;;  %v4295_v22 = vpack.i.bf16 %v1654_v3, %v1623_v2  ;;  %v1884_v23 = vpack.c.bf16 %v1756_v12, %v4988_v10  ;;  %v1658_v6 = vrot.slane %v4922_v39, 2  ;;  %v4186_v62 = vld [vmem:[%s5724_s13 + $0x70] sm:$0xff]  ;;  %v4175_v2 = vld [vmem:[%s5724_s13 + $0x18] sm:$0xff] }
 0x6d5   : > { %v1564_v24 = vsel %vm1561_vm6, %v1557_v54, %v1558_v18  ;;  %v4265_v28 = vpack.i.bf16 %v1661_v20, %v1662_v21  ;;  %v1698_v37 = vsel %vm1696_vm12, %v1693_v32, %v1694_v31  ;;  %v1699_v38 = vsel %vm1696_vm12, %v1692_v29, %v1693_v32  ;;  %v4179_v54 = vld [vmem:[%s5724_s13 + $0x38] sm:$0xff]  ;;  %v4185_v3 = vld [vmem:[%s5724_s13 + $0x68] sm:$0xff]  ;;  %v4174_v12 = vld [vmem:[%s5724_s13 + $0x10] sm:$0xff] }
 0x6d6   : > { %v4270_v26 = vpack.i.bf16 %v1564_v24, %v1590_v19  ;;  %v1525_v14 = vsel %vm1524_vm4, %v1522_v34, %v1523_v42  ;;  %v5020_v41 = vadd.s32 2, %v4884_v25  ;;  %v1526_v35 = vsel %vm1524_vm4, %v1521_v7, %v1522_v34  ;;  %2039 = vmatpush.bf16.msrb.mxu0 %v4179_v54  ;;  %v4173_v19 = vld [vmem:[%s5724_s13 + $0x8] sm:$0xff]  ;;  %v4183_v20 = vld [vmem:[%s5724_s13 + $0x58] sm:$0xff]  ;;  %v4172_v21 = vld [vmem:[%s5724_s13] sm:$0xff] }
 0x6d7   : > { %v4275_v8 = vpack.i.bf16 %v1698_v37, %v1699_v38  ;;  %v4285_v43 = vpack.i.bf16 %v1525_v14, %v1526_v35  ;;  %v1663_v44 = vsel %vm5748_vm11, %v1658_v6, %v1655_v57  ;;  %v1559_v42 = vrot.slane %v4871_v11, 7  ;;  %v4187_v57 = vld [vmem:[%s5724_s13 + $0x78] sm:$0xff]  ;;  %v4180_v24 = vld [vmem:[%s5724_s13 + $0x40] sm:$0xff] }
 0x6d8   : > { %vm5742_vm13 = vcmp.lt.s32.totalorder %v5020_v41, 32  ;;  %v1660_v46 = vsel %vm5748_vm11, %v1657_v60, %v1658_v6  ;;  %v1695_v47 = vrot.slane %v4922_v39, 3  ;;  %v5040_v17 = vadd.s32 3, %v4884_v25  ;;  %v4177_v60 = vld [vmem:[%s5724_s13 + $0x28] sm:$0xff]  ;;  %2058 = vmatpush.bf16.msra.mxu1 %v4187_v57 }
 0x6d9   : > { %v1562_v45 = vsel %vm1561_vm6, %v1559_v42, %v1560_v48  ;;  %v1691_v7 = vsel %vm5742_vm13, %v1663_v44, 0.0  ;;  %v1563_v49 = vsel %vm1561_vm6, %v1558_v18, %v1559_v42  ;;  %v4184_v18 = vld [vmem:[%s5724_s13 + $0x60] sm:$0xff]  ;;  %vm5744_vm13 = vcmask 785408  }
 0x6da   : > { %v4290_v50 = vpack.i.bf16 %v1562_v45, %v1563_v49  ;;  %v4300_v51 = vpack.i.bf16 %v1691_v7, %v1660_v46  ;;  %v1700_v48 = vsel %vm1696_vm12, %v1695_v47, %v1692_v29  ;;  %vm5743_vm15 = vcmp.lt.s32.totalorder %v5040_v17, 32  ;;  %2040 = vmatpush.bf16.msrb.mxu0 %v4178_v55 }
 0x6db   : > { %4296 = vrot.lane.b32.xlu0 %v4295_v22, %s5737_s25  ;;  %3867 = vmatmul.msk.bf16.gmra.mxu2 %vm728_vm0, %v1884_v23  ;;  %v1697_v52 = vsel %vm1696_vm12, %v1694_v31, %v1695_v47  ;;  %v1728_v25 = vsel %vm5743_vm15, %v1700_v48, 0.0  ;;  %v4182_v22 = vld [vmem:[%s5724_s13 + $0x50] sm:$0xff]  ;;  %v4181_v23 = vld [vmem:[%s5724_s13 + $0x48] sm:$0xff]  ;;  %vm5745_vm15 = vcmask 523264  }
 0x6dc   : > { %4271 = vrot.lane.b32.xlu1 %v4270_v26, %s4509_s22  ;;  %4266 = vrot.lane.b32.xlu2 %v4265_v28, %s5739_s0  ;;  %v4305_v53 = vpack.i.bf16 %v1728_v25, %v1697_v52  ;;  %v5103_v26 = vadd.s32 4294967292, %v4876_v13 }
 0x6dd   : > { %2059 = vmatpush.bf16.msra.mxu1 %v4186_v62 }
 0x6de   : > { %2041 = vmatpush.bf16.msrb.mxu0 %v4177_v60  ;;  %vm5746_vm8 = vcmp.ge.s32.totalorder %v5103_v26, 0 }
 0x6df   : > { %v1479_v37 = vsel %vm5746_vm8, %v4967_v56, 0.0 }
 0x6e1   : > { %2060 = vmatpush.bf16.msra.mxu1 %v4185_v3 }
 0x6e2   : > { %2042 = vmatpush.bf16.msrb.mxu0 %v4176_v61 }
 0x6e4   : > { %4276 = vrot.lane.b32.xlu1 %v4275_v8, %s4509_s22  ;;  %4286 = vrot.lane.b32.xlu2 %v4285_v43, %s5739_s0 }
 0x6e5   : > { %2061 = vmatpush.bf16.msra.mxu1 %v4184_v18 }
 0x6e6   : > { %2043 = vmatpush.bf16.msrb.mxu0 %v4175_v2 }
 0x6e9   : > { %2062 = vmatpush.bf16.msra.mxu1 %v4183_v20 }
 0x6ea   : > { %2044 = vmatpush.bf16.msrb.mxu0 %v4174_v12 }
 0x6ec   : > { %4291 = vrot.lane.b32.xlu1 %v4290_v50, %s4509_s22  ;;  %4301 = vrot.lane.b32.xlu2 %v4300_v51, %s5739_s0 }
 0x6ed   : > { %2063 = vmatpush.bf16.msra.mxu1 %v4182_v22 }
 0x6ee   : > { %2045 = vmatpush.bf16.msrb.mxu0 %v4173_v19 }
 0x6f1   : > { %2064 = vmatpush.bf16.msra.mxu1 %v4181_v23 }
 0x6f2   : > { %2046 = vmatpush.bf16.msrb.mxu0 %v4172_v21 }
 0x6f4   : > { %4306 = vrot.lane.b32.xlu1 %v4305_v53, %s4509_s22 }
 0x6f5   : > { %2065 = vmatpush.bf16.msra.mxu1 %v4180_v24 }
 0x72e   : > { %v4262_v28 = vpop.permute.xlu2 %4261 }
 0x72f   : > { %v4264_v6 = vunpack.i.h.bf16 %v4262_v28  ;;  %v4263_v35 = vunpack.i.l.bf16 %v4262_v28 }
 0x736   : > { %v4267_v8 = vpop.permute.xlu2 %4266 }
 0x737   : > { %v4269_v48 = vunpack.i.h.bf16 %v4267_v8  ;;  %v4268_v52 = vunpack.i.l.bf16 %v4267_v8 }
 0x73d   : > { %v4252_v34 = vpop.permute.xlu0 %4251 }
 0x73e   : > { %v4254_v46 = vunpack.i.h.bf16 %v4252_v34  ;;  %v4253_v7 = vunpack.i.l.bf16 %v4252_v34  ;;  %v4287_v60 = vpop.permute.xlu2 %4286 }
 0x73f   : > { %v4289_v20 = vunpack.i.h.bf16 %v4287_v60  ;;  %v4288_v21 = vunpack.i.l.bf16 %v4287_v60 }
 0x740   : > { %v1868_v50 = vsel %vm728_vm0, %v4859_v58, %v4254_v46  ;;  %v1867_v51 = vsel %vm728_vm0, %v4867_v59, %v4253_v7 }
 0x741   : > { %v1871_v55 = vsel %vm5745_vm15, %v1867_v51, %v4268_v52  ;;  %v1872_v57 = vsel %vm5745_vm15, %v1868_v50, %v4269_v48  ;;  %v4190_v50 = vld [vmem:[%s5726_s15] sm:$0xff] }
 0x742   : > { %v4380_v52 = vld [vmem:[%s5725_s14] ss:$0 sm:$0xff] }
 0x746   : > { %v4257_v29 = vpop.permute.xlu1 %4256 }
 0x747   : > { %v4259_v31 = vunpack.i.h.bf16 %v4257_v29  ;;  %v4258_v32 = vunpack.i.l.bf16 %v4257_v29 }
 0x749   : > { %v1853_v38 = vsel %vm728_vm0, %v1479_v37, %v4258_v32  ;;  %v1854_v14 = vsel %vm728_vm0, %v4890_v27, %v4259_v31  ;;  %v4282_v27 = vpop.permute.xlu0 %4281 }
 0x74a   : > { %v1858_v42 = vsel %vm5745_vm15, %v1853_v38, %v4263_v35  ;;  %v1859_v45 = vsel %vm5745_vm15, %v1854_v14, %v4264_v6  ;;  %v4284_v61 = vunpack.i.h.bf16 %v4282_v27  ;;  %v4283_v62 = vunpack.i.l.bf16 %v4282_v27  ;;  %v4302_v14 = vpop.permute.xlu2 %4301  ;;  %v4191_v27 = vld [vmem:[%s5726_s15 + $0x8] sm:$0xff] }
 0x74b   : > { %v4304_v35 = vunpack.i.h.bf16 %v4302_v14 }
 0x74c   : > { %v1855_v18 = vsel %vm728_vm0, %v4900_v0, %v4283_v62  ;;  %v1856_v19 = vsel %vm728_vm0, %v4988_v10, %v4284_v61 }
 0x74d   : > { %v1860_v29 = vsel %vm5745_vm15, %v1855_v18, %v4288_v21  ;;  %v1861_v31 = vsel %vm5745_vm15, %v1856_v19, %v4289_v20 }
 0x74e   : > { %v4272_v13 = vpop.permute.xlu1 %4271  ;;  %v2086_v48 = vpop.f32.mrf.mxu2 }
 0x74f   : > { %v4274_v43 = vunpack.i.h.bf16 %v4272_v13  ;;  %v4273_v44 = vunpack.i.l.bf16 %v4272_v13  ;;  %v4303_v13 = vunpack.i.l.bf16 %v4302_v14 }
 0x751   : > { %v1863_v56 = vsel %vm5744_vm13, %v1858_v42, %v4273_v44  ;;  %v1864_v47 = vsel %vm5744_vm13, %v1859_v45, %v4274_v43  ;;  %v4297_v22 = vpop.permute.xlu0 %4296 }
 0x752   : > { %v1879_v49 = vpack.c.bf16 %v1864_v47, %v1863_v56  ;;  %v4299_v32 = vunpack.i.h.bf16 %v4297_v22  ;;  %v4298_v34 = vunpack.i.l.bf16 %v4297_v22  ;;  %v4193_v47 = vld [vmem:[%s5726_s15 + $0x18] sm:$0xff] }
 0x753   : > { %2148 = vmatpush.bf16.msrb.mxu3 %v4193_v47 }
 0x754   : > { %2047 = vmatmul.bf16.vlgmr.msrb.gmra.mxu0 %v1879_v49  ;;  %v1870_v10 = vsel %vm728_vm0, %v4922_v39, %v4299_v32  ;;  %v1869_v6 = vsel %vm728_vm0, %v4871_v11, %v4298_v34  ;;  %v4192_v49 = vld [vmem:[%s5726_s15 + $0x10] sm:$0xff] }
 0x755   : > { %v1873_v42 = vsel %vm5745_vm15, %v1869_v6, %v4303_v13  ;;  %v1874_v45 = vsel %vm5745_vm15, %v1870_v10, %v4304_v35  ;;  %v4381_v6 = vld [vmem:[%s5727_s16] ss:$0 sm:$0xff] }
 0x756   : > { %v4277_v25 = vpop.permute.xlu1 %4276 }
 0x757   : > { %v4279_v53 = vunpack.i.h.bf16 %v4277_v25  ;;  %v4278_v54 = vunpack.i.l.bf16 %v4277_v25  ;;  %2149 = vmatpush.bf16.msrb.mxu3 %v4192_v49 }
 0x759   : > { %v1875_v2 = vsel %vm5744_vm13, %v1871_v55, %v4278_v54  ;;  %v1876_v3 = vsel %vm5744_vm13, %v1872_v57, %v4279_v53  ;;  %v2088_v57 = vpop.f32.mrf.mxu2 }
 0x75a   : > { %v1880_v12 = vpack.c.bf16 %v1876_v3, %v1875_v2 }
 0x75b   : > { %2150 = vmatpush.bf16.msrb.mxu3 %v4191_v27 }
 0x75c   : > { %2066 = vmatmul.bf16.vlgmr.msra.gmra.mxu1 %v1880_v12 }
 0x75e   : > { %v4292_v23 = vpop.permute.xlu1 %4291 }
 0x75f   : > { %v4294_v24 = vunpack.i.h.bf16 %v4292_v23  ;;  %v4293_v28 = vunpack.i.l.bf16 %v4292_v23  ;;  %2151 = vmatpush.bf16.msrb.mxu3 %v4190_v50 }
 0x761   : > { %v1865_v37 = vsel %vm5744_vm13, %v1860_v29, %v4293_v28  ;;  %v1866_v38 = vsel %vm5744_vm13, %v1861_v31, %v4294_v24  ;;  %v2091_v21 = vpop.f32.mrf.mxu2 }
 0x762   : > { %v1882_v0 = vpack.c.bf16 %v1866_v38, %v1865_v37 }
 0x764   : > { %2052 = vmatmul.bf16.gmra.mxu0 %v1882_v0 }
 0x766   : > { %v4307_v8 = vpop.permute.xlu1 %4306 }
 0x767   : > { %v4309_v43 = vunpack.i.h.bf16 %v4307_v8  ;;  %v4308_v44 = vunpack.i.l.bf16 %v4307_v8 }
 0x769   : > { %v1877_v46 = vsel %vm5744_vm13, %v1873_v42, %v4308_v44  ;;  %v1878_v7 = vsel %vm5744_vm13, %v1874_v45, %v4309_v43  ;;  %v2093_v37 = vpop.f32.mrf.mxu2 }
 0x76a   : > { %v1883_v56 = vpack.c.bf16 %v1878_v7, %v1877_v46 }
 0x76c   : > { %2071 = vmatmul.bf16.gmra.mxu1 %v1883_v56 }
 0x7d1   : > { %v2048_v51 = vpop.f32.mrf.mxu0 }
 0x7d2   : > { %v2049_v54 = vadd.f32 %v4380_v52, %v2048_v51 }
 0x7d9   : > { %v2050_v25 = vpop.f32.mrf.mxu0  ;;  %v2067_v53 = vpop.f32.mrf.mxu1 }
 0x7da   : > { %v2068_v55 = vadd.f32 %v2067_v53, %v2049_v54  ;;  %v2051_v60 = vadd.f32 %v4380_v52, %v2050_v25 }
 0x7dc   : > { %v2087_v62 = vadd.f32 %v2086_v48, %v2068_v55 }
 0x7de   : > { %v2096_v18 = vmax.f32 %v2087_v62, 0.0 }
 0x7e1   : > { %v2069_v61 = vpop.f32.mrf.mxu1  ;;  %v2053_v3 = vpop.f32.mrf.mxu0 }
 0x7e2   : > { %v2070_v2 = vadd.f32 %v2069_v61, %v2051_v60  ;;  %v2054_v23 = vadd.f32 %v4380_v52, %v2053_v3 }
 0x7e4   : > { %v2089_v12 = vadd.f32 %v2088_v57, %v2070_v2 }
 0x7e6   : > { %v2097_v19 = vmax.f32 %v2089_v12, 0.0 }
 0x7e8   : > { %v2100_v20 = vpack.c.bf16 %v2097_v19, %v2096_v18 }
 0x7e9   : > { %v2072_v22 = vpop.f32.mrf.mxu1  ;;  %v2055_v24 = vpop.f32.mrf.mxu0 }
 0x7ea   : > { %3884 = vmatmul.msk.bf16.vlgmr.msrb.gmra.mxu3 %vm5745_vm15, %v2100_v20  ;;  %v2073_v28 = vadd.f32 %v2072_v22, %v2054_v23  ;;  %v2056_v29 = vadd.f32 %v4380_v52, %v2055_v24 }
 0x7ec   : > { %v2092_v32 = vadd.f32 %v2091_v21, %v2073_v28  ;;  %v4197_v28 = vld [vmem:[%s5758_s30 + $0x28] sm:$0xff] }
 0x7ed   : > { %2358 = vmatpush.bf16.msrb.mxu1 %v4197_v28 }
 0x7ee   : > { %v2098_v0 = vmax.f32 %v2092_v32, 0.0 }
 0x7f1   : > { %v2074_v31 = vpop.f32.mrf.mxu1 }
 0x7f2   : > { %v2075_v34 = vadd.f32 %v2074_v31, %v2056_v29  ;;  %v4195_v29 = vld [vmem:[%s5757_s3 + $0x28] sm:$0xff] }
 0x7f3   : > { %v4199_v31 = vld [vmem:[%s5718_s7 + $0x28] sm:$0xff]  ;;  %2317 = vmatpush.bf16.msra.mxu0 %v4195_v29 }
 0x7f4   : > { %v2094_v38 = vadd.f32 %v2093_v37, %v2075_v34  ;;  %2399 = vmatpush.bf16.msra.mxu2 %v4199_v31  ;;  %v4194_v37 = vld [vmem:[%s5757_s3 + $0x20] sm:$0xff] }
 0x7f6   : > { %v2099_v14 = vmax.f32 %v2094_v38, 0.0  ;;  %v4196_v38 = vld [vmem:[%s5758_s30 + $0x20] sm:$0xff] }
 0x7f7   : > { %2318 = vmatpush.bf16.msra.mxu0 %v4194_v37  ;;  %2359 = vmatpush.bf16.msrb.mxu1 %v4196_v38 }
 0x7f8   : > { %v2101_v10 = vpack.c.bf16 %v2099_v14, %v2098_v0  ;;  %v4198_v0 = vld [vmem:[%s5718_s7 + $0x20] sm:$0xff] }
 0x7f9   : > { %2400 = vmatpush.bf16.msra.mxu2 %v4198_v0 }
 0x7fa   : > { %3885 = vmatmul.msk.bf16.gmra.mxu3 %vm5745_vm15, %v2101_v10 }
 0x86d   : > { %v2153_v35 = vpop.f32.mrf.mxu3 }
 0x86e   : > { %v2154_v13 = vadd.f32 %v4381_v6, %v2153_v35 }
 0x870   : > { %v2163_v8 = vadd.f32 %v2154_v13, %v4867_v59 }
 0x872   : > { %v2169_v43 = vsel %vm728_vm0, %v2163_v8, 0.0 }
 0x873   : > { %2170 = vadd.xlane.f32.xlu0 %v2169_v43 }
 0x875   : > { %v2155_v44 = vpop.f32.mrf.mxu3 }
 0x876   : > { %v2156_v42 = vadd.f32 %v4381_v6, %v2155_v44 }
 0x878   : > { %v2164_v45 = vadd.f32 %v2156_v42, %v4859_v58 }
 0x87a   : > { %v2172_v46 = vsel %vm728_vm0, %v2164_v45, 0.0 }
 0x87b   : > { %2173 = vadd.xlane.f32.xlu2 %v2172_v46 }
 0x87d   : > { %v2158_v7 = vpop.f32.mrf.mxu3 }
 0x87e   : > { %v2159_v56 = vadd.f32 %v4381_v6, %v2158_v7 }
 0x880   : > { %v2165_v47 = vadd.f32 %v2159_v56, %v4871_v11 }
 0x882   : > { %v2175_v49 = vsel %vm728_vm0, %v2165_v47, 0.0 }
 0x883   : > { %2176 = vadd.xlane.f32.xlu1 %v2175_v49 }
 0x885   : > { %v2160_v27 = vpop.f32.mrf.mxu3 }
 0x886   : > { %v2161_v50 = vadd.f32 %v4381_v6, %v2160_v27 }
 0x888   : > { %v2166_v59 = vadd.f32 %v2161_v50, %v4922_v39  ;;  %v4382_v50 = vld [vmem:[%s5728_s17] ss:$0 sm:$0xff] }
 0x88a   : > { %v2178_v51 = vsel %vm728_vm0, %v2166_v59, 0.0 }
 0x88b   : > { %2179 = vadd.xlane.f32.xlu2 %v2178_v51 }
 0x8e6   : > { %v2171_v48 = vpop.xlane.xlu0 %2170 }
 0x8e7   : > { %v2181_v58 = vmul.f32 %v2171_v48, %v4805_v4 }
 0x8e9   : > { %v2185_v52 = vsub.f32 %v2163_v8, %v2181_v58  ;;  %v4202_v58 = vld [vmem:[%s5757_s3 + $0x38] sm:$0xff] }
 0x8ea   : > { %2588 = vmatpush.bf16.msrb.mxu2 %v4202_v58 }
 0x8eb   : > { %v2189_v25 = vmul.f32 %v2185_v52, %v2185_v52 }
 0x8ed   : > { %v2193_v53 = vsel %vm728_vm0, %v2189_v25, 0.0 }
 0x8ee   : > { %v2174_v54 = vpop.xlane.xlu2 %2173  ;;  %2194 = vadd.xlane.f32.xlu0 %v2193_v53 }
 0x8ef   : > { %v2182_v11 = vmul.f32 %v2174_v54, %v4805_v4 }
 0x8f1   : > { %v5171_v55 = vsub.f32 %v2164_v45, %v2182_v11 }
 0x8f3   : > { %v2190_v57 = vmul.f32 %v5171_v55, %v5171_v55 }
 0x8f5   : > { %v2196_v39 = vsel %vm728_vm0, %v2190_v57, 0.0  ;;  %v4201_v57 = vld [vmem:[%s5757_s3 + $0x30] sm:$0xff] }
 0x8f6   : > { %v2177_v60 = vpop.xlane.xlu1 %2176  ;;  %2197 = vadd.xlane.f32.xlu1 %v2196_v39  ;;  %2589 = vmatpush.bf16.msrb.mxu2 %v4201_v57 }
 0x8f7   : > { %v2183_v61 = vmul.f32 %v2177_v60, %v4805_v4 }
 0x8f9   : > { %v5177_v62 = vsub.f32 %v2165_v47, %v2183_v61 }
 0x8fb   : > { %v2191_v2 = vmul.f32 %v5177_v62, %v5177_v62 }
 0x8fd   : > { %v2199_v3 = vsel %vm728_vm0, %v2191_v2, 0.0 }
 0x8fe   : > { %2200 = vadd.xlane.f32.xlu2 %v2199_v3  ;;  %v2180_v12 = vpop.xlane.xlu2 %2179 }
 0x8ff   : > { %v2184_v18 = vmul.f32 %v2180_v12, %v4805_v4 }
 0x901   : > { %v5183_v19 = vsub.f32 %v2166_v59, %v2184_v18 }
 0x903   : > { %v2192_v20 = vmul.f32 %v5183_v19, %v5183_v19 }
 0x905   : > { %v2202_v21 = vsel %vm728_vm0, %v2192_v20, 0.0 }
 0x906   : > { %2203 = vadd.xlane.f32.xlu0 %v2202_v21 }
 0x961   : > { %v2195_v22 = vpop.xlane.xlu0 %2194 }
 0x962   : > { %v2205_v23 = vmul.f32 %v2195_v22, %v4805_v4 }
 0x964   : > { %v2209_v24 = vadd.f32 1e-05, %v2205_v23 }
 0x966   : > { %4440 = vrsqrt.f32 %v2209_v24  ;;  %vm2219_vm15 = vweird.f32 %v2209_v24 }
 0x969   : > { %v2198_v32 = vpop.xlane.xlu1 %2197 }
 0x96a   : > { %v2206_v34 = vmul.f32 %v2198_v32, %v4805_v4 }
 0x96c   : > { %v4441_v14 = vpop.eup %4440  ;;  %v2210_v10 = vadd.f32 1e-05, %v2206_v34 }
 0x96d   : > { %v2214_v6 = vmul.f32 %v4441_v14, %v2209_v24  ;;  %vm2220_vm13 = vweird.f32 %v4441_v14 }
 0x96e   : > { %4442 = vrsqrt.f32 %v2210_v10  ;;  %vm2221_vm8 = vmor %vm2219_vm15, %vm2220_vm13 }
 0x96f   : > { %v2215_v35 = vmul.f32 %v4441_v14, %v2214_v6 }
 0x971   : > { %v2216_v13 = vmul.f32 0.5, %v2215_v35  ;;  %v2201_v8 = vpop.xlane.xlu2 %2200 }
 0x972   : > { %v2207_v43 = vmul.f32 %v2201_v8, %v4805_v4 }
 0x973   : > { %v2217_v44 = vsub.f32 1.5, %v2216_v13 }
 0x974   : > { %v4443_v42 = vpop.eup %4442  ;;  %v2211_v45 = vadd.f32 1e-05, %v2207_v43 }
 0x975   : > { %v2218_v46 = vmul.f32 %v4441_v14, %v2217_v44  ;;  %v2224_v7 = vmul.f32 %v4443_v42, %v2210_v10  ;;  %vm2230_vm14 = vweird.f32 %v4443_v42 }
 0x976   : > { %4444 = vrsqrt.f32 %v2211_v45  ;;  %vm2239_vm11 = vweird.f32 %v2211_v45 }
 0x977   : > { %v2222_v56 = vsel %vm2221_vm8, %v4441_v14, %v2218_v46  ;;  %v2225_v47 = vmul.f32 %v4443_v42, %v2224_v7  ;;  %vm2229_vm8 = vweird.f32 %v2210_v10 }
 0x978   : > { %v2253_v59 = vmul.f32 %v2222_v56, %v2185_v52  ;;  %v4383_v52 = vld [vmem:[%s5729_s18] ss:$0 sm:$0xff]  ;;  %vm2231_vm13 = vmor %vm2229_vm8, %vm2230_vm14 }
 0x979   : > { %v2226_v49 = vmul.f32 0.5, %v2225_v47  ;;  %v2204_v27 = vpop.xlane.xlu0 %2203  ;;  %v4385_v47 = vld [vmem:[%s5717_s6 + $0x2] ss:$0 sm:$0xff] }
 0x97a   : > { %v2208_v51 = vmul.f32 %v2204_v27, %v4805_v4  ;;  %v2260_v39 = vmul.f32 %v4382_v50, %v2253_v59 }
 0x97b   : > { %v2227_v48 = vsub.f32 1.5, %v2226_v49 }
 0x97c   : > { %v4445_v25 = vpop.eup %4444  ;;  %v2212_v53 = vadd.f32 1e-05, %v2208_v51  ;;  %v2267_v12 = vadd.f32 %v4383_v52, %v2260_v39 }
 0x97d   : > { %v2228_v54 = vmul.f32 %v4443_v42, %v2227_v48  ;;  %v2234_v11 = vmul.f32 %v4445_v25, %v2211_v45  ;;  %vm2240_vm15 = vweird.f32 %v4445_v25 }
 0x97e   : > { %4446 = vrsqrt.f32 %v2212_v53  ;;  %v5224_v28 = vmul.f32 %v2267_v12, %v4863_v1  ;;  %vm2241_vm14 = vmor %vm2239_vm11, %vm2240_vm15  ;;  %vm2249_vm11 = vweird.f32 %v2212_v53  ;;  %v4384_v12 = vld [vmem:[%s5761_s4 + $0x2] ss:$0 sm:$0xff] }
 0x97f   : > { %v2232_v60 = vsel %vm2231_vm13, %v4443_v42, %v2228_v54  ;;  %v2235_v61 = vmul.f32 %v4445_v25, %v2234_v11 }
 0x980   : > { %v2254_v2 = vmul.f32 %v2232_v60, %v5171_v55 }
 0x981   : > { %v2236_v3 = vmul.f32 0.5, %v2235_v61 }
 0x982   : > { %v2261_v18 = vmul.f32 %v4382_v50, %v2254_v2  ;;  %v4204_v2 = vld [vmem:[%s5758_s30 + $0x38] sm:$0xff] }
 0x983   : > { %v2237_v20 = vsub.f32 1.5, %v2236_v3 }
 0x984   : > { %v4447_v21 = vpop.eup %4446  ;;  %v2268_v22 = vadd.f32 %v4383_v52, %v2261_v18 }
 0x985   : > { %v2238_v23 = vmul.f32 %v4445_v25, %v2237_v20  ;;  %v2244_v24 = vmul.f32 %v4447_v21, %v2212_v53  ;;  %vm2250_vm8 = vweird.f32 %v4447_v21 }
 0x986   : > { %v5227_v29 = vmul.f32 %v2268_v22, %v4849_v16  ;;  %vm2251_vm13 = vmor %vm2249_vm11, %vm2250_vm8  ;;  %v4203_v22 = vld [vmem:[%s5758_s30 + $0x30] sm:$0xff] }
 0x987   : > { %v2242_v31 = vsel %vm2241_vm14, %v4445_v25, %v2238_v23  ;;  %v2245_v55 = vmul.f32 %v4447_v21, %v2244_v24  ;;  %v4386_v25 = vld [vmem:[%s5719_s8 + $0x2] ss:$0 sm:$0xff] }
 0x988   : > { %v5231_v32 = vpack.c.bf16 %v5227_v29, %v5224_v28  ;;  %v2255_v37 = vmul.f32 %v2242_v31, %v5177_v62 }
 0x989   : > { %v2246_v34 = vmul.f32 0.5, %v2245_v55 }
 0x98a   : > { %3900 = vmatmul.msk.bf16.vlgmr.msra.gmra.mxu0 %vm728_vm0, %v5231_v32  ;;  %3915 = vmatmul.msk.bf16.vlgmr.msrb.gmra.mxu1 %vm728_vm0, %v5231_v32  ;;  %v2262_v14 = vmul.f32 %v4382_v50, %v2255_v37 }
 0x98b   : > { %v2247_v38 = vsub.f32 1.5, %v2246_v34  ;;  %3930 = vmatmul.msk.bf16.vlgmr.msra.gmra.mxu2 %vm728_vm0, %v5231_v32 }
 0x98c   : > { %v2269_v35 = vadd.f32 %v4383_v52, %v2262_v14  ;;  %v5285_v14 = vld [vmem:[%s4642_s24] ss:$0 sm:$0xff]  ;;  %s5795_s24 = sld [smem:[#allocation9_spill]] }
 0x98d   : > { %v2248_v0 = vmul.f32 %v4447_v21, %v2247_v38 }
 0x98e   : > { %v5242_v8 = vmul.f32 %v2269_v35, %v4861_v63 }
 0x98f   : > { %v2252_v10 = vsel %vm2251_vm13, %v4447_v21, %v2248_v0 }
 0x990   : > { %v2256_v6 = vmul.f32 %v2252_v10, %v5183_v19 }
 0x992   : > { %v2263_v62 = vmul.f32 %v4382_v50, %v2256_v6  ;;  %s690_s28 = scalar_lea.vmem %s5795_s24, %s4637_s5 }
 0x994   : > { %v2270_v13 = vadd.f32 %v4383_v52, %v2263_v62 }
 0x996   : > { %v5245_v43 = vmul.f32 %v2270_v13, %v4905_v9 }
 0x998   : > { %v5249_v44 = vpack.c.bf16 %v5245_v43, %v5242_v8 }
 0x99a   : > { %3901 = vmatmul.msk.bf16.gmra.mxu0 %vm728_vm0, %v5249_v44  ;;  %3916 = vmatmul.msk.bf16.gmra.mxu1 %vm728_vm0, %v5249_v44 }
 0x99b   : > { %3931 = vmatmul.msk.bf16.gmra.mxu2 %vm728_vm0, %v5249_v44 }
 0x9ab   : > { %3957 = vmatmul.msk.bf16.vlgmr.msrb.gmra.mxu2 %vm728_vm0, %v5231_v32 }
 0x9bb   : > { %3958 = vmatmul.msk.bf16.gmra.mxu2 %vm728_vm0, %v5249_v44 }
 0xa07   : > { %v2361_v19 = vpop.f32.mrf.mxu1  ;;  %v2320_v56 = vpop.f32.mrf.mxu0 }
 0xa08   : > { %v2362_v53 = vadd.f32 %v4385_v47, %v2361_v19  ;;  %v2321_v23 = vadd.f32 %v4384_v12, %v2320_v56 }
 0xa0e   : > { %v2402_v42 = vpop.f32.mrf.mxu2 }
 0xa0f   : > { %v2363_v45 = vpop.f32.mrf.mxu1  ;;  %v2322_v11 = vpop.f32.mrf.mxu0  ;;  %v2403_v3 = vadd.f32 %v4386_v25, %v2402_v42 }
 0xa10   : > { %v2364_v48 = vadd.f32 %v4385_v47, %v2363_v45  ;;  %v2323_v21 = vadd.f32 %v4384_v12, %v2322_v11 }
 0xa12   : > { %v2414_v39 = vpack.c.bf16 %v2364_v48, %v2362_v53  ;;  %v2412_v31 = vpack.c.bf16 %v2323_v21, %v2321_v23 }
 0xa14   : > { %v2423_v18 = vsel %vm839_vm1, %v2414_v39, 0 }
 0xa16   : > { %v2404_v46 = vpop.f32.mrf.mxu2 }
 0xa17   : > { %v2366_v7 = vpop.f32.mrf.mxu1  ;;  %v2405_v60 = vadd.f32 %v4386_v25, %v2404_v46  ;;  %v2325_v24 = vpop.f32.mrf.mxu0 }
 0xa18   : > { %v2367_v50 = vadd.f32 %v4385_v47, %v2366_v7  ;;  %v2326_v37 = vadd.f32 %v4384_v12, %v2325_v24 }
 0xa19   : > { %v2493_v20 = vpack.c.bf16 %v2405_v60, %v2403_v3 }
 0xa1e   : > { %v2407_v49 = vpop.f32.mrf.mxu2 }
 0xa1f   : > { %v2368_v27 = vpop.f32.mrf.mxu1  ;;  %v2408_v57 = vadd.f32 %v4386_v25, %v2407_v49  ;;  %v2327_v55 = vpop.f32.mrf.mxu0 }
 0xa20   : > { %v2369_v59 = vadd.f32 %v4385_v47, %v2368_v27  ;;  %v2328_v34 = vadd.f32 %v4384_v12, %v2327_v55  ;;  %v4200_v47 = vld [vmem:[%s5720_s9 + $0x10] sm:$0xff] }
 0xa21   : > { %2544 = vmatpush.bf16.msra.mxu1 %v4200_v47 }
 0xa22   : > { %v2415_v51 = vpack.c.bf16 %v2369_v59, %v2367_v50  ;;  %v2413_v38 = vpack.c.bf16 %v2328_v34, %v2326_v37  ;;  %v4388_v59 = vld [vmem:[%s5717_s6 + $0x3] ss:$0 sm:$0xff] }
 0xa24   : > { %v2426_v58 = vsel %vm839_vm1, %v2415_v51, 0 }
 0xa25   : > { %2434 = vmatpush.bf16.xpose.msra.mxu3 %v2426_v58 }
 0xa26   : > { %v2409_v54 = vpop.f32.mrf.mxu2 }
 0xa27   : > { %v2410_v52 = vadd.f32 %v4386_v25, %v2409_v54 }
 0xa29   : > { %v2494_v61 = vpack.c.bf16 %v2410_v52, %v2408_v57 }
 0xa2b   : > { %2507 = vmatpush.bf16.msrb.mxu0 %v2494_v61 }
 0xa2d   : > { %2435 = vmatpush.bf16.xpose.msra.mxu3 %v2423_v18 }
 0xa2f   : > { %2508 = vmatpush.bf16.msrb.mxu0 %v2493_v20 }
 0xa34   : > { %3932 = vmatmul.msk.bf16.vlgmr.msra.gmra.mxu3 %vm839_vm1, %v2412_v31 }
 0xa35   : > { %2629 = vmatpush.bf16.msrb.mxu3 %v4204_v2 }
 0xa39   : > { %2630 = vmatpush.bf16.msrb.mxu3 %v4203_v22 }
 0xa44   : > { %3933 = vmatmul.msk.bf16.gmra.mxu3 %vm839_vm1, %v2413_v38 }
 0xa54   : > { %3972 = vmatmul.msk.bf16.vlgmr.msrb.gmra.mxu3 %vm728_vm0, %v5231_v32 }
 0xa64   : > { %3973 = vmatmul.msk.bf16.gmra.mxu3 %vm728_vm0, %v5249_v44 }
 0xab7   : > { %v2437_v0 = vpop.f32.mrf.mxu3 }
 0xab8   : > { %v2438_v10 = vadd.f32 %v5285_v14, %v2437_v0 }
 0xaba   : > { %v2447_v6 = vsel %vm728_vm0, %v2438_v10, -inf }
 0xabb   : > { %2448 = vmax.xlane.f32.xlu1 %v2447_v6 }
 0xabf   : > { %v2439_v35 = vpop.f32.mrf.mxu3 }
 0xac0   : > { %v2440_v62 = vadd.f32 %v5285_v14, %v2439_v35 }
 0xac2   : > { %v2450_v13 = vsel %vm728_vm0, %v2440_v62, -inf }
 0xac3   : > { %2451 = vmax.xlane.f32.xlu2 %v2450_v13  ;;  %v4205_v13 = vld [vmem:[%s5718_s7 + $0x30] sm:$0xff] }
 0xac7   : > { %v2442_v19 = vpop.f32.mrf.mxu3 }
 0xac8   : > { %v2443_v42 = vadd.f32 %v5285_v14, %v2442_v19 }
 0xaca   : > { %v2453_v45 = vsel %vm728_vm0, %v2443_v42, -inf }
 0xacb   : > { %2454 = vmax.xlane.f32.xlu0 %v2453_v45 }
 0xacf   : > { %v2444_v46 = vpop.f32.mrf.mxu3 }
 0xad0   : > { %v2445_v7 = vadd.f32 %v5285_v14, %v2444_v46 }
 0xad2   : > { %v2456_v56 = vsel %vm728_vm0, %v2445_v7, -inf }
 0xad3   : > { %2457 = vmax.xlane.f32.xlu1 %v2456_v56 }
 0xad7   : > { %v2632_v49 = vpop.f32.mrf.mxu3 }
 0xad8   : > { %v2633_v11 = vadd.f32 %v4388_v59, %v2632_v49 }
 0xadf   : > { %v2634_v27 = vpop.f32.mrf.mxu3 }
 0xae0   : > { %v2635_v53 = vadd.f32 %v4388_v59, %v2634_v27 }
 0xae2   : > { %v2685_v57 = vpack.c.bf16 %v2635_v53, %v2633_v11  ;;  %v2591_v11 = vpop.f32.mrf.mxu2 }
 0xae4   : > { %v2694_v52 = vsel %vm839_vm1, %v2685_v57, 0 }
 0xae7   : > { %v2637_v50 = vpop.f32.mrf.mxu3 }
 0xae8   : > { %v2638_v48 = vadd.f32 %v4388_v59, %v2637_v50 }
 0xaef   : > { %v2639_v51 = vpop.f32.mrf.mxu3 }
 0xaf0   : > { %v2640_v58 = vadd.f32 %v4388_v59, %v2639_v51 }
 0xaf2   : > { %v2686_v25 = vpack.c.bf16 %v2640_v58, %v2638_v48 }
 0xaf4   : > { %v2697_v54 = vsel %vm839_vm1, %v2686_v25, 0 }
 0xaf5   : > { %2705 = vmatpush.bf16.xpose.msrb.mxu1 %v2697_v54 }
 0xafd   : > { %2706 = vmatpush.bf16.xpose.msrb.mxu1 %v2694_v52 }
 0xb2e   : > { %v2449_v39 = vpop.xlane.xlu1 %2448 }
 0xb2f   : > { %v2459_v60 = vsub.f32 %v2438_v10, %v2449_v39  ;;  %v2593_v39 = vpop.f32.mrf.mxu2 }
 0xb31   : > { %v2463_v61 = vmul.f32 1.442695, %v2459_v60 }
 0xb33   : > { %4448 = vpow2.f32 %v2463_v61 }
 0xb36   : > { %v2452_v2 = vpop.xlane.xlu2 %2451 }
 0xb37   : > { %v2460_v3 = vsub.f32 %v2440_v62, %v2452_v2  ;;  %v4206_v62 = vld [vmem:[%s5718_s7 + $0x38] sm:$0xff] }
 0xb38   : > { %2670 = vmatpush.bf16.msra.mxu0 %v4206_v62 }
 0xb39   : > { %v4449_v12 = vpop.eup %4448  ;;  %v2465_v18 = vmul.f32 1.442695, %v2460_v3 }
 0xb3a   : > { %v2471_v20 = vsel %vm728_vm0, %v4449_v12, 0.0 }
 0xb3b   : > { %4450 = vpow2.f32 %v2465_v18  ;;  %2472 = vadd.xlane.f32.xlu2 %v2471_v20 }
 0xb3c   : > { %2671 = vmatpush.bf16.msra.mxu0 %v4205_v13 }
 0xb3e   : > { %v2455_v21 = vpop.xlane.xlu0 %2454 }
 0xb3f   : > { %v2461_v22 = vsub.f32 %v2443_v42, %v2455_v21 }
 0xb41   : > { %v4451_v23 = vpop.eup %4450  ;;  %v2467_v24 = vmul.f32 1.442695, %v2461_v22 }
 0xb42   : > { %v2474_v31 = vsel %vm728_vm0, %v4451_v23, 0.0 }
 0xb43   : > { %4452 = vpow2.f32 %v2467_v24  ;;  %2475 = vadd.xlane.f32.xlu0 %v2474_v31 }
 0xb46   : > { %v2458_v55 = vpop.xlane.xlu1 %2457 }
 0xb47   : > { %v2462_v34 = vsub.f32 %v2445_v7, %v2458_v55 }
 0xb49   : > { %v4453_v37 = vpop.eup %4452  ;;  %v2469_v38 = vmul.f32 1.442695, %v2462_v34 }
 0xb4a   : > { %v2477_v0 = vsel %vm728_vm0, %v4453_v37, 0.0 }
 0xb4b   : > { %4454 = vpow2.f32 %v2469_v38  ;;  %2478 = vadd.xlane.f32.xlu1 %v2477_v0 }
 0xb51   : > { %v4455_v10 = vpop.eup %4454 }
 0xb52   : > { %v2480_v6 = vsel %vm728_vm0, %v4455_v10, 0.0 }
 0xb53   : > { %2481 = vadd.xlane.f32.xlu2 %v2480_v6 }
 0xbae   : > { %v2473_v35 = vpop.xlane.xlu2 %2472 }
 0xbaf   : > { %4456 = vrcp.f32 %v2473_v35 }
 0xbb5   : > { %v4457_v42 = vpop.eup %4456 }
 0xbb6   : > { %v2476_v19 = vpop.xlane.xlu0 %2475  ;;  %v2487_v46 = vmul.f32 %v4457_v42, %v4449_v12 }
 0xbb7   : > { %4458 = vrcp.f32 %v2476_v19 }
 0xbbd   : > { %v4459_v45 = vpop.eup %4458 }
 0xbbe   : > { %v2488_v7 = vmul.f32 %v4459_v45, %v4451_v23  ;;  %v2479_v47 = vpop.xlane.xlu1 %2478  ;;  %v4389_v23 = vld [vmem:[%s5719_s8 + $0x3] ss:$0 sm:$0xff] }
 0xbbf   : > { %4460 = vrcp.f32 %v2479_v47 }
 0xbc0   : > { %v2491_v56 = vpack.c.bf16 %v2488_v7, %v2487_v46 }
 0xbc2   : > { %3934 = vmatmul.msk.bf16.vlgmr.msrb.gmra.mxu0 %vm728_vm0, %v2491_v56 }
 0xbc5   : > { %v4461_v27 = vpop.eup %4460 }
 0xbc6   : > { %v2482_v49 = vpop.xlane.xlu2 %2481  ;;  %v2489_v59 = vmul.f32 %v4461_v27, %v4453_v37 }
 0xbc7   : > { %4462 = vrcp.f32 %v2482_v49 }
 0xbcd   : > { %v4463_v50 = vpop.eup %4462 }
 0xbce   : > { %v2490_v51 = vmul.f32 %v4463_v50, %v4455_v10 }
 0xbd0   : > { %v2492_v48 = vpack.c.bf16 %v2490_v51, %v2489_v59 }
 0xbd2   : > { %3935 = vmatmul.msk.bf16.gmra.mxu0 %vm728_vm0, %v2492_v48 }
 0xbe2   : > { %3987 = vmatmul.msk.bf16.vlgmr.msra.gmra.mxu0 %vm728_vm0, %v5231_v32  ;;  %v4387_v32 = vld [vmem:[%s5761_s4 + $0x3] ss:$0 sm:$0xff] }
 0xbe3   : > { %v2594_v61 = vadd.f32 %v4387_v32, %v2593_v39  ;;  %v2592_v2 = vadd.f32 %v4387_v32, %v2591_v11 }
 0xbe5   : > { %v2683_v12 = vpack.c.bf16 %v2594_v61, %v2592_v2 }
 0xbf2   : > { %3988 = vmatmul.msk.bf16.gmra.mxu0 %vm728_vm0, %v5249_v44  ;;  %v2596_v44 = vpop.f32.mrf.mxu2 }
 0xbf3   : > { %v2597_v22 = vadd.f32 %v4387_v32, %v2596_v44 }
 0xbfa   : > { %v2598_v20 = vpop.f32.mrf.mxu2 }
 0xbfb   : > { %v2599_v21 = vadd.f32 %v4387_v32, %v2598_v20 }
 0xbfd   : > { %v2684_v31 = vpack.c.bf16 %v2599_v21, %v2597_v22 }
 0xc3f   : > { %v2510_v58 = vpop.f32.mrf.mxu0 }
 0xc47   : > { %v2512_v25 = vpop.f32.mrf.mxu0 }
 0xc48   : > { %v2520_v53 = vpack.c.bf16 %v2512_v25, %v2510_v58 }
 0xc4a   : > { %3942 = vmatmul.msk.bf16.vlgmr.msra.gmra.mxu1 %vm839_vm1, %v2520_v53 }
 0xc4f   : > { %v2515_v54 = vpop.f32.mrf.mxu0 }
 0xc57   : > { %v2517_v57 = vpop.f32.mrf.mxu0 }
 0xc58   : > { %v2521_v52 = vpack.c.bf16 %v2517_v57, %v2515_v54 }
 0xc5a   : > { %3943 = vmatmul.msk.bf16.gmra.mxu1 %vm839_vm1, %v2521_v52 }
 0xc5f   : > { %v2673_v60 = vpop.f32.mrf.mxu0 }
 0xc60   : > { %v2674_v0 = vadd.f32 %v4389_v23, %v2673_v60 }
 0xc67   : > { %v2675_v3 = vpop.f32.mrf.mxu0 }
 0xc68   : > { %v2676_v37 = vadd.f32 %v4389_v23, %v2675_v3 }
 0xc6a   : > { %3989 = vmatmul.msk.bf16.vlgmr.msrb.gmra.mxu1 %vm839_vm1, %v2683_v12  ;;  %v2764_v10 = vpack.c.bf16 %v2676_v37, %v2674_v0 }
 0xc6f   : > { %v2678_v18 = vpop.f32.mrf.mxu0 }
 0xc70   : > { %v2679_v55 = vadd.f32 %v4389_v23, %v2678_v18 }
 0xc77   : > { %v2680_v24 = vpop.f32.mrf.mxu0 }
 0xc78   : > { %v2681_v34 = vadd.f32 %v4389_v23, %v2680_v24  ;;  %v4207_v23 = vld [vmem:[%s5720_s9 + $0x18] sm:$0xff] }
 0xc79   : > { %2815 = vmatpush.bf16.msra.mxu3 %v4207_v23 }
 0xc7a   : > { %v2765_v38 = vpack.c.bf16 %v2681_v34, %v2679_v55  ;;  %3990 = vmatmul.msk.bf16.gmra.mxu1 %vm839_vm1, %v2684_v31 }
 0xc7c   : > { %2778 = vmatpush.bf16.msra.mxu2 %v2765_v38 }
 0xc80   : > { %2779 = vmatpush.bf16.msra.mxu2 %v2764_v10 }
 0xcc7   : > { %v5329_v6 = vpop.f32.mrf.mxu1 }
 0xccf   : > { %v5331_v35 = vpop.f32.mrf.mxu1 }
 0xcd7   : > { %v5333_v62 = vpop.f32.mrf.mxu1 }
 0xcdf   : > { %v5335_v13 = vpop.f32.mrf.mxu1 }
 0xce7   : > { %v2708_v19 = vpop.f32.mrf.mxu1 }
 0xce8   : > { %v2709_v42 = vadd.f32 %v5285_v14, %v2708_v19 }
 0xcea   : > { %v2718_v45 = vsel %vm728_vm0, %v2709_v42, -inf }
 0xceb   : > { %2719 = vmax.xlane.f32.xlu0 %v2718_v45 }
 0xcef   : > { %v2710_v46 = vpop.f32.mrf.mxu1 }
 0xcf0   : > { %v2711_v7 = vadd.f32 %v5285_v14, %v2710_v46 }
 0xcf2   : > { %v2721_v56 = vsel %vm728_vm0, %v2711_v7, -inf }
 0xcf3   : > { %2722 = vmax.xlane.f32.xlu1 %v2721_v56 }
 0xcf7   : > { %v2713_v47 = vpop.f32.mrf.mxu1 }
 0xcf8   : > { %v2714_v49 = vadd.f32 %v5285_v14, %v2713_v47 }
 0xcfa   : > { %v2724_v27 = vsel %vm728_vm0, %v2714_v49, -inf }
 0xcfb   : > { %2725 = vmax.xlane.f32.xlu2 %v2724_v27 }
 0xcff   : > { %v2715_v50 = vpop.f32.mrf.mxu1 }
 0xd00   : > { %v2716_v59 = vadd.f32 %v5285_v14, %v2715_v50 }
 0xd02   : > { %v2727_v51 = vsel %vm728_vm0, %v2716_v59, -inf }
 0xd03   : > { %2728 = vmax.xlane.f32.xlu0 %v2727_v51  ;;  %v4390_v51 = vld [vmem:[%s5721_s10 + $0x1] ss:$0 sm:$0xff] }
 0xd5e   : > { %v2720_v48 = vpop.xlane.xlu0 %2719 }
 0xd5f   : > { %v2730_v58 = vsub.f32 %v2709_v42, %v2720_v48  ;;  %v2556_v48 = vadd.f32 %v4390_v51, %v5329_v6 }
 0xd61   : > { %v2734_v25 = vmul.f32 1.442695, %v2730_v58 }
 0xd63   : > { %4464 = vpow2.f32 %v2734_v25 }
 0xd66   : > { %v2723_v53 = vpop.xlane.xlu1 %2722 }
 0xd67   : > { %v2731_v54 = vsub.f32 %v2711_v7, %v2723_v53 }
 0xd69   : > { %v4465_v11 = vpop.eup %4464  ;;  %v2736_v57 = vmul.f32 1.442695, %v2731_v54 }
 0xd6a   : > { %v2742_v52 = vsel %vm728_vm0, %v4465_v11, 0.0 }
 0xd6b   : > { %4466 = vpow2.f32 %v2736_v57  ;;  %2743 = vadd.xlane.f32.xlu1 %v2742_v52 }
 0xd6e   : > { %v2726_v39 = vpop.xlane.xlu2 %2725 }
 0xd6f   : > { %v2732_v60 = vsub.f32 %v2714_v49, %v2726_v39 }
 0xd71   : > { %v4467_v32 = vpop.eup %4466  ;;  %v2738_v61 = vmul.f32 1.442695, %v2732_v60 }
 0xd72   : > { %v2745_v14 = vsel %vm728_vm0, %v4467_v32, 0.0 }
 0xd73   : > { %4468 = vpow2.f32 %v2738_v61  ;;  %2746 = vadd.xlane.f32.xlu2 %v2745_v14 }
 0xd76   : > { %v2729_v2 = vpop.xlane.xlu0 %2728 }
 0xd77   : > { %v2733_v44 = vsub.f32 %v2716_v59, %v2729_v2  ;;  %v2559_v2 = vadd.f32 %v4390_v51, %v5335_v13 }
 0xd79   : > { %v4469_v3 = vpop.eup %4468  ;;  %v2740_v12 = vmul.f32 1.442695, %v2733_v44 }
 0xd7a   : > { %v2748_v18 = vsel %vm728_vm0, %v4469_v3, 0.0 }
 0xd7b   : > { %4470 = vpow2.f32 %v2740_v12  ;;  %2749 = vadd.xlane.f32.xlu0 %v2748_v18 }
 0xd81   : > { %v4471_v20 = vpop.eup %4470 }
 0xd82   : > { %v2751_v21 = vsel %vm728_vm0, %v4471_v20, 0.0 }
 0xd83   : > { %2752 = vadd.xlane.f32.xlu1 %v2751_v21 }
 0xdde   : > { %v2744_v22 = vpop.xlane.xlu1 %2743 }
 0xddf   : > { %4472 = vrcp.f32 %v2744_v22 }
 0xde5   : > { %v4473_v31 = vpop.eup %4472 }
 0xde6   : > { %v2747_v24 = vpop.xlane.xlu2 %2746  ;;  %v2758_v34 = vmul.f32 %v4473_v31, %v4465_v11  ;;  %v2557_v11 = vadd.f32 %v4390_v51, %v5331_v35 }
 0xde7   : > { %4474 = vrcp.f32 %v2747_v24 }
 0xded   : > { %v4475_v55 = vpop.eup %4474 }
 0xdee   : > { %v2759_v37 = vmul.f32 %v4475_v55, %v4467_v32  ;;  %v2750_v0 = vpop.xlane.xlu0 %2749  ;;  %v2558_v32 = vadd.f32 %v4390_v51, %v5333_v62 }
 0xdef   : > { %4476 = vrcp.f32 %v2750_v0 }
 0xdf0   : > { %v2762_v38 = vpack.c.bf16 %v2759_v37, %v2758_v34 }
 0xdf2   : > { %3991 = vmatmul.msk.bf16.vlgmr.msra.gmra.mxu2 %vm728_vm0, %v2762_v38 }
 0xdf5   : > { %v4477_v19 = vpop.eup %4476 }
 0xdf6   : > { %v2753_v10 = vpop.xlane.xlu1 %2752  ;;  %v2760_v45 = vmul.f32 %v4477_v19, %v4469_v3 }
 0xdf7   : > { %4478 = vrcp.f32 %v2753_v10 }
 0xdfd   : > { %v4479_v42 = vpop.eup %4478 }
 0xdfe   : > { %v2761_v46 = vmul.f32 %v4479_v42, %v4471_v20 }
 0xe00   : > { %v2763_v7 = vpack.c.bf16 %v2761_v46, %v2760_v45 }
 0xe02   : > { %3992 = vmatmul.msk.bf16.gmra.mxu2 %vm728_vm0, %v2763_v7 }
 0xe75   : > { %v2781_v56 = vpop.f32.mrf.mxu2 }
 0xe7d   : > { %v2783_v47 = vpop.f32.mrf.mxu2 }
 0xe7e   : > { %v2791_v49 = vpack.c.bf16 %v2783_v47, %v2781_v56 }
 0xe80   : > { %3999 = vmatmul.msk.bf16.vlgmr.msra.gmra.mxu3 %vm839_vm1, %v2791_v49 }
 0xe85   : > { %v2786_v27 = vpop.f32.mrf.mxu2 }
 0xe8d   : > { %v2788_v50 = vpop.f32.mrf.mxu2 }
 0xe8e   : > { %v2792_v59 = vpack.c.bf16 %v2788_v50, %v2786_v27 }
 0xe90   : > { %4000 = vmatmul.msk.bf16.gmra.mxu3 %vm839_vm1, %v2792_v59 }
 0xf03   : > { %v2817_v58 = vpop.f32.mrf.mxu3 }
 0xf04   : > { %v2827_v25 = vadd.f32 %v2817_v58, %v2556_v48 }
 0xf06   : > { %v2831_v53 = vadd.f32 %v2827_v25, %v5224_v28  ;;  %v4225_v25 = vld [vmem:[%s5724_s13 + $0x118] sm:$0xff] }
 0xf07   : > { %3363 = vmatpush.bf16.msrb.mxu2 %v4225_v25 }
 0xf08   : > { %v2839_v54 = vsel %vm728_vm0, %v2831_v53, 0.0 }
 0xf09   : > { %2840 = vadd.xlane.f32.xlu2 %v2839_v54 }
 0xf0b   : > { %v2819_v57 = vpop.f32.mrf.mxu3 }
 0xf0c   : > { %v2828_v52 = vadd.f32 %v2819_v57, %v2557_v11 }
 0xf0e   : > { %v2832_v39 = vadd.f32 %v2828_v52, %v5227_v29  ;;  %v4224_v52 = vld [vmem:[%s5724_s13 + $0x110] sm:$0xff] }
 0xf0f   : > { %3364 = vmatpush.bf16.msrb.mxu2 %v4224_v52 }
 0xf10   : > { %v2842_v60 = vsel %vm728_vm0, %v2832_v39, 0.0 }
 0xf11   : > { %2843 = vadd.xlane.f32.xlu1 %v2842_v60 }
 0xf13   : > { %v2822_v61 = vpop.f32.mrf.mxu3 }
 0xf14   : > { %v2829_v6 = vadd.f32 %v2822_v61, %v2558_v32 }
 0xf16   : > { %v2833_v14 = vadd.f32 %v2829_v6, %v5242_v8 }
 0xf18   : > { %v2845_v28 = vsel %vm728_vm0, %v2833_v14, 0.0 }
 0xf19   : > { %2846 = vadd.xlane.f32.xlu2 %v2845_v28 }
 0xf1b   : > { %v2824_v44 = vpop.f32.mrf.mxu3 }
 0xf1c   : > { %v2830_v35 = vadd.f32 %v2824_v44, %v2559_v2 }
 0xf1e   : > { %v2834_v3 = vadd.f32 %v2830_v35, %v5245_v43 }
 0xf20   : > { %v2848_v29 = vsel %vm728_vm0, %v2834_v3, 0.0 }
 0xf21   : > { %2849 = vadd.xlane.f32.xlu0 %v2848_v29 }
 0xf7c   : > { %v2841_v12 = vpop.xlane.xlu2 %2840 }
 0xf7d   : > { %v2851_v18 = vmul.f32 %v2841_v12, %v4805_v4 }
 0xf7f   : > { %v5372_v62 = vsub.f32 %v2831_v53, %v2851_v18  ;;  %v4391_v18 = vld [vmem:[%s5722_s11 + $0x1] ss:$0 sm:$0xff] }
 0xf81   : > { %v2859_v8 = vmul.f32 %v5372_v62, %v5372_v62 }
 0xf83   : > { %v2863_v20 = vsel %vm728_vm0, %v2859_v8, 0.0 }
 0xf84   : > { %v2844_v21 = vpop.xlane.xlu1 %2843  ;;  %2864 = vadd.xlane.f32.xlu0 %v2863_v20 }
 0xf85   : > { %v2852_v13 = vmul.f32 %v2844_v21, %v4805_v4 }
 0xf87   : > { %v2856_v22 = vsub.f32 %v2832_v39, %v2852_v13 }
 0xf89   : > { %v2860_v23 = vmul.f32 %v2856_v22, %v2856_v22 }
 0xf8b   : > { %v2866_v43 = vsel %vm728_vm0, %v2860_v23, 0.0 }
 0xf8c   : > { %2867 = vadd.xlane.f32.xlu2 %v2866_v43  ;;  %v2847_v24 = vpop.xlane.xlu2 %2846 }
 0xf8d   : > { %v2853_v31 = vmul.f32 %v2847_v24, %v4805_v4  ;;  %v4392_v24 = vld [vmem:[%s5723_s12 + $0x1] ss:$0 sm:$0xff] }
 0xf8f   : > { %v5380_v55 = vsub.f32 %v2833_v14, %v2853_v31 }
 0xf91   : > { %v2861_v34 = vmul.f32 %v5380_v55, %v5380_v55 }
 0xf93   : > { %v2869_v37 = vsel %vm728_vm0, %v2861_v34, 0.0 }
 0xf94   : > { %2870 = vadd.xlane.f32.xlu0 %v2869_v37  ;;  %v2850_v38 = vpop.xlane.xlu0 %2849 }
 0xf95   : > { %v2854_v0 = vmul.f32 %v2850_v38, %v4805_v4 }
 0xf97   : > { %v5386_v10 = vsub.f32 %v2834_v3, %v2854_v0 }
 0xf99   : > { %v2862_v19 = vmul.f32 %v5386_v10, %v5386_v10 }
 0xf9b   : > { %v2872_v42 = vsel %vm728_vm0, %v2862_v19, 0.0 }
 0xf9c   : > { %2873 = vadd.xlane.f32.xlu1 %v2872_v42 }
 0xff7   : > { %v2865_v45 = vpop.xlane.xlu0 %2864 }
 0xff8   : > { %v2875_v46 = vmul.f32 %v2865_v45, %v4805_v4 }
 0xffa   : > { %v2879_v7 = vadd.f32 1e-05, %v2875_v46 }
 0xffc   : > { %4480 = vrsqrt.f32 %v2879_v7  ;;  %vm2889_vm15 = vweird.f32 %v2879_v7 }
 0xfff   : > { %v2868_v56 = vpop.xlane.xlu2 %2867 }
0x1000   : > { %v2876_v47 = vmul.f32 %v2868_v56, %v4805_v4 }
0x1002   : > { %v4481_v49 = vpop.eup %4480  ;;  %v2880_v27 = vadd.f32 1e-05, %v2876_v47 }
0x1003   : > { %v2884_v50 = vmul.f32 %v4481_v49, %v2879_v7  ;;  %vm2890_vm1 = vweird.f32 %v4481_v49 }
0x1004   : > { %4482 = vrsqrt.f32 %v2880_v27  ;;  %vm2891_vm8 = vmor %vm2889_vm15, %vm2890_vm1  ;;  %vm2899_vm11 = vweird.f32 %v2880_v27 }
0x1005   : > { %v2885_v59 = vmul.f32 %v4481_v49, %v2884_v50 }
0x1007   : > { %v2886_v51 = vmul.f32 0.5, %v2885_v59  ;;  %v2871_v48 = vpop.xlane.xlu0 %2870 }
0x1008   : > { %v2877_v58 = vmul.f32 %v2871_v48, %v4805_v4 }
0x1009   : > { %v2887_v11 = vsub.f32 1.5, %v2886_v51 }
0x100a   : > { %v4483_v53 = vpop.eup %4482  ;;  %v2881_v54 = vadd.f32 1e-05, %v2877_v58 }
0x100b   : > { %v2894_v57 = vmul.f32 %v4483_v53, %v2880_v27  ;;  %v2888_v60 = vmul.f32 %v4481_v49, %v2887_v11  ;;  %vm2900_vm14 = vweird.f32 %v4483_v53 }
0x100c   : > { %4484 = vrsqrt.f32 %v2881_v54  ;;  %vm2901_vm13 = vmor %vm2899_vm11, %vm2900_vm14  ;;  %vm2909_vm15 = vweird.f32 %v2881_v54 }
0x100d   : > { %v2895_v39 = vmul.f32 %v4483_v53, %v2894_v57  ;;  %v2892_v44 = vsel %vm2891_vm8, %v4481_v49, %v2888_v60 }
0x100e   : > { %v2923_v8 = vmul.f32 %v2892_v44, %v5372_v62 }
0x100f   : > { %v2896_v32 = vmul.f32 0.5, %v2895_v39  ;;  %v2874_v61 = vpop.xlane.xlu1 %2873 }
0x1010   : > { %v2878_v6 = vmul.f32 %v2874_v61, %v4805_v4  ;;  %v2930_v31 = vmul.f32 %v4391_v18, %v2923_v8 }
0x1011   : > { %v2897_v14 = vsub.f32 1.5, %v2896_v32 }
0x1012   : > { %v4485_v28 = vpop.eup %4484  ;;  %v2882_v2 = vadd.f32 1e-05, %v2878_v6  ;;  %v2937_v42 = vadd.f32 %v4392_v24, %v2930_v31 }
0x1013   : > { %v2898_v35 = vmul.f32 %v4483_v53, %v2897_v14  ;;  %v2904_v3 = vmul.f32 %v4485_v28, %v2881_v54  ;;  %vm2910_vm1 = vweird.f32 %v4485_v28 }
0x1014   : > { %4486 = vrsqrt.f32 %v2882_v2  ;;  %vm2911_vm14 = vmor %vm2909_vm15, %vm2910_vm1  ;;  %v5413_v56 = vmul.f32 %v2937_v42, %v4863_v1  ;;  %vm2919_vm11 = vweird.f32 %v2882_v2  ;;  %vm5773_vm1 = vcmp.lt.s32.totalorder %v5020_v41, 32  ;;  %v4215_v41 = vld [vmem:[%s5724_s13 + $0xc8] sm:$0xff] }
0x1015   : > { %v2902_v29 = vsel %vm2901_vm13, %v4483_v53, %v2898_v35  ;;  %v2905_v12 = vmul.f32 %v4485_v28, %v2904_v3  ;;  %3319 = vmatpush.bf16.msrb.mxu0 %v4215_v41 }
0x1016   : > { %v2924_v20 = vmul.f32 %v2902_v29, %v2856_v22  ;;  %v2945_v51 = vrot.slane %v5413_v56, 4  ;;  %v2981_v39 = vrot.slane %v5413_v56, 7  ;;  %v2969_v60 = vrot.slane %v5413_v56, 6 }
0x1017   : > { %v2906_v21 = vmul.f32 0.5, %v2905_v12  ;;  %v2957_v14 = vrot.slane %v5413_v56, 5 }
0x1018   : > { %v2931_v13 = vmul.f32 %v4391_v18, %v2924_v20 }
0x1019   : > { %v2907_v23 = vsub.f32 1.5, %v2906_v21 }
0x101a   : > { %v4487_v43 = vpop.eup %4486  ;;  %v2938_v38 = vadd.f32 %v4392_v24, %v2931_v13 }
0x101b   : > { %v2908_v34 = vmul.f32 %v4485_v28, %v2907_v23  ;;  %v2914_v37 = vmul.f32 %v4487_v43, %v2882_v2  ;;  %vm2920_vm8 = vweird.f32 %v4487_v43 }
0x101c   : > { %v5410_v45 = vmul.f32 %v2938_v38, %v4849_v16  ;;  %vm2921_vm13 = vmor %vm2919_vm11, %vm2920_vm8  ;;  %vm5777_vm8 = vcmask 523264  }
0x101d   : > { %v2912_v0 = vsel %vm2911_vm14, %v4485_v28, %v2908_v34  ;;  %v2915_v19 = vmul.f32 %v4487_v43, %v2914_v37  ;;  %vm5775_vm14 = vcmp.lt.s32.totalorder %v4913_v36, 32  ;;  %v4213_v36 = vld [vmem:[%s5724_s13 + $0xb8] sm:$0xff]  ;;  %vm5778_vm11 = vmmov %vm5777_vm8 }
0x101e   : > { %v2925_v62 = vmul.f32 %v2912_v0, %v5380_v55  ;;  %v2946_v50 = vrot.slane %v5410_v45, 4  ;;  %v2970_v52 = vrot.slane %v5410_v45, 6  ;;  %v2958_v32 = vrot.slane %v5410_v45, 5 }
0x101f   : > { %v2916_v22 = vmul.f32 0.5, %v2915_v19  ;;  %v3022_v33 = vrot.slane %v5410_v45, 3  ;;  %v3010_v34 = vrot.slane %v5410_v45, 2  ;;  %v2998_v0 = vrot.slane %v5410_v45, 1 }
0x1020   : > { %v2932_v46 = vmul.f32 %v4391_v18, %v2925_v62  ;;  %v5428_v53 = vsel %vm1450_vm2, %v2945_v51, %v2946_v50  ;;  %v2975_v3 = vsel %vm1524_vm4, %v2969_v60, %v2970_v52  ;;  %v2963_v20 = vsel %vm1487_vm3, %v2957_v14, %v2958_v32 }
0x1021   : > { %v2917_v7 = vsub.f32 1.5, %v2916_v22  ;;  %v3021_v19 = vrot.slane %v5413_v56, 3  ;;  %v3009_v62 = vrot.slane %v5413_v56, 2 }
0x1022   : > { %v2939_v47 = vadd.f32 %v4392_v24, %v2932_v46  ;;  %v2997_v46 = vrot.slane %v5413_v56, 1 }
0x1023   : > { %v2918_v49 = vmul.f32 %v4487_v43, %v2917_v7 }
0x1024   : > { %v5416_v27 = vmul.f32 %v2939_v47, %v4861_v63  ;;  %v3027_v47 = vsel %vm1696_vm12, %v3021_v19, %v3022_v33 }
0x1025   : > { %v2922_v55 = vsel %vm2921_vm13, %v4487_v43, %v2918_v49  ;;  %vm5779_vm13 = vcmask 785408  }
0x1026   : > { %v2926_v59 = vmul.f32 %v2922_v55, %v5386_v10  ;;  %v2947_v48 = vrot.slane %v5416_v27, 4  ;;  %v2982_v10 = vrot.slane %v5410_v45, 7  ;;  %v3023_v31 = vrot.slane %v5416_v27, 3 }
0x1027   : > { %v3011_v15 = vrot.slane %v5416_v27, 2  ;;  %v2999_v30 = vrot.slane %v5416_v27, 1 }
0x1028   : > { %v2933_v58 = vmul.f32 %v4391_v18, %v2926_v59  ;;  %v5424_v25 = vsel %vm1450_vm2, %v2946_v50, %v2947_v48  ;;  %v2987_v2 = vsel %vm1561_vm6, %v2981_v39, %v2982_v10  ;;  %v3026_v42 = vsel %vm1696_vm12, %v3022_v33, %v3023_v31 }
0x1029   : > { %v3159_v54 = vpack.c.bf16 %v5424_v25, %v5428_v53  ;;  %v4335_v50 = vpack.i.bf16 %v3026_v42, %v3027_v47  ;;  %v4219_v42 = vld [vmem:[%s5724_s13 + $0xe8] sm:$0xff] }
0x102a   : > { %v2940_v11 = vadd.f32 %v4392_v24, %v2933_v58  ;;  %v2971_v58 = vrot.slane %v5416_v27, 6 }
0x102b   : > { %4112 = vmatmul.msk.bf16.vlgmr.msrb.gmra.mxu2 %vm728_vm0, %v3159_v54  ;;  %v2959_v54 = vrot.slane %v5416_v27, 5 }
0x102c   : > { %v5435_v57 = vmul.f32 %v2940_v11, %v4905_v9 }
0x102e   : > { %v2984_v61 = vrot.slane %v5435_v57, 7  ;;  %v2972_v6 = vrot.slane %v5435_v57, 6  ;;  %v2960_v28 = vrot.slane %v5435_v57, 5  ;;  %v2948_v44 = vrot.slane %v5435_v57, 4 }
0x1030   : > { %v2988_v35 = vsel %vm1561_vm6, %v2984_v61, %v2981_v39  ;;  %v2976_v29 = vsel %vm1524_vm4, %v2972_v6, %v2969_v60  ;;  %v2964_v12 = vsel %vm1487_vm3, %v2960_v28, %v2957_v14  ;;  %v5466_v24 = vsel %vm1450_vm2, %v2948_v44, %v2945_v51 }
0x1031   : > { %v2989_v18 = vsel %vm1570_vm10, %v2988_v35, 0.0  ;;  %v2977_v8 = vsel %vm1533_vm5, %v2976_v29, 0.0  ;;  %v2965_v21 = vsel %vm1496_vm7, %v2964_v12, 0.0  ;;  %v5478_v37 = vsel %vm1450_vm2, %v2947_v48, %v2948_v44 }
0x1032   : > { %v4325_v13 = vpack.i.bf16 %v2987_v2, %v2989_v18  ;;  %v4320_v23 = vpack.i.bf16 %v2975_v3, %v2977_v8  ;;  %v4310_v43 = vpack.i.bf16 %v2963_v20, %v2965_v21  ;;  %v3036_v38 = vsel %vm1740_vm9, %v5466_v24, 0.0 }
0x1033   : > { %vm5765_vm5 = vcmp.lt.s32.totalorder %v4856_v5, 6  ;;  %vm5766_vm2 = vcmp.lt.s32.totalorder %v4856_v5, 7  ;;  %v3162_v40 = vpack.c.bf16 %v3036_v38, %v5478_v37  ;;  %v2983_v48 = vrot.slane %v5416_v27, 7  ;;  %v4214_v5 = vld [vmem:[%s5724_s13 + $0xc0] sm:$0xff] }
0x1034   : > { %4326 = vrot.lane.b32.xlu0 %v4325_v13, %s4509_s22  ;;  %4321 = vrot.lane.b32.xlu2 %v4320_v23, %s5763_s29  ;;  %v3014_v22 = vsel %vm5765_vm5, %v3010_v34, %v3011_v15  ;;  %v3002_v7 = vsel %vm5766_vm2, %v2998_v0, %v2999_v30  ;;  %vm5767_vm7 = vmmov %vm5765_vm5  ;;  %v2973_v39 = vsel %vm1524_vm4, %v2971_v58, %v2972_v6  ;;  %v3024_v14 = vrot.slane %v5435_v57, 3  ;;  %v4210_v38 = vld [vmem:[%s5724_s13 + $0xa0] sm:$0xff] }
0x1035   : > { %4311 = vrot.lane.b32.xlu1 %v4310_v43, %s5764_s21  ;;  %v3015_v49 = vsel %vm5767_vm7, %v3009_v62, %v3010_v34  ;;  %vm5768_vm9 = vmmov %vm5766_vm2  ;;  %v2985_v11 = vsel %vm1561_vm6, %v2983_v48, %v2984_v61  ;;  %v2961_v60 = vsel %vm1487_vm3, %v2959_v54, %v2960_v28  ;;  %v3012_v2 = vrot.slane %v5435_v57, 2  ;;  %3320 = vmatpush.bf16.msrb.mxu0 %v4214_v5  ;;  %v4221_v34 = vld [vmem:[%s5724_s13 + $0xf8] sm:$0xff] }
0x1036   : > { %v4330_v55 = vpack.i.bf16 %v3014_v22, %v3015_v49  ;;  %v3003_v59 = vsel %vm5768_vm9, %v2997_v46, %v2998_v0  ;;  %v2986_v44 = vsel %vm1561_vm6, %v2982_v10, %v2983_v48  ;;  %v2974_v35 = vsel %vm1524_vm4, %v2970_v52, %v2971_v58  ;;  %vm5769_vm6 = vmmov %vm5765_vm5  ;;  %v4220_v0 = vld [vmem:[%s5724_s13 + $0xf0] sm:$0xff]  ;;  %v4218_v22 = vld [vmem:[%s5724_s13 + $0xe0] sm:$0xff] }
0x1037   : > { %v4315_v51 = vpack.i.bf16 %v3002_v7, %v3003_v59  ;;  %v3000_v3 = vrot.slane %v5435_v57, 1  ;;  %v4350_v29 = vpack.i.bf16 %v2985_v11, %v2986_v44  ;;  %v4345_v61 = vpack.i.bf16 %v2973_v39, %v2974_v35  ;;  %vm5770_vm4 = vmmov %vm5766_vm2  ;;  %v4216_v7 = vld [vmem:[%s5724_s13 + $0xd0] sm:$0xff] }
0x1038   : > { %v2962_v6 = vsel %vm1487_vm3, %v2958_v32, %v2959_v54  ;;  %v3028_v28 = vsel %vm1696_vm12, %v3024_v14, %v3021_v19  ;;  %v3016_v10 = vsel %vm5769_vm6, %v3012_v2, %v3009_v62  ;;  %v3025_v18 = vsel %vm1696_vm12, %v3023_v31, %v3024_v14  ;;  %vm5772_vm10 = vmmov %vm5765_vm5  ;;  %v4212_v31 = vld [vmem:[%s5724_s13 + $0xb0] sm:$0xff]  ;;  %v4209_v19 = vld [vmem:[%s5724_s13 + $0x98] sm:$0xff] }
0x1039   : > { %v4340_v12 = vpack.i.bf16 %v2961_v60, %v2962_v6  ;;  %v3004_v52 = vsel %vm5770_vm4, %v3000_v3, %v2997_v46  ;;  %vm5771_vm3 = vcmp.lt.s32.totalorder %v5040_v17, 32  ;;  %v3013_v8 = vsel %vm5772_vm10, %v3011_v15, %v3012_v2  ;;  %vm5774_vm15 = vmmov %vm5766_vm2  ;;  %v4223_v17 = vld [vmem:[%s5724_s13 + $0x108] sm:$0xff]  ;;  %3321 = vmatpush.bf16.msrb.mxu0 %v4213_v36  ;;  %v4222_v15 = vld [vmem:[%s5724_s13 + $0x100] sm:$0xff] }
0x103a   : > { %v3032_v32 = vsel %vm5771_vm3, %v3028_v28, 0.0  ;;  %v3020_v20 = vsel %vm5773_vm1, %v3016_v10, 0.0  ;;  %v3001_v21 = vsel %vm5774_vm15, %v2999_v30, %v3000_v3  ;;  %v3008_v13 = vsel %vm5775_vm14, %v3004_v52, 0.0  ;;  %3338 = vmatpush.bf16.msra.mxu1 %v4223_v17  ;;  %v4211_v30 = vld [vmem:[%s5724_s13 + $0xa8] sm:$0xff]  ;;  %v4208_v62 = vld [vmem:[%s5724_s13 + $0x90] sm:$0xff]  ;;  %v4217_v46 = vld [vmem:[%s5724_s13 + $0xd8] sm:$0xff] }
0x103b   : > { %4113 = vmatmul.msk.bf16.gmra.mxu2 %vm728_vm0, %v3162_v40  ;;  %v4365_v23 = vpack.i.bf16 %v3032_v32, %v3025_v18  ;;  %v4360_v43 = vpack.i.bf16 %v3020_v20, %v3013_v8  ;;  %v4355_v33 = vpack.i.bf16 %v3008_v13, %v3001_v21  ;;  %vm5776_vm12 = vcmp.ge.s32.totalorder %v5103_v26, 0  ;;  %vm5780_vm5 = vmmov %vm5779_vm13 }
0x103c   : > { %4336 = vrot.lane.b32.xlu2 %v4335_v50, %s4509_s22  ;;  %4331 = vrot.lane.b32.xlu0 %v4330_v55, %s5763_s29  ;;  %v2953_v48 = vsel %vm5776_vm12, %v5466_v24, 0.0  ;;  %vm5781_vm2 = vmmov %vm5777_vm8 }
0x103d   : > { %4316 = vrot.lane.b32.xlu1 %v4315_v51, %s5764_s21  ;;  %3322 = vmatpush.bf16.msrb.mxu0 %v4212_v31  ;;  %vm5782_vm7 = vmmov %vm5781_vm2 }
0x103e   : > { %3339 = vmatpush.bf16.msra.mxu1 %v4222_v15  ;;  %vm5783_vm9 = vmmov %vm5780_vm5 }
0x103f   : > { %vm5784_vm6 = vmmov %vm5780_vm5 }
0x1040   : > { %vm5785_vm4 = vmmov %vm5781_vm2 }
0x1041   : > { %3323 = vmatpush.bf16.msrb.mxu0 %v4211_v30  ;;  %vm5786_vm3 = vmmov %vm5781_vm2 }
0x1042   : > { %3340 = vmatpush.bf16.msra.mxu1 %v4221_v34  ;;  %vm5787_vm10 = vmmov %vm5780_vm5 }
0x1043   : > { %vm5788_vm1 = vmmov %vm5780_vm5 }
0x1044   : > { %4351 = vrot.lane.b32.xlu2 %v4350_v29, %s4509_s22  ;;  %4346 = vrot.lane.b32.xlu0 %v4345_v61, %s5763_s29  ;;  %vm5789_vm15 = vmmov %vm5781_vm2 }
0x1045   : > { %4341 = vrot.lane.b32.xlu1 %v4340_v12, %s5764_s21  ;;  %3324 = vmatpush.bf16.msrb.mxu0 %v4210_v38  ;;  %vm5790_vm14 = vmmov %vm5781_vm2 }
0x1046   : > { %3341 = vmatpush.bf16.msra.mxu1 %v4220_v0  ;;  %vm5791_vm12 = vmmov %vm5788_vm1 }
0x1049   : > { %3325 = vmatpush.bf16.msrb.mxu0 %v4209_v19 }
0x104a   : > { %3342 = vmatpush.bf16.msra.mxu1 %v4219_v42 }
0x104c   : > { %4366 = vrot.lane.b32.xlu2 %v4365_v23, %s4509_s22  ;;  %4361 = vrot.lane.b32.xlu0 %v4360_v43, %s5763_s29 }
0x104d   : > { %4356 = vrot.lane.b32.xlu1 %v4355_v33, %s5764_s21  ;;  %3326 = vmatpush.bf16.msrb.mxu0 %v4208_v62 }
0x104e   : > { %3343 = vmatpush.bf16.msra.mxu1 %v4218_v22 }
0x1052   : > { %3344 = vmatpush.bf16.msra.mxu1 %v4217_v46 }
0x1056   : > { %3345 = vmatpush.bf16.msra.mxu1 %v4216_v7 }
0x108e   : > { %v4322_v40 = vpop.permute.xlu2 %4321 }
0x108f   : > { %v4324_v59 = vunpack.i.h.bf16 %v4322_v40  ;;  %v4323_v51 = vunpack.i.l.bf16 %v4322_v40 }
0x1096   : > { %v4337_v60 = vpop.permute.xlu2 %4336 }
0x1097   : > { %v4338_v28 = vunpack.i.l.bf16 %v4337_v60 }
0x109e   : > { %v4352_v21 = vpop.permute.xlu2 %4351 }
0x109f   : > { %v4354_v17 = vunpack.i.h.bf16 %v4352_v21  ;;  %v4353_v31 = vunpack.i.l.bf16 %v4352_v21 }
0x10a6   : > { %v4327_v47 = vpop.permute.xlu0 %4326  ;;  %v4367_v22 = vpop.permute.xlu2 %4366 }
0x10a7   : > { %v4312_v49 = vpop.permute.xlu1 %4311  ;;  %v4329_v11 = vunpack.i.h.bf16 %v4327_v47  ;;  %v4328_v39 = vunpack.i.l.bf16 %v4327_v47 }
0x10a8   : > { %v4314_v50 = vunpack.i.h.bf16 %v4312_v49  ;;  %v4313_v55 = vunpack.i.l.bf16 %v4312_v49  ;;  %v4369_v49 = vunpack.i.h.bf16 %v4367_v22 }
0x10aa   : > { %v3133_v58 = vsel %vm728_vm0, %v2953_v48, %v4313_v55  ;;  %v3134_v54 = vsel %vm728_vm0, %v5428_v53, %v4314_v50  ;;  %v4339_v53 = vunpack.i.h.bf16 %v4337_v60  ;;  %v4368_v50 = vunpack.i.l.bf16 %v4367_v22  ;;  %v4227_v60 = vld [vmem:[%s5726_s15 + $0x28] sm:$0xff] }
0x10ab   : > { %v3137_v14 = vsel %vm5777_vm8, %v3133_v58, %v4323_v51  ;;  %v3138_v2 = vsel %vm5778_vm11, %v3134_v54, %v4324_v59  ;;  %vm5792_vm8 = vmmov %vm5788_vm1 }
0x10ac   : > { %v3142_v44 = vsel %vm5779_vm13, %v3138_v2, %v4329_v11  ;;  %v3141_v35 = vsel %vm5780_vm5, %v3137_v14, %v4328_v39  ;;  %v4229_v11 = vld [vmem:[%s5726_s15 + $0x38] sm:$0xff]  ;;  %v4228_v39 = vld [vmem:[%s5726_s15 + $0x30] sm:$0xff]  ;;  %v4226_v14 = vld [vmem:[%s5726_s15 + $0x20] sm:$0xff] }
0x10ad   : > { %v3157_v3 = vpack.c.bf16 %v3142_v44, %v3141_v35  ;;  %3430 = vmatpush.bf16.msrb.mxu3 %v4229_v11  ;;  %v4393_v35 = vld [vmem:[%s5725_s14 + $0x1] ss:$0 sm:$0xff]  ;;  %vm5793_vm11 = vmmov %vm5781_vm2 }
0x10ae   : > { %v4332_v29 = vpop.permute.xlu0 %4331  ;;  %v3366_v44 = vpop.f32.mrf.mxu2  ;;  %vm5794_vm13 = vmmov %vm5781_vm2 }
0x10af   : > { %v4317_v26 = vpop.permute.xlu1 %4316  ;;  %v4334_v24 = vunpack.i.h.bf16 %v4332_v29  ;;  %v4333_v61 = vunpack.i.l.bf16 %v4332_v29  ;;  %3327 = vmatmul.bf16.vlgmr.msrb.gmra.mxu0 %v3157_v3 }
0x10b0   : > { %v4319_v6 = vunpack.i.h.bf16 %v4317_v26  ;;  %v4318_v12 = vunpack.i.l.bf16 %v4317_v26 }
0x10b1   : > { %3431 = vmatpush.bf16.msrb.mxu3 %v4228_v39 }
0x10b2   : > { %v3146_v10 = vsel %vm728_vm0, %v5410_v45, %v4319_v6  ;;  %v3145_v52 = vsel %vm728_vm0, %v5413_v56, %v4318_v12 }
0x10b3   : > { %v3150_v18 = vsel %vm5781_vm2, %v3146_v10, %v4334_v24  ;;  %v3149_v32 = vsel %vm5782_vm7, %v3145_v52, %v4333_v61 }
0x10b4   : > { %v3154_v8 = vsel %vm5783_vm9, %v3150_v18, %v4339_v53  ;;  %v3153_v20 = vsel %vm5784_vm6, %v3149_v32, %v4338_v28 }
0x10b5   : > { %v3158_v13 = vpack.c.bf16 %v3154_v8, %v3153_v20  ;;  %3432 = vmatpush.bf16.msrb.mxu3 %v4227_v60 }
0x10b6   : > { %v4347_v23 = vpop.permute.xlu0 %4346  ;;  %v3368_v61 = vpop.f32.mrf.mxu2 }
0x10b7   : > { %v4342_v43 = vpop.permute.xlu1 %4341  ;;  %v4349_v33 = vunpack.i.h.bf16 %v4347_v23  ;;  %v4348_v41 = vunpack.i.l.bf16 %v4347_v23  ;;  %3346 = vmatmul.bf16.vlgmr.msra.gmra.mxu1 %v3158_v13 }
0x10b8   : > { %v4344_v5 = vunpack.i.h.bf16 %v4342_v43  ;;  %v4343_v36 = vunpack.i.l.bf16 %v4342_v43 }
0x10b9   : > { %3433 = vmatpush.bf16.msrb.mxu3 %v4226_v14 }
0x10ba   : > { %v3135_v15 = vsel %vm728_vm0, %v5424_v25, %v4343_v36  ;;  %v3136_v30 = vsel %vm728_vm0, %v5478_v37, %v4344_v5 }
0x10bb   : > { %v3140_v34 = vsel %vm5785_vm4, %v3136_v30, %v4349_v33  ;;  %v3139_v38 = vsel %vm5786_vm3, %v3135_v15, %v4348_v41 }
0x10bc   : > { %v3143_v0 = vsel %vm5787_vm10, %v3139_v38, %v4353_v31  ;;  %v3144_v19 = vsel %vm5788_vm1, %v3140_v34, %v4354_v17  ;;  %v4394_v38 = vld [vmem:[%s5727_s16 + $0x1] ss:$0 sm:$0xff] }
0x10bd   : > { %v3160_v42 = vpack.c.bf16 %v3144_v19, %v3143_v0 }
0x10be   : > { %v4362_v62 = vpop.permute.xlu0 %4361  ;;  %v3371_v20 = vpop.f32.mrf.mxu2 }
0x10bf   : > { %v4357_v46 = vpop.permute.xlu1 %4356  ;;  %v4364_v7 = vunpack.i.h.bf16 %v4362_v62  ;;  %v4363_v40 = vunpack.i.l.bf16 %v4362_v62  ;;  %3332 = vmatmul.bf16.gmra.mxu0 %v3160_v42 }
0x10c0   : > { %v4359_v47 = vunpack.i.h.bf16 %v4357_v46  ;;  %v4358_v25 = vunpack.i.l.bf16 %v4357_v46 }
0x10c2   : > { %v3148_v37 = vsel %vm728_vm0, %v5435_v57, %v4359_v47  ;;  %v3147_v55 = vsel %vm728_vm0, %v5416_v27, %v4358_v25 }
0x10c3   : > { %v3152_v59 = vsel %vm5789_vm15, %v3148_v37, %v4364_v7  ;;  %v3151_v51 = vsel %vm5790_vm14, %v3147_v55, %v4363_v40 }
0x10c4   : > { %v3155_v48 = vsel %vm5791_vm12, %v3151_v51, %v4368_v50  ;;  %v3156_v58 = vsel %vm5792_vm8, %v3152_v59, %v4369_v49 }
0x10c5   : > { %v3161_v54 = vpack.c.bf16 %v3156_v58, %v3155_v48 }
0x10c6   : > { %v3373_v17 = vpop.f32.mrf.mxu2 }
0x10c7   : > { %3351 = vmatmul.bf16.gmra.mxu1 %v3161_v54 }
0x112c   : > { %v3328_v2 = vpop.f32.mrf.mxu0 }
0x112d   : > { %v3329_v26 = vadd.f32 %v4393_v35, %v3328_v2 }
0x1134   : > { %v3330_v3 = vpop.f32.mrf.mxu0  ;;  %v3347_v29 = vpop.f32.mrf.mxu1 }
0x1135   : > { %v3348_v24 = vadd.f32 %v3347_v29, %v3329_v26  ;;  %v3331_v6 = vadd.f32 %v4393_v35, %v3330_v3 }
0x1137   : > { %v3367_v53 = vadd.f32 %v3366_v44, %v3348_v24 }
0x1139   : > { %v3376_v18 = vmax.f32 %v3367_v53, 0.0 }
0x113c   : > { %v3349_v12 = vpop.f32.mrf.mxu1  ;;  %v3333_v10 = vpop.f32.mrf.mxu0 }
0x113d   : > { %v3350_v28 = vadd.f32 %v3349_v12, %v3331_v6  ;;  %v3334_v13 = vadd.f32 %v4393_v35, %v3333_v10  ;;  %v4231_v10 = vld [vmem:[%s5730_s19 + $0x8] sm:$0xff] }
0x113e   : > { %3593 = vmatpush.bf16.msra.mxu0 %v4231_v10 }
0x113f   : > { %v3369_v52 = vadd.f32 %v3368_v61, %v3350_v28 }
0x1141   : > { %v3377_v32 = vmax.f32 %v3369_v52, 0.0 }
0x1143   : > { %v3380_v8 = vpack.c.bf16 %v3377_v32, %v3376_v18  ;;  %v4230_v32 = vld [vmem:[%s5730_s19] sm:$0xff] }
0x1144   : > { %v3352_v21 = vpop.f32.mrf.mxu1  ;;  %v3335_v23 = vpop.f32.mrf.mxu0  ;;  %3594 = vmatpush.bf16.msra.mxu0 %v4230_v32 }
0x1145   : > { %4139 = vmatmul.msk.bf16.vlgmr.msrb.gmra.mxu3 %vm5793_vm11, %v3380_v8  ;;  %v3353_v43 = vadd.f32 %v3352_v21, %v3334_v13  ;;  %v3336_v33 = vadd.f32 %v4393_v35, %v3335_v23 }
0x1147   : > { %v3372_v5 = vadd.f32 %v3371_v20, %v3353_v43 }
0x1149   : > { %v3378_v15 = vmax.f32 %v3372_v5, 0.0 }
0x114c   : > { %v3354_v41 = vpop.f32.mrf.mxu1 }
0x114d   : > { %v3355_v36 = vadd.f32 %v3354_v41, %v3336_v33 }
0x114f   : > { %v3374_v31 = vadd.f32 %v3373_v17, %v3355_v36 }
0x1151   : > { %v3379_v30 = vmax.f32 %v3374_v31, 0.0 }
0x1153   : > { %v3381_v34 = vpack.c.bf16 %v3379_v30, %v3378_v15 }
0x1155   : > { %4140 = vmatmul.msk.bf16.gmra.mxu3 %vm5794_vm13, %v3381_v34 }
0x11c8   : > { %v3435_v0 = vpop.f32.mrf.mxu3 }
0x11c9   : > { %v3436_v19 = vadd.f32 %v4394_v38, %v3435_v0  ;;  %v4395_v0 = vld [vmem:[%s5728_s17 + $0x1] ss:$0 sm:$0xff] }
0x11cb   : > { %v3445_v42 = vadd.f32 %v3436_v19, %v5413_v56 }
0x11cd   : > { %v3453_v62 = vsel %vm728_vm0, %v3445_v42, 0.0 }
0x11ce   : > { %3454 = vadd.xlane.f32.xlu1 %v3453_v62 }
0x11d0   : > { %v3437_v22 = vpop.f32.mrf.mxu3 }
0x11d1   : > { %v3438_v46 = vadd.f32 %v4394_v38, %v3437_v22 }
0x11d3   : > { %v3446_v7 = vadd.f32 %v3438_v46, %v5410_v45 }
0x11d5   : > { %v3456_v40 = vsel %vm728_vm0, %v3446_v7, 0.0 }
0x11d6   : > { %3457 = vadd.xlane.f32.xlu0 %v3456_v40 }
0x11d8   : > { %v3440_v47 = vpop.f32.mrf.mxu3 }
0x11d9   : > { %v3441_v25 = vadd.f32 %v4394_v38, %v3440_v47  ;;  %v4396_v47 = vld [vmem:[%s5729_s18 + $0x1] ss:$0 sm:$0xff] }
0x11db   : > { %v3447_v49 = vadd.f32 %v3441_v25, %v5416_v27 }
0x11dd   : > { %v3459_v50 = vsel %vm728_vm0, %v3447_v49, 0.0 }
0x11de   : > { %3460 = vadd.xlane.f32.xlu2 %v3459_v50 }
0x11e0   : > { %v3442_v37 = vpop.f32.mrf.mxu3 }
0x11e1   : > { %v3443_v55 = vadd.f32 %v4394_v38, %v3442_v37 }
0x11e3   : > { %v3448_v56 = vadd.f32 %v3443_v55, %v5435_v57 }
0x11e5   : > { %v3462_v59 = vsel %vm728_vm0, %v3448_v56, 0.0 }
0x11e6   : > { %3463 = vadd.xlane.f32.xlu1 %v3462_v59 }
0x1241   : > { %v3455_v51 = vpop.xlane.xlu1 %3454 }
0x1242   : > { %v3465_v45 = vmul.f32 %v3455_v51, %v4805_v4 }
0x1244   : > { %v3469_v48 = vsub.f32 %v3445_v42, %v3465_v45 }
0x1246   : > { %v3473_v58 = vmul.f32 %v3469_v48, %v3469_v48 }
0x1248   : > { %v3477_v54 = vsel %vm728_vm0, %v3473_v58, 0.0 }
0x1249   : > { %v3458_v11 = vpop.xlane.xlu0 %3457  ;;  %3478 = vadd.xlane.f32.xlu0 %v3477_v54 }
0x124a   : > { %v3466_v27 = vmul.f32 %v3458_v11, %v4805_v4 }
0x124c   : > { %v5659_v39 = vsub.f32 %v3446_v7, %v3466_v27 }
0x124e   : > { %v3474_v60 = vmul.f32 %v5659_v39, %v5659_v39 }
0x1250   : > { %v3480_v57 = vsel %vm728_vm0, %v3474_v60, 0.0 }
0x1251   : > { %v3461_v14 = vpop.xlane.xlu2 %3460  ;;  %3481 = vadd.xlane.f32.xlu2 %v3480_v57 }
0x1252   : > { %v3467_v2 = vmul.f32 %v3461_v14, %v4805_v4 }
0x1254   : > { %v5665_v44 = vsub.f32 %v3447_v49, %v3467_v2 }
0x1256   : > { %v3475_v35 = vmul.f32 %v5665_v44, %v5665_v44 }
0x1258   : > { %v3483_v3 = vsel %vm728_vm0, %v3475_v35, 0.0 }
0x1259   : > { %3484 = vadd.xlane.f32.xlu1 %v3483_v3  ;;  %v3464_v29 = vpop.xlane.xlu1 %3463 }
0x125a   : > { %v3468_v26 = vmul.f32 %v3464_v29, %v4805_v4 }
0x125c   : > { %v5671_v24 = vsub.f32 %v3448_v56, %v3468_v26 }
0x125e   : > { %v3476_v61 = vmul.f32 %v5671_v24, %v5671_v24 }
0x1260   : > { %v3486_v6 = vsel %vm728_vm0, %v3476_v61, 0.0 }
0x1261   : > { %3487 = vadd.xlane.f32.xlu0 %v3486_v6 }
0x12bc   : > { %v3479_v12 = vpop.xlane.xlu0 %3478 }
0x12bd   : > { %v3489_v53 = vmul.f32 %v3479_v12, %v4805_v4 }
0x12bf   : > { %v3493_v28 = vadd.f32 1e-05, %v3489_v53  ;;  %v4397_v53 = vld [vmem:[%s5731_s20] ss:$0 sm:$0xff] }
0x12c1   : > { %4488 = vrsqrt.f32 %v3493_v28  ;;  %vm3503_vm2 = vweird.f32 %v3493_v28 }
0x12c4   : > { %v3482_v52 = vpop.xlane.xlu2 %3481 }
0x12c5   : > { %v3490_v18 = vmul.f32 %v3482_v52, %v4805_v4 }
0x12c7   : > { %v4489_v8 = vpop.eup %4488  ;;  %v3494_v20 = vadd.f32 1e-05, %v3490_v18 }
0x12c8   : > { %v3498_v21 = vmul.f32 %v4489_v8, %v3493_v28  ;;  %vm3504_vm5 = vweird.f32 %v4489_v8 }
0x12c9   : > { %4490 = vrsqrt.f32 %v3494_v20  ;;  %vm3505_vm7 = vmor %vm3503_vm2, %vm3504_vm5  ;;  %vm3513_vm6 = vweird.f32 %v3494_v20 }
0x12ca   : > { %v3499_v13 = vmul.f32 %v4489_v8, %v3498_v21 }
0x12cc   : > { %v3500_v23 = vmul.f32 0.5, %v3499_v13  ;;  %v3485_v43 = vpop.xlane.xlu1 %3484 }
0x12cd   : > { %v3491_v33 = vmul.f32 %v3485_v43, %v4805_v4 }
0x12ce   : > { %v3501_v41 = vsub.f32 1.5, %v3500_v23 }
0x12cf   : > { %v4491_v5 = vpop.eup %4490  ;;  %v3495_v36 = vadd.f32 1e-05, %v3491_v33 }
0x12d0   : > { %v3502_v17 = vmul.f32 %v4489_v8, %v3501_v41  ;;  %v3508_v31 = vmul.f32 %v4491_v5, %v3494_v20  ;;  %vm3514_vm9 = vweird.f32 %v4491_v5 }
0x12d1   : > { %4492 = vrsqrt.f32 %v3495_v36  ;;  %vm3515_vm4 = vmor %vm3513_vm6, %vm3514_vm9  ;;  %vm3523_vm10 = vweird.f32 %v3495_v36 }
0x12d2   : > { %v3506_v15 = vsel %vm3505_vm7, %v4489_v8, %v3502_v17  ;;  %v3509_v30 = vmul.f32 %v4491_v5, %v3508_v31 }
0x12d3   : > { %v3537_v19 = vmul.f32 %v3506_v15, %v3469_v48 }
0x12d4   : > { %v3510_v34 = vmul.f32 0.5, %v3509_v30  ;;  %v3488_v38 = vpop.xlane.xlu0 %3487 }
0x12d5   : > { %v3492_v42 = vmul.f32 %v3488_v38, %v4805_v4  ;;  %v3544_v25 = vmul.f32 %v4395_v0, %v3537_v19 }
0x12d6   : > { %v3511_v62 = vsub.f32 1.5, %v3510_v34 }
0x12d7   : > { %v4493_v22 = vpop.eup %4492  ;;  %v3496_v46 = vadd.f32 1e-05, %v3492_v42  ;;  %v3551_v4 = vadd.f32 %v4396_v47, %v3544_v25 }
0x12d8   : > { %v3512_v7 = vmul.f32 %v4491_v5, %v3511_v62  ;;  %v3518_v40 = vmul.f32 %v4493_v22, %v3495_v36  ;;  %vm3524_vm3 = vweird.f32 %v4493_v22 }
0x12d9   : > { %4494 = vrsqrt.f32 %v3496_v46  ;;  %v3555_v54 = vmul.f32 %v3551_v4, %v4863_v1  ;;  %vm3525_vm1 = vmor %vm3523_vm10, %vm3524_vm3  ;;  %vm3533_vm14 = vweird.f32 %v3496_v46 }
0x12da   : > { %v3516_v49 = vsel %vm3515_vm4, %v4491_v5, %v3512_v7  ;;  %v3519_v50 = vmul.f32 %v4493_v22, %v3518_v40 }
0x12db   : > { %v3538_v37 = vmul.f32 %v3516_v49, %v5659_v39 }
0x12dc   : > { %v3520_v55 = vmul.f32 0.5, %v3519_v50 }
0x12dd   : > { %v3545_v56 = vmul.f32 %v4395_v0, %v3538_v37 }
0x12de   : > { %v3521_v59 = vsub.f32 1.5, %v3520_v55 }
0x12df   : > { %v4495_v51 = vpop.eup %4494  ;;  %v3552_v45 = vadd.f32 %v4396_v47, %v3545_v56 }
0x12e0   : > { %v3522_v48 = vmul.f32 %v4493_v22, %v3521_v59  ;;  %v3528_v58 = vmul.f32 %v4495_v51, %v3496_v46  ;;  %vm3534_vm15 = vweird.f32 %v4495_v51 }
0x12e1   : > { %v3556_v11 = vmul.f32 %v3552_v45, %v4849_v16  ;;  %vm3535_vm12 = vmor %vm3533_vm14, %vm3534_vm15 }
0x12e2   : > { %v3526_v27 = vsel %vm3525_vm1, %v4493_v22, %v3522_v48  ;;  %v3529_v60 = vmul.f32 %v4495_v51, %v3528_v58 }
0x12e3   : > { %v3559_v57 = vpack.c.bf16 %v3556_v11, %v3555_v54  ;;  %v3539_v39 = vmul.f32 %v3526_v27, %v5665_v44 }
0x12e4   : > { %v3530_v14 = vmul.f32 0.5, %v3529_v60 }
0x12e5   : > { %4151 = vmatmul.msk.bf16.vlgmr.msra.gmra.mxu0 %vm728_vm0, %v3559_v57  ;;  %v3546_v3 = vmul.f32 %v4395_v0, %v3539_v39 }
0x12e6   : > { %v3531_v2 = vsub.f32 1.5, %v3530_v14 }
0x12e7   : > { %v3553_v26 = vadd.f32 %v4396_v47, %v3546_v3 }
0x12e8   : > { %v3532_v35 = vmul.f32 %v4495_v51, %v3531_v2 }
0x12e9   : > { %v3557_v6 = vmul.f32 %v3553_v26, %v4861_v63 }
0x12ea   : > { %v3536_v29 = vsel %vm3535_vm12, %v4495_v51, %v3532_v35 }
0x12eb   : > { %v3540_v1 = vmul.f32 %v3536_v29, %v5671_v24 }
0x12ed   : > { %v3547_v16 = vmul.f32 %v4395_v0, %v3540_v1 }
0x12ef   : > { %v3554_v61 = vadd.f32 %v4396_v47, %v3547_v16 }
0x12f1   : > { %v3558_v12 = vmul.f32 %v3554_v61, %v4905_v9 }
0x12f3   : > { %v3560_v44 = vpack.c.bf16 %v3558_v12, %v3557_v6 }
0x12f5   : > { %4152 = vmatmul.msk.bf16.gmra.mxu0 %vm728_vm0, %v3560_v44 }
0x1362   : > { %v3596_v28 = vpop.f32.mrf.mxu0 }
0x1363   : > { %v3597_v24 = vadd.f32 %v4397_v53, %v3596_v28 }
0x1365   : > { %3606 = vst [vmem:[%s690_s28] sm:$0xff] %v3597_v24 }
0x136a   : > { %v3598_v10 = vpop.f32.mrf.mxu0 }
0x136b   : > { %v3599_v52 = vadd.f32 %v4397_v53, %v3598_v10 }
0x136d   : > { %3607 = vst [vmem:[%s690_s28 + $0x8] sm:$0xff] %v3599_v52 }
0x1372   : > { %v3601_v63 = vpop.f32.mrf.mxu0 }
0x1373   : > { %v3602_v18 = vadd.f32 %v4397_v53, %v3601_v63 }
0x1375   : > { %3608 = vst [vmem:[%s690_s28 + $0x10] sm:$0xff] %v3602_v18 }
0x137a   : > { %v3603_v9 = vpop.f32.mrf.mxu0 }
0x137b   : > { %v3604_v32 = vadd.f32 %v4397_v53, %v3603_v9 }
0x137d   : > { %3609 = vst [vmem:[%s690_s28 + $0x18] sm:$0xff] %v3604_v32 }
0x137e PF: > { %s5796_s29 = sld [smem:[#allocation2_spill]] }
0x1384   : > { %s31_s2 = sadd.s32 1, %s5796_s29  }
0x1385   : > { %p28_p4 = scmp.ge.s32.totalorder %s31_s2, 4  }
0x1387   :  { %30 = sbr.rel (!%p28_p4) target bundleno = 8 (0x8), region = 170 }

</bundles_post_ra>
